<compile_context>
chip_gen: v5e
topology: v5e:2x2
jax: 0.10.0
libtpu: 0.0.40
codegen_flags: <defaults>
</compile_context>

<pallas_src>
import functools

import jax
import jax.numpy as jnp
from jax import lax
from jax.experimental import pallas as pl
from jax.experimental.pallas import tpu as pltpu


# ------------------------------ config flags ---------------------------------
MXU_BF16 = True          # bf16 MXU operands (f32 accumulation); disable for parity
USE_TANH_GELU = True     # EUP tanh GELU (|err| vs exact erf GELU ~1e-3)
# 32 MiB is v7x-safe; on v5e this can be raised toward 64-96 MiB for deeper
# buffering of the (memory-bound) edge pass.
VMEM_LIMIT_BYTES = 32 * 1024 * 1024


def _mx_dtype():
  return jnp.bfloat16 if MXU_BF16 else jnp.float32


def _round_up(n, m):
  return ((n + m - 1) // m) * m


def _pad_rows(a, rows, value=0):
  pad = rows - a.shape[0]
  if pad == 0:
    return a
  return jnp.pad(a, ((0, pad),) + ((0, 0),) * (a.ndim - 1),
                 constant_values=value)


def _row_tile(n_rows, max_tile=128, min_tiles=1):
  """Row-tile size (multiple of 8, <= max_tile).  With min_tiles=2 the padded
  grid gets >=2 tiles when the row count allows it, so a 'parallel' grid axis
  can be sharded across both v7x TensorCores."""
  n8 = _round_up(max(n_rows, 1), 8)
  tile = min(max_tile, n8)
  if min_tiles > 1 and n8 // tile < min_tiles and n8 >= 8 * min_tiles:
    tile = max(8, _round_up(n8 // min_tiles, 8))
  n_pad = _round_up(n_rows, tile)
  return tile, n_pad


# ----------------------- in-kernel elementwise helpers -----------------------

def _sigmoid(x):
  return 1.0 / (1.0 + jnp.exp(-x))


def _softplus(x):
  return jnp.maximum(x, 0.0) + jnp.log(1.0 + jnp.exp(-jnp.abs(x)))


def _erf_poly(x):
  # Abramowitz & Stegun 7.1.26 (|err| < 1.5e-7) — exact-GELU fallback path.
  p = 0.3275911
  a1, a2, a3, a4, a5 = (0.254829592, -0.284496736, 1.421413741,
                        -1.453152027, 1.061405429)
  sign = jnp.where(x >= 0.0, 1.0, -1.0)
  ax = jnp.abs(x)
  t = 1.0 / (1.0 + p * ax)
  poly = ((((a5 * t + a4) * t + a3) * t + a2) * t + a1) * t
  return sign * (1.0 - poly * jnp.exp(-ax * ax))


def _gelu(x):
  if USE_TANH_GELU:
    c = 0.7978845608028654
    return 0.5 * x * (1.0 + jnp.tanh(c * (x + 0.044715 * x * x * x)))
  return 0.5 * x * (1.0 + _erf_poly(x * 0.7071067811865476))


# --------------------------- DRGCN: edge-phase kernel -------------------------
# Per edge tile: time gate, weight_gen MLP (fused layer-1 matmul), message,
# fused K/V projection; kv stored once in bf16.

def _drgcn_edge_kernel(tc_ref, src_ref, relg_ref, tsd_ref, et_ref,
                       wg1_ref, wg1t_ref, bg1_ref, wg2_ref, bg2_ref,
                       wkv_ref, bkv_ref, kv_ref):
  f32 = jnp.float32
  mxdt = wg1_ref.dtype

  denom = jnp.abs(tc_ref[0, 0]) + 1e-9
  delta_t = (tsd_ref[...] - et_ref[...]) / denom                      # [TE,1]
  time_mask = _sigmoid(delta_t)                                       # [TE,1]

  src_emb = src_ref[...]                                              # [TE,H]
  rel_emb = relg_ref[...] * time_mask                                 # [TE,H]

  # weight_gen layer 1 as ONE fused [TE,2H]@[2H,H] matmul; the scalar
  # time_mask column of the cat([src, rel, time]) input folds into the bias
  # path elementwise (no 1-lane matmul).
  cat = jnp.concatenate([src_emb.astype(mxdt), rel_emb.astype(mxdt)], axis=-1)
  hidden = (jnp.dot(cat, wg1_ref[...], preferred_element_type=f32)
            + time_mask * wg1t_ref[...] + bg1_ref[...])
  hidden = jnp.maximum(hidden, 0.0)

  # [E,1] projection as VPU multiply + lane reduce.
  dyn_w = _sigmoid(jnp.sum(hidden * wg2_ref[...], axis=-1, keepdims=True)
                   + bg2_ref[...])                                    # [TE,1]

  message = src_emb * rel_emb * dyn_w                                 # [TE,H]

  # Fused K/V projection ([H,2H]); f32 accumulate, single cast on store.
  kv = (jnp.dot(message.astype(mxdt), wkv_ref[...],
                preferred_element_type=f32) + bkv_ref[...])
  kv_ref[...] = kv.astype(kv_ref.dtype)


# --------------------- DRGCN: attention / aggregation kernel ------------------
# 1-D grid over a scalar-prefetched work list.  Each work item = (dst-row tile,
# edge chunk of that tile).  Online per-segment-max softmax per destination
# row; rows without incoming edges get exact zeros (matching scatter_add).

def _drgcn_attn_kernel(wt_ref, wc_ref, wv_ref, wf_ref, wl_ref,        # prefetch
                       x_ref, kv_ref, dst_ref, wq_ref, bq_ref,        # inputs
                       out_ref,                                       # output
                       q_sc, m_sc, l_sc, acc_sc,                      # scratch
                       *, hidden_dim, num_heads, head_dim, tile_rows):
  f32 = jnp.float32
  H, nh, hd, TN = hidden_dim, num_heads, head_dim, tile_rows
  g = pl.program_id(0)

  # ---- first work item of a destination tile: project Q, reset state -------
  @pl.when(wf_ref[g] == 1)
  def _():
    q = (jnp.dot(x_ref[...], wq_ref[...], preferred_element_type=f32)
         + bq_ref[...])                                               # [TN,H]
    q_sc[...] = q.astype(q_sc.dtype)
    m_sc[...] = jnp.full(m_sc.shape, -1e30, f32)
    l_sc[...] = jnp.zeros(l_sc.shape, f32)
    acc_sc[...] = jnp.zeros(acc_sc.shape, f32)

  # ---- one edge chunk belonging to this tile: online softmax update --------
  @pl.when(wv_ref[g] == 1)
  def _():
    row0 = wt_ref[g] * TN
    row_ids = row0 + lax.broadcasted_iota(jnp.int32, (TN, 1), 0)      # [TN,1]
    mask = dst_ref[...] == row_ids                                    # [TN,TE]

    kv = kv_ref[...]                                                  # [TE,2H]
    q = q_sc[...]                                                     # [TN,H]
    m_prev = m_sc[...]                                                # [TN,nh]
    l_prev = l_sc[...]
    acc_prev = acc_sc[...]                                            # [TN,H]
    scale = 1.0 / (hd ** 0.5)

    # Per-head scores (MXU); m/l/acc updates are batched into three
    # lane-dense full-width stores per chunk (no per-head masked stores).
    s_heads = []
    for h in range(nh):
      hs = slice(h * hd, (h + 1) * hd)
      s_h = jnp.einsum('rd,ed->re', q[:, hs], kv[:, hs],
                       preferred_element_type=f32) * scale            # [TN,TE]
      s_heads.append(jnp.where(mask, s_h, -1e30))

    s_max = jnp.concatenate(
        [jnp.max(s_h, axis=-1, keepdims=True) for s_h in s_heads],
        axis=-1)                                                      # [TN,nh]
    m_new = jnp.maximum(m_prev, s_max)
    alpha = jnp.exp(m_prev - m_new)                                   # [TN,nh]

    l_cols, acc_cols = [], []
    for h in range(nh):
      hs = slice(h * hd, (h + 1) * hd)
      vs = slice(H + h * hd, H + (h + 1) * hd)
      p_h = jnp.where(mask, jnp.exp(s_heads[h] - m_new[:, h:h + 1]), 0.0)
      l_cols.append(alpha[:, h:h + 1] * l_prev[:, h:h + 1]
                    + jnp.sum(p_h, axis=-1, keepdims=True))
      acc_cols.append(alpha[:, h:h + 1] * acc_prev[:, hs]
                      + jnp.dot(p_h.astype(kv.dtype), kv[:, vs],
                                preferred_element_type=f32))

    m_sc[...] = m_new
    l_sc[...] = jnp.concatenate(l_cols, axis=-1)
    acc_sc[...] = jnp.concatenate(acc_cols, axis=-1)

  # ---- last work item of the tile: normalize, one full-width store ---------
  @pl.when(wl_ref[g] == 1)
  def _():
    l = jnp.maximum(l_sc[...], 1e-30)       # edge-less rows -> exact zeros
    inv = pl.reciprocal(l, approx=True)     # [TN,nh]
    acc = acc_sc[...]                       # [TN,H]
    out = jnp.concatenate(
        [acc[:, h * hd:(h + 1) * hd] * inv[:, h:h + 1] for h in range(nh)],
        axis=-1)
    out_ref[...] = out.astype(out_ref.dtype)


def drgcn_forward(params, graph, x, timestamps, *, num_heads):
  N, H = x.shape
  E = graph['src'].shape[0]
  head_dim = H // num_heads
  mxdt = _mx_dtype()

  src = graph['src'].astype(jnp.int32)
  dst = graph['dst'].astype(jnp.int32)
  rel_idx = graph['rel'].astype(jnp.int32)
  edge_time = graph['edge_time'].astype(jnp.float32)

  # Sort edges by destination so pass 2 can walk per-dst-tile chunk ranges.
  order = jnp.argsort(dst)
  src = jnp.take(src, order)
  dst_s = jnp.take(dst, order)
  rel_idx = jnp.take(rel_idx, order)
  edge_time = jnp.take(edge_time, order)

  # Index-driven row gathers (XLA gather) in sorted edge order.
  src_emb = jnp.take(x, src, axis=0)                                  # [E,H]
  rel_g = jnp.take(params['drgcn_rel_emb'], rel_idx, axis=0)          # [E,H]
  ts_dst = jnp.take(timestamps.astype(jnp.float32), dst_s,
                    axis=0).reshape(E, 1)                             # [E,1]
  et_col = edge_time.reshape(E, 1)                                    # [E,1]

  # ----- edge tiling -----
  TE2 = 128                            # pass-2 edge chunk (lane aligned)
  TE1 = 512 if E > 2 * TE2 else _round_up(max(E, 1), TE2)   # pass-1 edge tile
  E_pad = _round_up(max(E, 1), TE1)    # multiple of both TE1 and TE2

  # ----- destination-row tiling -----
  TN, N_pad = _row_tile(N, max_tile=128, min_tiles=1)
  num_tiles = N_pad // TN

  src_emb = _pad_rows(src_emb, E_pad)
  rel_g = _pad_rows(rel_g, E_pad)
  ts_dst = _pad_rows(ts_dst, E_pad)
  et_col = _pad_rows(et_col, E_pad)
  dst_pad = jnp.concatenate(
      [dst_s, jnp.full((E_pad - E,), N_pad, jnp.int32)]) if E_pad > E else dst_s

  # Weights (MXU operands pre-cast to bf16 in the wrapper).
  wg1 = params['wg1']                                                 # [2H+1,H]
  wg1_sr = wg1[:2 * H].astype(mxdt)                                   # [2H,H]
  wg1_t = wg1[2 * H:2 * H + 1]                                        # [1,H]
  wg2_row = params['wg2'].reshape(1, H)
  wkv = jnp.concatenate([params['wk'], params['wv']], axis=1).astype(mxdt)
  bkv = jnp.concatenate([params['bk'], params['bv']], axis=1)
  tc = params['time_coeff'].reshape(1, 1).astype(jnp.float32)

  def full(a):
    return pl.BlockSpec(a.shape, lambda e: (0,) * a.ndim)

  # ----- pass 1: per-edge message -> fused K/V (edge-tile grid, parallel) ----
  kv = pl.pallas_call(
      _drgcn_edge_kernel,
      out_shape=jax.ShapeDtypeStruct((E_pad, 2 * H), mxdt),
      grid=(E_pad // TE1,),
      in_specs=[pl.BlockSpec(memory_space=pltpu.MemorySpace.SMEM),    # tc
                pl.BlockSpec((TE1, H), lambda e: (e, 0)),             # src_emb
                pl.BlockSpec((TE1, H), lambda e: (e, 0)),             # rel_g
                pl.BlockSpec((TE1, 1), lambda e: (e, 0)),             # ts_dst
                pl.BlockSpec((TE1, 1), lambda e: (e, 0)),             # edge_time
                full(wg1_sr), full(wg1_t), full(params['bg1']),
                full(wg2_row), full(params['bg2']), full(wkv), full(bkv)],
      out_specs=pl.BlockSpec((TE1, 2 * H), lambda e: (e, 0)),
      compiler_params=pltpu.CompilerParams(
          dimension_semantics=("parallel",),
          vmem_limit_bytes=VMEM_LIMIT_BYTES),
  )(tc, src_emb, rel_g, ts_dst, et_col,
    wg1_sr, wg1_t, params['bg1'], wg2_row, params['bg2'], wkv, bkv)

  # ----- pass 2 work list: per dst-tile edge-chunk ranges (scalar prefetch) --
  n_chunks = E_pad // TE2
  tile_starts = jnp.arange(num_tiles, dtype=jnp.int32) * TN
  edge_start = jnp.searchsorted(dst_pad, tile_starts,
                                side='left').astype(jnp.int32)
  edge_end = jnp.searchsorted(dst_pad, tile_starts + TN,
                              side='left').astype(jnp.int32)
  chunk_lo = edge_start // TE2
  chunk_hi = (edge_end + TE2 - 1) // TE2
  count = jnp.where(edge_end > edge_start,
                    chunk_hi - chunk_lo, 0).astype(jnp.int32)
  work = jnp.maximum(count, 1)         # >=1 step/tile so edge-less tiles zero
  cum = jnp.cumsum(work)
  offs = cum - work
  total = cum[-1]
  G = n_chunks + num_tiles             # static upper bound on total work items
  g_idx = jnp.arange(G, dtype=jnp.int32)
  w_tile = jnp.minimum(
      jnp.searchsorted(cum, g_idx, side='right').astype(jnp.int32),
      num_tiles - 1)
  local = g_idx - offs[w_tile]
  w_chunk = jnp.clip(chunk_lo[w_tile] + local, 0, n_chunks - 1).astype(jnp.int32)
  in_range = g_idx < total
  w_valid = (in_range & (local < count[w_tile])).astype(jnp.int32)
  w_first = (in_range & (local == 0)).astype(jnp.int32)
  w_last = (in_range & (local == work[w_tile] - 1)).astype(jnp.int32)

  # ----- pass 2: per-dst-tile attention + scatter aggregation ----------------
  x_mx = _pad_rows(x, N_pad).astype(mxdt)
  dst_row = dst_pad.reshape(1, E_pad)
  wq = params['wq'].astype(mxdt)
  bq = params['bq']

  kernel = functools.partial(_drgcn_attn_kernel, hidden_dim=H,
                             num_heads=num_heads, head_dim=head_dim,
                             tile_rows=TN)
  grid_spec = pltpu.PrefetchScalarGridSpec(
      num_scalar_prefetch=5,
      grid=(G,),
      in_specs=[pl.BlockSpec((TN, H), lambda g, wt, wc, wv, wf, wl: (wt[g], 0)),
                pl.BlockSpec((TE2, 2 * H),
                             lambda g, wt, wc, wv, wf, wl: (wc[g], 0)),
                pl.BlockSpec((1, TE2),
                             lambda g, wt, wc, wv, wf, wl: (0, wc[g])),
                pl.BlockSpec((H, H), lambda g, *_: (0, 0)),
                pl.BlockSpec((1, H), lambda g, *_: (0, 0))],
      out_specs=pl.BlockSpec((TN, H), lambda g, wt, wc, wv, wf, wl: (wt[g], 0)),
      scratch_shapes=[pltpu.VMEM((TN, H), mxdt),                      # q
                      pltpu.VMEM((TN, num_heads), jnp.float32),       # m
                      pltpu.VMEM((TN, num_heads), jnp.float32),       # l
                      pltpu.VMEM((TN, H), jnp.float32)])              # acc
  out = pl.pallas_call(
      kernel,
      out_shape=jax.ShapeDtypeStruct((N_pad, H), jnp.float32),
      grid_spec=grid_spec,
      compiler_params=pltpu.CompilerParams(
          dimension_semantics=("arbitrary",),
          vmem_limit_bytes=VMEM_LIMIT_BYTES),
  )(w_tile, w_chunk, w_valid, w_first, w_last,
    x_mx, kv, dst_row, wq, bq)
  return out[:N]


# ------------------------------ MST-ODE kernel --------------------------------

def _mstode_kernel(h_ref, ws1_ref, bs1_ref, ws2_ref, bs2_ref,
                   wt1_ref, bt1_ref, wt2_ref, bt2_ref,
                   wgas_ref, wgat_ref, wgbs_ref, wgbt_ref, bga_ref, bgb_ref,
                   out_ref, *, num_steps):
  f32 = jnp.float32
  mxdt = ws1_ref.dtype
  Ws1 = ws1_ref[...]; Bs1 = bs1_ref[...]
  Ws2 = ws2_ref[...]; Bs2 = bs2_ref[...]
  Wt1 = wt1_ref[...]; Bt1 = bt1_ref[...]
  Wt2 = wt2_ref[...]; Bt2 = bt2_ref[...]
  Wga_s = wgas_ref[...]; Wga_t = wgat_ref[...]
  Wgb_s = wgbs_ref[...]; Wgb_t = wgbt_ref[...]
  Bga = bga_ref[...]; Bgb = bgb_ref[...]

  def deriv(h):
    hm = h.astype(mxdt)
    space = jnp.dot(_gelu(jnp.dot(hm, Ws1, preferred_element_type=f32)
                          + Bs1).astype(mxdt),
                    Ws2, preferred_element_type=f32) + Bs2
    timed = jnp.dot(_softplus(jnp.dot(hm, Wt1, preferred_element_type=f32)
                              + Bt1).astype(mxdt),
                    Wt2, preferred_element_type=f32) + Bt2
    # fusion_gate(cat([space, timed])) as VPU multiply + lane reduce.
    g0 = _sigmoid(jnp.sum(space * Wga_s + timed * Wga_t,
                          axis=-1, keepdims=True) + Bga)
    g1 = _sigmoid(jnp.sum(space * Wgb_s + timed * Wgb_t,
                          axis=-1, keepdims=True) + Bgb)
    return g0 * space + g1 * timed

  # TODO(synk): torchdiffeq's adaptive dopri5 step-size control has no clean
  # in-kernel equivalent; integrate t in [0,1] with fixed-step Dormand-Prince.
  dt = 1.0 / num_steps

  def rk45_step(_, h):
    # Output is accumulated incrementally as each stage is produced to keep
    # the peak number of live [TM,H] temporaries down.
    k1 = deriv(h)
    y = h + (dt * (35.0 / 384.0)) * k1
    k2 = deriv(h + (dt * 0.2) * k1)
    k3 = deriv(h + dt * ((3.0 / 40.0) * k1 + (9.0 / 40.0) * k2))
    y = y + (dt * (500.0 / 1113.0)) * k3
    k4 = deriv(h + dt * ((44.0 / 45.0) * k1 - (56.0 / 15.0) * k2
                         + (32.0 / 9.0) * k3))
    y = y + (dt * (125.0 / 192.0)) * k4
    k5 = deriv(h + dt * ((19372.0 / 6561.0) * k1 - (25360.0 / 2187.0) * k2
                         + (64448.0 / 6561.0) * k3 - (212.0 / 729.0) * k4))
    y = y - (dt * (2187.0 / 6784.0)) * k5
    k6 = deriv(h + dt * ((9017.0 / 3168.0) * k1 - (355.0 / 33.0) * k2
                         + (46732.0 / 5247.0) * k3 + (49.0 / 176.0) * k4
                         - (5103.0 / 18656.0) * k5))
    return y + (dt * (11.0 / 84.0)) * k6

  # Visible loop (not a Python unroll) keeps per-step live ranges bounded.
  out_ref[...] = lax.fori_loop(0, num_steps, rk45_step, h_ref[...])


def mstode_forward(params, h, *, num_steps=4):
  M, H = h.shape
  mxdt = _mx_dtype()
  # >=2 row tiles when possible so both v7x TensorCores get work.
  TM, M_pad = _row_tile(M, max_tile=128, min_tiles=2)
  h_p = _pad_rows(h, M_pad)

  wga = params['ode_wga']; wgb = params['ode_wgb']
  wga_s = wga[:H].reshape(1, H); wga_t = wga[H:].reshape(1, H)
  wgb_s = wgb[:H].reshape(1, H); wgb_t = wgb[H:].reshape(1, H)

  # MXU weights pre-cast to bf16 once here (hoisted out of the RK loop).
  weights = [params['ode_ws1'].astype(mxdt), params['ode_bs1'],
             params['ode_ws2'].astype(mxdt), params['ode_bs2'],
             params['ode_wt1'].astype(mxdt), params['ode_bt1'],
             params['ode_wt2'].astype(mxdt), params['ode_bt2'],
             wga_s, wga_t, wgb_s, wgb_t,
             params['ode_bga'], params['ode_bgb']]

  in_specs = ([pl.BlockSpec((TM, H), lambda i: (i, 0))]
              + [pl.BlockSpec(w.shape, lambda i: (0, 0)) for w in weights])

  out = pl.pallas_call(
      functools.partial(_mstode_kernel, num_steps=num_steps),
      out_shape=jax.ShapeDtypeStruct((M_pad, H), jnp.float32),
      grid=(M_pad // TM,),
      in_specs=in_specs,
      out_specs=pl.BlockSpec((TM, H), lambda i: (i, 0)),
      compiler_params=pltpu.CompilerParams(
          dimension_semantics=("parallel",),
          vmem_limit_bytes=VMEM_LIMIT_BYTES),
  )(h_p, *weights)
  return out[:M]


# ------------------------------- STAGEN forward -------------------------------

def stagen_forward(params, graph, query_time, *, num_heads, num_steps=4):
  x = params['ent_emb']                                   # [num_ent, H]
  rel = params['rel_emb']                                 # [num_rel, H]
  x = drgcn_forward(params, graph, x, query_time, num_heads=num_heads)
  # One ODE pallas_call over the concatenated [ent; rel] rows (as in the
  # reference h0 = cat([x, rel])): amortizes weight DMA and keeps both v7x
  # TensorCores busy even when the relation block alone is a single tile.
  h0 = jnp.concatenate([x, rel], axis=0)
  h = mstode_forward(params, h0, num_steps=num_steps)
  return h[:x.shape[0]], h[x.shape[0]:]


# ------------------------------- params / inputs -------------------------------

def init_params(key, num_ent, num_rel, hidden_dim, num_heads):
  del num_heads
  H = hidden_dim
  ks = jax.random.split(key, 16)

  def lin(k, fan_in, fan_out):
    return (jax.random.normal(k, (fan_in, fan_out), jnp.float32)
            / jnp.sqrt(jnp.float32(fan_in)))

  z = lambda *s: jnp.zeros(s, jnp.float32)
  p = {
      'ent_emb': jax.random.normal(ks[0], (num_ent, H), jnp.float32),
      'rel_emb': jax.random.normal(ks[1], (num_rel, H), jnp.float32),
      'drgcn_rel_emb': jax.random.normal(ks[2], (num_rel, H), jnp.float32),
      'time_coeff': jnp.array(1.0, jnp.float32),
      'wq': lin(ks[3], H, H), 'bq': z(1, H),
      'wk': lin(ks[4], H, H), 'bk': z(1, H),
      'wv': lin(ks[5], H, H), 'bv': z(1, H),
      'wg1': lin(ks[6], 2 * H + 1, H), 'bg1': z(1, H),
      'wg2': lin(ks[7], H, 1), 'bg2': z(1, 1),
      'ode_ws1': lin(ks[8], H, 2 * H), 'ode_bs1': z(1, 2 * H),
      'ode_ws2': lin(ks[9], 2 * H, H), 'ode_bs2': z(1, H),
      'ode_wt1': lin(ks[10], H, H // 2), 'ode_bt1': z(1, H // 2),
      'ode_wt2': lin(ks[11], H // 2, H), 'ode_bt2': z(1, H),
  }
  wg = lin(ks[12], 2 * H, 2)
  p['ode_wga'] = wg[:, 0:1]
  p['ode_wgb'] = wg[:, 1:2]
  p['ode_bga'] = z(1, 1)
  p['ode_bgb'] = z(1, 1)
  return p


if __name__ == "__main__":
  NUM_ENT, NUM_REL, HIDDEN, HEADS, NUM_EDGES = 16, 4, 32, 4, 24
  key = jax.random.PRNGKey(0)
  kp, k1, k2, k3, k4, k5 = jax.random.split(key, 6)

  params = init_params(kp, NUM_ENT, NUM_REL, HIDDEN, HEADS)
  graph = {
      'src': jax.random.randint(k1, (NUM_EDGES,), 0, NUM_ENT, jnp.int32),
      'dst': jax.random.randint(k2, (NUM_EDGES,), 0, NUM_ENT, jnp.int32),
      'rel': jax.random.randint(k3, (NUM_EDGES,), 0, NUM_REL, jnp.int32),
      'edge_time': jax.random.uniform(k4, (NUM_EDGES,), jnp.float32),
  }
  query_time = jax.random.uniform(k5, (NUM_ENT,), jnp.float32)

  fwd = jax.jit(functools.partial(stagen_forward, num_heads=HEADS))
  ent_out, rel_out = fwd(params, graph, query_time)
  jax.block_until_ready((ent_out, rel_out))

  assert ent_out.shape == (NUM_ENT, HIDDEN) and rel_out.shape == (NUM_REL, HIDDEN)
  assert bool(jnp.all(jnp.isfinite(ent_out))) and bool(jnp.all(jnp.isfinite(rel_out)))
  print("KERNEL_OK")
</pallas_src>

<mosaic_0001>
module attributes {stable_mosaic.version = 11 : i64} {
  func.func @_drgcn_edge_kernel(%arg0: i32, %arg1: memref<1x1xf32, #tpu.memory_space<smem>>, %arg2: memref<128x32xf32, #tpu.memory_space<vmem>>, %arg3: memref<128x32xf32, #tpu.memory_space<vmem>>, %arg4: memref<128x1xf32, #tpu.memory_space<vmem>>, %arg5: memref<128x1xf32, #tpu.memory_space<vmem>>, %arg6: memref<64x32xbf16, #tpu.memory_space<vmem>>, %arg7: memref<1x32xf32, #tpu.memory_space<vmem>>, %arg8: memref<1x32xf32, #tpu.memory_space<vmem>>, %arg9: memref<1x32xf32, #tpu.memory_space<vmem>>, %arg10: memref<1x1xf32, #tpu.memory_space<vmem>>, %arg11: memref<32x64xbf16, #tpu.memory_space<vmem>>, %arg12: memref<1x64xf32, #tpu.memory_space<vmem>>, %arg13: memref<128x64xbf16, #tpu.memory_space<vmem>>) attributes {dimension_semantics = [#tpu.dimension_semantics<parallel>], iteration_bounds = array<i64: 1>, scalar_prefetch = 0 : i64, scratch_operands = 0 : i64, tpu.core_type = #tpu.core_type<tc>, window_params = [{transform_indices = @transform_0, window_bounds = array<i64: 1, 1>}, {transform_indices = @transform_1, window_bounds = array<i64: 128, 32>}, {transform_indices = @transform_2, window_bounds = array<i64: 128, 32>}, {transform_indices = @transform_3, window_bounds = array<i64: 128, 1>}, {transform_indices = @transform_4, window_bounds = array<i64: 128, 1>}, {pipeline_mode = #tpu.pipeline_mode<synchronous>, transform_indices = @transform_5, window_bounds = array<i64: 64, 32>}, {pipeline_mode = #tpu.pipeline_mode<synchronous>, transform_indices = @transform_6, window_bounds = array<i64: 1, 32>}, {pipeline_mode = #tpu.pipeline_mode<synchronous>, transform_indices = @transform_7, window_bounds = array<i64: 1, 32>}, {pipeline_mode = #tpu.pipeline_mode<synchronous>, transform_indices = @transform_8, window_bounds = array<i64: 1, 32>}, {pipeline_mode = #tpu.pipeline_mode<synchronous>, transform_indices = @transform_9, window_bounds = array<i64: 1, 1>}, {pipeline_mode = #tpu.pipeline_mode<synchronous>, transform_indices = @transform_10, window_bounds = array<i64: 32, 64>}, {pipeline_mode = #tpu.pipeline_mode<synchronous>, transform_indices = @transform_11, window_bounds = array<i64: 1, 64>}, {transform_indices = @transform_12, window_bounds = array<i64: 128, 64>}]} {
    %c0 = arith.constant 0 : index
    %c0_0 = arith.constant 0 : index
    %0 = memref.load %arg1[%c0, %c0_0] : memref<1x1xf32, #tpu.memory_space<smem>>
    %1 = math.absf %0 : f32
    %cst = arith.constant 9.99999971E-10 : f32
    %2 = arith.addf %1, %cst : f32
    %c0_1 = arith.constant 0 : index
    %c0_2 = arith.constant 0 : index
    %3 = vector.load %arg4[%c0_1, %c0_2] : memref<128x1xf32, #tpu.memory_space<vmem>>, vector<128x1xf32>
    %c0_3 = arith.constant 0 : index
    %c0_4 = arith.constant 0 : index
    %4 = vector.load %arg5[%c0_3, %c0_4] : memref<128x1xf32, #tpu.memory_space<vmem>>, vector<128x1xf32>
    %5 = arith.subf %3, %4 : vector<128x1xf32>
    %6 = vector.broadcast %2 : f32 to vector<128x1xf32>
    %7 = arith.divf %5, %6 : vector<128x1xf32>
    %cst_5 = arith.constant 0.000000e+00 : f32
    %8 = vector.broadcast %cst_5 : f32 to vector<128x1xf32>
    %9 = arith.subf %8, %7 : vector<128x1xf32>
    %10 = math.exp %9 : vector<128x1xf32>
    %cst_6 = arith.constant 1.000000e+00 : f32
    %11 = vector.broadcast %cst_6 : f32 to vector<128x1xf32>
    %12 = arith.addf %11, %10 : vector<128x1xf32>
    %cst_7 = arith.constant 1.000000e+00 : f32
    %13 = vector.broadcast %cst_7 : f32 to vector<128x1xf32>
    %14 = arith.divf %13, %12 : vector<128x1xf32>
    %c0_8 = arith.constant 0 : index
    %c0_9 = arith.constant 0 : index
    %15 = vector.load %arg2[%c0_8, %c0_9] : memref<128x32xf32, #tpu.memory_space<vmem>>, vector<128x32xf32>
    %c0_10 = arith.constant 0 : index
    %c0_11 = arith.constant 0 : index
    %16 = vector.load %arg3[%c0_10, %c0_11] : memref<128x32xf32, #tpu.memory_space<vmem>>, vector<128x32xf32>
    %17 = vector.broadcast %14 : vector<128x1xf32> to vector<128x32xf32>
    %18 = arith.mulf %16, %17 : vector<128x32xf32>
    %19 = arith.truncf %15 : vector<128x32xf32> to vector<128x32xbf16>
    %20 = arith.truncf %18 : vector<128x32xf32> to vector<128x32xbf16>
    %21 = tpu.concatenate %19, %20 in 1 : vector<128x32xbf16>, vector<128x32xbf16> -> vector<128x64xbf16>
    %c0_12 = arith.constant 0 : index
    %c0_13 = arith.constant 0 : index
    %22 = vector.load %arg6[%c0_12, %c0_13] : memref<64x32xbf16, #tpu.memory_space<vmem>>, vector<64x32xbf16>
    %cst_14 = arith.constant dense<0.000000e+00> : vector<128x32xf32>
    %23 = tpu.matmul %21, %22, %cst_14 {dimension_numbers = #tpu.dot_dimension_numbers<[1], [0], [0], [1], [0, 0, 1, 1], [], []>} : vector<128x64xbf16>, vector<64x32xbf16>, vector<128x32xf32> -> vector<128x32xf32>
    %c0_15 = arith.constant 0 : index
    %c0_16 = arith.constant 0 : index
    %24 = vector.load %arg7[%c0_15, %c0_16] : memref<1x32xf32, #tpu.memory_space<vmem>>, vector<1x32xf32>
    %25 = vector.broadcast %14 : vector<128x1xf32> to vector<128x32xf32>
    %26 = vector.broadcast %24 : vector<1x32xf32> to vector<128x32xf32>
    %27 = arith.mulf %25, %26 : vector<128x32xf32>
    %28 = arith.addf %23, %27 : vector<128x32xf32>
    %c0_17 = arith.constant 0 : index
    %c0_18 = arith.constant 0 : index
    %29 = vector.load %arg8[%c0_17, %c0_18] : memref<1x32xf32, #tpu.memory_space<vmem>>, vector<1x32xf32>
    %30 = vector.broadcast %29 : vector<1x32xf32> to vector<128x32xf32>
    %31 = arith.addf %28, %30 : vector<128x32xf32>
    %cst_19 = arith.constant 0.000000e+00 : f32
    %32 = vector.broadcast %cst_19 : f32 to vector<128x32xf32>
    %33 = arith.maximumf %31, %32 : vector<128x32xf32>
    %c0_20 = arith.constant 0 : index
    %c0_21 = arith.constant 0 : index
    %34 = vector.load %arg9[%c0_20, %c0_21] : memref<1x32xf32, #tpu.memory_space<vmem>>, vector<1x32xf32>
    %35 = vector.broadcast %34 : vector<1x32xf32> to vector<128x32xf32>
    %36 = arith.mulf %33, %35 : vector<128x32xf32>
    %cst_22 = arith.constant dense<0.000000e+00> : vector<128xf32>
    %37 = vector.multi_reduction <add>, %36, %cst_22 [1] : vector<128x32xf32> to vector<128xf32>
    %38 = vector.shape_cast %37 : vector<128xf32> to vector<128x1xf32>
    %c0_23 = arith.constant 0 : index
    %c0_24 = arith.constant 0 : index
    %39 = vector.load %arg10[%c0_23, %c0_24] : memref<1x1xf32, #tpu.memory_space<vmem>>, vector<1x1xf32>
    %40 = vector.broadcast %39 : vector<1x1xf32> to vector<128x1xf32>
    %41 = arith.addf %38, %40 : vector<128x1xf32>
    %cst_25 = arith.constant 0.000000e+00 : f32
    %42 = vector.broadcast %cst_25 : f32 to vector<128x1xf32>
    %43 = arith.subf %42, %41 : vector<128x1xf32>
    %44 = math.exp %43 : vector<128x1xf32>
    %cst_26 = arith.constant 1.000000e+00 : f32
    %45 = vector.broadcast %cst_26 : f32 to vector<128x1xf32>
    %46 = arith.addf %45, %44 : vector<128x1xf32>
    %cst_27 = arith.constant 1.000000e+00 : f32
    %47 = vector.broadcast %cst_27 : f32 to vector<128x1xf32>
    %48 = arith.divf %47, %46 : vector<128x1xf32>
    %49 = arith.mulf %15, %18 : vector<128x32xf32>
    %50 = vector.broadcast %48 : vector<128x1xf32> to vector<128x32xf32>
    %51 = arith.mulf %49, %50 : vector<128x32xf32>
    %52 = arith.truncf %51 : vector<128x32xf32> to vector<128x32xbf16>
    %c0_28 = arith.constant 0 : index
    %c0_29 = arith.constant 0 : index
    %53 = vector.load %arg11[%c0_28, %c0_29] : memref<32x64xbf16, #tpu.memory_space<vmem>>, vector<32x64xbf16>
    %cst_30 = arith.constant dense<0.000000e+00> : vector<128x64xf32>
    %54 = tpu.matmul %52, %53, %cst_30 {dimension_numbers = #tpu.dot_dimension_numbers<[1], [0], [0], [1], [0, 0, 1, 1], [], []>} : vector<128x32xbf16>, vector<32x64xbf16>, vector<128x64xf32> -> vector<128x64xf32>
    %c0_31 = arith.constant 0 : index
    %c0_32 = arith.constant 0 : index
    %55 = vector.load %arg12[%c0_31, %c0_32] : memref<1x64xf32, #tpu.memory_space<vmem>>, vector<1x64xf32>
    %56 = vector.broadcast %55 : vector<1x64xf32> to vector<128x64xf32>
    %57 = arith.addf %54, %56 : vector<128x64xf32>
    %58 = arith.truncf %57 : vector<128x64xf32> to vector<128x64xbf16>
    %c0_33 = arith.constant 0 : index
    %c0_34 = arith.constant 0 : index
    %59 = vector.load %arg13[%c0_33, %c0_34] : memref<128x64xbf16, #tpu.memory_space<vmem>>, vector<128x64xbf16>
    tpu.vector_store %arg13[%c0_33, %c0_34], %58 {strides = array<i32>} : memref<128x64xbf16, #tpu.memory_space<vmem>>, vector<128x64xbf16>,
    return
  }
  func.func @transform_0(%arg0: i32) -> (i32, i32) {
    %c0_i32 = arith.constant 0 : i32
    %c0_i32_0 = arith.constant 0 : i32
    %c0_i32_1 = arith.constant 0 : i32
    return %c0_i32, %c0_i32_0 : i32, i32
  }
  func.func @transform_1(%arg0: i32) -> (i32, i32) {
    %c0_i32 = arith.constant 0 : i32
    %c0_i32_0 = arith.constant 0 : i32
    return %arg0, %c0_i32 : i32, i32
  }
  func.func @transform_2(%arg0: i32) -> (i32, i32) {
    %c0_i32 = arith.constant 0 : i32
    %c0_i32_0 = arith.constant 0 : i32
    return %arg0, %c0_i32 : i32, i32
  }
  func.func @transform_3(%arg0: i32) -> (i32, i32) {
    %c0_i32 = arith.constant 0 : i32
    %c0_i32_0 = arith.constant 0 : i32
    return %arg0, %c0_i32 : i32, i32
  }
  func.func @transform_4(%arg0: i32) -> (i32, i32) {
    %c0_i32 = arith.constant 0 : i32
    %c0_i32_0 = arith.constant 0 : i32
    return %arg0, %c0_i32 : i32, i32
  }
  func.func @transform_5(%arg0: i32) -> (i32, i32) {
    %c0_i32 = arith.constant 0 : i32
    %c0_i32_0 = arith.constant 0 : i32
    %c0_i32_1 = arith.constant 0 : i32
    return %c0_i32, %c0_i32_0 : i32, i32
  }
  func.func @transform_6(%arg0: i32) -> (i32, i32) {
    %c0_i32 = arith.constant 0 : i32
    %c0_i32_0 = arith.constant 0 : i32
    %c0_i32_1 = arith.constant 0 : i32
    return %c0_i32, %c0_i32_0 : i32, i32
  }
  func.func @transform_7(%arg0: i32) -> (i32, i32) {
    %c0_i32 = arith.constant 0 : i32
    %c0_i32_0 = arith.constant 0 : i32
    %c0_i32_1 = arith.constant 0 : i32
    return %c0_i32, %c0_i32_0 : i32, i32
  }
  func.func @transform_8(%arg0: i32) -> (i32, i32) {
    %c0_i32 = arith.constant 0 : i32
    %c0_i32_0 = arith.constant 0 : i32
    %c0_i32_1 = arith.constant 0 : i32
    return %c0_i32, %c0_i32_0 : i32, i32
  }
  func.func @transform_9(%arg0: i32) -> (i32, i32) {
    %c0_i32 = arith.constant 0 : i32
    %c0_i32_0 = arith.constant 0 : i32
    %c0_i32_1 = arith.constant 0 : i32
    return %c0_i32, %c0_i32_0 : i32, i32
  }
  func.func @transform_10(%arg0: i32) -> (i32, i32) {
    %c0_i32 = arith.constant 0 : i32
    %c0_i32_0 = arith.constant 0 : i32
    %c0_i32_1 = arith.constant 0 : i32
    return %c0_i32, %c0_i32_0 : i32, i32
  }
  func.func @transform_11(%arg0: i32) -> (i32, i32) {
    %c0_i32 = arith.constant 0 : i32
    %c0_i32_0 = arith.constant 0 : i32
    %c0_i32_1 = arith.constant 0 : i32
    return %c0_i32, %c0_i32_0 : i32, i32
  }
  func.func @transform_12(%arg0: i32) -> (i32, i32) {
    %c0_i32 = arith.constant 0 : i32
    %c0_i32_0 = arith.constant 0 : i32
    return %arg0, %c0_i32 : i32, i32
  }
}

module attributes {stable_mosaic.version = 11 : i64} {
  func.func @_drgcn_attn_kernel(%arg0: i32, %arg1: memref<2xi32, #tpu.memory_space<smem>>, %arg2: memref<2xi32, #tpu.memory_space<smem>>, %arg3: memref<2xi32, #tpu.memory_space<smem>>, %arg4: memref<2xi32, #tpu.memory_space<smem>>, %arg5: memref<2xi32, #tpu.memory_space<smem>>, %arg6: memref<16x32xbf16, #tpu.memory_space<vmem>>, %arg7: memref<128x64xbf16, #tpu.memory_space<vmem>>, %arg8: memref<1x128xi32, #tpu.memory_space<vmem>>, %arg9: memref<32x32xbf16, #tpu.memory_space<vmem>>, %arg10: memref<1x32xf32, #tpu.memory_space<vmem>>, %arg11: memref<16x32xf32, #tpu.memory_space<vmem>>, %arg12: memref<16x32xbf16, #tpu.memory_space<vmem>>, %arg13: memref<16x4xf32, #tpu.memory_space<vmem>>, %arg14: memref<16x4xf32, #tpu.memory_space<vmem>>, %arg15: memref<16x32xf32, #tpu.memory_space<vmem>>) attributes {dimension_semantics = [#tpu.dimension_semantics<arbitrary>], iteration_bounds = array<i64: 2>, scalar_prefetch = 5 : i64, scratch_operands = 4 : i64, tpu.core_type = #tpu.core_type<tc>, window_params = [{transform_indices = @transform_0, window_bounds = array<i64: 16, 32>}, {transform_indices = @transform_1, window_bounds = array<i64: 128, 64>}, {transform_indices = @transform_2, window_bounds = array<i64: 1, 128>}, {pipeline_mode = #tpu.pipeline_mode<synchronous>, transform_indices = @transform_3, window_bounds = array<i64: 32, 32>}, {pipeline_mode = #tpu.pipeline_mode<synchronous>, transform_indices = @transform_4, window_bounds = array<i64: 1, 32>}, {transform_indices = @transform_5, window_bounds = array<i64: 16, 32>}]} {
    %0 = arith.index_cast %arg0 : i32 to index
    %1 = memref.load %arg4[%0] : memref<2xi32, #tpu.memory_space<smem>>
    %c1_i32 = arith.constant 1 : i32
    %2 = arith.cmpi eq, %1, %c1_i32 : i32
    %3 = arith.extui %2 : i1 to i32
    %c0_i32 = arith.constant 0 : i32
    %4 = arith.cmpi ne, %3, %c0_i32 : i32
    scf.if %4 {
      %c0 = arith.constant 0 : index
      %c0_4 = arith.constant 0 : index
      %15 = vector.load %arg6[%c0, %c0_4] : memref<16x32xbf16, #tpu.memory_space<vmem>>, vector<16x32xbf16>
      %c0_5 = arith.constant 0 : index
      %c0_6 = arith.constant 0 : index
      %16 = vector.load %arg9[%c0_5, %c0_6] : memref<32x32xbf16, #tpu.memory_space<vmem>>, vector<32x32xbf16>
      %cst = arith.constant dense<0.000000e+00> : vector<16x32xf32>
      %17 = tpu.matmul %15, %16, %cst {dimension_numbers = #tpu.dot_dimension_numbers<[1], [0], [0], [1], [0, 0, 1, 1], [], []>} : vector<16x32xbf16>, vector<32x32xbf16>, vector<16x32xf32> -> vector<16x32xf32>
      %c0_7 = arith.constant 0 : index
      %c0_8 = arith.constant 0 : index
      %18 = vector.load %arg10[%c0_7, %c0_8] : memref<1x32xf32, #tpu.memory_space<vmem>>, vector<1x32xf32>
      %19 = vector.broadcast %18 : vector<1x32xf32> to vector<16x32xf32>
      %20 = arith.addf %17, %19 : vector<16x32xf32>
      %21 = arith.truncf %20 : vector<16x32xf32> to vector<16x32xbf16>
      %c0_9 = arith.constant 0 : index
      %c0_10 = arith.constant 0 : index
      %22 = vector.load %arg12[%c0_9, %c0_10] : memref<16x32xbf16, #tpu.memory_space<vmem>>, vector<16x32xbf16>
      tpu.vector_store %arg12[%c0_9, %c0_10], %21 {strides = array<i32>} : memref<16x32xbf16, #tpu.memory_space<vmem>>, vector<16x32xbf16>,
      %cst_11 = arith.constant -1.000000e+30 : f32
      %23 = vector.broadcast %cst_11 : f32 to vector<16x4xf32>
      %c0_12 = arith.constant 0 : index
      %c0_13 = arith.constant 0 : index
      %24 = vector.load %arg13[%c0_12, %c0_13] : memref<16x4xf32, #tpu.memory_space<vmem>>, vector<16x4xf32>
      tpu.vector_store %arg13[%c0_12, %c0_13], %23 {strides = array<i32>} : memref<16x4xf32, #tpu.memory_space<vmem>>, vector<16x4xf32>,
      %cst_14 = arith.constant 0.000000e+00 : f32
      %25 = vector.broadcast %cst_14 : f32 to vector<16x4xf32>
      %c0_15 = arith.constant 0 : index
      %c0_16 = arith.constant 0 : index
      %26 = vector.load %arg14[%c0_15, %c0_16] : memref<16x4xf32, #tpu.memory_space<vmem>>, vector<16x4xf32>
      tpu.vector_store %arg14[%c0_15, %c0_16], %25 {strides = array<i32>} : memref<16x4xf32, #tpu.memory_space<vmem>>, vector<16x4xf32>,
      %cst_17 = arith.constant 0.000000e+00 : f32
      %27 = vector.broadcast %cst_17 : f32 to vector<16x32xf32>
      %c0_18 = arith.constant 0 : index
      %c0_19 = arith.constant 0 : index
      %28 = vector.load %arg15[%c0_18, %c0_19] : memref<16x32xf32, #tpu.memory_space<vmem>>, vector<16x32xf32>
      tpu.vector_store %arg15[%c0_18, %c0_19], %27 {strides = array<i32>} : memref<16x32xf32, #tpu.memory_space<vmem>>, vector<16x32xf32>,
    } else {
    }
    %5 = arith.index_cast %arg0 : i32 to index
    %6 = memref.load %arg3[%5] : memref<2xi32, #tpu.memory_space<smem>>
    %c1_i32_0 = arith.constant 1 : i32
    %7 = arith.cmpi eq, %6, %c1_i32_0 : i32
    %8 = arith.extui %7 : i1 to i32
    %c0_i32_1 = arith.constant 0 : i32
    %9 = arith.cmpi ne, %8, %c0_i32_1 : i32
    scf.if %9 {
      %15 = arith.index_cast %arg0 : i32 to index
      %16 = memref.load %arg1[%15] : memref<2xi32, #tpu.memory_space<smem>>
      %c16_i32 = arith.constant 16 : i32
      %17 = arith.muli %16, %c16_i32 : i32
      %18 = tpu.iota {dimensions = array<i32: 0>} : vector<16x1xi32>
      %19 = vector.broadcast %17 : i32 to vector<16x1xi32>
      %20 = arith.addi %19, %18 : vector<16x1xi32>
      %c0 = arith.constant 0 : index
      %c0_4 = arith.constant 0 : index
      %21 = vector.load %arg8[%c0, %c0_4] : memref<1x128xi32, #tpu.memory_space<vmem>>, vector<1x128xi32>
      %22 = vector.broadcast %21 : vector<1x128xi32> to vector<16x128xi32>
      %23 = vector.broadcast %20 : vector<16x1xi32> to vector<16x128xi32>
      %24 = arith.cmpi eq, %22, %23 : vector<16x128xi32>
      %c0_5 = arith.constant 0 : index
      %c0_6 = arith.constant 0 : index
      %25 = vector.load %arg7[%c0_5, %c0_6] : memref<128x64xbf16, #tpu.memory_space<vmem>>, vector<128x64xbf16>
      %c0_7 = arith.constant 0 : index
      %c0_8 = arith.constant 0 : index
      %26 = vector.load %arg12[%c0_7, %c0_8] : memref<16x32xbf16, #tpu.memory_space<vmem>>, vector<16x32xbf16>
      %c0_9 = arith.constant 0 : index
      %c0_10 = arith.constant 0 : index
      %27 = vector.load %arg13[%c0_9, %c0_10] : memref<16x4xf32, #tpu.memory_space<vmem>>, vector<16x4xf32>
      %c0_11 = arith.constant 0 : index
      %c0_12 = arith.constant 0 : index
      %28 = vector.load %arg14[%c0_11, %c0_12] : memref<16x4xf32, #tpu.memory_space<vmem>>, vector<16x4xf32>
      %c0_13 = arith.constant 0 : index
      %c0_14 = arith.constant 0 : index
      %29 = vector.load %arg15[%c0_13, %c0_14] : memref<16x32xf32, #tpu.memory_space<vmem>>, vector<16x32xf32>
      %30 = vector.extract_strided_slice %26 {offsets = [0, 0], sizes = [16, 8], strides = [1, 1]} : vector<16x32xbf16> to vector<16x8xbf16>
      %31 = vector.extract_strided_slice %25 {offsets = [0, 0], sizes = [128, 8], strides = [1, 1]} : vector<128x64xbf16> to vector<128x8xbf16>
      "tpu.trace_start"() <{level = 10 : i32, message = "rd,ed->re"}> : () -> ()
      %cst = arith.constant dense<0.000000e+00> : vector<16x128xf32>
      %32 = tpu.matmul %30, %31, %cst {dimension_numbers = #tpu.dot_dimension_numbers<[1], [1], [0], [0], [0, 0, 1, 0], [], []>} : vector<16x8xbf16>, vector<128x8xbf16>, vector<16x128xf32> -> vector<16x128xf32>
      "tpu.trace_stop"() : () -> ()
      %cst_15 = arith.constant 0.353553385 : f32
      %33 = vector.broadcast %cst_15 : f32 to vector<16x128xf32>
      %34 = arith.mulf %32, %33 : vector<16x128xf32>
      %cst_16 = arith.constant -1.000000e+30 : f32
      %35 = vector.broadcast %cst_16 : f32 to vector<16x128xf32>
      %36 = arith.select %24, %34, %35 : vector<16x128xi1>, vector<16x128xf32>
      %37 = vector.extract_strided_slice %26 {offsets = [0, 8], sizes = [16, 8], strides = [1, 1]} : vector<16x32xbf16> to vector<16x8xbf16>
      %38 = vector.extract_strided_slice %25 {offsets = [0, 8], sizes = [128, 8], strides = [1, 1]} : vector<128x64xbf16> to vector<128x8xbf16>
      "tpu.trace_start"() <{level = 10 : i32, message = "rd,ed->re"}> : () -> ()
      %cst_17 = arith.constant dense<0.000000e+00> : vector<16x128xf32>
      %39 = tpu.matmul %37, %38, %cst_17 {dimension_numbers = #tpu.dot_dimension_numbers<[1], [1], [0], [0], [0, 0, 1, 0], [], []>} : vector<16x8xbf16>, vector<128x8xbf16>, vector<16x128xf32> -> vector<16x128xf32>
      "tpu.trace_stop"() : () -> ()
      %cst_18 = arith.constant 0.353553385 : f32
      %40 = vector.broadcast %cst_18 : f32 to vector<16x128xf32>
      %41 = arith.mulf %39, %40 : vector<16x128xf32>
      %cst_19 = arith.constant -1.000000e+30 : f32
      %42 = vector.broadcast %cst_19 : f32 to vector<16x128xf32>
      %43 = arith.select %24, %41, %42 : vector<16x128xi1>, vector<16x128xf32>
      %44 = vector.extract_strided_slice %26 {offsets = [0, 16], sizes = [16, 8], strides = [1, 1]} : vector<16x32xbf16> to vector<16x8xbf16>
      %45 = vector.extract_strided_slice %25 {offsets = [0, 16], sizes = [128, 8], strides = [1, 1]} : vector<128x64xbf16> to vector<128x8xbf16>
      "tpu.trace_start"() <{level = 10 : i32, message = "rd,ed->re"}> : () -> ()
      %cst_20 = arith.constant dense<0.000000e+00> : vector<16x128xf32>
      %46 = tpu.matmul %44, %45, %cst_20 {dimension_numbers = #tpu.dot_dimension_numbers<[1], [1], [0], [0], [0, 0, 1, 0], [], []>} : vector<16x8xbf16>, vector<128x8xbf16>, vector<16x128xf32> -> vector<16x128xf32>
      "tpu.trace_stop"() : () -> ()
      %cst_21 = arith.constant 0.353553385 : f32
      %47 = vector.broadcast %cst_21 : f32 to vector<16x128xf32>
      %48 = arith.mulf %46, %47 : vector<16x128xf32>
      %cst_22 = arith.constant -1.000000e+30 : f32
      %49 = vector.broadcast %cst_22 : f32 to vector<16x128xf32>
      %50 = arith.select %24, %48, %49 : vector<16x128xi1>, vector<16x128xf32>
      %51 = vector.extract_strided_slice %26 {offsets = [0, 24], sizes = [16, 8], strides = [1, 1]} : vector<16x32xbf16> to vector<16x8xbf16>
      %52 = vector.extract_strided_slice %25 {offsets = [0, 24], sizes = [128, 8], strides = [1, 1]} : vector<128x64xbf16> to vector<128x8xbf16>
      "tpu.trace_start"() <{level = 10 : i32, message = "rd,ed->re"}> : () -> ()
      %cst_23 = arith.constant dense<0.000000e+00> : vector<16x128xf32>
      %53 = tpu.matmul %51, %52, %cst_23 {dimension_numbers = #tpu.dot_dimension_numbers<[1], [1], [0], [0], [0, 0, 1, 0], [], []>} : vector<16x8xbf16>, vector<128x8xbf16>, vector<16x128xf32> -> vector<16x128xf32>
      "tpu.trace_stop"() : () -> ()
      %cst_24 = arith.constant 0.353553385 : f32
      %54 = vector.broadcast %cst_24 : f32 to vector<16x128xf32>
      %55 = arith.mulf %53, %54 : vector<16x128xf32>
      %cst_25 = arith.constant -1.000000e+30 : f32
      %56 = vector.broadcast %cst_25 : f32 to vector<16x128xf32>
      %57 = arith.select %24, %55, %56 : vector<16x128xi1>, vector<16x128xf32>
      %cst_26 = arith.constant dense<0xFF800000> : vector<16xf32>
      %58 = vector.multi_reduction <maximumf>, %36, %cst_26 [1] : vector<16x128xf32> to vector<16xf32>
      %59 = vector.shape_cast %58 : vector<16xf32> to vector<16x1xf32>
      %cst_27 = arith.constant dense<0xFF800000> : vector<16xf32>
      %60 = vector.multi_reduction <maximumf>, %43, %cst_27 [1] : vector<16x128xf32> to vector<16xf32>
      %61 = vector.shape_cast %60 : vector<16xf32> to vector<16x1xf32>
      %cst_28 = arith.constant dense<0xFF800000> : vector<16xf32>
      %62 = vector.multi_reduction <maximumf>, %50, %cst_28 [1] : vector<16x128xf32> to vector<16xf32>
      %63 = vector.shape_cast %62 : vector<16xf32> to vector<16x1xf32>
      %cst_29 = arith.constant dense<0xFF800000> : vector<16xf32>
      %64 = vector.multi_reduction <maximumf>, %57, %cst_29 [1] : vector<16x128xf32> to vector<16xf32>
      %65 = vector.shape_cast %64 : vector<16xf32> to vector<16x1xf32>
      %66 = tpu.concatenate %59, %61, %63, %65 in 1 : vector<16x1xf32>, vector<16x1xf32>, vector<16x1xf32>, vector<16x1xf32> -> vector<16x4xf32>
      %67 = arith.maximumf %27, %66 : vector<16x4xf32>
      %68 = arith.subf %27, %67 : vector<16x4xf32>
      %69 = math.exp %68 : vector<16x4xf32>
      %70 = vector.extract_strided_slice %67 {offsets = [0, 0], sizes = [16, 1], strides = [1, 1]} : vector<16x4xf32> to vector<16x1xf32>
      %71 = vector.broadcast %70 : vector<16x1xf32> to vector<16x128xf32>
      %72 = arith.subf %36, %71 : vector<16x128xf32>
      %73 = math.exp %72 : vector<16x128xf32>
      %cst_30 = arith.constant 0.000000e+00 : f32
      %74 = vector.broadcast %cst_30 : f32 to vector<16x128xf32>
      %75 = arith.select %24, %73, %74 : vector<16x128xi1>, vector<16x128xf32>
      %76 = vector.extract_strided_slice %69 {offsets = [0, 0], sizes = [16, 1], strides = [1, 1]} : vector<16x4xf32> to vector<16x1xf32>
      %77 = vector.extract_strided_slice %28 {offsets = [0, 0], sizes = [16, 1], strides = [1, 1]} : vector<16x4xf32> to vector<16x1xf32>
      %78 = arith.mulf %76, %77 : vector<16x1xf32>
      %cst_31 = arith.constant dense<0.000000e+00> : vector<16xf32>
      %79 = vector.multi_reduction <add>, %75, %cst_31 [1] : vector<16x128xf32> to vector<16xf32>
      %80 = vector.shape_cast %79 : vector<16xf32> to vector<16x1xf32>
      %81 = arith.addf %78, %80 : vector<16x1xf32>
      %82 = vector.extract_strided_slice %69 {offsets = [0, 0], sizes = [16, 1], strides = [1, 1]} : vector<16x4xf32> to vector<16x1xf32>
      %83 = vector.extract_strided_slice %29 {offsets = [0, 0], sizes = [16, 8], strides = [1, 1]} : vector<16x32xf32> to vector<16x8xf32>
      %84 = vector.broadcast %82 : vector<16x1xf32> to vector<16x8xf32>
      %85 = arith.mulf %84, %83 : vector<16x8xf32>
      %86 = arith.truncf %75 : vector<16x128xf32> to vector<16x128xbf16>
      %87 = vector.extract_strided_slice %25 {offsets = [0, 32], sizes = [128, 8], strides = [1, 1]} : vector<128x64xbf16> to vector<128x8xbf16>
      %cst_32 = arith.constant dense<0.000000e+00> : vector<16x8xf32>
      %88 = tpu.matmul %86, %87, %cst_32 {dimension_numbers = #tpu.dot_dimension_numbers<[1], [0], [0], [1], [0, 0, 1, 1], [], []>} : vector<16x128xbf16>, vector<128x8xbf16>, vector<16x8xf32> -> vector<16x8xf32>
      %89 = arith.addf %85, %88 : vector<16x8xf32>
      %90 = vector.extract_strided_slice %67 {offsets = [0, 1], sizes = [16, 1], strides = [1, 1]} : vector<16x4xf32> to vector<16x1xf32>
      %91 = vector.broadcast %90 : vector<16x1xf32> to vector<16x128xf32>
      %92 = arith.subf %43, %91 : vector<16x128xf32>
      %93 = math.exp %92 : vector<16x128xf32>
      %cst_33 = arith.constant 0.000000e+00 : f32
      %94 = vector.broadcast %cst_33 : f32 to vector<16x128xf32>
      %95 = arith.select %24, %93, %94 : vector<16x128xi1>, vector<16x128xf32>
      %96 = vector.extract_strided_slice %69 {offsets = [0, 1], sizes = [16, 1], strides = [1, 1]} : vector<16x4xf32> to vector<16x1xf32>
      %97 = vector.extract_strided_slice %28 {offsets = [0, 1], sizes = [16, 1], strides = [1, 1]} : vector<16x4xf32> to vector<16x1xf32>
      %98 = arith.mulf %96, %97 : vector<16x1xf32>
      %cst_34 = arith.constant dense<0.000000e+00> : vector<16xf32>
      %99 = vector.multi_reduction <add>, %95, %cst_34 [1] : vector<16x128xf32> to vector<16xf32>
      %100 = vector.shape_cast %99 : vector<16xf32> to vector<16x1xf32>
      %101 = arith.addf %98, %100 : vector<16x1xf32>
      %102 = vector.extract_strided_slice %69 {offsets = [0, 1], sizes = [16, 1], strides = [1, 1]} : vector<16x4xf32> to vector<16x1xf32>
      %103 = vector.extract_strided_slice %29 {offsets = [0, 8], sizes = [16, 8], strides = [1, 1]} : vector<16x32xf32> to vector<16x8xf32>
      %104 = vector.broadcast %102 : vector<16x1xf32> to vector<16x8xf32>
      %105 = arith.mulf %104, %103 : vector<16x8xf32>
      %106 = arith.truncf %95 : vector<16x128xf32> to vector<16x128xbf16>
      %107 = vector.extract_strided_slice %25 {offsets = [0, 40], sizes = [128, 8], strides = [1, 1]} : vector<128x64xbf16> to vector<128x8xbf16>
      %cst_35 = arith.constant dense<0.000000e+00> : vector<16x8xf32>
      %108 = tpu.matmul %106, %107, %cst_35 {dimension_numbers = #tpu.dot_dimension_numbers<[1], [0], [0], [1], [0, 0, 1, 1], [], []>} : vector<16x128xbf16>, vector<128x8xbf16>, vector<16x8xf32> -> vector<16x8xf32>
      %109 = arith.addf %105, %108 : vector<16x8xf32>
      %110 = vector.extract_strided_slice %67 {offsets = [0, 2], sizes = [16, 1], strides = [1, 1]} : vector<16x4xf32> to vector<16x1xf32>
      %111 = vector.broadcast %110 : vector<16x1xf32> to vector<16x128xf32>
      %112 = arith.subf %50, %111 : vector<16x128xf32>
      %113 = math.exp %112 : vector<16x128xf32>
      %cst_36 = arith.constant 0.000000e+00 : f32
      %114 = vector.broadcast %cst_36 : f32 to vector<16x128xf32>
      %115 = arith.select %24, %113, %114 : vector<16x128xi1>, vector<16x128xf32>
      %116 = vector.extract_strided_slice %69 {offsets = [0, 2], sizes = [16, 1], strides = [1, 1]} : vector<16x4xf32> to vector<16x1xf32>
      %117 = vector.extract_strided_slice %28 {offsets = [0, 2], sizes = [16, 1], strides = [1, 1]} : vector<16x4xf32> to vector<16x1xf32>
      %118 = arith.mulf %116, %117 : vector<16x1xf32>
      %cst_37 = arith.constant dense<0.000000e+00> : vector<16xf32>
      %119 = vector.multi_reduction <add>, %115, %cst_37 [1] : vector<16x128xf32> to vector<16xf32>
      %120 = vector.shape_cast %119 : vector<16xf32> to vector<16x1xf32>
      %121 = arith.addf %118, %120 : vector<16x1xf32>
      %122 = vector.extract_strided_slice %69 {offsets = [0, 2], sizes = [16, 1], strides = [1, 1]} : vector<16x4xf32> to vector<16x1xf32>
      %123 = vector.extract_strided_slice %29 {offsets = [0, 16], sizes = [16, 8], strides = [1, 1]} : vector<16x32xf32> to vector<16x8xf32>
      %124 = vector.broadcast %122 : vector<16x1xf32> to vector<16x8xf32>
      %125 = arith.mulf %124, %123 : vector<16x8xf32>
      %126 = arith.truncf %115 : vector<16x128xf32> to vector<16x128xbf16>
      %127 = vector.extract_strided_slice %25 {offsets = [0, 48], sizes = [128, 8], strides = [1, 1]} : vector<128x64xbf16> to vector<128x8xbf16>
      %cst_38 = arith.constant dense<0.000000e+00> : vector<16x8xf32>
      %128 = tpu.matmul %126, %127, %cst_38 {dimension_numbers = #tpu.dot_dimension_numbers<[1], [0], [0], [1], [0, 0, 1, 1], [], []>} : vector<16x128xbf16>, vector<128x8xbf16>, vector<16x8xf32> -> vector<16x8xf32>
      %129 = arith.addf %125, %128 : vector<16x8xf32>
      %130 = vector.extract_strided_slice %67 {offsets = [0, 3], sizes = [16, 1], strides = [1, 1]} : vector<16x4xf32> to vector<16x1xf32>
      %131 = vector.broadcast %130 : vector<16x1xf32> to vector<16x128xf32>
      %132 = arith.subf %57, %131 : vector<16x128xf32>
      %133 = math.exp %132 : vector<16x128xf32>
      %cst_39 = arith.constant 0.000000e+00 : f32
      %134 = vector.broadcast %cst_39 : f32 to vector<16x128xf32>
      %135 = arith.select %24, %133, %134 : vector<16x128xi1>, vector<16x128xf32>
      %136 = vector.extract_strided_slice %69 {offsets = [0, 3], sizes = [16, 1], strides = [1, 1]} : vector<16x4xf32> to vector<16x1xf32>
      %137 = vector.extract_strided_slice %28 {offsets = [0, 3], sizes = [16, 1], strides = [1, 1]} : vector<16x4xf32> to vector<16x1xf32>
      %138 = arith.mulf %136, %137 : vector<16x1xf32>
      %cst_40 = arith.constant dense<0.000000e+00> : vector<16xf32>
      %139 = vector.multi_reduction <add>, %135, %cst_40 [1] : vector<16x128xf32> to vector<16xf32>
      %140 = vector.shape_cast %139 : vector<16xf32> to vector<16x1xf32>
      %141 = arith.addf %138, %140 : vector<16x1xf32>
      %142 = vector.extract_strided_slice %69 {offsets = [0, 3], sizes = [16, 1], strides = [1, 1]} : vector<16x4xf32> to vector<16x1xf32>
      %143 = vector.extract_strided_slice %29 {offsets = [0, 24], sizes = [16, 8], strides = [1, 1]} : vector<16x32xf32> to vector<16x8xf32>
      %144 = vector.broadcast %142 : vector<16x1xf32> to vector<16x8xf32>
      %145 = arith.mulf %144, %143 : vector<16x8xf32>
      %146 = arith.truncf %135 : vector<16x128xf32> to vector<16x128xbf16>
      %147 = vector.extract_strided_slice %25 {offsets = [0, 56], sizes = [128, 8], strides = [1, 1]} : vector<128x64xbf16> to vector<128x8xbf16>
      %cst_41 = arith.constant dense<0.000000e+00> : vector<16x8xf32>
      %148 = tpu.matmul %146, %147, %cst_41 {dimension_numbers = #tpu.dot_dimension_numbers<[1], [0], [0], [1], [0, 0, 1, 1], [], []>} : vector<16x128xbf16>, vector<128x8xbf16>, vector<16x8xf32> -> vector<16x8xf32>
      %149 = arith.addf %145, %148 : vector<16x8xf32>
      %c0_42 = arith.constant 0 : index
      %c0_43 = arith.constant 0 : index
      %150 = vector.load %arg13[%c0_42, %c0_43] : memref<16x4xf32, #tpu.memory_space<vmem>>, vector<16x4xf32>
      tpu.vector_store %arg13[%c0_42, %c0_43], %67 {strides = array<i32>} : memref<16x4xf32, #tpu.memory_space<vmem>>, vector<16x4xf32>,
      %151 = tpu.concatenate %81, %101, %121, %141 in 1 : vector<16x1xf32>, vector<16x1xf32>, vector<16x1xf32>, vector<16x1xf32> -> vector<16x4xf32>
      %c0_44 = arith.constant 0 : index
      %c0_45 = arith.constant 0 : index
      %152 = vector.load %arg14[%c0_44, %c0_45] : memref<16x4xf32, #tpu.memory_space<vmem>>, vector<16x4xf32>
      tpu.vector_store %arg14[%c0_44, %c0_45], %151 {strides = array<i32>} : memref<16x4xf32, #tpu.memory_space<vmem>>, vector<16x4xf32>,
      %153 = tpu.concatenate %89, %109, %129, %149 in 1 : vector<16x8xf32>, vector<16x8xf32>, vector<16x8xf32>, vector<16x8xf32> -> vector<16x32xf32>
      %c0_46 = arith.constant 0 : index
      %c0_47 = arith.constant 0 : index
      %154 = vector.load %arg15[%c0_46, %c0_47] : memref<16x32xf32, #tpu.memory_space<vmem>>, vector<16x32xf32>
      tpu.vector_store %arg15[%c0_46, %c0_47], %153 {strides = array<i32>} : memref<16x32xf32, #tpu.memory_space<vmem>>, vector<16x32xf32>,
    } else {
    }
    %10 = arith.index_cast %arg0 : i32 to index
    %11 = memref.load %arg5[%10] : memref<2xi32, #tpu.memory_space<smem>>
    %c1_i32_2 = arith.constant 1 : i32
    %12 = arith.cmpi eq, %11, %c1_i32_2 : i32
    %13 = arith.extui %12 : i1 to i32
    %c0_i32_3 = arith.constant 0 : i32
    %14 = arith.cmpi ne, %13, %c0_i32_3 : i32
    scf.if %14 {
      %c0 = arith.constant 0 : index
      %c0_4 = arith.constant 0 : index
      %15 = vector.load %arg14[%c0, %c0_4] : memref<16x4xf32, #tpu.memory_space<vmem>>, vector<16x4xf32>
      %cst = arith.constant 1.000000e-30 : f32
      %16 = vector.broadcast %cst : f32 to vector<16x4xf32>
      %17 = arith.maximumf %15, %16 : vector<16x4xf32>
      %18 = tpu.reciprocal %17 {approx = true} : vector<16x4xf32> -> vector<16x4xf32>
      %c0_5 = arith.constant 0 : index
      %c0_6 = arith.constant 0 : index
      %19 = vector.load %arg15[%c0_5, %c0_6] : memref<16x32xf32, #tpu.memory_space<vmem>>, vector<16x32xf32>
      %20 = vector.extract_strided_slice %19 {offsets = [0, 0], sizes = [16, 8], strides = [1, 1]} : vector<16x32xf32> to vector<16x8xf32>
      %21 = vector.extract_strided_slice %18 {offsets = [0, 0], sizes = [16, 1], strides = [1, 1]} : vector<16x4xf32> to vector<16x1xf32>
      %22 = vector.broadcast %21 : vector<16x1xf32> to vector<16x8xf32>
      %23 = arith.mulf %20, %22 : vector<16x8xf32>
      %24 = vector.extract_strided_slice %19 {offsets = [0, 8], sizes = [16, 8], strides = [1, 1]} : vector<16x32xf32> to vector<16x8xf32>
      %25 = vector.extract_strided_slice %18 {offsets = [0, 1], sizes = [16, 1], strides = [1, 1]} : vector<16x4xf32> to vector<16x1xf32>
      %26 = vector.broadcast %25 : vector<16x1xf32> to vector<16x8xf32>
      %27 = arith.mulf %24, %26 : vector<16x8xf32>
      %28 = vector.extract_strided_slice %19 {offsets = [0, 16], sizes = [16, 8], strides = [1, 1]} : vector<16x32xf32> to vector<16x8xf32>
      %29 = vector.extract_strided_slice %18 {offsets = [0, 2], sizes = [16, 1], strides = [1, 1]} : vector<16x4xf32> to vector<16x1xf32>
      %30 = vector.broadcast %29 : vector<16x1xf32> to vector<16x8xf32>
      %31 = arith.mulf %28, %30 : vector<16x8xf32>
      %32 = vector.extract_strided_slice %19 {offsets = [0, 24], sizes = [16, 8], strides = [1, 1]} : vector<16x32xf32> to vector<16x8xf32>
      %33 = vector.extract_strided_slice %18 {offsets = [0, 3], sizes = [16, 1], strides = [1, 1]} : vector<16x4xf32> to vector<16x1xf32>
      %34 = vector.broadcast %33 : vector<16x1xf32> to vector<16x8xf32>
      %35 = arith.mulf %32, %34 : vector<16x8xf32>
      %36 = tpu.concatenate %23, %27, %31, %35 in 1 : vector<16x8xf32>, vector<16x8xf32>, vector<16x8xf32>, vector<16x8xf32> -> vector<16x32xf32>
      %c0_7 = arith.constant 0 : index
      %c0_8 = arith.constant 0 : index
      %37 = vector.load %arg11[%c0_7, %c0_8] : memref<16x32xf32, #tpu.memory_space<vmem>>, vector<16x32xf32>
      tpu.vector_store %arg11[%c0_7, %c0_8], %36 {strides = array<i32>} : memref<16x32xf32, #tpu.memory_space<vmem>>, vector<16x32xf32>,
    } else {
    }
    return
  }
  func.func @transform_0(%arg0: i32, %arg1: memref<2xi32, #tpu.memory_space<smem>>, %arg2: memref<2xi32, #tpu.memory_space<smem>>, %arg3: memref<2xi32, #tpu.memory_space<smem>>, %arg4: memref<2xi32, #tpu.memory_space<smem>>, %arg5: memref<2xi32, #tpu.memory_space<smem>>) -> (i32, i32) {
    %0 = arith.index_cast %arg0 : i32 to index
    %1 = memref.load %arg1[%0] : memref<2xi32, #tpu.memory_space<smem>>
    %c0_i32 = arith.constant 0 : i32
    %c0_i32_0 = arith.constant 0 : i32
    return %1, %c0_i32 : i32, i32
  }
  func.func @transform_1(%arg0: i32, %arg1: memref<2xi32, #tpu.memory_space<smem>>, %arg2: memref<2xi32, #tpu.memory_space<smem>>, %arg3: memref<2xi32, #tpu.memory_space<smem>>, %arg4: memref<2xi32, #tpu.memory_space<smem>>, %arg5: memref<2xi32, #tpu.memory_space<smem>>) -> (i32, i32) {
    %0 = arith.index_cast %arg0 : i32 to index
    %1 = memref.load %arg2[%0] : memref<2xi32, #tpu.memory_space<smem>>
    %c0_i32 = arith.constant 0 : i32
    %c0_i32_0 = arith.constant 0 : i32
    return %1, %c0_i32 : i32, i32
  }
  func.func @transform_2(%arg0: i32, %arg1: memref<2xi32, #tpu.memory_space<smem>>, %arg2: memref<2xi32, #tpu.memory_space<smem>>, %arg3: memref<2xi32, #tpu.memory_space<smem>>, %arg4: memref<2xi32, #tpu.memory_space<smem>>, %arg5: memref<2xi32, #tpu.memory_space<smem>>) -> (i32, i32) {
    %0 = arith.index_cast %arg0 : i32 to index
    %1 = memref.load %arg2[%0] : memref<2xi32, #tpu.memory_space<smem>>
    %c0_i32 = arith.constant 0 : i32
    %c0_i32_0 = arith.constant 0 : i32
    return %c0_i32, %1 : i32, i32
  }
  func.func @transform_3(%arg0: i32, %arg1: memref<2xi32, #tpu.memory_space<smem>>, %arg2: memref<2xi32, #tpu.memory_space<smem>>, %arg3: memref<2xi32, #tpu.memory_space<smem>>, %arg4: memref<2xi32, #tpu.memory_space<smem>>, %arg5: memref<2xi32, #tpu.memory_space<smem>>) -> (i32, i32) {
    %c0_i32 = arith.constant 0 : i32
    %c0_i32_0 = arith.constant 0 : i32
    %c0_i32_1 = arith.constant 0 : i32
    return %c0_i32, %c0_i32_0 : i32, i32
  }
  func.func @transform_4(%arg0: i32, %arg1: memref<2xi32, #tpu.memory_space<smem>>, %arg2: memref<2xi32, #tpu.memory_space<smem>>, %arg3: memref<2xi32, #tpu.memory_space<smem>>, %arg4: memref<2xi32, #tpu.memory_space<smem>>, %arg5: memref<2xi32, #tpu.memory_space<smem>>) -> (i32, i32) {
    %c0_i32 = arith.constant 0 : i32
    %c0_i32_0 = arith.constant 0 : i32
    %c0_i32_1 = arith.constant 0 : i32
    return %c0_i32, %c0_i32_0 : i32, i32
  }
  func.func @transform_5(%arg0: i32, %arg1: memref<2xi32, #tpu.memory_space<smem>>, %arg2: memref<2xi32, #tpu.memory_space<smem>>, %arg3: memref<2xi32, #tpu.memory_space<smem>>, %arg4: memref<2xi32, #tpu.memory_space<smem>>, %arg5: memref<2xi32, #tpu.memory_space<smem>>) -> (i32, i32) {
    %0 = arith.index_cast %arg0 : i32 to index
    %1 = memref.load %arg1[%0] : memref<2xi32, #tpu.memory_space<smem>>
    %c0_i32 = arith.constant 0 : i32
    %c0_i32_0 = arith.constant 0 : i32
    return %1, %c0_i32 : i32, i32
  }
}

module attributes {stable_mosaic.version = 11 : i64} {
  func.func @_mstode_kernel(%arg0: i32, %arg1: memref<16x32xf32, #tpu.memory_space<vmem>>, %arg2: memref<32x64xbf16, #tpu.memory_space<vmem>>, %arg3: memref<1x64xf32, #tpu.memory_space<vmem>>, %arg4: memref<64x32xbf16, #tpu.memory_space<vmem>>, %arg5: memref<1x32xf32, #tpu.memory_space<vmem>>, %arg6: memref<32x16xbf16, #tpu.memory_space<vmem>>, %arg7: memref<1x16xf32, #tpu.memory_space<vmem>>, %arg8: memref<16x32xbf16, #tpu.memory_space<vmem>>, %arg9: memref<1x32xf32, #tpu.memory_space<vmem>>, %arg10: memref<1x32xf32, #tpu.memory_space<vmem>>, %arg11: memref<1x32xf32, #tpu.memory_space<vmem>>, %arg12: memref<1x32xf32, #tpu.memory_space<vmem>>, %arg13: memref<1x32xf32, #tpu.memory_space<vmem>>, %arg14: memref<1x1xf32, #tpu.memory_space<vmem>>, %arg15: memref<1x1xf32, #tpu.memory_space<vmem>>, %arg16: memref<16x32xf32, #tpu.memory_space<vmem>>) attributes {dimension_semantics = [#tpu.dimension_semantics<parallel>], iteration_bounds = array<i64: 2>, scalar_prefetch = 0 : i64, scratch_operands = 0 : i64, tpu.core_type = #tpu.core_type<tc>, window_params = [{transform_indices = @transform_0, window_bounds = array<i64: 16, 32>}, {pipeline_mode = #tpu.pipeline_mode<synchronous>, transform_indices = @transform_1, window_bounds = array<i64: 32, 64>}, {pipeline_mode = #tpu.pipeline_mode<synchronous>, transform_indices = @transform_2, window_bounds = array<i64: 1, 64>}, {pipeline_mode = #tpu.pipeline_mode<synchronous>, transform_indices = @transform_3, window_bounds = array<i64: 64, 32>}, {pipeline_mode = #tpu.pipeline_mode<synchronous>, transform_indices = @transform_4, window_bounds = array<i64: 1, 32>}, {pipeline_mode = #tpu.pipeline_mode<synchronous>, transform_indices = @transform_5, window_bounds = array<i64: 32, 16>}, {pipeline_mode = #tpu.pipeline_mode<synchronous>, transform_indices = @transform_6, window_bounds = array<i64: 1, 16>}, {pipeline_mode = #tpu.pipeline_mode<synchronous>, transform_indices = @transform_7, window_bounds = array<i64: 16, 32>}, {pipeline_mode = #tpu.pipeline_mode<synchronous>, transform_indices = @transform_8, window_bounds = array<i64: 1, 32>}, {pipeline_mode = #tpu.pipeline_mode<synchronous>, transform_indices = @transform_9, window_bounds = array<i64: 1, 32>}, {pipeline_mode = #tpu.pipeline_mode<synchronous>, transform_indices = @transform_10, window_bounds = array<i64: 1, 32>}, {pipeline_mode = #tpu.pipeline_mode<synchronous>, transform_indices = @transform_11, window_bounds = array<i64: 1, 32>}, {pipeline_mode = #tpu.pipeline_mode<synchronous>, transform_indices = @transform_12, window_bounds = array<i64: 1, 32>}, {pipeline_mode = #tpu.pipeline_mode<synchronous>, transform_indices = @transform_13, window_bounds = array<i64: 1, 1>}, {pipeline_mode = #tpu.pipeline_mode<synchronous>, transform_indices = @transform_14, window_bounds = array<i64: 1, 1>}, {transform_indices = @transform_15, window_bounds = array<i64: 16, 32>}]} {
    %c0 = arith.constant 0 : index
    %c0_0 = arith.constant 0 : index
    %0 = vector.load %arg2[%c0, %c0_0] : memref<32x64xbf16, #tpu.memory_space<vmem>>, vector<32x64xbf16>
    %c0_1 = arith.constant 0 : index
    %c0_2 = arith.constant 0 : index
    %1 = vector.load %arg3[%c0_1, %c0_2] : memref<1x64xf32, #tpu.memory_space<vmem>>, vector<1x64xf32>
    %c0_3 = arith.constant 0 : index
    %c0_4 = arith.constant 0 : index
    %2 = vector.load %arg4[%c0_3, %c0_4] : memref<64x32xbf16, #tpu.memory_space<vmem>>, vector<64x32xbf16>
    %c0_5 = arith.constant 0 : index
    %c0_6 = arith.constant 0 : index
    %3 = vector.load %arg5[%c0_5, %c0_6] : memref<1x32xf32, #tpu.memory_space<vmem>>, vector<1x32xf32>
    %c0_7 = arith.constant 0 : index
    %c0_8 = arith.constant 0 : index
    %4 = vector.load %arg6[%c0_7, %c0_8] : memref<32x16xbf16, #tpu.memory_space<vmem>>, vector<32x16xbf16>
    %c0_9 = arith.constant 0 : index
    %c0_10 = arith.constant 0 : index
    %5 = vector.load %arg7[%c0_9, %c0_10] : memref<1x16xf32, #tpu.memory_space<vmem>>, vector<1x16xf32>
    %c0_11 = arith.constant 0 : index
    %c0_12 = arith.constant 0 : index
    %6 = vector.load %arg8[%c0_11, %c0_12] : memref<16x32xbf16, #tpu.memory_space<vmem>>, vector<16x32xbf16>
    %c0_13 = arith.constant 0 : index
    %c0_14 = arith.constant 0 : index
    %7 = vector.load %arg9[%c0_13, %c0_14] : memref<1x32xf32, #tpu.memory_space<vmem>>, vector<1x32xf32>
    %c0_15 = arith.constant 0 : index
    %c0_16 = arith.constant 0 : index
    %8 = vector.load %arg10[%c0_15, %c0_16] : memref<1x32xf32, #tpu.memory_space<vmem>>, vector<1x32xf32>
    %c0_17 = arith.constant 0 : index
    %c0_18 = arith.constant 0 : index
    %9 = vector.load %arg11[%c0_17, %c0_18] : memref<1x32xf32, #tpu.memory_space<vmem>>, vector<1x32xf32>
    %c0_19 = arith.constant 0 : index
    %c0_20 = arith.constant 0 : index
    %10 = vector.load %arg12[%c0_19, %c0_20] : memref<1x32xf32, #tpu.memory_space<vmem>>, vector<1x32xf32>
    %c0_21 = arith.constant 0 : index
    %c0_22 = arith.constant 0 : index
    %11 = vector.load %arg13[%c0_21, %c0_22] : memref<1x32xf32, #tpu.memory_space<vmem>>, vector<1x32xf32>
    %c0_23 = arith.constant 0 : index
    %c0_24 = arith.constant 0 : index
    %12 = vector.load %arg14[%c0_23, %c0_24] : memref<1x1xf32, #tpu.memory_space<vmem>>, vector<1x1xf32>
    %c0_25 = arith.constant 0 : index
    %c0_26 = arith.constant 0 : index
    %13 = vector.load %arg15[%c0_25, %c0_26] : memref<1x1xf32, #tpu.memory_space<vmem>>, vector<1x1xf32>
    %c0_27 = arith.constant 0 : index
    %c0_28 = arith.constant 0 : index
    %14 = vector.load %arg1[%c0_27, %c0_28] : memref<16x32xf32, #tpu.memory_space<vmem>>, vector<16x32xf32>
    %c0_i32 = arith.constant 0 : i32
    %c4_i32 = arith.constant 4 : i32
    %15 = arith.addi %c0_i32, %c4_i32 : i32
    %c1_i32 = arith.constant 1 : i32
    %16 = scf.for %arg17 = %c0_i32 to %15 step %c1_i32 iter_args(%arg18 = %14) -> (vector<16x32xf32>)  : i32 {
      %18 = arith.truncf %arg18 : vector<16x32xf32> to vector<16x32xbf16>
      %cst = arith.constant dense<0.000000e+00> : vector<16x64xf32>
      %19 = tpu.matmul %18, %0, %cst {dimension_numbers = #tpu.dot_dimension_numbers<[1], [0], [0], [1], [0, 0, 1, 1], [], []>} : vector<16x32xbf16>, vector<32x64xbf16>, vector<16x64xf32> -> vector<16x64xf32>
      %20 = vector.broadcast %1 : vector<1x64xf32> to vector<16x64xf32>
      %21 = arith.addf %19, %20 : vector<16x64xf32>
      %cst_31 = arith.constant 5.000000e-01 : f32
      %22 = vector.broadcast %cst_31 : f32 to vector<16x64xf32>
      %23 = arith.mulf %22, %21 : vector<16x64xf32>
      %cst_32 = arith.constant 4.471500e-02 : f32
      %24 = vector.broadcast %cst_32 : f32 to vector<16x64xf32>
      %25 = arith.mulf %24, %21 : vector<16x64xf32>
      %26 = arith.mulf %25, %21 : vector<16x64xf32>
      %27 = arith.mulf %26, %21 : vector<16x64xf32>
      %28 = arith.addf %21, %27 : vector<16x64xf32>
      %cst_33 = arith.constant 0.797884583 : f32
      %29 = vector.broadcast %cst_33 : f32 to vector<16x64xf32>
      %30 = arith.mulf %29, %28 : vector<16x64xf32>
      %31 = math.tanh %30 : vector<16x64xf32>
      %cst_34 = arith.constant 1.000000e+00 : f32
      %32 = vector.broadcast %cst_34 : f32 to vector<16x64xf32>
      %33 = arith.addf %32, %31 : vector<16x64xf32>
      %34 = arith.mulf %23, %33 : vector<16x64xf32>
      %35 = arith.truncf %34 : vector<16x64xf32> to vector<16x64xbf16>
      %cst_35 = arith.constant dense<0.000000e+00> : vector<16x32xf32>
      %36 = tpu.matmul %35, %2, %cst_35 {dimension_numbers = #tpu.dot_dimension_numbers<[1], [0], [0], [1], [0, 0, 1, 1], [], []>} : vector<16x64xbf16>, vector<64x32xbf16>, vector<16x32xf32> -> vector<16x32xf32>
      %37 = vector.broadcast %3 : vector<1x32xf32> to vector<16x32xf32>
      %38 = arith.addf %36, %37 : vector<16x32xf32>
      %cst_36 = arith.constant dense<0.000000e+00> : vector<16x16xf32>
      %39 = tpu.matmul %18, %4, %cst_36 {dimension_numbers = #tpu.dot_dimension_numbers<[1], [0], [0], [1], [0, 0, 1, 1], [], []>} : vector<16x32xbf16>, vector<32x16xbf16>, vector<16x16xf32> -> vector<16x16xf32>
      %40 = vector.broadcast %5 : vector<1x16xf32> to vector<16x16xf32>
      %41 = arith.addf %39, %40 : vector<16x16xf32>
      %cst_37 = arith.constant 0.000000e+00 : f32
      %42 = vector.broadcast %cst_37 : f32 to vector<16x16xf32>
      %43 = arith.maximumf %41, %42 : vector<16x16xf32>
      %44 = math.absf %41 : vector<16x16xf32>
      %cst_38 = arith.constant 0.000000e+00 : f32
      %45 = vector.broadcast %cst_38 : f32 to vector<16x16xf32>
      %46 = arith.subf %45, %44 : vector<16x16xf32>
      %47 = math.exp %46 : vector<16x16xf32>
      %cst_39 = arith.constant 1.000000e+00 : f32
      %48 = vector.broadcast %cst_39 : f32 to vector<16x16xf32>
      %49 = arith.addf %48, %47 : vector<16x16xf32>
      %50 = math.log %49 : vector<16x16xf32>
      %51 = arith.addf %43, %50 : vector<16x16xf32>
      %52 = arith.truncf %51 : vector<16x16xf32> to vector<16x16xbf16>
      %cst_40 = arith.constant dense<0.000000e+00> : vector<16x32xf32>
      %53 = tpu.matmul %52, %6, %cst_40 {dimension_numbers = #tpu.dot_dimension_numbers<[1], [0], [0], [1], [0, 0, 1, 1], [], []>} : vector<16x16xbf16>, vector<16x32xbf16>, vector<16x32xf32> -> vector<16x32xf32>
      %54 = vector.broadcast %7 : vector<1x32xf32> to vector<16x32xf32>
      %55 = arith.addf %53, %54 : vector<16x32xf32>
      %56 = vector.broadcast %8 : vector<1x32xf32> to vector<16x32xf32>
      %57 = arith.mulf %38, %56 : vector<16x32xf32>
      %58 = vector.broadcast %9 : vector<1x32xf32> to vector<16x32xf32>
      %59 = arith.mulf %55, %58 : vector<16x32xf32>
      %60 = arith.addf %57, %59 : vector<16x32xf32>
      %cst_41 = arith.constant dense<0.000000e+00> : vector<16xf32>
      %61 = vector.multi_reduction <add>, %60, %cst_41 [1] : vector<16x32xf32> to vector<16xf32>
      %62 = vector.shape_cast %61 : vector<16xf32> to vector<16x1xf32>
      %63 = vector.broadcast %12 : vector<1x1xf32> to vector<16x1xf32>
      %64 = arith.addf %62, %63 : vector<16x1xf32>
      %cst_42 = arith.constant 0.000000e+00 : f32
      %65 = vector.broadcast %cst_42 : f32 to vector<16x1xf32>
      %66 = arith.subf %65, %64 : vector<16x1xf32>
      %67 = math.exp %66 : vector<16x1xf32>
      %cst_43 = arith.constant 1.000000e+00 : f32
      %68 = vector.broadcast %cst_43 : f32 to vector<16x1xf32>
      %69 = arith.addf %68, %67 : vector<16x1xf32>
      %cst_44 = arith.constant 1.000000e+00 : f32
      %70 = vector.broadcast %cst_44 : f32 to vector<16x1xf32>
      %71 = arith.divf %70, %69 : vector<16x1xf32>
      %72 = vector.broadcast %10 : vector<1x32xf32> to vector<16x32xf32>
      %73 = arith.mulf %38, %72 : vector<16x32xf32>
      %74 = vector.broadcast %11 : vector<1x32xf32> to vector<16x32xf32>
      %75 = arith.mulf %55, %74 : vector<16x32xf32>
      %76 = arith.addf %73, %75 : vector<16x32xf32>
      %cst_45 = arith.constant dense<0.000000e+00> : vector<16xf32>
      %77 = vector.multi_reduction <add>, %76, %cst_45 [1] : vector<16x32xf32> to vector<16xf32>
      %78 = vector.shape_cast %77 : vector<16xf32> to vector<16x1xf32>
      %79 = vector.broadcast %13 : vector<1x1xf32> to vector<16x1xf32>
      %80 = arith.addf %78, %79 : vector<16x1xf32>
      %cst_46 = arith.constant 0.000000e+00 : f32
      %81 = vector.broadcast %cst_46 : f32 to vector<16x1xf32>
      %82 = arith.subf %81, %80 : vector<16x1xf32>
      %83 = math.exp %82 : vector<16x1xf32>
      %cst_47 = arith.constant 1.000000e+00 : f32
      %84 = vector.broadcast %cst_47 : f32 to vector<16x1xf32>
      %85 = arith.addf %84, %83 : vector<16x1xf32>
      %cst_48 = arith.constant 1.000000e+00 : f32
      %86 = vector.broadcast %cst_48 : f32 to vector<16x1xf32>
      %87 = arith.divf %86, %85 : vector<16x1xf32>
      %88 = vector.broadcast %71 : vector<16x1xf32> to vector<16x32xf32>
      %89 = arith.mulf %88, %38 : vector<16x32xf32>
      %90 = vector.broadcast %87 : vector<16x1xf32> to vector<16x32xf32>
      %91 = arith.mulf %90, %55 : vector<16x32xf32>
      %92 = arith.addf %89, %91 : vector<16x32xf32>
      %cst_49 = arith.constant 0.022786459 : f32
      %93 = vector.broadcast %cst_49 : f32 to vector<16x32xf32>
      %94 = arith.mulf %93, %92 : vector<16x32xf32>
      %95 = arith.addf %arg18, %94 : vector<16x32xf32>
      %cst_50 = arith.constant 5.000000e-02 : f32
      %96 = vector.broadcast %cst_50 : f32 to vector<16x32xf32>
      %97 = arith.mulf %96, %92 : vector<16x32xf32>
      %98 = arith.addf %arg18, %97 : vector<16x32xf32>
      %99 = arith.truncf %98 : vector<16x32xf32> to vector<16x32xbf16>
      %cst_51 = arith.constant dense<0.000000e+00> : vector<16x64xf32>
      %100 = tpu.matmul %99, %0, %cst_51 {dimension_numbers = #tpu.dot_dimension_numbers<[1], [0], [0], [1], [0, 0, 1, 1], [], []>} : vector<16x32xbf16>, vector<32x64xbf16>, vector<16x64xf32> -> vector<16x64xf32>
      %101 = vector.broadcast %1 : vector<1x64xf32> to vector<16x64xf32>
      %102 = arith.addf %100, %101 : vector<16x64xf32>
      %cst_52 = arith.constant 5.000000e-01 : f32
      %103 = vector.broadcast %cst_52 : f32 to vector<16x64xf32>
      %104 = arith.mulf %103, %102 : vector<16x64xf32>
      %cst_53 = arith.constant 4.471500e-02 : f32
      %105 = vector.broadcast %cst_53 : f32 to vector<16x64xf32>
      %106 = arith.mulf %105, %102 : vector<16x64xf32>
      %107 = arith.mulf %106, %102 : vector<16x64xf32>
      %108 = arith.mulf %107, %102 : vector<16x64xf32>
      %109 = arith.addf %102, %108 : vector<16x64xf32>
      %cst_54 = arith.constant 0.797884583 : f32
      %110 = vector.broadcast %cst_54 : f32 to vector<16x64xf32>
      %111 = arith.mulf %110, %109 : vector<16x64xf32>
      %112 = math.tanh %111 : vector<16x64xf32>
      %cst_55 = arith.constant 1.000000e+00 : f32
      %113 = vector.broadcast %cst_55 : f32 to vector<16x64xf32>
      %114 = arith.addf %113, %112 : vector<16x64xf32>
      %115 = arith.mulf %104, %114 : vector<16x64xf32>
      %116 = arith.truncf %115 : vector<16x64xf32> to vector<16x64xbf16>
      %cst_56 = arith.constant dense<0.000000e+00> : vector<16x32xf32>
      %117 = tpu.matmul %116, %2, %cst_56 {dimension_numbers = #tpu.dot_dimension_numbers<[1], [0], [0], [1], [0, 0, 1, 1], [], []>} : vector<16x64xbf16>, vector<64x32xbf16>, vector<16x32xf32> -> vector<16x32xf32>
      %118 = vector.broadcast %3 : vector<1x32xf32> to vector<16x32xf32>
      %119 = arith.addf %117, %118 : vector<16x32xf32>
      %cst_57 = arith.constant dense<0.000000e+00> : vector<16x16xf32>
      %120 = tpu.matmul %99, %4, %cst_57 {dimension_numbers = #tpu.dot_dimension_numbers<[1], [0], [0], [1], [0, 0, 1, 1], [], []>} : vector<16x32xbf16>, vector<32x16xbf16>, vector<16x16xf32> -> vector<16x16xf32>
      %121 = vector.broadcast %5 : vector<1x16xf32> to vector<16x16xf32>
      %122 = arith.addf %120, %121 : vector<16x16xf32>
      %cst_58 = arith.constant 0.000000e+00 : f32
      %123 = vector.broadcast %cst_58 : f32 to vector<16x16xf32>
      %124 = arith.maximumf %122, %123 : vector<16x16xf32>
      %125 = math.absf %122 : vector<16x16xf32>
      %cst_59 = arith.constant 0.000000e+00 : f32
      %126 = vector.broadcast %cst_59 : f32 to vector<16x16xf32>
      %127 = arith.subf %126, %125 : vector<16x16xf32>
      %128 = math.exp %127 : vector<16x16xf32>
      %cst_60 = arith.constant 1.000000e+00 : f32
      %129 = vector.broadcast %cst_60 : f32 to vector<16x16xf32>
      %130 = arith.addf %129, %128 : vector<16x16xf32>
      %131 = math.log %130 : vector<16x16xf32>
      %132 = arith.addf %124, %131 : vector<16x16xf32>
      %133 = arith.truncf %132 : vector<16x16xf32> to vector<16x16xbf16>
      %cst_61 = arith.constant dense<0.000000e+00> : vector<16x32xf32>
      %134 = tpu.matmul %133, %6, %cst_61 {dimension_numbers = #tpu.dot_dimension_numbers<[1], [0], [0], [1], [0, 0, 1, 1], [], []>} : vector<16x16xbf16>, vector<16x32xbf16>, vector<16x32xf32> -> vector<16x32xf32>
      %135 = vector.broadcast %7 : vector<1x32xf32> to vector<16x32xf32>
      %136 = arith.addf %134, %135 : vector<16x32xf32>
      %137 = vector.broadcast %8 : vector<1x32xf32> to vector<16x32xf32>
      %138 = arith.mulf %119, %137 : vector<16x32xf32>
      %139 = vector.broadcast %9 : vector<1x32xf32> to vector<16x32xf32>
      %140 = arith.mulf %136, %139 : vector<16x32xf32>
      %141 = arith.addf %138, %140 : vector<16x32xf32>
      %cst_62 = arith.constant dense<0.000000e+00> : vector<16xf32>
      %142 = vector.multi_reduction <add>, %141, %cst_62 [1] : vector<16x32xf32> to vector<16xf32>
      %143 = vector.shape_cast %142 : vector<16xf32> to vector<16x1xf32>
      %144 = vector.broadcast %12 : vector<1x1xf32> to vector<16x1xf32>
      %145 = arith.addf %143, %144 : vector<16x1xf32>
      %cst_63 = arith.constant 0.000000e+00 : f32
      %146 = vector.broadcast %cst_63 : f32 to vector<16x1xf32>
      %147 = arith.subf %146, %145 : vector<16x1xf32>
      %148 = math.exp %147 : vector<16x1xf32>
      %cst_64 = arith.constant 1.000000e+00 : f32
      %149 = vector.broadcast %cst_64 : f32 to vector<16x1xf32>
      %150 = arith.addf %149, %148 : vector<16x1xf32>
      %cst_65 = arith.constant 1.000000e+00 : f32
      %151 = vector.broadcast %cst_65 : f32 to vector<16x1xf32>
      %152 = arith.divf %151, %150 : vector<16x1xf32>
      %153 = vector.broadcast %10 : vector<1x32xf32> to vector<16x32xf32>
      %154 = arith.mulf %119, %153 : vector<16x32xf32>
      %155 = vector.broadcast %11 : vector<1x32xf32> to vector<16x32xf32>
      %156 = arith.mulf %136, %155 : vector<16x32xf32>
      %157 = arith.addf %154, %156 : vector<16x32xf32>
      %cst_66 = arith.constant dense<0.000000e+00> : vector<16xf32>
      %158 = vector.multi_reduction <add>, %157, %cst_66 [1] : vector<16x32xf32> to vector<16xf32>
      %159 = vector.shape_cast %158 : vector<16xf32> to vector<16x1xf32>
      %160 = vector.broadcast %13 : vector<1x1xf32> to vector<16x1xf32>
      %161 = arith.addf %159, %160 : vector<16x1xf32>
      %cst_67 = arith.constant 0.000000e+00 : f32
      %162 = vector.broadcast %cst_67 : f32 to vector<16x1xf32>
      %163 = arith.subf %162, %161 : vector<16x1xf32>
      %164 = math.exp %163 : vector<16x1xf32>
      %cst_68 = arith.constant 1.000000e+00 : f32
      %165 = vector.broadcast %cst_68 : f32 to vector<16x1xf32>
      %166 = arith.addf %165, %164 : vector<16x1xf32>
      %cst_69 = arith.constant 1.000000e+00 : f32
      %167 = vector.broadcast %cst_69 : f32 to vector<16x1xf32>
      %168 = arith.divf %167, %166 : vector<16x1xf32>
      %169 = vector.broadcast %152 : vector<16x1xf32> to vector<16x32xf32>
      %170 = arith.mulf %169, %119 : vector<16x32xf32>
      %171 = vector.broadcast %168 : vector<16x1xf32> to vector<16x32xf32>
      %172 = arith.mulf %171, %136 : vector<16x32xf32>
      %173 = arith.addf %170, %172 : vector<16x32xf32>
      %cst_70 = arith.constant 7.500000e-02 : f32
      %174 = vector.broadcast %cst_70 : f32 to vector<16x32xf32>
      %175 = arith.mulf %174, %92 : vector<16x32xf32>
      %cst_71 = arith.constant 2.250000e-01 : f32
      %176 = vector.broadcast %cst_71 : f32 to vector<16x32xf32>
      %177 = arith.mulf %176, %173 : vector<16x32xf32>
      %178 = arith.addf %175, %177 : vector<16x32xf32>
      %cst_72 = arith.constant 2.500000e-01 : f32
      %179 = vector.broadcast %cst_72 : f32 to vector<16x32xf32>
      %180 = arith.mulf %179, %178 : vector<16x32xf32>
      %181 = arith.addf %arg18, %180 : vector<16x32xf32>
      %182 = arith.truncf %181 : vector<16x32xf32> to vector<16x32xbf16>
      %cst_73 = arith.constant dense<0.000000e+00> : vector<16x64xf32>
      %183 = tpu.matmul %182, %0, %cst_73 {dimension_numbers = #tpu.dot_dimension_numbers<[1], [0], [0], [1], [0, 0, 1, 1], [], []>} : vector<16x32xbf16>, vector<32x64xbf16>, vector<16x64xf32> -> vector<16x64xf32>
      %184 = vector.broadcast %1 : vector<1x64xf32> to vector<16x64xf32>
      %185 = arith.addf %183, %184 : vector<16x64xf32>
      %cst_74 = arith.constant 5.000000e-01 : f32
      %186 = vector.broadcast %cst_74 : f32 to vector<16x64xf32>
      %187 = arith.mulf %186, %185 : vector<16x64xf32>
      %cst_75 = arith.constant 4.471500e-02 : f32
      %188 = vector.broadcast %cst_75 : f32 to vector<16x64xf32>
      %189 = arith.mulf %188, %185 : vector<16x64xf32>
      %190 = arith.mulf %189, %185 : vector<16x64xf32>
      %191 = arith.mulf %190, %185 : vector<16x64xf32>
      %192 = arith.addf %185, %191 : vector<16x64xf32>
      %cst_76 = arith.constant 0.797884583 : f32
      %193 = vector.broadcast %cst_76 : f32 to vector<16x64xf32>
      %194 = arith.mulf %193, %192 : vector<16x64xf32>
      %195 = math.tanh %194 : vector<16x64xf32>
      %cst_77 = arith.constant 1.000000e+00 : f32
      %196 = vector.broadcast %cst_77 : f32 to vector<16x64xf32>
      %197 = arith.addf %196, %195 : vector<16x64xf32>
      %198 = arith.mulf %187, %197 : vector<16x64xf32>
      %199 = arith.truncf %198 : vector<16x64xf32> to vector<16x64xbf16>
      %cst_78 = arith.constant dense<0.000000e+00> : vector<16x32xf32>
      %200 = tpu.matmul %199, %2, %cst_78 {dimension_numbers = #tpu.dot_dimension_numbers<[1], [0], [0], [1], [0, 0, 1, 1], [], []>} : vector<16x64xbf16>, vector<64x32xbf16>, vector<16x32xf32> -> vector<16x32xf32>
      %201 = vector.broadcast %3 : vector<1x32xf32> to vector<16x32xf32>
      %202 = arith.addf %200, %201 : vector<16x32xf32>
      %cst_79 = arith.constant dense<0.000000e+00> : vector<16x16xf32>
      %203 = tpu.matmul %182, %4, %cst_79 {dimension_numbers = #tpu.dot_dimension_numbers<[1], [0], [0], [1], [0, 0, 1, 1], [], []>} : vector<16x32xbf16>, vector<32x16xbf16>, vector<16x16xf32> -> vector<16x16xf32>
      %204 = vector.broadcast %5 : vector<1x16xf32> to vector<16x16xf32>
      %205 = arith.addf %203, %204 : vector<16x16xf32>
      %cst_80 = arith.constant 0.000000e+00 : f32
      %206 = vector.broadcast %cst_80 : f32 to vector<16x16xf32>
      %207 = arith.maximumf %205, %206 : vector<16x16xf32>
      %208 = math.absf %205 : vector<16x16xf32>
      %cst_81 = arith.constant 0.000000e+00 : f32
      %209 = vector.broadcast %cst_81 : f32 to vector<16x16xf32>
      %210 = arith.subf %209, %208 : vector<16x16xf32>
      %211 = math.exp %210 : vector<16x16xf32>
      %cst_82 = arith.constant 1.000000e+00 : f32
      %212 = vector.broadcast %cst_82 : f32 to vector<16x16xf32>
      %213 = arith.addf %212, %211 : vector<16x16xf32>
      %214 = math.log %213 : vector<16x16xf32>
      %215 = arith.addf %207, %214 : vector<16x16xf32>
      %216 = arith.truncf %215 : vector<16x16xf32> to vector<16x16xbf16>
      %cst_83 = arith.constant dense<0.000000e+00> : vector<16x32xf32>
      %217 = tpu.matmul %216, %6, %cst_83 {dimension_numbers = #tpu.dot_dimension_numbers<[1], [0], [0], [1], [0, 0, 1, 1], [], []>} : vector<16x16xbf16>, vector<16x32xbf16>, vector<16x32xf32> -> vector<16x32xf32>
      %218 = vector.broadcast %7 : vector<1x32xf32> to vector<16x32xf32>
      %219 = arith.addf %217, %218 : vector<16x32xf32>
      %220 = vector.broadcast %8 : vector<1x32xf32> to vector<16x32xf32>
      %221 = arith.mulf %202, %220 : vector<16x32xf32>
      %222 = vector.broadcast %9 : vector<1x32xf32> to vector<16x32xf32>
      %223 = arith.mulf %219, %222 : vector<16x32xf32>
      %224 = arith.addf %221, %223 : vector<16x32xf32>
      %cst_84 = arith.constant dense<0.000000e+00> : vector<16xf32>
      %225 = vector.multi_reduction <add>, %224, %cst_84 [1] : vector<16x32xf32> to vector<16xf32>
      %226 = vector.shape_cast %225 : vector<16xf32> to vector<16x1xf32>
      %227 = vector.broadcast %12 : vector<1x1xf32> to vector<16x1xf32>
      %228 = arith.addf %226, %227 : vector<16x1xf32>
      %cst_85 = arith.constant 0.000000e+00 : f32
      %229 = vector.broadcast %cst_85 : f32 to vector<16x1xf32>
      %230 = arith.subf %229, %228 : vector<16x1xf32>
      %231 = math.exp %230 : vector<16x1xf32>
      %cst_86 = arith.constant 1.000000e+00 : f32
      %232 = vector.broadcast %cst_86 : f32 to vector<16x1xf32>
      %233 = arith.addf %232, %231 : vector<16x1xf32>
      %cst_87 = arith.constant 1.000000e+00 : f32
      %234 = vector.broadcast %cst_87 : f32 to vector<16x1xf32>
      %235 = arith.divf %234, %233 : vector<16x1xf32>
      %236 = vector.broadcast %10 : vector<1x32xf32> to vector<16x32xf32>
      %237 = arith.mulf %202, %236 : vector<16x32xf32>
      %238 = vector.broadcast %11 : vector<1x32xf32> to vector<16x32xf32>
      %239 = arith.mulf %219, %238 : vector<16x32xf32>
      %240 = arith.addf %237, %239 : vector<16x32xf32>
      %cst_88 = arith.constant dense<0.000000e+00> : vector<16xf32>
      %241 = vector.multi_reduction <add>, %240, %cst_88 [1] : vector<16x32xf32> to vector<16xf32>
      %242 = vector.shape_cast %241 : vector<16xf32> to vector<16x1xf32>
      %243 = vector.broadcast %13 : vector<1x1xf32> to vector<16x1xf32>
      %244 = arith.addf %242, %243 : vector<16x1xf32>
      %cst_89 = arith.constant 0.000000e+00 : f32
      %245 = vector.broadcast %cst_89 : f32 to vector<16x1xf32>
      %246 = arith.subf %245, %244 : vector<16x1xf32>
      %247 = math.exp %246 : vector<16x1xf32>
      %cst_90 = arith.constant 1.000000e+00 : f32
      %248 = vector.broadcast %cst_90 : f32 to vector<16x1xf32>
      %249 = arith.addf %248, %247 : vector<16x1xf32>
      %cst_91 = arith.constant 1.000000e+00 : f32
      %250 = vector.broadcast %cst_91 : f32 to vector<16x1xf32>
      %251 = arith.divf %250, %249 : vector<16x1xf32>
      %252 = vector.broadcast %235 : vector<16x1xf32> to vector<16x32xf32>
      %253 = arith.mulf %252, %202 : vector<16x32xf32>
      %254 = vector.broadcast %251 : vector<16x1xf32> to vector<16x32xf32>
      %255 = arith.mulf %254, %219 : vector<16x32xf32>
      %256 = arith.addf %253, %255 : vector<16x32xf32>
      %cst_92 = arith.constant 0.112309076 : f32
      %257 = vector.broadcast %cst_92 : f32 to vector<16x32xf32>
      %258 = arith.mulf %257, %256 : vector<16x32xf32>
      %259 = arith.addf %95, %258 : vector<16x32xf32>
      %cst_93 = arith.constant 0.977777779 : f32
      %260 = vector.broadcast %cst_93 : f32 to vector<16x32xf32>
      %261 = arith.mulf %260, %92 : vector<16x32xf32>
      %cst_94 = arith.constant 3.73333335 : f32
      %262 = vector.broadcast %cst_94 : f32 to vector<16x32xf32>
      %263 = arith.mulf %262, %173 : vector<16x32xf32>
      %264 = arith.subf %261, %263 : vector<16x32xf32>
      %cst_95 = arith.constant 3.55555558 : f32
      %265 = vector.broadcast %cst_95 : f32 to vector<16x32xf32>
      %266 = arith.mulf %265, %256 : vector<16x32xf32>
      %267 = arith.addf %264, %266 : vector<16x32xf32>
      %cst_96 = arith.constant 2.500000e-01 : f32
      %268 = vector.broadcast %cst_96 : f32 to vector<16x32xf32>
      %269 = arith.mulf %268, %267 : vector<16x32xf32>
      %270 = arith.addf %arg18, %269 : vector<16x32xf32>
      %271 = arith.truncf %270 : vector<16x32xf32> to vector<16x32xbf16>
      %cst_97 = arith.constant dense<0.000000e+00> : vector<16x64xf32>
      %272 = tpu.matmul %271, %0, %cst_97 {dimension_numbers = #tpu.dot_dimension_numbers<[1], [0], [0], [1], [0, 0, 1, 1], [], []>} : vector<16x32xbf16>, vector<32x64xbf16>, vector<16x64xf32> -> vector<16x64xf32>
      %273 = vector.broadcast %1 : vector<1x64xf32> to vector<16x64xf32>
      %274 = arith.addf %272, %273 : vector<16x64xf32>
      %cst_98 = arith.constant 5.000000e-01 : f32
      %275 = vector.broadcast %cst_98 : f32 to vector<16x64xf32>
      %276 = arith.mulf %275, %274 : vector<16x64xf32>
      %cst_99 = arith.constant 4.471500e-02 : f32
      %277 = vector.broadcast %cst_99 : f32 to vector<16x64xf32>
      %278 = arith.mulf %277, %274 : vector<16x64xf32>
      %279 = arith.mulf %278, %274 : vector<16x64xf32>
      %280 = arith.mulf %279, %274 : vector<16x64xf32>
      %281 = arith.addf %274, %280 : vector<16x64xf32>
      %cst_100 = arith.constant 0.797884583 : f32
      %282 = vector.broadcast %cst_100 : f32 to vector<16x64xf32>
      %283 = arith.mulf %282, %281 : vector<16x64xf32>
      %284 = math.tanh %283 : vector<16x64xf32>
      %cst_101 = arith.constant 1.000000e+00 : f32
      %285 = vector.broadcast %cst_101 : f32 to vector<16x64xf32>
      %286 = arith.addf %285, %284 : vector<16x64xf32>
      %287 = arith.mulf %276, %286 : vector<16x64xf32>
      %288 = arith.truncf %287 : vector<16x64xf32> to vector<16x64xbf16>
      %cst_102 = arith.constant dense<0.000000e+00> : vector<16x32xf32>
      %289 = tpu.matmul %288, %2, %cst_102 {dimension_numbers = #tpu.dot_dimension_numbers<[1], [0], [0], [1], [0, 0, 1, 1], [], []>} : vector<16x64xbf16>, vector<64x32xbf16>, vector<16x32xf32> -> vector<16x32xf32>
      %290 = vector.broadcast %3 : vector<1x32xf32> to vector<16x32xf32>
      %291 = arith.addf %289, %290 : vector<16x32xf32>
      %cst_103 = arith.constant dense<0.000000e+00> : vector<16x16xf32>
      %292 = tpu.matmul %271, %4, %cst_103 {dimension_numbers = #tpu.dot_dimension_numbers<[1], [0], [0], [1], [0, 0, 1, 1], [], []>} : vector<16x32xbf16>, vector<32x16xbf16>, vector<16x16xf32> -> vector<16x16xf32>
      %293 = vector.broadcast %5 : vector<1x16xf32> to vector<16x16xf32>
      %294 = arith.addf %292, %293 : vector<16x16xf32>
      %cst_104 = arith.constant 0.000000e+00 : f32
      %295 = vector.broadcast %cst_104 : f32 to vector<16x16xf32>
      %296 = arith.maximumf %294, %295 : vector<16x16xf32>
      %297 = math.absf %294 : vector<16x16xf32>
      %cst_105 = arith.constant 0.000000e+00 : f32
      %298 = vector.broadcast %cst_105 : f32 to vector<16x16xf32>
      %299 = arith.subf %298, %297 : vector<16x16xf32>
      %300 = math.exp %299 : vector<16x16xf32>
      %cst_106 = arith.constant 1.000000e+00 : f32
      %301 = vector.broadcast %cst_106 : f32 to vector<16x16xf32>
      %302 = arith.addf %301, %300 : vector<16x16xf32>
      %303 = math.log %302 : vector<16x16xf32>
      %304 = arith.addf %296, %303 : vector<16x16xf32>
      %305 = arith.truncf %304 : vector<16x16xf32> to vector<16x16xbf16>
      %cst_107 = arith.constant dense<0.000000e+00> : vector<16x32xf32>
      %306 = tpu.matmul %305, %6, %cst_107 {dimension_numbers = #tpu.dot_dimension_numbers<[1], [0], [0], [1], [0, 0, 1, 1], [], []>} : vector<16x16xbf16>, vector<16x32xbf16>, vector<16x32xf32> -> vector<16x32xf32>
      %307 = vector.broadcast %7 : vector<1x32xf32> to vector<16x32xf32>
      %308 = arith.addf %306, %307 : vector<16x32xf32>
      %309 = vector.broadcast %8 : vector<1x32xf32> to vector<16x32xf32>
      %310 = arith.mulf %291, %309 : vector<16x32xf32>
      %311 = vector.broadcast %9 : vector<1x32xf32> to vector<16x32xf32>
      %312 = arith.mulf %308, %311 : vector<16x32xf32>
      %313 = arith.addf %310, %312 : vector<16x32xf32>
      %cst_108 = arith.constant dense<0.000000e+00> : vector<16xf32>
      %314 = vector.multi_reduction <add>, %313, %cst_108 [1] : vector<16x32xf32> to vector<16xf32>
      %315 = vector.shape_cast %314 : vector<16xf32> to vector<16x1xf32>
      %316 = vector.broadcast %12 : vector<1x1xf32> to vector<16x1xf32>
      %317 = arith.addf %315, %316 : vector<16x1xf32>
      %cst_109 = arith.constant 0.000000e+00 : f32
      %318 = vector.broadcast %cst_109 : f32 to vector<16x1xf32>
      %319 = arith.subf %318, %317 : vector<16x1xf32>
      %320 = math.exp %319 : vector<16x1xf32>
      %cst_110 = arith.constant 1.000000e+00 : f32
      %321 = vector.broadcast %cst_110 : f32 to vector<16x1xf32>
      %322 = arith.addf %321, %320 : vector<16x1xf32>
      %cst_111 = arith.constant 1.000000e+00 : f32
      %323 = vector.broadcast %cst_111 : f32 to vector<16x1xf32>
      %324 = arith.divf %323, %322 : vector<16x1xf32>
      %325 = vector.broadcast %10 : vector<1x32xf32> to vector<16x32xf32>
      %326 = arith.mulf %291, %325 : vector<16x32xf32>
      %327 = vector.broadcast %11 : vector<1x32xf32> to vector<16x32xf32>
      %328 = arith.mulf %308, %327 : vector<16x32xf32>
      %329 = arith.addf %326, %328 : vector<16x32xf32>
      %cst_112 = arith.constant dense<0.000000e+00> : vector<16xf32>
      %330 = vector.multi_reduction <add>, %329, %cst_112 [1] : vector<16x32xf32> to vector<16xf32>
      %331 = vector.shape_cast %330 : vector<16xf32> to vector<16x1xf32>
      %332 = vector.broadcast %13 : vector<1x1xf32> to vector<16x1xf32>
      %333 = arith.addf %331, %332 : vector<16x1xf32>
      %cst_113 = arith.constant 0.000000e+00 : f32
      %334 = vector.broadcast %cst_113 : f32 to vector<16x1xf32>
      %335 = arith.subf %334, %333 : vector<16x1xf32>
      %336 = math.exp %335 : vector<16x1xf32>
      %cst_114 = arith.constant 1.000000e+00 : f32
      %337 = vector.broadcast %cst_114 : f32 to vector<16x1xf32>
      %338 = arith.addf %337, %336 : vector<16x1xf32>
      %cst_115 = arith.constant 1.000000e+00 : f32
      %339 = vector.broadcast %cst_115 : f32 to vector<16x1xf32>
      %340 = arith.divf %339, %338 : vector<16x1xf32>
      %341 = vector.broadcast %324 : vector<16x1xf32> to vector<16x32xf32>
      %342 = arith.mulf %341, %291 : vector<16x32xf32>
      %343 = vector.broadcast %340 : vector<16x1xf32> to vector<16x32xf32>
      %344 = arith.mulf %343, %308 : vector<16x32xf32>
      %345 = arith.addf %342, %344 : vector<16x32xf32>
      %cst_116 = arith.constant 0.162760422 : f32
      %346 = vector.broadcast %cst_116 : f32 to vector<16x32xf32>
      %347 = arith.mulf %346, %345 : vector<16x32xf32>
      %348 = arith.addf %259, %347 : vector<16x32xf32>
      %cst_117 = arith.constant 2.95259857 : f32
      %349 = vector.broadcast %cst_117 : f32 to vector<16x32xf32>
      %350 = arith.mulf %349, %92 : vector<16x32xf32>
      %cst_118 = arith.constant 11.5957937 : f32
      %351 = vector.broadcast %cst_118 : f32 to vector<16x32xf32>
      %352 = arith.mulf %351, %173 : vector<16x32xf32>
      %353 = arith.subf %350, %352 : vector<16x32xf32>
      %cst_119 = arith.constant 9.82289314 : f32
      %354 = vector.broadcast %cst_119 : f32 to vector<16x32xf32>
      %355 = arith.mulf %354, %256 : vector<16x32xf32>
      %356 = arith.addf %353, %355 : vector<16x32xf32>
      %cst_120 = arith.constant 0.290809333 : f32
      %357 = vector.broadcast %cst_120 : f32 to vector<16x32xf32>
      %358 = arith.mulf %357, %345 : vector<16x32xf32>
      %359 = arith.subf %356, %358 : vector<16x32xf32>
      %cst_121 = arith.constant 2.500000e-01 : f32
      %360 = vector.broadcast %cst_121 : f32 to vector<16x32xf32>
      %361 = arith.mulf %360, %359 : vector<16x32xf32>
      %362 = arith.addf %arg18, %361 : vector<16x32xf32>
      %363 = arith.truncf %362 : vector<16x32xf32> to vector<16x32xbf16>
      %cst_122 = arith.constant dense<0.000000e+00> : vector<16x64xf32>
      %364 = tpu.matmul %363, %0, %cst_122 {dimension_numbers = #tpu.dot_dimension_numbers<[1], [0], [0], [1], [0, 0, 1, 1], [], []>} : vector<16x32xbf16>, vector<32x64xbf16>, vector<16x64xf32> -> vector<16x64xf32>
      %365 = vector.broadcast %1 : vector<1x64xf32> to vector<16x64xf32>
      %366 = arith.addf %364, %365 : vector<16x64xf32>
      %cst_123 = arith.constant 5.000000e-01 : f32
      %367 = vector.broadcast %cst_123 : f32 to vector<16x64xf32>
      %368 = arith.mulf %367, %366 : vector<16x64xf32>
      %cst_124 = arith.constant 4.471500e-02 : f32
      %369 = vector.broadcast %cst_124 : f32 to vector<16x64xf32>
      %370 = arith.mulf %369, %366 : vector<16x64xf32>
      %371 = arith.mulf %370, %366 : vector<16x64xf32>
      %372 = arith.mulf %371, %366 : vector<16x64xf32>
      %373 = arith.addf %366, %372 : vector<16x64xf32>
      %cst_125 = arith.constant 0.797884583 : f32
      %374 = vector.broadcast %cst_125 : f32 to vector<16x64xf32>
      %375 = arith.mulf %374, %373 : vector<16x64xf32>
      %376 = math.tanh %375 : vector<16x64xf32>
      %cst_126 = arith.constant 1.000000e+00 : f32
      %377 = vector.broadcast %cst_126 : f32 to vector<16x64xf32>
      %378 = arith.addf %377, %376 : vector<16x64xf32>
      %379 = arith.mulf %368, %378 : vector<16x64xf32>
      %380 = arith.truncf %379 : vector<16x64xf32> to vector<16x64xbf16>
      %cst_127 = arith.constant dense<0.000000e+00> : vector<16x32xf32>
      %381 = tpu.matmul %380, %2, %cst_127 {dimension_numbers = #tpu.dot_dimension_numbers<[1], [0], [0], [1], [0, 0, 1, 1], [], []>} : vector<16x64xbf16>, vector<64x32xbf16>, vector<16x32xf32> -> vector<16x32xf32>
      %382 = vector.broadcast %3 : vector<1x32xf32> to vector<16x32xf32>
      %383 = arith.addf %381, %382 : vector<16x32xf32>
      %cst_128 = arith.constant dense<0.000000e+00> : vector<16x16xf32>
      %384 = tpu.matmul %363, %4, %cst_128 {dimension_numbers = #tpu.dot_dimension_numbers<[1], [0], [0], [1], [0, 0, 1, 1], [], []>} : vector<16x32xbf16>, vector<32x16xbf16>, vector<16x16xf32> -> vector<16x16xf32>
      %385 = vector.broadcast %5 : vector<1x16xf32> to vector<16x16xf32>
      %386 = arith.addf %384, %385 : vector<16x16xf32>
      %cst_129 = arith.constant 0.000000e+00 : f32
      %387 = vector.broadcast %cst_129 : f32 to vector<16x16xf32>
      %388 = arith.maximumf %386, %387 : vector<16x16xf32>
      %389 = math.absf %386 : vector<16x16xf32>
      %cst_130 = arith.constant 0.000000e+00 : f32
      %390 = vector.broadcast %cst_130 : f32 to vector<16x16xf32>
      %391 = arith.subf %390, %389 : vector<16x16xf32>
      %392 = math.exp %391 : vector<16x16xf32>
      %cst_131 = arith.constant 1.000000e+00 : f32
      %393 = vector.broadcast %cst_131 : f32 to vector<16x16xf32>
      %394 = arith.addf %393, %392 : vector<16x16xf32>
      %395 = math.log %394 : vector<16x16xf32>
      %396 = arith.addf %388, %395 : vector<16x16xf32>
      %397 = arith.truncf %396 : vector<16x16xf32> to vector<16x16xbf16>
      %cst_132 = arith.constant dense<0.000000e+00> : vector<16x32xf32>
      %398 = tpu.matmul %397, %6, %cst_132 {dimension_numbers = #tpu.dot_dimension_numbers<[1], [0], [0], [1], [0, 0, 1, 1], [], []>} : vector<16x16xbf16>, vector<16x32xbf16>, vector<16x32xf32> -> vector<16x32xf32>
      %399 = vector.broadcast %7 : vector<1x32xf32> to vector<16x32xf32>
      %400 = arith.addf %398, %399 : vector<16x32xf32>
      %401 = vector.broadcast %8 : vector<1x32xf32> to vector<16x32xf32>
      %402 = arith.mulf %383, %401 : vector<16x32xf32>
      %403 = vector.broadcast %9 : vector<1x32xf32> to vector<16x32xf32>
      %404 = arith.mulf %400, %403 : vector<16x32xf32>
      %405 = arith.addf %402, %404 : vector<16x32xf32>
      %cst_133 = arith.constant dense<0.000000e+00> : vector<16xf32>
      %406 = vector.multi_reduction <add>, %405, %cst_133 [1] : vector<16x32xf32> to vector<16xf32>
      %407 = vector.shape_cast %406 : vector<16xf32> to vector<16x1xf32>
      %408 = vector.broadcast %12 : vector<1x1xf32> to vector<16x1xf32>
      %409 = arith.addf %407, %408 : vector<16x1xf32>
      %cst_134 = arith.constant 0.000000e+00 : f32
      %410 = vector.broadcast %cst_134 : f32 to vector<16x1xf32>
      %411 = arith.subf %410, %409 : vector<16x1xf32>
      %412 = math.exp %411 : vector<16x1xf32>
      %cst_135 = arith.constant 1.000000e+00 : f32
      %413 = vector.broadcast %cst_135 : f32 to vector<16x1xf32>
      %414 = arith.addf %413, %412 : vector<16x1xf32>
      %cst_136 = arith.constant 1.000000e+00 : f32
      %415 = vector.broadcast %cst_136 : f32 to vector<16x1xf32>
      %416 = arith.divf %415, %414 : vector<16x1xf32>
      %417 = vector.broadcast %10 : vector<1x32xf32> to vector<16x32xf32>
      %418 = arith.mulf %383, %417 : vector<16x32xf32>
      %419 = vector.broadcast %11 : vector<1x32xf32> to vector<16x32xf32>
      %420 = arith.mulf %400, %419 : vector<16x32xf32>
      %421 = arith.addf %418, %420 : vector<16x32xf32>
      %cst_137 = arith.constant dense<0.000000e+00> : vector<16xf32>
      %422 = vector.multi_reduction <add>, %421, %cst_137 [1] : vector<16x32xf32> to vector<16xf32>
      %423 = vector.shape_cast %422 : vector<16xf32> to vector<16x1xf32>
      %424 = vector.broadcast %13 : vector<1x1xf32> to vector<16x1xf32>
      %425 = arith.addf %423, %424 : vector<16x1xf32>
      %cst_138 = arith.constant 0.000000e+00 : f32
      %426 = vector.broadcast %cst_138 : f32 to vector<16x1xf32>
      %427 = arith.subf %426, %425 : vector<16x1xf32>
      %428 = math.exp %427 : vector<16x1xf32>
      %cst_139 = arith.constant 1.000000e+00 : f32
      %429 = vector.broadcast %cst_139 : f32 to vector<16x1xf32>
      %430 = arith.addf %429, %428 : vector<16x1xf32>
      %cst_140 = arith.constant 1.000000e+00 : f32
      %431 = vector.broadcast %cst_140 : f32 to vector<16x1xf32>
      %432 = arith.divf %431, %430 : vector<16x1xf32>
      %433 = vector.broadcast %416 : vector<16x1xf32> to vector<16x32xf32>
      %434 = arith.mulf %433, %383 : vector<16x32xf32>
      %435 = vector.broadcast %432 : vector<16x1xf32> to vector<16x32xf32>
      %436 = arith.mulf %435, %400 : vector<16x32xf32>
      %437 = arith.addf %434, %436 : vector<16x32xf32>
      %cst_141 = arith.constant 0.0805940479 : f32
      %438 = vector.broadcast %cst_141 : f32 to vector<16x32xf32>
      %439 = arith.mulf %438, %437 : vector<16x32xf32>
      %440 = arith.subf %348, %439 : vector<16x32xf32>
      %cst_142 = arith.constant 2.84627533 : f32
      %441 = vector.broadcast %cst_142 : f32 to vector<16x32xf32>
      %442 = arith.mulf %441, %92 : vector<16x32xf32>
      %cst_143 = arith.constant 10.757576 : f32
      %443 = vector.broadcast %cst_143 : f32 to vector<16x32xf32>
      %444 = arith.mulf %443, %173 : vector<16x32xf32>
      %445 = arith.subf %442, %444 : vector<16x32xf32>
      %cst_144 = arith.constant 8.90642261 : f32
      %446 = vector.broadcast %cst_144 : f32 to vector<16x32xf32>
      %447 = arith.mulf %446, %256 : vector<16x32xf32>
      %448 = arith.addf %445, %447 : vector<16x32xf32>
      %cst_145 = arith.constant 0.278409094 : f32
      %449 = vector.broadcast %cst_145 : f32 to vector<16x32xf32>
      %450 = arith.mulf %449, %345 : vector<16x32xf32>
      %451 = arith.addf %448, %450 : vector<16x32xf32>
      %cst_146 = arith.constant 0.273531318 : f32
      %452 = vector.broadcast %cst_146 : f32 to vector<16x32xf32>
      %453 = arith.mulf %452, %437 : vector<16x32xf32>
      %454 = arith.subf %451, %453 : vector<16x32xf32>
      %cst_147 = arith.constant 2.500000e-01 : f32
      %455 = vector.broadcast %cst_147 : f32 to vector<16x32xf32>
      %456 = arith.mulf %455, %454 : vector<16x32xf32>
      %457 = arith.addf %arg18, %456 : vector<16x32xf32>
      %458 = arith.truncf %457 : vector<16x32xf32> to vector<16x32xbf16>
      %cst_148 = arith.constant dense<0.000000e+00> : vector<16x64xf32>
      %459 = tpu.matmul %458, %0, %cst_148 {dimension_numbers = #tpu.dot_dimension_numbers<[1], [0], [0], [1], [0, 0, 1, 1], [], []>} : vector<16x32xbf16>, vector<32x64xbf16>, vector<16x64xf32> -> vector<16x64xf32>
      %460 = vector.broadcast %1 : vector<1x64xf32> to vector<16x64xf32>
      %461 = arith.addf %459, %460 : vector<16x64xf32>
      %cst_149 = arith.constant 5.000000e-01 : f32
      %462 = vector.broadcast %cst_149 : f32 to vector<16x64xf32>
      %463 = arith.mulf %462, %461 : vector<16x64xf32>
      %cst_150 = arith.constant 4.471500e-02 : f32
      %464 = vector.broadcast %cst_150 : f32 to vector<16x64xf32>
      %465 = arith.mulf %464, %461 : vector<16x64xf32>
      %466 = arith.mulf %465, %461 : vector<16x64xf32>
      %467 = arith.mulf %466, %461 : vector<16x64xf32>
      %468 = arith.addf %461, %467 : vector<16x64xf32>
      %cst_151 = arith.constant 0.797884583 : f32
      %469 = vector.broadcast %cst_151 : f32 to vector<16x64xf32>
      %470 = arith.mulf %469, %468 : vector<16x64xf32>
      %471 = math.tanh %470 : vector<16x64xf32>
      %cst_152 = arith.constant 1.000000e+00 : f32
      %472 = vector.broadcast %cst_152 : f32 to vector<16x64xf32>
      %473 = arith.addf %472, %471 : vector<16x64xf32>
      %474 = arith.mulf %463, %473 : vector<16x64xf32>
      %475 = arith.truncf %474 : vector<16x64xf32> to vector<16x64xbf16>
      %cst_153 = arith.constant dense<0.000000e+00> : vector<16x32xf32>
      %476 = tpu.matmul %475, %2, %cst_153 {dimension_numbers = #tpu.dot_dimension_numbers<[1], [0], [0], [1], [0, 0, 1, 1], [], []>} : vector<16x64xbf16>, vector<64x32xbf16>, vector<16x32xf32> -> vector<16x32xf32>
      %477 = vector.broadcast %3 : vector<1x32xf32> to vector<16x32xf32>
      %478 = arith.addf %476, %477 : vector<16x32xf32>
      %cst_154 = arith.constant dense<0.000000e+00> : vector<16x16xf32>
      %479 = tpu.matmul %458, %4, %cst_154 {dimension_numbers = #tpu.dot_dimension_numbers<[1], [0], [0], [1], [0, 0, 1, 1], [], []>} : vector<16x32xbf16>, vector<32x16xbf16>, vector<16x16xf32> -> vector<16x16xf32>
      %480 = vector.broadcast %5 : vector<1x16xf32> to vector<16x16xf32>
      %481 = arith.addf %479, %480 : vector<16x16xf32>
      %cst_155 = arith.constant 0.000000e+00 : f32
      %482 = vector.broadcast %cst_155 : f32 to vector<16x16xf32>
      %483 = arith.maximumf %481, %482 : vector<16x16xf32>
      %484 = math.absf %481 : vector<16x16xf32>
      %cst_156 = arith.constant 0.000000e+00 : f32
      %485 = vector.broadcast %cst_156 : f32 to vector<16x16xf32>
      %486 = arith.subf %485, %484 : vector<16x16xf32>
      %487 = math.exp %486 : vector<16x16xf32>
      %cst_157 = arith.constant 1.000000e+00 : f32
      %488 = vector.broadcast %cst_157 : f32 to vector<16x16xf32>
      %489 = arith.addf %488, %487 : vector<16x16xf32>
      %490 = math.log %489 : vector<16x16xf32>
      %491 = arith.addf %483, %490 : vector<16x16xf32>
      %492 = arith.truncf %491 : vector<16x16xf32> to vector<16x16xbf16>
      %cst_158 = arith.constant dense<0.000000e+00> : vector<16x32xf32>
      %493 = tpu.matmul %492, %6, %cst_158 {dimension_numbers = #tpu.dot_dimension_numbers<[1], [0], [0], [1], [0, 0, 1, 1], [], []>} : vector<16x16xbf16>, vector<16x32xbf16>, vector<16x32xf32> -> vector<16x32xf32>
      %494 = vector.broadcast %7 : vector<1x32xf32> to vector<16x32xf32>
      %495 = arith.addf %493, %494 : vector<16x32xf32>
      %496 = vector.broadcast %8 : vector<1x32xf32> to vector<16x32xf32>
      %497 = arith.mulf %478, %496 : vector<16x32xf32>
      %498 = vector.broadcast %9 : vector<1x32xf32> to vector<16x32xf32>
      %499 = arith.mulf %495, %498 : vector<16x32xf32>
      %500 = arith.addf %497, %499 : vector<16x32xf32>
      %cst_159 = arith.constant dense<0.000000e+00> : vector<16xf32>
      %501 = vector.multi_reduction <add>, %500, %cst_159 [1] : vector<16x32xf32> to vector<16xf32>
      %502 = vector.shape_cast %501 : vector<16xf32> to vector<16x1xf32>
      %503 = vector.broadcast %12 : vector<1x1xf32> to vector<16x1xf32>
      %504 = arith.addf %502, %503 : vector<16x1xf32>
      %cst_160 = arith.constant 0.000000e+00 : f32
      %505 = vector.broadcast %cst_160 : f32 to vector<16x1xf32>
      %506 = arith.subf %505, %504 : vector<16x1xf32>
      %507 = math.exp %506 : vector<16x1xf32>
      %cst_161 = arith.constant 1.000000e+00 : f32
      %508 = vector.broadcast %cst_161 : f32 to vector<16x1xf32>
      %509 = arith.addf %508, %507 : vector<16x1xf32>
      %cst_162 = arith.constant 1.000000e+00 : f32
      %510 = vector.broadcast %cst_162 : f32 to vector<16x1xf32>
      %511 = arith.divf %510, %509 : vector<16x1xf32>
      %512 = vector.broadcast %10 : vector<1x32xf32> to vector<16x32xf32>
      %513 = arith.mulf %478, %512 : vector<16x32xf32>
      %514 = vector.broadcast %11 : vector<1x32xf32> to vector<16x32xf32>
      %515 = arith.mulf %495, %514 : vector<16x32xf32>
      %516 = arith.addf %513, %515 : vector<16x32xf32>
      %cst_163 = arith.constant dense<0.000000e+00> : vector<16xf32>
      %517 = vector.multi_reduction <add>, %516, %cst_163 [1] : vector<16x32xf32> to vector<16xf32>
      %518 = vector.shape_cast %517 : vector<16xf32> to vector<16x1xf32>
      %519 = vector.broadcast %13 : vector<1x1xf32> to vector<16x1xf32>
      %520 = arith.addf %518, %519 : vector<16x1xf32>
      %cst_164 = arith.constant 0.000000e+00 : f32
      %521 = vector.broadcast %cst_164 : f32 to vector<16x1xf32>
      %522 = arith.subf %521, %520 : vector<16x1xf32>
      %523 = math.exp %522 : vector<16x1xf32>
      %cst_165 = arith.constant 1.000000e+00 : f32
      %524 = vector.broadcast %cst_165 : f32 to vector<16x1xf32>
      %525 = arith.addf %524, %523 : vector<16x1xf32>
      %cst_166 = arith.constant 1.000000e+00 : f32
      %526 = vector.broadcast %cst_166 : f32 to vector<16x1xf32>
      %527 = arith.divf %526, %525 : vector<16x1xf32>
      %528 = vector.broadcast %511 : vector<16x1xf32> to vector<16x32xf32>
      %529 = arith.mulf %528, %478 : vector<16x32xf32>
      %530 = vector.broadcast %527 : vector<16x1xf32> to vector<16x32xf32>
      %531 = arith.mulf %530, %495 : vector<16x32xf32>
      %532 = arith.addf %529, %531 : vector<16x32xf32>
      %cst_167 = arith.constant 0.032738097 : f32
      %533 = vector.broadcast %cst_167 : f32 to vector<16x32xf32>
      %534 = arith.mulf %533, %532 : vector<16x32xf32>
      %535 = arith.addf %440, %534 : vector<16x32xf32>
      scf.yield %535 : vector<16x32xf32>
    }
    %c0_29 = arith.constant 0 : index
    %c0_30 = arith.constant 0 : index
    %17 = vector.load %arg16[%c0_29, %c0_30] : memref<16x32xf32, #tpu.memory_space<vmem>>, vector<16x32xf32>
    tpu.vector_store %arg16[%c0_29, %c0_30], %16 {strides = array<i32>} : memref<16x32xf32, #tpu.memory_space<vmem>>, vector<16x32xf32>,
    return
  }
  func.func @transform_0(%arg0: i32) -> (i32, i32) {
    %c0_i32 = arith.constant 0 : i32
    %c0_i32_0 = arith.constant 0 : i32
    return %arg0, %c0_i32 : i32, i32
  }
  func.func @transform_1(%arg0: i32) -> (i32, i32) {
    %c0_i32 = arith.constant 0 : i32
    %c0_i32_0 = arith.constant 0 : i32
    %c0_i32_1 = arith.constant 0 : i32
    return %c0_i32, %c0_i32_0 : i32, i32
  }
  func.func @transform_2(%arg0: i32) -> (i32, i32) {
    %c0_i32 = arith.constant 0 : i32
    %c0_i32_0 = arith.constant 0 : i32
    %c0_i32_1 = arith.constant 0 : i32
    return %c0_i32, %c0_i32_0 : i32, i32
  }
  func.func @transform_3(%arg0: i32) -> (i32, i32) {
    %c0_i32 = arith.constant 0 : i32
    %c0_i32_0 = arith.constant 0 : i32
    %c0_i32_1 = arith.constant 0 : i32
    return %c0_i32, %c0_i32_0 : i32, i32
  }
  func.func @transform_4(%arg0: i32) -> (i32, i32) {
    %c0_i32 = arith.constant 0 : i32
    %c0_i32_0 = arith.constant 0 : i32
    %c0_i32_1 = arith.constant 0 : i32
    return %c0_i32, %c0_i32_0 : i32, i32
  }
  func.func @transform_5(%arg0: i32) -> (i32, i32) {
    %c0_i32 = arith.constant 0 : i32
    %c0_i32_0 = arith.constant 0 : i32
    %c0_i32_1 = arith.constant 0 : i32
    return %c0_i32, %c0_i32_0 : i32, i32
  }
  func.func @transform_6(%arg0: i32) -> (i32, i32) {
    %c0_i32 = arith.constant 0 : i32
    %c0_i32_0 = arith.constant 0 : i32
    %c0_i32_1 = arith.constant 0 : i32
    return %c0_i32, %c0_i32_0 : i32, i32
  }
  func.func @transform_7(%arg0: i32) -> (i32, i32) {
    %c0_i32 = arith.constant 0 : i32
    %c0_i32_0 = arith.constant 0 : i32
    %c0_i32_1 = arith.constant 0 : i32
    return %c0_i32, %c0_i32_0 : i32, i32
  }
  func.func @transform_8(%arg0: i32) -> (i32, i32) {
    %c0_i32 = arith.constant 0 : i32
    %c0_i32_0 = arith.constant 0 : i32
    %c0_i32_1 = arith.constant 0 : i32
    return %c0_i32, %c0_i32_0 : i32, i32
  }
  func.func @transform_9(%arg0: i32) -> (i32, i32) {
    %c0_i32 = arith.constant 0 : i32
    %c0_i32_0 = arith.constant 0 : i32
    %c0_i32_1 = arith.constant 0 : i32
    return %c0_i32, %c0_i32_0 : i32, i32
  }
  func.func @transform_10(%arg0: i32) -> (i32, i32) {
    %c0_i32 = arith.constant 0 : i32
    %c0_i32_0 = arith.constant 0 : i32
    %c0_i32_1 = arith.constant 0 : i32
    return %c0_i32, %c0_i32_0 : i32, i32
  }
  func.func @transform_11(%arg0: i32) -> (i32, i32) {
    %c0_i32 = arith.constant 0 : i32
    %c0_i32_0 = arith.constant 0 : i32
    %c0_i32_1 = arith.constant 0 : i32
    return %c0_i32, %c0_i32_0 : i32, i32
  }
  func.func @transform_12(%arg0: i32) -> (i32, i32) {
    %c0_i32 = arith.constant 0 : i32
    %c0_i32_0 = arith.constant 0 : i32
    %c0_i32_1 = arith.constant 0 : i32
    return %c0_i32, %c0_i32_0 : i32, i32
  }
  func.func @transform_13(%arg0: i32) -> (i32, i32) {
    %c0_i32 = arith.constant 0 : i32
    %c0_i32_0 = arith.constant 0 : i32
    %c0_i32_1 = arith.constant 0 : i32
    return %c0_i32, %c0_i32_0 : i32, i32
  }
  func.func @transform_14(%arg0: i32) -> (i32, i32) {
    %c0_i32 = arith.constant 0 : i32
    %c0_i32_0 = arith.constant 0 : i32
    %c0_i32_1 = arith.constant 0 : i32
    return %c0_i32, %c0_i32_0 : i32, i32
  }
  func.func @transform_15(%arg0: i32) -> (i32, i32) {
    %c0_i32 = arith.constant 0 : i32
    %c0_i32_0 = arith.constant 0 : i32
    return %arg0, %c0_i32 : i32, i32
  }
}

</mosaic_0001>

<bundles_post_ra>
// kernel: stagen_forward.3
= control target key start
LH: loop header
LB: loop body
LE: loop exit
PB: predicated region body
PF: predicated region fallthrough
CT: control target
= control target key end

     0   :  { %v1714_v0 = vmov 0   ;;  %s1715_s27 = smov 32   ;;  %s2860_s0 = inlined_call_operand.<no memory space> [shape: f32[1,1], index: 0, kind: input, shape index: {}]   ;;  %s2861_s6 = inlined_call_operand.vmem [shape: f32[1,32], index: 6, kind: input, shape index: {}]   ;;  %s2862_s3 = inlined_call_operand.vmem [shape: f32[128,1], index: 3, kind: input, shape index: {}]   ;;  %s2863_s4 = inlined_call_operand.vmem [shape: f32[128,1], index: 4, kind: input, shape index: {}]   ;;  %s2864_s2 = inlined_call_operand.vmem [shape: f32[128,32], index: 2, kind: input, shape index: {}]   ;;  %s2865_s5 = inlined_call_operand.vmem [shape: bf16[64,32], index: 5, kind: input, shape index: {}]   ;;  %s2866_s1 = inlined_call_operand.vmem [shape: f32[128,32], index: 1, kind: input, shape index: {}]   ;;  %s2867_s7 = inlined_call_operand.vmem [shape: f32[1,32], index: 7, kind: input, shape index: {}]   ;;  %s2868_s8 = inlined_call_operand.vmem [shape: f32[1,32], index: 8, kind: input, shape index: {}]   ;;  %s2869_s9 = inlined_call_operand.<no memory space> [shape: f32[1,1], index: 9, kind: input, shape index: {}]   ;;  %s2870_s11 = inlined_call_operand.vmem [shape: f32[1,64], index: 11, kind: input, shape index: {}]   ;;  %s2871_s10 = inlined_call_operand.vmem [shape: bf16[32,64], index: 10, kind: input, shape index: {}]   ;;  %s2872_s12 = inlined_call_operand.vmem [shape: bf16[128,64], index: 12, kind: output, shape index: {}]  }
   0x1   :  { %1563 = vset.pattern.permute.xlu1 %v1714_v0  ;;  %1562 = vset.pattern.permute.xlu0 %v1714_v0  ;;  %s46_s23 = sand.u32 2147483647, %s2860_s0  ;;  %v56_v3 = vld [vmem:[%s2862_s3 + $0x40] sm:$0xff]  ;;  %v50_v9 = vld [vmem:[%s2862_s3 + $0x10] sm:$0xff]  ;;  %v57_v11 = vld [vmem:[%s2862_s3 + $0x48] sm:$0xff] }
   0x2   :  { %s47_s24 = sadd.f32 1e-09, %s46_s23  ;;  %1564 = vset.pattern.permute.xlu2 %v1714_v0  ;;  %v72_v4 = vld [vmem:[%s2863_s4 + $0x40] sm:$0xff]  ;;  %v66_v10 = vld [vmem:[%s2863_s4 + $0x10] sm:$0xff]  ;;  %v73_v14 = vld [vmem:[%s2863_s4 + $0x48] sm:$0xff] }
   0x3   :  { %v48_v6 = vld [vmem:[%s2862_s3] sm:$0xff]  ;;  %v49_v15 = vld [vmem:[%s2862_s3 + $0x8] sm:$0xff]  ;;  %v51_v17 = vld [vmem:[%s2862_s3 + $0x18] sm:$0xff]  ;;  %v88_v24 = vsub.f32 %v56_v3, %v72_v4  ;;  %v82_v28 = vsub.f32 %v50_v9, %v66_v10  ;;  %v89_v29 = vsub.f32 %v57_v11, %v73_v14 }
   0x4   :  { %v96_v1 = vstv %s47_s24  ;;  %v64_v7 = vld [vmem:[%s2863_s4] sm:$0xff]  ;;  %v65_v16 = vld [vmem:[%s2863_s4 + $0x8] sm:$0xff]  ;;  %v67_v18 = vld [vmem:[%s2863_s4 + $0x18] sm:$0xff] }
   0x5   :  { %1570 = vrcp.f32 %v96_v1  ;;  %v108_v8 = vand.u32 2147483648, %v96_v1  ;;  %vm102_vm0 = vweird.f32 %v96_v1  ;;  %v106_v13 = vand.u32 2147483647, %v96_v1  ;;  %v59_v19 = vld [vmem:[%s2862_s3 + $0x58] sm:$0xff]  ;;  %v58_v22 = vld [vmem:[%s2862_s3 + $0x50] sm:$0xff]  ;;  %v52_v30 = vld [vmem:[%s2862_s3 + $0x20] sm:$0xff] }
   0x6   :  { %v75_v21 = vld [vmem:[%s2863_s4 + $0x58] sm:$0xff]  ;;  %v74_v23 = vld [vmem:[%s2863_s4 + $0x50] sm:$0xff]  ;;  %v80_v26 = vsub.f32 %v48_v6, %v64_v7  ;;  %v68_v31 = vld [vmem:[%s2863_s4 + $0x20] sm:$0xff]  ;;  %v81_v32 = vsub.f32 %v49_v15, %v65_v16  ;;  %v83_v33 = vsub.f32 %v51_v17, %v67_v18 }
   0x7   :  { %v109_v25 = vor.u32 1.1754944e-38, %v108_v8  ;;  %vm107_vm3 = vcmp.eq.f32.partialorder %v106_v13, 8.507059e+37  ;;  %v91_v34 = vsub.f32 %v59_v19, %v75_v21  ;;  %v90_v35 = vsub.f32 %v58_v22, %v74_v23  ;;  %v60_v47 = vld [vmem:[%s2862_s3 + $0x60] sm:$0xff]  ;;  %v53_v61 = vld [vmem:[%s2862_s3 + $0x28] sm:$0xff]  ;;  %v1882_v21 = vld [vmem:[%s2862_s3 + $0x30] sm:$0xff] }
   0x8   :  { %v84_v38 = vsub.f32 %v52_v30, %v68_v31  ;;  %v76_v48 = vld [vmem:[%s2863_s4 + $0x60] sm:$0xff]  ;;  %v69_v62 = vld [vmem:[%s2863_s4 + $0x28] sm:$0xff]  ;;  %v1887_v22 = vld [vmem:[%s2863_s4 + $0x30] sm:$0xff] }
   0x9   :  { %v92_v58 = vsub.f32 %v60_v47, %v76_v48  ;;  %v85_v4 = vsub.f32 %v53_v61, %v69_v62  ;;  %v77_v6 = vld [vmem:[%s2863_s4 + $0x68] sm:$0xff] }
   0xb   :  { %v1571_v2 = vpop.eup %1570 }
   0xc   :  { %v98_v5 = vmul.f32 %v1571_v2, %v96_v1  ;;  %vm103_vm1 = vweird.f32 %v1571_v2 }
   0xd   :  { %vm104_vm2 = vmor %vm102_vm0, %vm103_vm1 }
   0xe   :  { %v99_v12 = vsub.f32 1.0, %v98_v5  ;;  %v61_v5 = vld [vmem:[%s2862_s3 + $0x68] sm:$0xff] }
   0xf   :  { %v93_v10 = vsub.f32 %v61_v5, %v77_v6 }
  0x10   :  { %v100_v20 = vmul.f32 %v1571_v2, %v99_v12 }
  0x12   :  { %v101_v27 = vadd.f32 %v1571_v2, %v100_v20 }
  0x14   :  { %v105_v36 = vsel %vm104_vm2, %v1571_v2, %v101_v27 }
  0x15   :  { %v1838_v37 = vsel %vm107_vm3, %v109_v25, %v105_v36 }
  0x16   :  { %v119_v39 = vmul.f32 %v1838_v37, %v88_v24  ;;  %v111_v40 = vmul.f32 %v1838_v37, %v80_v26  ;;  %v113_v41 = vmul.f32 %v1838_v37, %v82_v28  ;;  %v120_v42 = vmul.f32 %v1838_v37, %v89_v29 }
  0x17   :  { %v112_v43 = vmul.f32 %v1838_v37, %v81_v32  ;;  %v114_v44 = vmul.f32 %v1838_v37, %v83_v33  ;;  %v122_v45 = vmul.f32 %v1838_v37, %v91_v34  ;;  %v121_v46 = vmul.f32 %v1838_v37, %v90_v35 }
  0x18   :  { %v135_v49 = vsub.f32 0.0, %v119_v39  ;;  %v127_v50 = vsub.f32 0.0, %v111_v40  ;;  %v129_v51 = vsub.f32 0.0, %v113_v41  ;;  %v136_v52 = vsub.f32 0.0, %v120_v42 }
  0x19   :  { %v128_v53 = vsub.f32 0.0, %v112_v43  ;;  %v130_v54 = vsub.f32 0.0, %v114_v44  ;;  %v138_v60 = vsub.f32 0.0, %v122_v45  ;;  %v137_v0 = vsub.f32 0.0, %v121_v46 }
  0x1a   :  { %v159_v55 = vmul.f32 1.442695, %v135_v49  ;;  %v143_v56 = vmul.f32 1.442695, %v127_v50  ;;  %v147_v57 = vmul.f32 1.442695, %v129_v51  ;;  %v115_v1 = vmul.f32 %v1838_v37, %v84_v38 }
  0x1b   :  { %v161_v59 = vmul.f32 1.442695, %v136_v52  ;;  %v145_v63 = vmul.f32 1.442695, %v128_v53  ;;  %v149_v2 = vmul.f32 1.442695, %v130_v54  ;;  %v123_v3 = vmul.f32 %v1838_v37, %v92_v58 }
  0x1c   :  { %1572 = vpow2.f32 %v159_v55  ;;  %v165_v7 = vmul.f32 1.442695, %v138_v60  ;;  %v163_v8 = vmul.f32 1.442695, %v137_v0  ;;  %v131_v9 = vsub.f32 0.0, %v115_v1 }
  0x1d   :  { %1574 = vpow2.f32 %v143_v56  ;;  %v139_v12 = vsub.f32 0.0, %v123_v3  ;;  %v1869_v13 = vmul.f32 %v1838_v37, %v85_v4  ;;  %v1877_v20 = vmul.f32 %v1838_v37, %v93_v10 }
  0x1e   :  { %1576 = vpow2.f32 %v147_v57  ;;  %v151_v18 = vmul.f32 1.442695, %v131_v9  ;;  %v86_v34 = vsub.f32 %v1882_v21, %v1887_v22 }
  0x1f   :  { %1578 = vpow2.f32 %v161_v59  ;;  %v1891_v25 = vmul.f32 1.442695, %v139_v12  ;;  %v132_v26 = vsub.f32 0.0, %v1869_v13  ;;  %v140_v36 = vsub.f32 0.0, %v1877_v20 }
  0x20   :  { %1580 = vpow2.f32 %v145_v63 }
  0x21   :  { %1582 = vpow2.f32 %v149_v2  ;;  %v169_v13 = vmul.f32 1.442695, %v140_v36  ;;  %v55_v36 = vld [vmem:[%s2862_s3 + $0x38] sm:$0xff] }
  0x22   :  { %v1573_v11 = vpop.eup %1572  ;;  %1584 = vpow2.f32 %v165_v7 }
  0x23   :  { %v1575_v14 = vpop.eup %1574  ;;  %v1871_v15 = vadd.f32 1.0, %v1573_v11  ;;  %1586 = vpow2.f32 %v163_v8 }
  0x24   :  { %v1577_v16 = vpop.eup %1576  ;;  %v1873_v17 = vadd.f32 1.0, %v1575_v14 }
  0x25   :  { %v1579_v19 = vpop.eup %1578  ;;  %1588 = vrcp.f32 %v1871_v15  ;;  %v320_v24 = vand.u32 2147483647, %v1871_v15  ;;  %v322_v28 = vand.u32 2147483648, %v1871_v15  ;;  %v1896_v30 = vadd.f32 1.0, %v1577_v16 }
  0x26   :  { %v1581_v23 = vpop.eup %1580  ;;  %1590 = vrcp.f32 %v1873_v17  ;;  %v200_v29 = vand.u32 2147483647, %v1873_v17  ;;  %v1898_v31 = vadd.f32 1.0, %v1579_v19  ;;  %v202_v32 = vand.u32 2147483648, %v1873_v17 }
  0x27   :  { %v1583_v27 = vpop.eup %1582  ;;  %v1901_v33 = vadd.f32 1.0, %v1581_v23  ;;  %1592 = vpow2.f32 %v151_v18  ;;  %vm316_vm4 = vweird.f32 %v1871_v15  ;;  %vm196_vm5 = vweird.f32 %v1873_v17 }
  0x28   :  { %v1585_v35 = vpop.eup %1584  ;;  %1594 = vrcp.f32 %v1896_v30  ;;  %vm1909_vm6 = vcmp.eq.f32.partialorder %v320_v24, 8.507059e+37  ;;  %v230_v40 = vand.u32 2147483647, %v1896_v30  ;;  %v232_v41 = vand.u32 2147483648, %v1896_v30 }
  0x29   :  { %v1587_v38 = vpop.eup %1586  ;;  %1596 = vrcp.f32 %v1898_v31  ;;  %v1916_v42 = vadd.f32 1.0, %v1583_v27  ;;  %v323_v44 = vor.u32 1.1754944e-38, %v322_v28  ;;  %vm1918_vm7 = vcmp.eq.f32.partialorder %v200_v29, 8.507059e+37 }
  0x2a   :  { %v337_v46 = vand.u32 2147483648, %v1898_v31  ;;  %1598 = vrcp.f32 %v1901_v33  ;;  %v203_v49 = vor.u32 1.1754944e-38, %v202_v32  ;;  %vm226_vm8 = vweird.f32 %v1896_v30 }
  0x2b   :  { %v1589_v43 = vpop.eup %1588  ;;  %v335_v50 = vand.u32 2147483647, %v1898_v31  ;;  %vm331_vm9 = vweird.f32 %v1898_v31  ;;  %v215_v52 = vand.u32 2147483647, %v1901_v33  ;;  %v217_v53 = vand.u32 2147483648, %v1901_v33 }
  0x2c   :  { %v1591_v47 = vpop.eup %1590  ;;  %v312_v48 = vmul.f32 %v1589_v43, %v1871_v15  ;;  %vm317_vm10 = vweird.f32 %v1589_v43  ;;  %vm1931_vm11 = vcmp.eq.f32.partialorder %v230_v40, 8.507059e+37  ;;  %v233_v57 = vor.u32 1.1754944e-38, %v232_v41 }
  0x2d   :  { %v192_v51 = vmul.f32 %v1591_v47, %v1873_v17  ;;  %v1593_v54 = vpop.eup %1592  ;;  %1600 = vrcp.f32 %v1916_v42  ;;  %vm197_vm12 = vweird.f32 %v1591_v47  ;;  %v338_v60 = vor.u32 1.1754944e-38, %v337_v46  ;;  %vm1947_vm0 = vmor %vm316_vm4, %vm317_vm10 }
  0x2e   :  { %v313_v55 = vsub.f32 1.0, %v312_v48  ;;  %v1595_v58 = vpop.eup %1594  ;;  %vm211_vm13 = vweird.f32 %v1901_v33  ;;  %vm1938_vm14 = vcmp.eq.f32.partialorder %v335_v50, 8.507059e+37  ;;  %vm241_vm15 = vweird.f32 %v1916_v42  ;;  %vm1959_vm3 = vmor %vm196_vm5, %vm197_vm12 }
  0x2f   :  { %v193_v59 = vsub.f32 1.0, %v192_v51  ;;  %v1597_v61 = vpop.eup %1596  ;;  %v222_v63 = vmul.f32 %v1595_v58, %v1896_v30  ;;  %v245_v1 = vand.u32 2147483647, %v1916_v42  ;;  %vm227_vm1 = vweird.f32 %v1595_v58 }
  0x30   :  { %v314_v62 = vmul.f32 %v1589_v43, %v313_v55  ;;  %v1599_v2 = vpop.eup %1598  ;;  %v327_v5 = vmul.f32 %v1597_v61, %v1898_v31  ;;  %vm1952_vm2 = vcmp.eq.f32.partialorder %v215_v52, 8.507059e+37  ;;  %v218_v7 = vor.u32 1.1754944e-38, %v217_v53  ;;  %vm1977_vm5 = vmor %vm226_vm8, %vm227_vm1 }
  0x31   :  { %v194_v4 = vmul.f32 %v1591_v47, %v193_v59  ;;  %v223_v10 = vsub.f32 1.0, %v222_v63  ;;  %vm332_vm4 = vweird.f32 %v1597_v61  ;;  %v207_v11 = vmul.f32 %v1599_v2, %v1901_v33 }
  0x32   :  { %v315_v8 = vadd.f32 %v1589_v43, %v314_v62  ;;  %v328_v14 = vsub.f32 1.0, %v327_v5  ;;  %vm212_vm10 = vweird.f32 %v1599_v2  ;;  %v1964_v15 = vadd.f32 1.0, %v1585_v35  ;;  %v62_v5 = vld [vmem:[%s2862_s3 + $0x70] sm:$0xff] }
  0x33   :  { %v195_v12 = vadd.f32 %v1591_v47, %v194_v4  ;;  %v1601_v16 = vpop.eup %1600  ;;  %v224_v19 = vmul.f32 %v1595_v58, %v223_v10  ;;  %v208_v23 = vsub.f32 1.0, %v207_v11  ;;  %v1968_v17 = vadd.f32 1.0, %v1587_v38  ;;  %vm1995_vm8 = vmor %vm211_vm13, %vm212_vm10  ;;  %v78_v10 = vld [vmem:[%s2863_s4 + $0x70] sm:$0xff]  ;;  %v63_v11 = vld [vmem:[%s2862_s3 + $0x78] sm:$0xff] }
  0x34   :  { %v319_v18 = vsel %vm1947_vm0, %v1589_v43, %v315_v8  ;;  %v329_v29 = vmul.f32 %v1597_v61, %v328_v14  ;;  %v237_v32 = vmul.f32 %v1601_v16, %v1916_v42  ;;  %v247_v40 = vand.u32 2147483648, %v1916_v42 }
  0x35   :  { %v324_v24 = vsel %vm1909_vm6, %v323_v44, %v319_v18  ;;  %v199_v27 = vsel %vm1959_vm3, %v1591_v47, %v195_v12  ;;  %v225_v38 = vadd.f32 %v1595_v58, %v224_v19  ;;  %vm1987_vm6 = vmor %vm331_vm9, %vm332_vm4  ;;  %v209_v30 = vmul.f32 %v1599_v2, %v208_v23  ;;  %v79_v12 = vld [vmem:[%s2863_s4 + $0x78] sm:$0xff] }
  0x36   :  { %505 = vperm.xlu1 %1563, %v324_v24   ;;  %v204_v35 = vsel %vm1918_vm7, %v203_v49, %v199_v27  ;;  %v330_v41 = vadd.f32 %v1597_v61, %v329_v29  ;;  %v238_v44 = vsub.f32 1.0, %v237_v32  ;;  %vm242_vm7 = vweird.f32 %v1601_v16 }
  0x37   :  { %465 = vperm.xlu0 %1562, %v204_v35   ;;  %1602 = vrcp.f32 %v1964_v15  ;;  %v229_v31 = vsel %vm1977_vm5, %v1595_v58, %v225_v38  ;;  %v210_v45 = vadd.f32 %v1599_v2, %v209_v30  ;;  %v365_v46 = vand.u32 2147483647, %v1964_v15  ;;  %vm2014_vm9 = vmor %vm241_vm15, %vm242_vm7 }
  0x38   :  { %v2003_v47 = vadd.f32 1.0, %v1593_v54  ;;  %v234_v48 = vsel %vm1931_vm11, %v233_v57, %v229_v31  ;;  %v334_v33 = vsel %vm1987_vm6, %v1597_v61, %v330_v41  ;;  %v239_v49 = vmul.f32 %v1601_v16, %v238_v44 }
  0x39   :  { %1604 = vrcp.f32 %v1968_v17  ;;  %475 = vperm.xlu2 %1564, %v234_v48   ;;  %v214_v50 = vsel %vm1995_vm8, %v1599_v2, %v210_v45  ;;  %v367_v52 = vand.u32 2147483648, %v1964_v15  ;;  %v153_v53 = vmul.f32 1.442695, %v132_v26 }
  0x3a   :  { %v339_v54 = vsel %vm1938_vm14, %v338_v60, %v334_v33  ;;  %v240_v55 = vadd.f32 %v1601_v16, %v239_v49  ;;  %v248_v56 = vor.u32 1.1754944e-38, %v247_v40  ;;  %v117_v57 = vmul.f32 %v1838_v37, %v86_v34  ;;  %v71_v60 = vld [vmem:[%s2863_s4 + $0x38] sm:$0xff] }
  0x3b   :  { %v219_v42 = vsel %vm1952_vm2, %v218_v7, %v214_v50  ;;  %vm2029_vm11 = vcmp.eq.f32.partialorder %v245_v1, 8.507059e+37  ;;  %1606 = vrcp.f32 %v2003_v47  ;;  %vm361_vm12 = vweird.f32 %v1964_v15 }
  0x3c   :  { %v244_v59 = vsel %vm2014_vm9, %v1601_v16, %v240_v55  ;;  %vm2039_vm13 = vcmp.eq.f32.partialorder %v365_v46, 8.507059e+37  ;;  %1608 = vpow2.f32 %v1891_v25  ;;  %v368_v34 = vor.u32 1.1754944e-38, %v367_v52 }
  0x3d   :  { %v1603_v26 = vpop.eup %1602  ;;  %vm346_vm14 = vweird.f32 %v1968_v17  ;;  %v350_v20 = vand.u32 2147483647, %v1968_v17  ;;  %v249_v25 = vsel %vm2029_vm11, %v248_v56, %v244_v59  ;;  %v352_v62 = vand.u32 2147483648, %v1968_v17 }
  0x3e   :  { %510 = vperm.xlu1 %1563, %v339_v54   ;;  %v357_v22 = vmul.f32 %v1603_v26, %v1964_v15  ;;  %1610 = vpow2.f32 %v153_v53  ;;  %v133_v63 = vsub.f32 0.0, %v117_v57  ;;  %vm362_vm15 = vweird.f32 %v1603_v26 }
  0x3f   :  { %v1605_v61 = vpop.eup %1604  ;;  %470 = vperm.xlu0 %1562, %v219_v42   ;;  %1612 = vpow2.f32 %v169_v13  ;;  %vm256_vm0 = vweird.f32 %v2003_v47  ;;  %v260_v2 = vand.u32 2147483647, %v2003_v47  ;;  %v87_v4 = vsub.f32 %v55_v36, %v71_v60  ;;  %vm2078_vm3 = vmor %vm361_vm12, %vm362_vm15 }
  0x40   :  { %v358_v0 = vsub.f32 1.0, %v357_v22  ;;  %v342_v1 = vmul.f32 %v1605_v61, %v1968_v17  ;;  %v155_v3 = vmul.f32 1.442695, %v133_v63  ;;  %vm347_vm1 = vweird.f32 %v1605_v61 }
  0x41   :  { %v1607_v6 = vpop.eup %1606  ;;  %480 = vperm.xlu2 %1564, %v249_v25   ;;  %vm2062_vm2 = vcmp.eq.f32.partialorder %v350_v20, 8.507059e+37  ;;  %v353_v18 = vor.u32 1.1754944e-38, %v352_v62  ;;  %v262_v23 = vand.u32 2147483648, %v2003_v47  ;;  %v118_v24 = vmul.f32 %v1838_v37, %v87_v4  ;;  %vm2088_vm4 = vmor %vm346_vm14, %vm347_vm1 }
  0x42   :  { %v359_v7 = vmul.f32 %v1603_v26, %v358_v0  ;;  %v343_v8 = vsub.f32 1.0, %v342_v1  ;;  %v1609_v14 = vpop.eup %1608  ;;  %v252_v19 = vmul.f32 %v1607_v6, %v2003_v47  ;;  %1614 = vpow2.f32 %v155_v3 }
  0x43   :  { %v187_v29 = vadd.f32 1.0, %v1609_v14  ;;  %vm257_vm10 = vweird.f32 %v1607_v6  ;;  %v94_v38 = vsub.f32 %v62_v5, %v78_v10  ;;  %v95_v39 = vsub.f32 %v63_v11, %v79_v12  ;;  %v455_v14 = vld [vmem:[%s2864_s2 + $0x40] sm:$0xff] }
  0x44   :  { %v360_v27 = vadd.f32 %v1603_v26, %v359_v7  ;;  %v344_v28 = vmul.f32 %v1605_v61, %v343_v8  ;;  %v1611_v32 = vpop.eup %1610  ;;  %v253_v35 = vsub.f32 1.0, %v252_v19  ;;  %v134_v43 = vsub.f32 0.0, %v118_v24  ;;  %vm2100_vm5 = vmor %vm256_vm0, %vm257_vm10 }
  0x45   :  { %v1613_v30 = vpop.eup %1612  ;;  %1616 = vrcp.f32 %v187_v29  ;;  %v263_v46 = vor.u32 1.1754944e-38, %v262_v23  ;;  %v180_v48 = vadd.f32 1.0, %v1611_v32  ;;  %vm261_vm6 = vcmp.eq.f32.partialorder %v260_v2, 8.507059e+37 }
  0x46   :  { %v364_v40 = vsel %vm2078_vm3, %v1603_v26, %v360_v27  ;;  %v345_v41 = vadd.f32 %v1605_v61, %v344_v28  ;;  %v254_v31 = vmul.f32 %v1607_v6, %v253_v35  ;;  %v2104_v33 = vadd.f32 1.0, %v1613_v30 }
  0x47   :  { %v369_v44 = vsel %vm2039_vm13, %v368_v34, %v364_v40  ;;  %v125_v51 = vmul.f32 %v1838_v37, %v94_v38  ;;  %v380_v53 = vand.u32 2147483647, %v187_v29  ;;  %1618 = vrcp.f32 %v180_v48 }
  0x48   :  { %520 = vperm.xlu1 %1563, %v369_v44   ;;  %v349_v17 = vsel %vm2088_vm4, %v1605_v61, %v345_v41  ;;  %v255_v50 = vadd.f32 %v1607_v6, %v254_v31  ;;  %v1615_v52 = vpop.eup %1614  ;;  %v157_v47 = vmul.f32 1.442695, %v134_v43  ;;  %v126_v54 = vmul.f32 %v1838_v37, %v95_v39 }
  0x49   :  { %v354_v49 = vsel %vm2062_vm2, %v353_v18, %v349_v17  ;;  %1620 = vrcp.f32 %v2104_v33  ;;  %v382_v42 = vand.u32 2147483648, %v187_v29  ;;  %vm376_vm8 = vweird.f32 %v187_v29 }
  0x4a   :  { %515 = vperm.xlu0 %1562, %v354_v49   ;;  %v259_v55 = vsel %vm2100_vm5, %v1607_v6, %v255_v50  ;;  %v2113_v13 = vadd.f32 1.0, %v1615_v52  ;;  %vm2115_vm7 = vcmp.eq.f32.partialorder %v380_v53, 8.507059e+37  ;;  %1622 = vpow2.f32 %v157_v47 }
  0x4b   :  { %v1617_v56 = vpop.eup %1616  ;;  %v264_v57 = vsel %vm261_vm6, %v263_v46, %v259_v55  ;;  %v141_v59 = vsub.f32 0.0, %v125_v51  ;;  %v142_v37 = vsub.f32 0.0, %v126_v54  ;;  %v275_v22 = vand.u32 2147483647, %v180_v48 }
  0x4c   :  { %485 = vperm.xlu2 %1564, %v264_v57   ;;  %v372_v58 = vmul.f32 %v1617_v56, %v187_v29  ;;  %vm377_vm9 = vweird.f32 %v1617_v56  ;;  %1624 = vrcp.f32 %v2113_v13  ;;  %v383_v20 = vor.u32 1.1754944e-38, %v382_v42 }
  0x4d   :  { %v1619_v34 = vpop.eup %1618  ;;  %v277_v36 = vand.u32 2147483648, %v180_v48  ;;  %v171_v60 = vmul.f32 1.442695, %v141_v59  ;;  %v173_v61 = vmul.f32 1.442695, %v142_v37  ;;  %vm271_vm11 = vweird.f32 %v180_v48  ;;  %vm2122_vm12 = vmor %vm376_vm8, %vm377_vm9 }
  0x4e   :  { %v373_v21 = vsub.f32 1.0, %v372_v58  ;;  %v267_v63 = vmul.f32 %v1619_v34, %v180_v48  ;;  %v395_v0 = vand.u32 2147483647, %v2104_v33  ;;  %vm391_vm13 = vweird.f32 %v2104_v33 }
  0x4f   :  { %v1621_v25 = vpop.eup %1620  ;;  %v397_v3 = vand.u32 2147483648, %v2104_v33  ;;  %1626 = vpow2.f32 %v171_v60  ;;  %vm272_vm14 = vweird.f32 %v1619_v34  ;;  %vm2129_vm15 = vcmp.eq.f32.partialorder %v275_v22, 8.507059e+37 }
  0x50   :  { %v374_v62 = vmul.f32 %v1617_v56, %v373_v21  ;;  %v387_v2 = vmul.f32 %v1621_v25, %v2104_v33  ;;  %v268_v5 = vsub.f32 1.0, %v267_v63  ;;  %1628 = vpow2.f32 %v173_v61  ;;  %v1623_v6 = vpop.eup %1622  ;;  %vm2142_vm2 = vmor %vm271_vm11, %vm272_vm14 }
  0x51   :  { %v278_v8 = vor.u32 1.1754944e-38, %v277_v36  ;;  %vm392_vm0 = vweird.f32 %v1621_v25  ;;  %vm2135_vm1 = vcmp.eq.f32.partialorder %v395_v0, 8.507059e+37  ;;  %v182_v16 = vadd.f32 1.0, %v1623_v6 }
  0x52   :  { %v375_v4 = vadd.f32 %v1617_v56, %v374_v62  ;;  %v388_v9 = vsub.f32 1.0, %v387_v2  ;;  %v1625_v10 = vpop.eup %1624  ;;  %v269_v12 = vmul.f32 %v1619_v34, %v268_v5  ;;  %v398_v24 = vor.u32 1.1754944e-38, %v397_v3  ;;  %vm2149_vm3 = vmor %vm391_vm13, %vm392_vm0 }
  0x53   :  { %v282_v27 = vmul.f32 %v1625_v10, %v2113_v13  ;;  %vm286_vm4 = vweird.f32 %v2113_v13  ;;  %v292_v32 = vand.u32 2147483648, %v2113_v13  ;;  %1630 = vrcp.f32 %v182_v16 }
  0x54   :  { %v379_v11 = vsel %vm2122_vm12, %v1617_v56, %v375_v4  ;;  %v389_v23 = vmul.f32 %v1621_v25, %v388_v9  ;;  %v270_v28 = vadd.f32 %v1619_v34, %v269_v12  ;;  %vm287_vm10 = vweird.f32 %v1625_v10 }
  0x55   :  { %v384_v18 = vsel %vm2115_vm7, %v383_v20, %v379_v11  ;;  %v1627_v15 = vpop.eup %1626  ;;  %v283_v38 = vsub.f32 1.0, %v282_v27  ;;  %v290_v39 = vand.u32 2147483647, %v2113_v13  ;;  %vm288_vm5 = vmor %vm286_vm4, %vm287_vm10  ;;  %v293_v45 = vor.u32 1.1754944e-38, %v292_v32 }
  0x56   :  { %525 = vperm.xlu1 %1563, %v384_v18   ;;  %v390_v35 = vadd.f32 %v1621_v25, %v389_v23  ;;  %v1629_v30 = vpop.eup %1628  ;;  %v274_v40 = vsel %vm2142_vm2, %v1619_v34, %v270_v28  ;;  %v189_v41 = vadd.f32 1.0, %v1627_v15  ;;  %v305_v52 = vand.u32 2147483647, %v182_v16 }
  0x57   :  { %v279_v43 = vsel %vm2129_vm15, %v278_v8, %v274_v40  ;;  %v284_v31 = vmul.f32 %v1625_v10, %v283_v38  ;;  %vm291_vm6 = vcmp.eq.f32.partialorder %v290_v39, 8.507059e+37  ;;  %v190_v48 = vadd.f32 1.0, %v1629_v30  ;;  %v447_v8 = vld [vmem:[%s2864_s2] sm:$0xff]  ;;  %v458_v38 = vld [vmem:[%s2864_s2 + $0x58] sm:$0xff]  ;;  %v449_v30 = vld [vmem:[%s2864_s2 + $0x10] sm:$0xff] }
  0x58   :  { %v394_v44 = vsel %vm2149_vm3, %v1621_v25, %v390_v35  ;;  %490 = vperm.xlu0 %1562, %v279_v43   ;;  %1632 = vrcp.f32 %v189_v41  ;;  %v307_v53 = vand.u32 2147483648, %v182_v16  ;;  %vm301_vm8 = vweird.f32 %v182_v16  ;;  %v450_v40 = vld [vmem:[%s2864_s2 + $0x18] sm:$0xff] }
  0x59   :  { %v399_v17 = vsel %vm2135_vm1, %v398_v24, %v394_v44  ;;  %v285_v46 = vadd.f32 %v1625_v10, %v284_v31  ;;  %v1631_v33 = vpop.eup %1630  ;;  %1634 = vrcp.f32 %v190_v48  ;;  %v410_v57 = vand.u32 2147483647, %v189_v41  ;;  %v457_v44 = vld [vmem:[%s2864_s2 + $0x50] sm:$0xff] }
  0x5a   :  { %530 = vperm.xlu2 %1564, %v399_v17   ;;  %v297_v50 = vmul.f32 %v1631_v33, %v182_v16  ;;  %vm302_vm7 = vweird.f32 %v1631_v33  ;;  %vm306_vm11 = vcmp.eq.f32.partialorder %v305_v52, 8.507059e+37  ;;  %v308_v42 = vor.u32 1.1754944e-38, %v307_v53  ;;  %v456_v16 = vld [vmem:[%s2864_s2 + $0x48] sm:$0xff] }
  0x5b   :  { %v289_v49 = vsel %vm288_vm5, %v1625_v10, %v285_v46  ;;  %vm303_vm9 = vmor %vm301_vm8, %vm302_vm7  ;;  %v412_v58 = vand.u32 2147483648, %v189_v41  ;;  %vm406_vm12 = vweird.f32 %v189_v41  ;;  %vm411_vm14 = vcmp.eq.f32.partialorder %v410_v57, 8.507059e+37  ;;  %v448_v10 = vld [vmem:[%s2864_s2 + $0x8] sm:$0xff] }
  0x5c   :  { %v294_v51 = vsel %vm291_vm6, %v293_v45, %v289_v49  ;;  %v298_v47 = vsub.f32 1.0, %v297_v50  ;;  %vm421_vm0 = vweird.f32 %v190_v48  ;;  %v427_v36 = vand.u32 2147483648, %v190_v48 }
  0x5d   :  { %v413_v20 = vor.u32 1.1754944e-38, %v412_v58  ;;  %v425_v25 = vand.u32 2147483647, %v190_v48  ;;  %vm764_vm4 = vcmask 523264   ;;  %vm687_vm10 = vcmask 261120  }
  0x5e   :  { %495 = vperm.xlu1 %1563, %v294_v51   ;;  %v1633_v54 = vpop.eup %1632  ;;  %v299_v55 = vmul.f32 %v1631_v33, %v298_v47  ;;  %v428_v1 = vor.u32 1.1754944e-38, %v427_v36 }
  0x5f   :  { %v402_v56 = vmul.f32 %v1633_v54, %v189_v41  ;;  %vm407_vm13 = vweird.f32 %v1633_v54  ;;  %v1635_v59 = vpop.eup %1634  ;;  %vm426_vm3 = vcmp.eq.f32.partialorder %v425_v25, 8.507059e+37  ;;  %v452_v25 = vld [vmem:[%s2864_s2 + $0x28] sm:$0xff] }
  0x60   :  { %v300_v13 = vadd.f32 %v1631_v33, %v299_v55  ;;  %v417_v22 = vmul.f32 %v1635_v59, %v190_v48  ;;  %vm408_vm15 = vmor %vm406_vm12, %vm407_vm13  ;;  %vm422_vm1 = vweird.f32 %v1635_v59 }
  0x61   :  { %v403_v26 = vsub.f32 1.0, %v402_v56  ;;  %vm423_vm2 = vmor %vm421_vm0, %vm422_vm1  ;;  %v460_v56 = vld [vmem:[%s2864_s2 + $0x68] sm:$0xff] }
  0x62   :  { %v304_v37 = vsel %vm303_vm9, %v1631_v33, %v300_v13  ;;  %v418_v61 = vsub.f32 1.0, %v417_v22 }
  0x63   :  { %v404_v21 = vmul.f32 %v1633_v54, %v403_v26  ;;  %v309_v34 = vsel %vm306_vm11, %v308_v42, %v304_v37  ;;  %v459_v37 = vld [vmem:[%s2864_s2 + $0x60] sm:$0xff] }
  0x64   :  { %500 = vperm.xlu2 %1564, %v309_v34   ;;  %v419_v63 = vmul.f32 %v1635_v59, %v418_v61 }
  0x65   :  { %v405_v60 = vadd.f32 %v1633_v54, %v404_v21  ;;  %v1551_v21 = vld [vmem:[%s2865_s5 + $0x18] sm:$0xff] }
  0x66   :  { %v420_v2 = vadd.f32 %v1635_v59, %v419_v63  ;;  %785 = vmatpush.bf16.msra.mxu0 %v1551_v21  ;;  %1554 = vmatpush.bf16.msra.mxu2 %v1551_v21  ;;  %v1549_v21 = vld [vmem:[%s2865_s5 + $0x8] sm:$0xff] }
  0x67   :  { %v409_v62 = vsel %vm408_vm15, %v1633_v54, %v405_v60 }
  0x68   :  { %v414_v0 = vsel %vm411_vm14, %v413_v20, %v409_v62  ;;  %v424_v3 = vsel %vm423_vm2, %v1635_v59, %v420_v2  ;;  %v451_v59 = vld [vmem:[%s2864_s2 + $0x20] sm:$0xff]  ;;  %v1550_v20 = vld [vmem:[%s2865_s5 + $0x10] sm:$0xff]  ;;  %v454_v62 = vld [vmem:[%s2864_s2 + $0x38] sm:$0xff] }
  0x69   :  { %535 = vperm.xlu1 %1563, %v414_v0   ;;  %v429_v4 = vsel %vm426_vm3, %v428_v1, %v424_v3  ;;  %v2295_v1 = vld [vmem:[%s2866_s1 + $0x28] sm:$0xff] }
  0x6a   :  { %786 = vmatpush.bf16.msra.mxu0 %v1550_v20  ;;  %1555 = vmatpush.bf16.msra.mxu2 %v1550_v20  ;;  %v431_v20 = vld [vmem:[%s2866_s1] sm:$0xff] }
  0x6c   :  { %540 = vperm.xlu2 %1564, %v429_v4  }
  0x6e   :  { %787 = vmatpush.bf16.msra.mxu0 %v1549_v21  ;;  %1556 = vmatpush.bf16.msra.mxu2 %v1549_v21 }
  0x93   :  { %v2166_v5 = vpop.permute.xlu2 %475 }
  0x94   :  { %v2231_v17 = vmul.f32 %v2166_v5, %v449_v30 }
  0x96   :  { %v577_v53 = vpack.c.bf16 %v2231_v17, %v2231_v17 }
  0x98   :  { %v649_v42 = vunpack.c.l.b16 %v577_v53  ;;  %v461_v53 = vld [vmem:[%s2864_s2 + $0x70] sm:$0xff] }
  0x9b   :  { %v2181_v11 = vpop.permute.xlu2 %480 }
  0x9c   :  { %v2234_v45 = vmul.f32 %v2181_v11, %v450_v40 }
  0x9e   :  { %v578_v47 = vpack.c.bf16 %v2234_v45, %v2234_v45 }
  0xa0   :  { %v650_v58 = vunpack.c.l.b16 %v578_v47 }
  0xa2   :  { %v664_v22 = vpack.c.b16 %v650_v58, %v649_v42 }
  0xa6   :  { %v2219_v41 = vpop.permute.xlu2 %485 }
  0xa7   :  { %v2274_v36 = vmul.f32 %v2219_v41, %v451_v59 }
  0xa8   :  { %v2168_v6 = vpop.permute.xlu1 %505 }
  0xa9   :  { %v2170_v7 = vpop.permute.xlu0 %465  ;;  %v2199_v24 = vmul.f32 %v2168_v6, %v455_v14  ;;  %v579_v2 = vpack.c.bf16 %v2274_v36, %v2274_v36 }
  0xaa   :  { %v2176_v9 = vmul.f32 %v2170_v7, %v447_v8 }
  0xab   :  { %v583_v15 = vpack.c.bf16 %v2199_v24, %v2199_v24 }
  0xac   :  { %v575_v19 = vpack.c.bf16 %v2176_v9, %v2176_v9 }
  0xad   :  { %v655_v46 = vunpack.c.l.b16 %v583_v15 }
  0xae   :  { %v647_v29 = vunpack.c.l.b16 %v575_v19  ;;  %v453_v19 = vld [vmem:[%s2864_s2 + $0x30] sm:$0xff] }
  0xb0   :  { %v2183_v12 = vpop.permute.xlu1 %510 }
  0xb1   :  { %v2191_v18 = vpop.permute.xlu0 %470  ;;  %v2202_v27 = vmul.f32 %v2183_v12, %v456_v16 }
  0xb2   :  { %v2196_v23 = vmul.f32 %v2191_v18, %v448_v10 }
  0xb3   :  { %v584_v35 = vpack.c.bf16 %v2202_v27, %v2202_v27 }
  0xb4   :  { %v576_v28 = vpack.c.bf16 %v2196_v23, %v2196_v23  ;;  %v2253_v13 = vpop.permute.xlu2 %530 }
  0xb5   :  { %v656_v48 = vunpack.c.l.b16 %v584_v35  ;;  %v2257_v26 = vmul.f32 %v2253_v13, %v460_v56 }
  0xb6   :  { %v648_v32 = vunpack.c.l.b16 %v576_v28 }
  0xb7   :  { %v667_v54 = vpack.c.b16 %v656_v48, %v655_v46  ;;  %v588_v60 = vpack.c.bf16 %v2257_v26, %v2257_v26  ;;  %v462_v48 = vld [vmem:[%s2864_s2 + $0x78] sm:$0xff] }
  0xb8   :  { %v663_v39 = vpack.c.b16 %v648_v32, %v647_v29  ;;  %v651_v32 = vunpack.c.l.b16 %v579_v2 }
  0xb9   :  { %v660_v3 = vunpack.c.l.b16 %v588_v60  ;;  %v432_v60 = vld [vmem:[%s2866_s1 + $0x8] sm:$0xff] }
  0xba   :  { %v2221_v43 = vpop.permute.xlu1 %520  ;;  %671 = vrot.lane.b32.xlu0 %v663_v39, %s1715_s27 }
  0xbb   :  { %v2228_v31 = vmul.f32 %v2221_v43, %v458_v38 }
  0xbc   :  { %v2236_v33 = vpop.permute.xlu0 %515 }
  0xbd   :  { %v586_v49 = vpack.c.bf16 %v2228_v31, %v2228_v31  ;;  %v2241_v50 = vmul.f32 %v2236_v33, %v457_v44 }
  0xbe   :  { %v2299_v4 = vpop.permute.xlu2 %500 }
  0xbf   :  { %v658_v51 = vunpack.c.l.b16 %v586_v49  ;;  %v585_v52 = vpack.c.bf16 %v2241_v50, %v2241_v50  ;;  %v2303_v14 = vmul.f32 %v2299_v4, %v454_v62  ;;  %v560_v62 = vpack.c.bf16 %v432_v60, %v432_v60 }
  0xc1   :  { %v657_v55 = vunpack.c.l.b16 %v585_v52  ;;  %v582_v38 = vpack.c.bf16 %v2303_v14, %v2303_v14  ;;  %v608_v2 = vunpack.c.l.b16 %v560_v62  ;;  %v435_v62 = vld [vmem:[%s2866_s1 + $0x20] sm:$0xff] }
  0xc2   :  { %679 = vrot.lane.b32.xlu0 %v667_v54, %s1715_s27  ;;  %v2339_v54 = vld [vmem:[%s2866_s1 + $0x70] sm:$0xff] }
  0xc3   :  { %v668_v57 = vpack.c.b16 %v658_v51, %v657_v55  ;;  %v654_v44 = vunpack.c.l.b16 %v582_v38 }
  0xc5   :  { %681 = vrot.lane.b32.xlu1 %v668_v57, %s1715_s27 }
  0xc6   :  { %v2325_v49 = vpop.permute.xlu2 %540 }
  0xc7   :  { %v2328_v52 = vmul.f32 %v2325_v49, %v462_v48 }
  0xc8   :  { %v2268_v34 = vpop.permute.xlu1 %525 }
  0xc9   :  { %v2279_v61 = vmul.f32 %v2268_v34, %v459_v37  ;;  %v590_v55 = vpack.c.bf16 %v2328_v52, %v2328_v52 }
  0xca   :  { %673 = vrot.lane.b32.xlu0 %v664_v22, %s1715_s27  ;;  %v2290_v0 = vpop.permute.xlu0 %490  ;;  %v1548_v22 = vld [vmem:[%s2865_s5] sm:$0xff] }
  0xcb   :  { %v587_v63 = vpack.c.bf16 %v2279_v61, %v2279_v61  ;;  %v548_v10 = vmul.f32 %v2290_v0, %v452_v25  ;;  %v662_v58 = vunpack.c.l.b16 %v590_v55  ;;  %788 = vmatpush.bf16.msra.mxu0 %v1548_v22  ;;  %1557 = vmatpush.bf16.msra.mxu2 %v1548_v22  ;;  %v559_v25 = vpack.c.bf16 %v431_v20, %v431_v20 }
  0xcd   :  { %v659_v8 = vunpack.c.l.b16 %v587_v63  ;;  %v580_v16 = vpack.c.bf16 %v548_v10, %v548_v10  ;;  %v2309_v29 = vmul.f32 %v548_v10, %v2295_v1  ;;  %v607_v63 = vunpack.c.l.b16 %v559_v25 }
  0xcf   :  { %v669_v28 = vpack.c.b16 %v660_v3, %v659_v8  ;;  %v652_v15 = vunpack.c.l.b16 %v580_v16  ;;  %v439_v3 = vld [vmem:[%s2866_s1 + $0x40] sm:$0xff]  ;;  %v440_v8 = vld [vmem:[%s2866_s1 + $0x48] sm:$0xff]  ;;  %v623_v10 = vpack.c.b16 %v608_v2, %v607_v63  ;;  %v563_v2 = vpack.c.bf16 %v435_v62, %v435_v62 }
  0xd0   :  { %v2311_v35 = vpop.permute.xlu1 %495  ;;  %v567_v16 = vpack.c.bf16 %v439_v3, %v439_v3  ;;  %v564_v3 = vpack.c.bf16 %v2295_v1, %v2295_v1 }
  0xd1   :  { %v2317_v39 = vmul.f32 %v2311_v35, %v453_v19  ;;  %v665_v30 = vpack.c.b16 %v652_v15, %v651_v32  ;;  %v568_v19 = vpack.c.bf16 %v440_v8, %v440_v8 }
  0xd2   :  { %683 = vrot.lane.b32.xlu0 %v669_v28, %s1715_s27  ;;  %v615_v15 = vunpack.c.l.b16 %v567_v16  ;;  %v611_v16 = vunpack.c.l.b16 %v563_v2 }
  0xd3   :  { %v581_v40 = vpack.c.bf16 %v2317_v39, %v2317_v39  ;;  %675 = vrot.lane.b32.xlu2 %v665_v30, %s1715_s27  ;;  %v616_v38 = vunpack.c.l.b16 %v568_v19  ;;  %v433_v30 = vld [vmem:[%s2866_s1 + $0x10] sm:$0xff]  ;;  %v612_v19 = vunpack.c.l.b16 %v564_v3 }
  0xd5   :  { %v653_v46 = vunpack.c.l.b16 %v581_v40  ;;  %v434_v40 = vld [vmem:[%s2866_s1 + $0x18] sm:$0xff] }
  0xd6   :  { %v562_v48 = vpack.c.bf16 %v434_v40, %v434_v40 }
  0xd7   :  { %v666_v51 = vpack.c.b16 %v654_v44, %v653_v46  ;;  %v627_v44 = vpack.c.b16 %v616_v38, %v615_v15  ;;  %v561_v46 = vpack.c.bf16 %v433_v30, %v433_v30  ;;  %v625_v15 = vpack.c.b16 %v612_v19, %v611_v16  ;;  %v2419_v16 = vld [vmem:[%s2861_s6] ss:$0 sm:$0xff] }
  0xd8   :  { %v2426_v19 = vld [vmem:[%s2867_s7] ss:$0 sm:$0xff] }
  0xd9   :  { %677 = vrot.lane.b32.xlu1 %v666_v51, %s1715_s27  ;;  %v609_v55 = vunpack.c.l.b16 %v561_v46 }
  0xdb   :  { %v2334_v47 = vpop.permute.xlu1 %535 }
  0xdc   :  { %v557_v56 = vmul.f32 %v2334_v47, %v461_v53 }
  0xde   :  { %v589_v57 = vpack.c.bf16 %v557_v56, %v557_v56  ;;  %v2345_v42 = vmul.f32 %v557_v56, %v2339_v54  ;;  %v610_v56 = vunpack.c.l.b16 %v562_v48  ;;  %v437_v48 = vld [vmem:[%s2866_s1 + $0x30] sm:$0xff] }
  0xe0   :  { %v661_v59 = vunpack.c.l.b16 %v589_v57  ;;  %v441_v57 = vld [vmem:[%s2866_s1 + $0x50] sm:$0xff] }
  0xe2   :  { %v670_v37 = vpack.c.b16 %v662_v58, %v661_v59  ;;  %v442_v58 = vld [vmem:[%s2866_s1 + $0x58] sm:$0xff]  ;;  %v624_v59 = vpack.c.b16 %v610_v56, %v609_v55  ;;  %v565_v55 = vpack.c.bf16 %v437_v48, %v437_v48 }
  0xe3   :  { %v570_v21 = vpack.c.bf16 %v442_v58, %v442_v58 }
  0xe4   :  { %685 = vrot.lane.b32.xlu2 %v670_v37, %s1715_s27  ;;  %v569_v37 = vpack.c.bf16 %v441_v57, %v441_v57 }
  0xe5   :  { %v618_v25 = vunpack.c.l.b16 %v570_v21  ;;  %v446_v21 = vld [vmem:[%s2866_s1 + $0x78] sm:$0xff] }
  0xe6   :  { %v617_v60 = vunpack.c.l.b16 %v569_v37 }
  0xe8   :  { %v628_v63 = vpack.c.b16 %v618_v25, %v617_v60  ;;  %v574_v60 = vpack.c.bf16 %v446_v21, %v446_v21 }
  0xea   :  { %v622_v2 = vunpack.c.l.b16 %v574_v60 }
 0x12c   :  { %v672_v28 = vpop.permute.xlu0 %671 }
 0x12d   :  { %v690_v32 = vsel %vm687_vm10, %v623_v10, %v672_v28  ;;  %v443_v28 = vld [vmem:[%s2866_s1 + $0x60] sm:$0xff]  ;;  %v676_v40 = vpop.permute.xlu2 %675 }
 0x12e   :  { %1524 = vmatmul.msk.bf16.vlgmr.msra.gmra.mxu0 %vm764_vm4, %v690_v32  ;;  %v444_v32 = vld [vmem:[%s2866_s1 + $0x68] sm:$0xff]  ;;  %v571_v38 = vpack.c.bf16 %v443_v28, %v443_v28  ;;  %v696_v1 = vsel %vm687_vm10, %v625_v15, %v676_v40  ;;  %v725_v40 = vmul.f32 %v2419_v16, %v2191_v18 }
 0x12f   :  { %v572_v30 = vpack.c.bf16 %v444_v32, %v444_v32 }
 0x131   :  { %v620_v46 = vunpack.c.l.b16 %v572_v30 }
 0x134   :  { %v680_v51 = vpop.permute.xlu0 %679 }
 0x135   :  { %v702_v53 = vsel %vm687_vm10, %v627_v44, %v680_v51  ;;  %v619_v44 = vunpack.c.l.b16 %v571_v38  ;;  %v438_v51 = vld [vmem:[%s2866_s1 + $0x38] sm:$0xff]  ;;  %v2432_v38 = vld [vmem:[%s2868_s8] ss:$0 sm:$0xff] }
 0x136   :  { %1528 = vmatmul.msk.bf16.vlgmr.msra.gmra.mxu2 %vm764_vm4, %v702_v53  ;;  %v566_v56 = vpack.c.bf16 %v438_v51, %v438_v51  ;;  %v732_v51 = vmul.f32 %v2419_v16, %v2168_v6 }
 0x137   :  { %v682_v8 = vpop.permute.xlu1 %681  ;;  %v629_v53 = vpack.c.b16 %v620_v46, %v619_v44 }
 0x138   :  { %v705_v10 = vsel %vm687_vm10, %v628_v63, %v682_v8  ;;  %v614_v37 = vunpack.c.l.b16 %v566_v56  ;;  %v726_v56 = vmul.f32 %v2419_v16, %v2166_v5  ;;  %v727_v5 = vmul.f32 %v2419_v16, %v2181_v11 }
 0x13c   :  { %v674_v22 = vpop.permute.xlu0 %673 }
 0x13d   :  { %v693_v20 = vsel %vm687_vm10, %v624_v59, %v674_v22  ;;  %v613_v59 = vunpack.c.l.b16 %v565_v55 }
 0x13e   :  { %1525 = vmatmul.msk.bf16.gmra.mxu0 %vm764_vm4, %v693_v20  ;;  %v573_v20 = vpack.c.bf16 %v2339_v54, %v2339_v54  ;;  %v686_v8 = vpop.permute.xlu2 %685  ;;  %v724_v54 = vmul.f32 %v2419_v16, %v2170_v7 }
 0x13f   :  { %v626_v22 = vpack.c.b16 %v614_v37, %v613_v59 }
 0x140   :  { %v621_v63 = vunpack.c.l.b16 %v573_v20 }
 0x142   :  { %v630_v3 = vpack.c.b16 %v622_v2, %v621_v63 }
 0x144   :  { %v684_v57 = vpop.permute.xlu0 %683 }
 0x145   :  { %v708_v58 = vsel %vm687_vm10, %v629_v53, %v684_v57 }
 0x146   :  { %1529 = vmatmul.msk.bf16.gmra.mxu2 %vm764_vm4, %v705_v10  ;;  %v711_v10 = vsel %vm687_vm10, %v630_v3, %v686_v8 }
 0x14b   :  { %v678_v25 = vpop.permute.xlu1 %677 }
 0x14c   :  { %v699_v62 = vsel %vm687_vm10, %v626_v22, %v678_v25 }
 0x14e   :  { %1526 = vmatmul.msk.bf16.gmra.mxu0 %vm764_vm4, %v696_v1 }
 0x156   :  { %1530 = vmatmul.msk.bf16.gmra.mxu2 %vm764_vm4, %v708_v58 }
 0x15e   :  { %1527 = vmatmul.msk.bf16.gmra.mxu0 %vm764_vm4, %v699_v62  ;;  %v733_v62 = vmul.f32 %v2419_v16, %v2183_v12 }
 0x166   :  { %1531 = vmatmul.msk.bf16.gmra.mxu2 %vm764_vm4, %v711_v10 }
 0x1ab   :  { %v790_v28 = vpop.f32.mrf.mxu0 }
 0x1ac   :  { %v791_v32 = vadd.f32 %v790_v28, %v724_v54 }
 0x1ae   :  { %v834_v15 = vadd.f32 %v2426_v19, %v791_v32  ;;  %v734_v32 = vmul.f32 %v2419_v16, %v2236_v33  ;;  %v735_v33 = vmul.f32 %v2419_v16, %v2221_v43 }
 0x1b0   :  { %v850_v30 = vmax.f32 %v834_v15, 0.0 }
 0x1b2   :  { %v870_v7 = vmul.f32 %v2432_v38, %v850_v30  ;;  %v728_v30 = vmul.f32 %v2419_v16, %v2219_v41 }
 0x1b3   :  { %v792_v1 = vpop.f32.mrf.mxu0 }
 0x1b4   :  { %v793_v44 = vadd.f32 %v792_v1, %v725_v40  ;;  %v886_v46 = vsel %vm687_vm10, %v870_v7, 0.0 }
 0x1b5   :  { %887 = vadd.xlane.f32.xlu0 %v886_v46 }
 0x1b6   :  { %v835_v48 = vadd.f32 %v2426_v19, %v793_v44 }
 0x1b8   :  { %v851_v53 = vmax.f32 %v835_v48, 0.0 }
 0x1b9   :  { %v810_v55 = vpop.f32.mrf.mxu2 }
 0x1ba   :  { %v811_v57 = vadd.f32 %v810_v55, %v732_v51  ;;  %v871_v18 = vmul.f32 %v2432_v38, %v851_v53 }
 0x1bb   :  { %v795_v58 = vpop.f32.mrf.mxu0 }
 0x1bc   :  { %v842_v59 = vadd.f32 %v2426_v19, %v811_v57  ;;  %v796_v37 = vadd.f32 %v795_v58, %v726_v56  ;;  %v889_v21 = vsel %vm687_vm10, %v871_v18, 0.0  ;;  %v729_v18 = vmul.f32 %v2419_v16, %v2290_v0 }
 0x1bd   :  { %890 = vadd.xlane.f32.xlu1 %v889_v21 }
 0x1be   :  { %v858_v22 = vmax.f32 %v842_v59, 0.0  ;;  %v836_v20 = vadd.f32 %v2426_v19, %v796_v37 }
 0x1c0   :  { %v852_v60 = vmax.f32 %v836_v20, 0.0  ;;  %v878_v6 = vmul.f32 %v2432_v38, %v858_v22 }
 0x1c1   :  { %v812_v25 = vpop.f32.mrf.mxu2 }
 0x1c2   :  { %v872_v63 = vmul.f32 %v2432_v38, %v852_v60  ;;  %v813_v3 = vadd.f32 %v812_v25, %v733_v62  ;;  %v910_v10 = vsel %vm687_vm10, %v878_v6, 0.0  ;;  %v736_v25 = vmul.f32 %v2419_v16, %v2268_v34 }
 0x1c3   :  { %v797_v2 = vpop.f32.mrf.mxu0  ;;  %v18_v34 = vstv %s2869_s9 }
 0x1c4   :  { %v798_v8 = vadd.f32 %v797_v2, %v727_v5  ;;  %v892_v54 = vsel %vm687_vm10, %v872_v63, 0.0  ;;  %v843_v11 = vadd.f32 %v2426_v19, %v813_v3  ;;  %v730_v2 = vmul.f32 %v2419_v16, %v2311_v35  ;;  %19 = vst [vmem:[#allocation3] sm:$0x1] %v18_v34 }
 0x1c5   :  { %911 = vadd.xlane.f32.xlu1 %v910_v10  ;;  %893 = vadd.xlane.f32.xlu2 %v892_v54 }
 0x1c6   :  { %v837_v28 = vadd.f32 %v2426_v19, %v798_v8  ;;  %v859_v44 = vmax.f32 %v843_v11, 0.0 }
 0x1c8   :  { %v853_v15 = vmax.f32 %v837_v28, 0.0  ;;  %v879_v41 = vmul.f32 %v2432_v38, %v859_v44  ;;  %v731_v44 = vmul.f32 %v2419_v16, %v2299_v4 }
 0x1c9   :  { %v815_v12 = vpop.f32.mrf.mxu2 }
 0x1ca   :  { %v816_v40 = vadd.f32 %v815_v12, %v734_v32  ;;  %v873_v7 = vmul.f32 %v2432_v38, %v853_v15  ;;  %v913_v43 = vsel %vm687_vm10, %v879_v41, 0.0 }
 0x1cb   :  { %v800_v1 = vpop.f32.mrf.mxu0 }
 0x1cc   :  { %v844_v46 = vadd.f32 %v2426_v19, %v816_v40  ;;  %v801_v48 = vadd.f32 %v800_v1, %v728_v30  ;;  %v895_v51 = vsel %vm687_vm10, %v873_v7, 0.0  ;;  %v737_v30 = vmul.f32 %v2419_v16, %v2253_v13 }
 0x1cd   :  { %896 = vadd.xlane.f32.xlu2 %v895_v51 }
 0x1ce   :  { %v860_v53 = vmax.f32 %v844_v46, 0.0  ;;  %v838_v55 = vadd.f32 %v2426_v19, %v801_v48 }
 0x1d0   :  { %v880_v56 = vmul.f32 %v2432_v38, %v860_v53  ;;  %v854_v21 = vmax.f32 %v838_v55, 0.0 }
 0x1d1   :  { %v817_v57 = vpop.f32.mrf.mxu2 }
 0x1d2   :  { %v818_v58 = vadd.f32 %v817_v57, %v735_v33  ;;  %v916_v59 = vsel %vm687_vm10, %v880_v56, 0.0  ;;  %v874_v62 = vmul.f32 %v2432_v38, %v854_v21  ;;  %v738_v57 = vmul.f32 %v2419_v16, %v2334_v47 }
 0x1d3   :  { %917 = vadd.xlane.f32.xlu0 %v916_v59  ;;  %v802_v37 = vpop.f32.mrf.mxu0 }
 0x1d4   :  { %v845_v22 = vadd.f32 %v2426_v19, %v818_v58  ;;  %v803_v20 = vadd.f32 %v802_v37, %v729_v18  ;;  %v898_v15 = vsel %vm687_vm10, %v874_v62, 0.0 }
 0x1d5   :  { %914 = vadd.xlane.f32.xlu2 %v913_v43 }
 0x1d6   :  { %v861_v60 = vmax.f32 %v845_v22, 0.0  ;;  %v839_v6 = vadd.f32 %v2426_v19, %v803_v20 }
 0x1d8   :  { %v855_v5 = vmax.f32 %v839_v6, 0.0  ;;  %v881_v0 = vmul.f32 %v2432_v38, %v861_v60  ;;  %v739_v60 = vmul.f32 %v2419_v16, %v2325_v49 }
 0x1d9   :  { %v820_v63 = vpop.f32.mrf.mxu2 }
 0x1da   :  { %v821_v3 = vadd.f32 %v820_v63, %v736_v25  ;;  %v919_v8 = vsel %vm687_vm10, %v881_v0, 0.0  ;;  %v875_v10 = vmul.f32 %v2432_v38, %v855_v5 }
 0x1db   :  { %920 = vadd.xlane.f32.xlu1 %v919_v8  ;;  %v805_v54 = vpop.f32.mrf.mxu0 }
 0x1dc   :  { %v846_v28 = vadd.f32 %v2426_v19, %v821_v3  ;;  %v806_v32 = vadd.f32 %v805_v54, %v730_v2  ;;  %v901_v11 = vsel %vm687_vm10, %v875_v10, 0.0  ;;  %v2514_v3 = vld [vmem:[#allocation3] ss:$0 sm:$0xff] }
 0x1dd   :  { %902 = vadd.xlane.f32.xlu0 %v901_v11  ;;  %899 = vadd.xlane.f32.xlu2 %v898_v15 }
 0x1de   :  { %v862_v35 = vmax.f32 %v846_v28, 0.0  ;;  %v840_v12 = vadd.f32 %v2426_v19, %v806_v32 }
 0x1e0   :  { %v856_v40 = vmax.f32 %v840_v12, 0.0  ;;  %v882_v7 = vmul.f32 %v2432_v38, %v862_v35 }
 0x1e1   :  { %v822_v1 = vpop.f32.mrf.mxu2 }
 0x1e2   :  { %v823_v46 = vadd.f32 %v822_v1, %v737_v30  ;;  %v922_v48 = vsel %vm687_vm10, %v882_v7, 0.0  ;;  %v876_v51 = vmul.f32 %v2432_v38, %v856_v40 }
 0x1e3   :  { %v807_v53 = vpop.f32.mrf.mxu0  ;;  %923 = vadd.xlane.f32.xlu1 %v922_v48 }
 0x1e4   :  { %v847_v33 = vadd.f32 %v2426_v19, %v823_v46  ;;  %v808_v55 = vadd.f32 %v807_v53, %v731_v44  ;;  %v904_v56 = vsel %vm687_vm10, %v876_v51, 0.0 }
 0x1e5   :  { %905 = vadd.xlane.f32.xlu0 %v904_v56 }
 0x1e6   :  { %v863_v13 = vmax.f32 %v847_v33, 0.0  ;;  %v841_v41 = vadd.f32 %v2426_v19, %v808_v55 }
 0x1e8   :  { %v857_v4 = vmax.f32 %v841_v41, 0.0  ;;  %v883_v18 = vmul.f32 %v2432_v38, %v863_v13 }
 0x1e9   :  { %v825_v58 = vpop.f32.mrf.mxu2 }
 0x1ea   :  { %v826_v59 = vadd.f32 %v825_v58, %v738_v57  ;;  %v925_v37 = vsel %vm687_vm10, %v883_v18, 0.0  ;;  %v877_v21 = vmul.f32 %v2432_v38, %v857_v4 }
 0x1eb   :  { %926 = vadd.xlane.f32.xlu2 %v925_v37 }
 0x1ec   :  { %v848_v22 = vadd.f32 %v2426_v19, %v826_v59  ;;  %v907_v20 = vsel %vm687_vm10, %v877_v21, 0.0 }
 0x1ed   :  { %908 = vadd.xlane.f32.xlu1 %v907_v20 }
 0x1ee   :  { %v864_v43 = vmax.f32 %v848_v22, 0.0 }
 0x1f0   :  { %v884_v47 = vmul.f32 %v2432_v38, %v864_v43 }
 0x1f1   :  { %v827_v6 = vpop.f32.mrf.mxu2 }
 0x1f2   :  { %v828_v25 = vadd.f32 %v827_v6, %v739_v60  ;;  %v928_v5 = vsel %vm687_vm10, %v884_v47, 0.0 }
 0x1f3   :  { %929 = vadd.xlane.f32.xlu2 %v928_v5 }
 0x1f4   :  { %v849_v0 = vadd.f32 %v2426_v19, %v828_v25 }
 0x1f6   :  { %v865_v62 = vmax.f32 %v849_v0, 0.0 }
 0x1f8   :  { %v885_v63 = vmul.f32 %v2432_v38, %v865_v62 }
 0x1fa   :  { %v931_v2 = vsel %vm687_vm10, %v885_v63, 0.0 }
 0x1fb   :  { %932 = vadd.xlane.f32.xlu0 %v931_v2 }
 0x228   :  { %v888_v8 = vpop.xlane.xlu0 %887 }
 0x229   :  { %v938_v49 = vadd.f32 %v2514_v3, %v888_v8 }
 0x22b   :  { %v954_v16 = vsub.f32 0.0, %v938_v49 }
 0x22d   :  { %v970_v10 = vmul.f32 1.442695, %v954_v16 }
 0x22f   :  { %1636 = vpow2.f32 %v970_v10 }
 0x230   :  { %v891_v54 = vpop.xlane.xlu1 %890 }
 0x231   :  { %v939_v34 = vadd.f32 %v2514_v3, %v891_v54 }
 0x233   :  { %v955_v28 = vsub.f32 0.0, %v939_v34 }
 0x235   :  { %v1637_v32 = vpop.eup %1636  ;;  %v972_v19 = vmul.f32 1.442695, %v955_v28 }
 0x236   :  { %v1002_v11 = vadd.f32 1.0, %v1637_v32 }
 0x237   :  { %1638 = vpow2.f32 %v972_v19 }
 0x238   :  { %1640 = vrcp.f32 %v1002_v11  ;;  %v912_v38 = vpop.xlane.xlu1 %911  ;;  %v894_v15 = vpop.xlane.xlu2 %893  ;;  %v1027_v56 = vand.u32 2147483647, %v1002_v11  ;;  %v1029_v13 = vand.u32 2147483648, %v1002_v11  ;;  %vm1023_vm6 = vweird.f32 %v1002_v11 }
 0x239   :  { %v946_v35 = vadd.f32 %v2514_v3, %v912_v38  ;;  %v940_v12 = vadd.f32 %v2514_v3, %v894_v15 }
 0x23a   :  { %vm1028_vm7 = vcmp.eq.f32.partialorder %v1027_v56, 8.507059e+37  ;;  %v1030_v37 = vor.u32 1.1754944e-38, %v1029_v13 }
 0x23b   :  { %v962_v30 = vsub.f32 0.0, %v946_v35  ;;  %v956_v40 = vsub.f32 0.0, %v940_v12 }
 0x23d   :  { %v1639_v7 = vpop.eup %1638  ;;  %v974_v1 = vmul.f32 1.442695, %v956_v40  ;;  %v986_v48 = vmul.f32 1.442695, %v962_v30 }
 0x23e   :  { %v1641_v44 = vpop.eup %1640  ;;  %v1003_v46 = vadd.f32 1.0, %v1639_v7 }
 0x23f   :  { %v1019_v51 = vmul.f32 %v1641_v44, %v1002_v11  ;;  %vm1024_vm5 = vweird.f32 %v1641_v44 }
 0x240   :  { %1642 = vrcp.f32 %v1003_v46  ;;  %v897_v53 = vpop.xlane.xlu2 %896  ;;  %vm1025_vm8 = vmor %vm1023_vm6, %vm1024_vm5  ;;  %v1042_v62 = vand.u32 2147483647, %v1003_v46  ;;  %v1044_v63 = vand.u32 2147483648, %v1003_v46  ;;  %vm1038_vm11 = vweird.f32 %v1003_v46 }
 0x241   :  { %1644 = vpow2.f32 %v974_v1  ;;  %v941_v33 = vadd.f32 %v2514_v3, %v897_v53  ;;  %v1020_v55 = vsub.f32 1.0, %v1019_v51 }
 0x242   :  { %1646 = vpow2.f32 %v986_v48  ;;  %v1045_v32 = vor.u32 1.1754944e-38, %v1044_v63  ;;  %vm1043_vm13 = vcmp.eq.f32.partialorder %v1042_v62, 8.507059e+37 }
 0x243   :  { %v957_v41 = vsub.f32 0.0, %v941_v33  ;;  %v1021_v57 = vmul.f32 %v1641_v44, %v1020_v55 }
 0x245   :  { %v976_v4 = vmul.f32 1.442695, %v957_v41  ;;  %v1022_v18 = vadd.f32 %v1641_v44, %v1021_v57 }
 0x246   :  { %v1643_v58 = vpop.eup %1642  ;;  %v918_v59 = vpop.xlane.xlu0 %917 }
 0x247   :  { %v1645_v21 = vpop.eup %1644  ;;  %1648 = vpow2.f32 %v976_v4  ;;  %v948_v22 = vadd.f32 %v2514_v3, %v918_v59  ;;  %v1026_v20 = vsel %vm1025_vm8, %v1641_v44, %v1022_v18  ;;  %v1034_v43 = vmul.f32 %v1643_v58, %v1003_v46 }
 0x248   :  { %v1647_v60 = vpop.eup %1646  ;;  %v2522_v47 = vadd.f32 1.0, %v1645_v21  ;;  %v915_v6 = vpop.xlane.xlu2 %914  ;;  %v1031_v25 = vsel %vm1028_vm7, %v1030_v37, %v1026_v20  ;;  %vm1039_vm9 = vweird.f32 %v1643_v58 }
 0x249   :  { %v964_v5 = vsub.f32 0.0, %v948_v22  ;;  %1276 = vperm.xlu0 %1562, %v1031_v25   ;;  %v1035_v0 = vsub.f32 1.0, %v1034_v43  ;;  %v2525_v2 = vadd.f32 1.0, %v1647_v60  ;;  %v947_v16 = vadd.f32 %v2514_v3, %v915_v6  ;;  %vm1040_vm12 = vmor %vm1038_vm11, %vm1039_vm9 }
 0x24a   :  { %1650 = vrcp.f32 %v2522_v47  ;;  %v1057_v46 = vand.u32 2147483647, %v2522_v47  ;;  %v1059_v41 = vand.u32 2147483648, %v2522_v47  ;;  %vm1053_vm15 = vweird.f32 %v2522_v47 }
 0x24b   :  { %v990_v8 = vmul.f32 1.442695, %v964_v5  ;;  %v1036_v49 = vmul.f32 %v1643_v58, %v1035_v0  ;;  %v963_v15 = vsub.f32 0.0, %v947_v16 }
 0x24c   :  { %vm1058_vm1 = vcmp.eq.f32.partialorder %v1057_v46, 8.507059e+37  ;;  %v1060_v25 = vor.u32 1.1754944e-38, %v1059_v41 }
 0x24d   :  { %v1649_v10 = vpop.eup %1648  ;;  %1652 = vpow2.f32 %v990_v8  ;;  %v1037_v54 = vadd.f32 %v1643_v58, %v1036_v49  ;;  %v988_v13 = vmul.f32 1.442695, %v963_v15 }
 0x24e   :  { %v2528_v34 = vadd.f32 1.0, %v1649_v10  ;;  %v921_v28 = vpop.xlane.xlu1 %920  ;;  %1654 = vrcp.f32 %v2525_v2 }
 0x24f   :  { %v949_v19 = vadd.f32 %v2514_v3, %v921_v28  ;;  %v1041_v11 = vsel %vm1040_vm12, %v1643_v58, %v1037_v54 }
 0x250   :  { %v1651_v38 = vpop.eup %1650  ;;  %1656 = vrcp.f32 %v2528_v34  ;;  %v900_v35 = vpop.xlane.xlu2 %899  ;;  %v1046_v30 = vsel %vm1043_vm13, %v1045_v32, %v1041_v11  ;;  %v1072_v21 = vand.u32 2147483647, %v2528_v34  ;;  %v1074_v22 = vand.u32 2147483648, %v2528_v34 }
 0x251   :  { %v903_v12 = vpop.xlane.xlu0 %902  ;;  %v965_v40 = vsub.f32 0.0, %v949_v19  ;;  %v942_v7 = vadd.f32 %v2514_v3, %v900_v35  ;;  %1281 = vperm.xlu1 %1563, %v1046_v30   ;;  %v1049_v44 = vmul.f32 %v1651_v38, %v2522_v47  ;;  %vm1054_vm14 = vweird.f32 %v1651_v38 }
 0x252   :  { %v943_v1 = vadd.f32 %v2514_v3, %v903_v12  ;;  %vm1055_vm0 = vmor %vm1053_vm15, %vm1054_vm14  ;;  %vm1068_vm2 = vweird.f32 %v2528_v34  ;;  %vm2555_vm3 = vcmp.eq.f32.partialorder %v1072_v21, 8.507059e+37  ;;  %v1075_v28 = vor.u32 1.1754944e-38, %v1074_v22 }
 0x253   :  { %v1653_v48 = vpop.eup %1652  ;;  %v992_v51 = vmul.f32 1.442695, %v965_v40  ;;  %v958_v53 = vsub.f32 0.0, %v942_v7  ;;  %v1050_v55 = vsub.f32 1.0, %v1049_v44 }
 0x254   :  { %v959_v33 = vsub.f32 0.0, %v943_v1  ;;  %v2537_v56 = vadd.f32 1.0, %v1653_v48  ;;  %v2540_v57 = vpop.eup %1654 }
 0x255   :  { %1658 = vpow2.f32 %v992_v51  ;;  %v978_v4 = vmul.f32 1.442695, %v958_v53  ;;  %v1051_v58 = vmul.f32 %v1651_v38, %v1050_v55  ;;  %v2553_v8 = vmul.f32 %v2540_v57, %v2525_v2 }
 0x256   :  { %v980_v18 = vmul.f32 1.442695, %v959_v33  ;;  %v1657_v59 = vpop.eup %1656  ;;  %1660 = vrcp.f32 %v2537_v56  ;;  %v924_v37 = vpop.xlane.xlu1 %923  ;;  %v1179_v30 = vand.u32 2147483648, %v2537_v56  ;;  %vm1173_vm8 = vweird.f32 %v2537_v56 }
 0x257   :  { %1662 = vpow2.f32 %v978_v4  ;;  %v950_v20 = vadd.f32 %v2514_v3, %v924_v37  ;;  %v1052_v43 = vadd.f32 %v1651_v38, %v1051_v58  ;;  %v1064_v60 = vmul.f32 %v1657_v59, %v2528_v34 }
 0x258   :  { %1664 = vpow2.f32 %v988_v13  ;;  %vm1069_vm4 = vweird.f32 %v1657_v59  ;;  %v1140_v21 = vsub.f32 1.0, %v2553_v8 }
 0x259   :  { %v906_v6 = vpop.xlane.xlu0 %905  ;;  %1666 = vpow2.f32 %v980_v18  ;;  %v966_v5 = vsub.f32 0.0, %v950_v20  ;;  %v1056_v0 = vsel %vm1055_vm0, %v1651_v38, %v1052_v43  ;;  %v1065_v63 = vsub.f32 1.0, %v1064_v60  ;;  %vm1070_vm6 = vmor %vm1068_vm2, %vm1069_vm4 }
 0x25a   :  { %v944_v47 = vadd.f32 %v2514_v3, %v906_v6  ;;  %v1061_v62 = vsel %vm1058_vm1, %v1060_v25, %v1056_v0  ;;  %v1177_v38 = vand.u32 2147483647, %v2537_v56 }
 0x25b   :  { %v1659_v49 = vpop.eup %1658  ;;  %v994_v16 = vmul.f32 1.442695, %v966_v5  ;;  %1286 = vperm.xlu2 %1564, %v1061_v62   ;;  %v1066_v11 = vmul.f32 %v1657_v59, %v1065_v63  ;;  %v1180_v5 = vor.u32 1.1754944e-38, %v1179_v30 }
 0x25c   :  { %v960_v10 = vsub.f32 0.0, %v944_v47  ;;  %v1661_v32 = vpop.eup %1660  ;;  %v2559_v19 = vadd.f32 1.0, %v1659_v49  ;;  %vm2584_vm7 = vcmp.eq.f32.partialorder %v1177_v38, 8.507059e+37 }
 0x25d   :  { %v1663_v15 = vpop.eup %1662  ;;  %1668 = vpow2.f32 %v994_v16  ;;  %v1169_v12 = vmul.f32 %v1661_v32, %v2537_v56  ;;  %v1067_v44 = vadd.f32 %v1657_v59, %v1066_v11  ;;  %vm1174_vm5 = vweird.f32 %v1661_v32 }
 0x25e   :  { %v982_v35 = vmul.f32 1.442695, %v960_v10  ;;  %v1665_v40 = vpop.eup %1664  ;;  %1670 = vrcp.f32 %v2559_v19  ;;  %v2565_v7 = vadd.f32 1.0, %v1663_v15  ;;  %v927_v1 = vpop.xlane.xlu2 %926  ;;  %v1192_v53 = vand.u32 2147483647, %v2559_v19  ;;  %vm1175_vm9 = vmor %vm1173_vm8, %vm1174_vm5 }
 0x25f   :  { %v1667_v46 = vpop.eup %1666  ;;  %v951_v48 = vadd.f32 %v2514_v3, %v927_v1  ;;  %v1170_v51 = vsub.f32 1.0, %v1169_v12  ;;  %v1071_v13 = vsel %vm1070_vm6, %v1657_v59, %v1067_v44  ;;  %v1194_v41 = vand.u32 2147483648, %v2559_v19 }
 0x260   :  { %1672 = vpow2.f32 %v982_v35  ;;  %v2573_v33 = vadd.f32 1.0, %v1667_v46  ;;  %v909_v55 = vpop.xlane.xlu1 %908  ;;  %v1076_v58 = vsel %vm2555_vm3, %v1075_v28, %v1071_v13  ;;  %v2579_v34 = vadd.f32 1.0, %v1665_v40 }
 0x261   :  { %1674 = vrcp.f32 %v2565_v7  ;;  %v967_v4 = vsub.f32 0.0, %v951_v48  ;;  %v945_v18 = vadd.f32 %v2514_v3, %v909_v55  ;;  %v1171_v37 = vmul.f32 %v1661_v32, %v1170_v51  ;;  %1291 = vperm.xlu0 %1562, %v1076_v58  }
 0x262   :  { %1676 = vrcp.f32 %v2573_v33  ;;  %vm1188_vm11 = vweird.f32 %v2559_v19  ;;  %v1195_v47 = vor.u32 1.1754944e-38, %v1194_v41  ;;  %vm2593_vm12 = vcmp.eq.f32.partialorder %v1192_v53, 8.507059e+37 }
 0x263   :  { %v1669_v22 = vpop.eup %1668  ;;  %v996_v59 = vmul.f32 1.442695, %v967_v4  ;;  %v961_v20 = vsub.f32 0.0, %v945_v18  ;;  %v1172_v43 = vadd.f32 %v1661_v32, %v1171_v37  ;;  %vm1083_vm13 = vweird.f32 %v2565_v7 }
 0x264   :  { %v1671_v6 = vpop.eup %1670  ;;  %v2588_v25 = vadd.f32 1.0, %v1669_v22  ;;  %v1087_v35 = vand.u32 2147483647, %v2565_v7  ;;  %v1089_v12 = vand.u32 2147483648, %v2565_v7  ;;  %vm1098_vm0 = vweird.f32 %v2573_v33 }
 0x265   :  { %1678 = vpow2.f32 %v996_v59  ;;  %v984_v0 = vmul.f32 1.442695, %v961_v20  ;;  %v1176_v62 = vsel %vm1175_vm9, %v1661_v32, %v1172_v43  ;;  %v1184_v63 = vmul.f32 %v1671_v6, %v2559_v19 }
 0x266   :  { %v1673_v56 = vpop.eup %1672  ;;  %1680 = vrcp.f32 %v2588_v25  ;;  %v930_v54 = vpop.xlane.xlu2 %929  ;;  %v1181_v28 = vsel %vm2584_vm7, %v1180_v5, %v1176_v62  ;;  %vm1189_vm14 = vweird.f32 %v1671_v6  ;;  %v1102_v46 = vand.u32 2147483647, %v2573_v33 }
 0x267   :  { %v1675_v16 = vpop.eup %1674  ;;  %v2598_v10 = vadd.f32 1.0, %v1673_v56  ;;  %1682 = vpow2.f32 %v984_v0  ;;  %v952_v32 = vadd.f32 %v2514_v3, %v930_v54  ;;  %1326 = vperm.xlu1 %1563, %v1181_v28   ;;  %v1185_v11 = vsub.f32 1.0, %v1184_v63  ;;  %vm1190_vm1 = vmor %vm1188_vm11, %vm1189_vm14 }
 0x268   :  { %v1079_v38 = vmul.f32 %v1675_v16, %v2565_v7  ;;  %v1677_v15 = vpop.eup %1676  ;;  %vm1084_vm15 = vweird.f32 %v1675_v16  ;;  %v1104_v48 = vand.u32 2147483648, %v2573_v33  ;;  %vm2617_vm2 = vcmp.eq.f32.partialorder %v1087_v35, 8.507059e+37 }
 0x269   :  { %1684 = vrcp.f32 %v2598_v10  ;;  %v968_v30 = vsub.f32 0.0, %v952_v32  ;;  %v1186_v40 = vmul.f32 %v1671_v6, %v1185_v11  ;;  %v1094_v44 = vmul.f32 %v1677_v15, %v2573_v33  ;;  %vm1085_vm4 = vmor %vm1083_vm13, %vm1084_vm15 }
 0x26a   :  { %v1080_v1 = vsub.f32 1.0, %v1079_v38  ;;  %v1090_v37 = vor.u32 1.1754944e-38, %v1089_v12  ;;  %vm1099_vm3 = vweird.f32 %v1677_v15  ;;  %v1105_v54 = vor.u32 1.1754944e-38, %v1104_v48 }
 0x26b   :  { %v1679_v51 = vpop.eup %1678  ;;  %v998_v53 = vmul.f32 1.442695, %v968_v30  ;;  %v1187_v55 = vadd.f32 %v1671_v6, %v1186_v40  ;;  %v1095_v41 = vsub.f32 1.0, %v1094_v44  ;;  %vm1100_vm5 = vmor %vm1098_vm0, %vm1099_vm3  ;;  %v1209_v7 = vand.u32 2147483648, %v2588_v25 }
 0x26c   :  { %v1081_v13 = vmul.f32 %v1675_v16, %v1080_v1  ;;  %v1681_v4 = vpop.eup %1680  ;;  %v2612_v18 = vadd.f32 1.0, %v1679_v51  ;;  %vm1103_vm6 = vcmp.eq.f32.partialorder %v1102_v46, 8.507059e+37  ;;  %v1207_v38 = vand.u32 2147483647, %v2588_v25 }
 0x26d   :  { %v1683_v22 = vpop.eup %1682  ;;  %1686 = vpow2.f32 %v998_v53  ;;  %v1191_v59 = vsel %vm1190_vm1, %v1671_v6, %v1187_v55  ;;  %v1096_v43 = vmul.f32 %v1677_v15, %v1095_v41  ;;  %v1199_v0 = vmul.f32 %v1681_v4, %v2588_v25 }
 0x26e   :  { %v1082_v20 = vadd.f32 %v1675_v16, %v1081_v13  ;;  %1688 = vrcp.f32 %v2612_v18  ;;  %v2624_v5 = vadd.f32 1.0, %v1683_v22  ;;  %v933_v56 = vpop.xlane.xlu0 %932  ;;  %v1196_v19 = vsel %vm2593_vm12, %v1195_v47, %v1191_v59 }
 0x26f   :  { %v2621_v60 = vpop.eup %1684  ;;  %v953_v6 = vadd.f32 %v2514_v3, %v933_v56  ;;  %1331 = vperm.xlu0 %1562, %v1196_v19   ;;  %v1097_v63 = vadd.f32 %v1677_v15, %v1096_v43  ;;  %v1200_v47 = vsub.f32 1.0, %v1199_v0  ;;  %vm1204_vm8 = vweird.f32 %v1681_v4 }
 0x270   :  { %v1086_v62 = vsel %vm1085_vm4, %v1675_v16, %v1082_v20  ;;  %1690 = vrcp.f32 %v2624_v5  ;;  %v1109_v3 = vmul.f32 %v2621_v60, %v2598_v10  ;;  %vm1203_vm7 = vweird.f32 %v2588_v25 }
 0x271   :  { %v1091_v28 = vsel %vm2617_vm2, %v1090_v37, %v1086_v62  ;;  %v969_v49 = vsub.f32 0.0, %v953_v6  ;;  %v1101_v32 = vsel %vm1100_vm5, %v1677_v15, %v1097_v63  ;;  %v1201_v11 = vmul.f32 %v1681_v4, %v1200_v47  ;;  %vm1205_vm9 = vmor %vm1203_vm7, %vm1204_vm8 }
 0x272   :  { %1296 = vperm.xlu2 %1564, %v1091_v28   ;;  %v1106_v16 = vsel %vm1103_vm6, %v1105_v54, %v1101_v32  ;;  %1692 = vrcp.f32 %v2579_v34  ;;  %v1110_v12 = vsub.f32 1.0, %v1109_v3  ;;  %v1210_v1 = vor.u32 1.1754944e-38, %v1209_v7 }
 0x273   :  { %v1687_v35 = vpop.eup %1686  ;;  %v1000_v33 = vmul.f32 1.442695, %v969_v49  ;;  %1301 = vperm.xlu1 %1563, %v1106_v16   ;;  %v1202_v15 = vadd.f32 %v1681_v4, %v1201_v11  ;;  %v1119_v44 = vand.u32 2147483648, %v2598_v10  ;;  %vm1114_vm11 = vweird.f32 %v2621_v60 }
 0x274   :  { %v1689_v30 = vpop.eup %1688  ;;  %v2645_v40 = vadd.f32 1.0, %v1687_v35  ;;  %v1111_v46 = vmul.f32 %v2621_v60, %v1110_v12  ;;  %v1117_v48 = vand.u32 2147483647, %v2598_v10  ;;  %vm1208_vm12 = vcmp.eq.f32.partialorder %v1207_v38, 8.507059e+37 }
 0x275   :  { %1694 = vpow2.f32 %v1000_v33  ;;  %v1206_v25 = vsel %vm1205_vm9, %v1681_v4, %v1202_v15  ;;  %v1214_v53 = vmul.f32 %v1689_v30, %v2612_v18  ;;  %vm1113_vm13 = vweird.f32 %v2598_v10 }
 0x276   :  { %v1691_v51 = vpop.eup %1690  ;;  %1696 = vrcp.f32 %v2645_v40  ;;  %v1211_v55 = vsel %vm1208_vm12, %v1210_v1, %v1206_v25  ;;  %v1112_v13 = vadd.f32 %v2621_v60, %v1111_v46  ;;  %vm1115_vm14 = vmor %vm1113_vm13, %vm1114_vm11  ;;  %v1120_v41 = vor.u32 1.1754944e-38, %v1119_v44 }
 0x277   :  { %1336 = vperm.xlu0 %1562, %v1211_v55   ;;  %v1215_v58 = vsub.f32 1.0, %v1214_v53  ;;  %v1124_v37 = vmul.f32 %v1691_v51, %v2624_v5  ;;  %v1141_v22 = vmul.f32 %v2540_v57, %v1140_v21  ;;  %vm1118_vm15 = vcmp.eq.f32.partialorder %v1117_v48, 8.507059e+37 }
 0x278   :  { %v2659_v59 = vpop.eup %1692  ;;  %v1116_v4 = vsel %vm1115_vm14, %v2621_v60, %v1112_v13  ;;  %v1222_v20 = vand.u32 2147483647, %v2612_v18  ;;  %v1224_v43 = vand.u32 2147483648, %v2612_v18  ;;  %vm1219_vm0 = vweird.f32 %v1689_v30 }
 0x279   :  { %v1121_v10 = vsel %vm1118_vm15, %v1120_v41, %v1116_v4  ;;  %v1216_v56 = vmul.f32 %v1689_v30, %v1215_v58  ;;  %v1125_v19 = vsub.f32 1.0, %v1124_v37  ;;  %vm1218_vm1 = vweird.f32 %v2612_v18 }
 0x27a   :  { %vm1129_vm2 = vweird.f32 %v1691_v51  ;;  %v1134_v8 = vand.u32 2147483648, %v2624_v5  ;;  %vm1144_vm3 = vweird.f32 %v2540_v57  ;;  %v1132_v63 = vand.u32 2147483647, %v2624_v5  ;;  %vm1220_vm4 = vmor %vm1218_vm1, %vm1219_vm0 }
 0x27b   :  { %v1695_v0 = vpop.eup %1694  ;;  %1306 = vperm.xlu1 %1563, %v1121_v10   ;;  %v1217_v6 = vadd.f32 %v1689_v30, %v1216_v56  ;;  %v1126_v62 = vmul.f32 %v1691_v51, %v1125_v19  ;;  %vm1223_vm5 = vcmp.eq.f32.partialorder %v1222_v20, 8.507059e+37  ;;  %v1225_v54 = vor.u32 1.1754944e-38, %v1224_v43 }
 0x27c   :  { %v1697_v21 = vpop.eup %1696  ;;  %v2667_v60 = vadd.f32 1.0, %v1695_v0  ;;  %vm1128_vm6 = vweird.f32 %v2624_v5  ;;  %v1154_v7 = vmul.f32 %v2659_v59, %v2579_v34  ;;  %v1135_v32 = vor.u32 1.1754944e-38, %v1134_v8 }
 0x27d   :  { %v1229_v28 = vmul.f32 %v1697_v21, %v2645_v40  ;;  %v1221_v18 = vsel %vm1220_vm4, %v1689_v30, %v1217_v6  ;;  %v1127_v47 = vadd.f32 %v1691_v51, %v1126_v62  ;;  %vm1130_vm8 = vmor %vm1128_vm6, %vm1129_vm2  ;;  %v1142_v16 = vadd.f32 %v2540_v57, %v1141_v22  ;;  %v1700_v6 = vld [vmem:[%s2866_s1] sm:$0xff] }
 0x27e   :  { %1698 = vrcp.f32 %v2667_v60  ;;  %v1226_v49 = vsel %vm1223_vm5, %v1225_v54, %v1221_v18  ;;  %vm1133_vm7 = vcmp.eq.f32.partialorder %v1132_v63, 8.507059e+37  ;;  %v1239_v5 = vand.u32 2147483648, %v2645_v40  ;;  %v1701_v63 = vld [vmem:[%s2866_s1 + $0x8] sm:$0xff] }
 0x27f   :  { %v1230_v3 = vsub.f32 1.0, %v1229_v28  ;;  %1341 = vperm.xlu2 %1564, %v1226_v49   ;;  %v1131_v11 = vsel %vm1130_vm8, %v1691_v51, %v1127_v47  ;;  %v1155_v38 = vsub.f32 1.0, %v1154_v7  ;;  %vm1234_vm9 = vweird.f32 %v1697_v21 }
 0x280   :  { %v1136_v35 = vsel %vm1133_vm7, %v1135_v32, %v1131_v11  ;;  %v1237_v12 = vand.u32 2147483647, %v2645_v40  ;;  %vm1143_vm11 = vweird.f32 %v2525_v2  ;;  %v1149_v30 = vand.u32 2147483648, %v2525_v2  ;;  %v1702_v32 = vld [vmem:[%s2866_s1 + $0x10] sm:$0xff] }
 0x281   :  { %v1231_v33 = vmul.f32 %v1697_v21, %v1230_v3  ;;  %1311 = vperm.xlu0 %1562, %v1136_v35   ;;  %vm1233_vm12 = vweird.f32 %v2645_v40  ;;  %vm2684_vm13 = vmor %vm1143_vm11, %vm1144_vm3  ;;  %v1147_v44 = vand.u32 2147483647, %v2525_v2  ;;  %v1240_v48 = vor.u32 1.1754944e-38, %v1239_v5 }
 0x282   :  { %vm1235_vm14 = vmor %vm1233_vm12, %vm1234_vm9  ;;  %v1156_v51 = vmul.f32 %v2659_v59, %v1155_v38  ;;  %vm1238_vm15 = vcmp.eq.f32.partialorder %v1237_v12, 8.507059e+37  ;;  %v1146_v53 = vsel %vm2684_vm13, %v2540_v57, %v1142_v16  ;;  %v1150_v13 = vor.u32 1.1754944e-38, %v1149_v30  ;;  %v1704_v12 = vld [vmem:[%s2866_s1 + $0x50] sm:$0xff]  ;;  %v1705_v30 = vld [vmem:[%s2866_s1 + $0x58] sm:$0xff] }
 0x283   :  { %v1232_v15 = vadd.f32 %v1697_v21, %v1231_v33  ;;  %vm1148_vm0 = vcmp.eq.f32.partialorder %v1147_v44, 8.507059e+37  ;;  %vm1159_vm1 = vweird.f32 %v2659_v59  ;;  %v1254_v37 = vand.u32 2147483648, %v2667_v60 }
 0x284   :  { %v1699_v46 = vpop.eup %1698  ;;  %v1151_v58 = vsel %vm1148_vm0, %v1150_v13, %v1146_v53  ;;  %v1157_v2 = vadd.f32 %v2659_v59, %v1156_v51  ;;  %v1164_v22 = vand.u32 2147483648, %v2579_v34  ;;  %v1252_v57 = vand.u32 2147483647, %v2667_v60 }
 0x285   :  { %v1236_v25 = vsel %vm1235_vm14, %v1697_v21, %v1232_v15  ;;  %v1244_v40 = vmul.f32 %v1699_v46, %v2667_v60  ;;  %vm1249_vm2 = vweird.f32 %v1699_v46  ;;  %vm1158_vm3 = vweird.f32 %v2579_v34 }
 0x286   :  { %v1241_v55 = vsel %vm1238_vm15, %v1240_v48, %v1236_v25  ;;  %v1162_v20 = vand.u32 2147483647, %v2579_v34  ;;  %vm1160_vm4 = vmor %vm1158_vm3, %vm1159_vm1  ;;  %vm1248_vm5 = vweird.f32 %v2667_v60  ;;  %v1255_v56 = vor.u32 1.1754944e-38, %v1254_v37  ;;  %v1553_v34 = vld [vmem:[%s2871_s10 + $0x8] sm:$0xff] }
 0x287   :  { %v1245_v41 = vsub.f32 1.0, %v1244_v40  ;;  %1346 = vperm.xlu2 %1564, %v1241_v55   ;;  %v1161_v10 = vsel %vm1160_vm4, %v2659_v59, %v1157_v2  ;;  %vm1250_vm6 = vmor %vm1248_vm5, %vm1249_vm2  ;;  %v1165_v19 = vor.u32 1.1754944e-38, %v1164_v22  ;;  %vm1253_vm8 = vcmp.eq.f32.partialorder %v1252_v57, 8.507059e+37  ;;  %1428 = vmatpush.bf16.msra.mxu1 %v1553_v34  ;;  %v1552_v59 = vld [vmem:[%s2871_s10] sm:$0xff]  ;;  %v1709_v57 = vld [vmem:[%s2866_s1 + $0x30] sm:$0xff] }
 0x288   :  { %vm1163_vm7 = vcmp.eq.f32.partialorder %v1162_v20, 8.507059e+37  ;;  %1558 = vmatpush.bf16.msra.mxu3 %v1553_v34  ;;  %v1258_v62 = vmul.f32 %v1700_v6, %v2176_v9  ;;  %v1259_v54 = vmul.f32 %v1701_v63, %v2196_v23  ;;  %v1260_v3 = vmul.f32 %v1702_v32, %v2231_v17  ;;  %v1703_v9 = vld [vmem:[%s2866_s1 + $0x18] sm:$0xff] }
 0x289   :  { %v1246_v4 = vmul.f32 %v1699_v46, %v1245_v41  ;;  %1316 = vperm.xlu0 %1562, %v1151_v58   ;;  %v1166_v21 = vsel %vm1163_vm7, %v1165_v19, %v1161_v10  ;;  %v1261_v16 = vmul.f32 %v1703_v9, %v2234_v45  ;;  %v1268_v17 = vmul.f32 %v1704_v12, %v2241_v50  ;;  %v1708_v41 = vld [vmem:[%s2866_s1 + $0x60] sm:$0xff]  ;;  %v1710_v20 = vld [vmem:[%s2866_s1 + $0x38] sm:$0xff] }
 0x28a   :  { %v1269_v45 = vmul.f32 %v1705_v30, %v2228_v31  ;;  %v1707_v31 = vld [vmem:[%s2866_s1 + $0x68] sm:$0xff]  ;;  %vm1487_vm9 = vcmask 519168  }
 0x28b   :  { %v1247_v43 = vadd.f32 %v1699_v46, %v1246_v4  ;;  %1429 = vmatpush.bf16.msra.mxu1 %v1552_v59  ;;  %v1271_v13 = vmul.f32 %v1707_v31, %v2257_v26  ;;  %v1264_v26 = vmul.f32 %v1709_v57, %v2317_v39 }
 0x28c   :  { %1559 = vmatpush.bf16.msra.mxu3 %v1552_v59 }
 0x28d   :  { %v1251_v0 = vsel %vm1250_vm6, %v1699_v46, %v1247_v43  ;;  %v1706_v46 = vld [vmem:[%s2866_s1 + $0x20] sm:$0xff] }
 0x28e   :  { %v1256_v8 = vsel %vm1253_vm8, %v1255_v56, %v1251_v0  ;;  %v1262_v48 = vmul.f32 %v1706_v46, %v2274_v36  ;;  %v1270_v36 = vmul.f32 %v1708_v41, %v2279_v61  ;;  %v1265_v61 = vmul.f32 %v1710_v20, %v2303_v14 }
 0x28f   :  { %1351 = vperm.xlu1 %1563, %v1256_v8   ;;  %1321 = vperm.xlu2 %1564, %v1166_v21   ;;  %v1711_v8 = vld [vmem:[%s2866_s1 + $0x48] sm:$0xff]  ;;  %v1712_v21 = vld [vmem:[%s2866_s1 + $0x40] sm:$0xff] }
 0x290   :  { %v1267_v39 = vmul.f32 %v1711_v8, %v2202_v27  ;;  %v1266_v14 = vmul.f32 %v1712_v21, %v2199_v24  ;;  %v2778_v24 = vld [vmem:[%s2870_s11] ss:$0 sm:$0xff] }
 0x2b5   :  { %v1287_v49 = vpop.permute.xlu2 %1286 }
 0x2b6   :  { %v1356_v11 = vmul.f32 %v1287_v49, %v1260_v3 }
 0x2bb   :  { %v1277_v60 = vpop.permute.xlu0 %1276 }
 0x2bc   :  { %v1354_v18 = vmul.f32 %v1277_v60, %v1258_v62  ;;  %v1713_v62 = vld [vmem:[%s2866_s1 + $0x78] sm:$0xff] }
 0x2bd   :  { %v1273_v63 = vmul.f32 %v1713_v62, %v2328_v52 }
 0x2c3   :  { %v1282_v28 = vpop.permute.xlu1 %1281 }
 0x2c4   :  { %v1355_v47 = vmul.f32 %v1282_v28, %v1259_v54 }
 0x2c6   :  { %v1370_v7 = vpack.c.bf16 %v1355_v47, %v1354_v18 }
 0x2c8   :  { %1540 = vmatmul.msk.bf16.vlgmr.msra.gmra.mxu1 %vm687_vm10, %v1370_v7 }
 0x2cc   :  { %v1297_v33 = vpop.permute.xlu2 %1296 }
 0x2cd   :  { %v1358_v53 = vmul.f32 %v1297_v33, %v1262_v48 }
 0x2d3   :  { %v1292_v23 = vpop.permute.xlu0 %1291 }
 0x2d4   :  { %v1357_v5 = vmul.f32 %v1292_v23, %v1261_v16 }
 0x2d6   :  { %v1371_v38 = vpack.c.bf16 %v1357_v5, %v1356_v11 }
 0x2d8   :  { %1541 = vmatmul.msk.bf16.gmra.mxu1 %vm687_vm10, %v1371_v38 }
 0x2d9   :  { %v1327_v35 = vpop.permute.xlu1 %1326  ;;  %v1342_v40 = vpop.permute.xlu2 %1341 }
 0x2da   :  { %v1364_v1 = vmul.f32 %v1327_v35, %v1268_v17  ;;  %v1367_v2 = vmul.f32 %v1342_v40, %v1271_v13 }
 0x2e1   :  { %v1332_v15 = vpop.permute.xlu0 %1331  ;;  %v1347_v22 = vpop.permute.xlu2 %1346 }
 0x2e2   :  { %v1365_v44 = vmul.f32 %v1332_v15, %v1269_v45  ;;  %v1368_v28 = vmul.f32 %v1347_v22, %v2345_v42 }
 0x2e4   :  { %v1375_v51 = vpack.c.bf16 %v1365_v44, %v1364_v1 }
 0x2e5   :  { %v1302_v25 = vpop.permute.xlu1 %1301 }
 0x2e6   :  { %v1359_v50 = vmul.f32 %v1302_v25, %v2309_v29  ;;  %1545 = vmatmul.msk.bf16.vlgmr.msra.gmra.mxu3 %vm687_vm10, %v1375_v51 }
 0x2e8   :  { %v1372_v55 = vpack.c.bf16 %v1359_v50, %v1358_v53 }
 0x2e9   :  { %v1337_v58 = vpop.permute.xlu0 %1336  ;;  %v1322_v0 = vpop.permute.xlu2 %1321 }
 0x2ea   :  { %1542 = vmatmul.msk.bf16.gmra.mxu1 %vm687_vm10, %v1372_v55  ;;  %v1366_v29 = vmul.f32 %v1337_v58, %v1270_v36  ;;  %v1363_v59 = vmul.f32 %v1322_v0, %v1267_v39 }
 0x2ec   :  { %v1376_v37 = vpack.c.bf16 %v1367_v2, %v1366_v29 }
 0x2ed   :  { %v1307_v4 = vpop.permute.xlu1 %1306 }
 0x2ee   :  { %v1360_v10 = vmul.f32 %v1307_v4, %v1264_v26 }
 0x2f3   :  { %v1312_v43 = vpop.permute.xlu0 %1311 }
 0x2f4   :  { %v1361_v56 = vmul.f32 %v1312_v43, %v1265_v61 }
 0x2f6   :  { %1546 = vmatmul.msk.bf16.gmra.mxu3 %vm687_vm10, %v1376_v37  ;;  %v1373_v19 = vpack.c.bf16 %v1361_v56, %v1360_v10 }
 0x2fa   :  { %1543 = vmatmul.msk.bf16.gmra.mxu1 %vm687_vm10, %v1373_v19 }
 0x2fb   :  { %v1317_v34 = vpop.permute.xlu0 %1316 }
 0x2fc   :  { %v1362_v60 = vmul.f32 %v1317_v34, %v1266_v14 }
 0x2fe   :  { %v1374_v6 = vpack.c.bf16 %v1363_v59, %v1362_v60 }
 0x301   :  { %v1352_v54 = vpop.permute.xlu1 %1351 }
 0x302   :  { %v1369_v27 = vmul.f32 %v1352_v54, %v1273_v63 }
 0x304   :  { %v1377_v18 = vpack.c.bf16 %v1369_v27, %v1368_v28 }
 0x306   :  { %1547 = vmatmul.msk.bf16.gmra.mxu3 %vm687_vm10, %v1377_v18 }
 0x30a   :  { %1544 = vmatmul.msk.bf16.gmra.mxu1 %vm687_vm10, %v1374_v6 }
 0x345   :  { %v1431_v47 = vpop.f32.mrf.mxu1 }
 0x346   :  { %v1432_v7 = vadd.f32 %v2778_v24, %v1431_v47 }
 0x348   :  { %v1471_v49 = vpack.c.bf16 %v1432_v7, %v1432_v7 }
 0x34a   :  { %1488 = vst.msk [vmem:[%s2872_s12] sm:$0xf] %vm1487_vm9, %v1471_v49 }
 0x34d   :  { %v1433_v52 = vpop.f32.mrf.mxu1 }
 0x34e   :  { %v1434_v42 = vadd.f32 %v2778_v24, %v1433_v52 }
 0x350   :  { %v1472_v32 = vpack.c.bf16 %v1434_v42, %v1434_v42 }
 0x352   :  { %1489 = vst.msk [vmem:[%s2872_s12 + $0x4] sm:$0xf] %vm1487_vm9, %v1472_v32 }
 0x355   :  { %v1436_v3 = vpop.f32.mrf.mxu1 }
 0x356   :  { %v1437_v9 = vadd.f32 %v2778_v24, %v1436_v3 }
 0x358   :  { %v1473_v16 = vpack.c.bf16 %v1437_v9, %v1437_v9 }
 0x35a   :  { %1490 = vst.msk [vmem:[%s2872_s12 + $0x8] sm:$0xf] %vm1487_vm9, %v1473_v16 }
 0x35d   :  { %v1438_v23 = vpop.f32.mrf.mxu1 }
 0x35e   :  { %v1439_v11 = vadd.f32 %v2778_v24, %v1438_v23 }
 0x360   :  { %v1474_v5 = vpack.c.bf16 %v1439_v11, %v1439_v11 }
 0x362   :  { %1491 = vst.msk [vmem:[%s2872_s12 + $0xc] sm:$0xf] %vm1487_vm9, %v1474_v5 }
 0x367   :  { %v1441_v38 = vpop.f32.mrf.mxu1 }
 0x368   :  { %v1442_v35 = vadd.f32 %v2778_v24, %v1441_v38 }
 0x369   :  { %v1456_v33 = vpop.f32.mrf.mxu3 }
 0x36a   :  { %v1475_v12 = vpack.c.bf16 %v1442_v35, %v1442_v35  ;;  %v1457_v17 = vadd.f32 %v2778_v24, %v1456_v33 }
 0x36c   :  { %1492 = vst.msk [vmem:[%s2872_s12 + $0x10] sm:$0xf] %vm1487_vm9, %v1475_v12  ;;  %v1481_v30 = vpack.c.bf16 %v1457_v17, %v1457_v17 }
 0x36e   :  { %1498 = vst.msk [vmem:[%s2872_s12 + $0x28] sm:$0xf] %vm1487_vm9, %v1481_v30 }
 0x36f   :  { %v1443_v45 = vpop.f32.mrf.mxu1 }
 0x370   :  { %v1444_v15 = vadd.f32 %v2778_v24, %v1443_v45 }
 0x371   :  { %v1458_v1 = vpop.f32.mrf.mxu3 }
 0x372   :  { %v1476_v44 = vpack.c.bf16 %v1444_v15, %v1444_v15  ;;  %v1459_v46 = vadd.f32 %v2778_v24, %v1458_v1 }
 0x374   :  { %1493 = vst.msk [vmem:[%s2872_s12 + $0x14] sm:$0xf] %vm1487_vm9, %v1476_v44  ;;  %v1482_v48 = vpack.c.bf16 %v1459_v46, %v1459_v46 }
 0x376   :  { %1499 = vst.msk [vmem:[%s2872_s12 + $0x2c] sm:$0xf] %vm1487_vm9, %v1482_v48 }
 0x377   :  { %v1446_v51 = vpop.f32.mrf.mxu1 }
 0x378   :  { %v1447_v25 = vadd.f32 %v2778_v24, %v1446_v51 }
 0x379   :  { %v1461_v53 = vpop.f32.mrf.mxu3 }
 0x37a   :  { %v1477_v40 = vpack.c.bf16 %v1447_v25, %v1447_v25  ;;  %v1462_v50 = vadd.f32 %v2778_v24, %v1461_v53 }
 0x37c   :  { %1494 = vst.msk [vmem:[%s2872_s12 + $0x18] sm:$0xf] %vm1487_vm9, %v1477_v40  ;;  %v1483_v55 = vpack.c.bf16 %v1462_v50, %v1462_v50 }
 0x37e   :  { %1500 = vst.msk [vmem:[%s2872_s12 + $0x30] sm:$0xf] %vm1487_vm9, %v1483_v55 }
 0x37f   :  { %v1448_v31 = vpop.f32.mrf.mxu1 }
 0x380   :  { %v1449_v13 = vadd.f32 %v2778_v24, %v1448_v31 }
 0x381   :  { %v1463_v41 = vpop.f32.mrf.mxu3 }
 0x382   :  { %v1478_v36 = vpack.c.bf16 %v1449_v13, %v1449_v13  ;;  %v1464_v58 = vadd.f32 %v2778_v24, %v1463_v41 }
 0x384   :  { %1495 = vst.msk [vmem:[%s2872_s12 + $0x1c] sm:$0xf] %vm1487_vm9, %v1478_v36  ;;  %v1484_v2 = vpack.c.bf16 %v1464_v58, %v1464_v58 }
 0x386   :  { %1501 = vst.msk [vmem:[%s2872_s12 + $0x34] sm:$0xf] %vm1487_vm9, %v1484_v2 }
 0x387   :  { %v1451_v29 = vpop.f32.mrf.mxu1 }
 0x388   :  { %v1452_v37 = vadd.f32 %v2778_v24, %v1451_v29 }
 0x389   :  { %v1466_v22 = vpop.f32.mrf.mxu3 }
 0x38a   :  { %v1479_v4 = vpack.c.bf16 %v1452_v37, %v1452_v37  ;;  %v1467_v57 = vadd.f32 %v2778_v24, %v1466_v22 }
 0x38c   :  { %1496 = vst.msk [vmem:[%s2872_s12 + $0x20] sm:$0xf] %vm1487_vm9, %v1479_v4  ;;  %v1485_v26 = vpack.c.bf16 %v1467_v57, %v1467_v57 }
 0x38e   :  { %1502 = vst.msk [vmem:[%s2872_s12 + $0x38] sm:$0xf] %vm1487_vm9, %v1485_v26 }
 0x38f   :  { %v1453_v20 = vpop.f32.mrf.mxu1 }
 0x390   :  { %v1454_v61 = vadd.f32 %v2778_v24, %v1453_v20 }
 0x391   :  { %v1468_v43 = vpop.f32.mrf.mxu3 }
 0x392   :  { %v1480_v10 = vpack.c.bf16 %v1454_v61, %v1454_v61  ;;  %v1469_v56 = vadd.f32 %v2778_v24, %v1468_v43 }
 0x394   :  { %1497 = vst.msk [vmem:[%s2872_s12 + $0x24] sm:$0xf] %vm1487_vm9, %v1480_v10  ;;  %v1486_v19 = vpack.c.bf16 %v1469_v56, %v1469_v56 }
 0x396   :  { %1503 = vst.msk [vmem:[%s2872_s12 + $0x3c] sm:$0xf] %vm1487_vm9, %v1486_v19 }

// kernel: stagen_forward.4
= control target key start
LH: loop header
LB: loop body
LE: loop exit
PB: predicated region body
PF: predicated region fallthrough
CT: control target
= control target key end

     0   :  { %s1476_s19 = smov [#allocation7]   ;;  %s1477_s20 = smov [#allocation8]   ;;  %s1965_s0 = inlined_call_operand.vmem [shape: s32[2], index: 0, kind: input, shape index: {}]   ;;  %s1966_s5 = inlined_call_operand.vmem [shape: bf16[16,32], index: 5, kind: input, shape index: {}]   ;;  %s1967_s6 = inlined_call_operand.vmem [shape: bf16[128,64], index: 6, kind: input, shape index: {}]   ;;  %s1968_s7 = inlined_call_operand.vmem [shape: s32[1,128], index: 7, kind: input, shape index: {}]   ;;  %s1969_s8 = inlined_call_operand.vmem [shape: bf16[32,32], index: 8, kind: input, shape index: {}]   ;;  %s1970_s9 = inlined_call_operand.vmem [shape: f32[1,32], index: 9, kind: input, shape index: {}]   ;;  %s1971_s10 = inlined_call_operand.vmem [shape: f32[16,32], index: 10, kind: output, shape index: {}]   ;;  %s1972_s1 = inlined_call_operand.vmem [shape: s32[2], index: 1, kind: input, shape index: {}]   ;;  %s1973_s2 = inlined_call_operand.vmem [shape: s32[2], index: 2, kind: input, shape index: {}]   ;;  %s1974_s3 = inlined_call_operand.vmem [shape: s32[2], index: 3, kind: input, shape index: {}]   ;;  %s1975_s4 = inlined_call_operand.vmem [shape: s32[2], index: 4, kind: input, shape index: {}]  }
   0x1   :  { %s16_s15 = sshll.u32 %s1965_s0, 4  ;;  %s21_s18 = sshll.u32 %s1972_s1, 4  ;;  %s17_s15 = int_to_ptr.vmem [resolvable:$true] %s16_s15  ;;  %s22_s18 = int_to_ptr.vmem [resolvable:$true] %s21_s18 }
   0x2   :  { %19 = dma.vmem_to_smem %s17_s15, 16, %s1476_s19, [#allocation6] }
   0x3   :  { %24 = dma.vmem_to_smem %s22_s18, 16, %s1477_s20, [#allocation6] }
   0x4   :  { %s26_s23 = sshll.u32 %s1973_s2, 4  ;;  %s31_s26 = sshll.u32 %s1974_s3, 4  ;;  %s27_s23 = int_to_ptr.vmem [resolvable:$true] %s26_s23  ;;  %s32_s26 = int_to_ptr.vmem [resolvable:$true] %s31_s26 }
   0x5   :  { %s1478_s0 = smov [#allocation9]   ;;  %s1479_s27 = smov [#allocation10]  }
   0x6   :  { %29 = dma.vmem_to_smem %s27_s23, 16, %s1478_s0, [#allocation6] }
   0x7   :  { %34 = dma.vmem_to_smem %s32_s26, 16, %s1479_s27, [#allocation6] }
   0x8   :  { %s36_s29 = sshll.u32 %s1975_s4, 4  ;;  %s1480_s30 = smov [#allocation11]   ;;  %s37_s29 = int_to_ptr.vmem [resolvable:$true] %s36_s29 }
   0x9   :  { %39 = dma.vmem_to_smem %s37_s29, 16, %s1480_s30, [#allocation6] }
   0xa   :  { %1470 = dma.done.wait [#allocation6], 80 }
   0xb   :  { %1471 = vsyncadd [#allocation6], 4294967216 }
   0xc   :  { %42 = sfence }
   0xd   :  { %s1571_s2 = smov 0  }
   0xe LB: > { %s1577_s3 = sadd.s32 4294967295, %s1474_s2   ;;  %p1235_p0 = scmp.ge.s32.totalorder %s1474_s2, 1  ;;  %s1474_s2 = sphi %s1571_s2, %s48_s2  }
   0xf   : > { %p254_p1 = scmp.lt.s32.totalorder %s1474_s2, 3 }
  0x11   : > { %p255_p2 = pnand %p1235_p0, %p254_p1 }
  0x12   : > { %s294_s4 = sld [smem:[#allocation7 + %s1577_s3]] (!%p255_p2) }
  0x13   : > { %258 = sbr.rel (%p255_p2) target bundleno = 1232 (0x4d0), region = 40  ;;  %s302_s11 = sld [smem:[#allocation8 + %s1577_s3]] (!%p255_p2) }
  0x14   : > { %s310_s12 = sld [smem:[#allocation8 + %s1577_s3]] (!%p255_p2) }
  0x15   : > { %s315_s13 = sld [smem:[#allocation7 + %s1577_s3]] (!%p255_p2) }
  0x16   : > { %s324_s14 = sld [smem:[#allocation10 + %s1577_s3]] (!%p255_p2) }
  0x18   : > { %s1236_s15 = sshll.u32 %s294_s4, 1 }
  0x19   : > { %p296_p3 = scmp.lt.s32.totalorder %s1236_s15, 1  ;;  %s1238_s16 = sshll.u32 %s302_s11, 4 }
  0x1a   : > { %p304_p4 = scmp.lt.s32.totalorder %s1238_s16, 15  ;;  %p311_p5 = scmp.lt.s32.totalorder %s310_s12, 0 }
  0x1b   : > { %s1983_s15 = smov (!%p296_p3, %s1236_s15), 1  ;;  %s1240_s18 = sshll.u32 %s315_s13, 1 }
  0x1c   : > { %s1985_s16 = smov (!%p304_p4, %s1238_s16), 15  ;;  %s1237_s17 = sshll.u32 %s1983_s15, 2 }
  0x1d   : > { %s299_s21 = scalar_lea.vmem %s1966_s5, %s1237_s17  ;;  %s1239_s22 = sshll.u32 %s1985_s16, 2 }
  0x1e   : > { %s1592_s25 = scalar_lea.vmem %s1967_s6, %s1239_s22  ;;  %p317_p6 = scmp.lt.s32.totalorder %s1240_s18, 1 }
  0x1f   : > { %s1987_s12 = smov (!%p311_p5, %s310_s12), 0  ;;  %p1242_p7 = scmp.ne.s32.totalorder %s324_s14, 1 }
  0x20   : > { %s1989_s18 = smov (!%p317_p6, %s1240_s18), 1  ;;  %s313_s27 = scalar_lea.vmem %s1968_s7, %s1987_s12 }
  0x21   : > { %s1241_s1 = sshll.u32 %s1989_s18, 3  ;;  %328 = sbr.rel (%p1242_p7) target bundleno = 185 (0xb9), region = 44 }
  0x22   : > { %s1603_s30 = scalar_lea.vmem %s1971_s10, %s1241_s1 }
  0x26   : > { %v1315_v0 = vld [vmem:[%s1969_s8 + $0x8] sm:$0xff]  ;;  %vm379_vm0 = vcmask 31744   ;;  %v1481_v1 = vmov 0.0   ;;  %v1314_v2 = vld [vmem:[%s1969_s8] sm:$0xff]  ;;  %v1482_v3 = vmov -1e+30  }
  0x27   : > { %382 = vst.msk [vmem:[#allocation4] sm:$0xff] %vm379_vm0, %v1481_v1  ;;  %366 = vmatpush.bf16.msra.mxu0 %v1315_v0  ;;  %vm356_vm1 = vcmask 261120   ;;  %v1313_v4 = vld [vmem:[%s299_s21] sm:$0xff]  ;;  %vm376_vm2 = vcmask 257024  }
  0x28   : > { %380 = vst.msk [vmem:[#allocation3] sm:$0xff] %vm379_vm0, %v1482_v3  ;;  %v1358_v5 = vld [vmem:[%s1970_s9] ss:$0 sm:$0xff] }
  0x29   : > { %381 = vst.msk [vmem:[#allocation3 + $0x8] sm:$0xff] %vm379_vm0, %v1482_v3 }
  0x2a   : > { %383 = vst.msk [vmem:[#allocation4 + $0x8] sm:$0xff] %vm379_vm0, %v1481_v1 }
  0x2b   : > { %384 = vst.msk [vmem:[#allocation5] sm:$0xff] %vm356_vm1, %v1481_v1  ;;  %367 = vmatpush.bf16.msra.mxu0 %v1314_v2 }
  0x2c   : > { %385 = vst.msk [vmem:[#allocation5 + $0x8] sm:$0xff] %vm356_vm1, %v1481_v1 }
  0x2e   : > { %1255 = vmatmul.msk.bf16.vlgmr.msra.gmra.mxu0 %vm356_vm1, %v1313_v4 }
  0xab   : > { %v369_v6 = vpop.f32.mrf.mxu0 }
  0xac   : > { %v370_v7 = vadd.f32 %v1358_v5, %v369_v6 }
  0xae   : > { %v374_v8 = vpack.c.bf16 %v370_v7, %v370_v7 }
  0xb0   : > { %377 = vst.msk [vmem:[#allocation2] sm:$0xf] %vm376_vm2, %v374_v8 }
  0xb3   : > { %v371_v9 = vpop.f32.mrf.mxu0 }
  0xb4   : > { %v372_v10 = vadd.f32 %v1358_v5, %v371_v9 }
  0xb6   : > { %v375_v11 = vpack.c.bf16 %v372_v10, %v372_v10 }
  0xb8   : > { %378 = vst.msk [vmem:[#allocation2 + $0x4] sm:$0xf] %vm376_vm2, %v375_v11 }
  0xb9 PF: > { %s386_s17 = sld [smem:[#allocation9 + %s1577_s3]] }
  0xbf   : > { %p1256_p8 = scmp.ne.s32.totalorder %s386_s17, 1 }
  0xc0   : > { %s1483_s18 = smov (!%p1256_p8), 120   ;;  %s1484_s19 = smov (!%p1256_p8), 112  }
  0xc1   : > { %390 = sbr.rel (%p1256_p8) target bundleno = 1072 (0x430), region = 48  ;;  %s1485_s20 = smov (!%p1256_p8), 104  }
  0xc2   : > { %s1486_s21 = smov (!%p1256_p8), 96   ;;  %s1487_s22 = smov (!%p1256_p8), 88  }
  0xc3   : > { %s1488_s23 = smov (!%p1256_p8), 80   ;;  %s1489_s24 = smov (!%p1256_p8), 72  }
  0xc4   : > { %s1494_s12 = smov (!%p1256_p8), 16   ;;  %s1496_s28 = smov (!%p1256_p8), 24  }
  0xc6   : > { %v1616_v12 = vld [vmem:[%s1592_s25 + $0x38] sm:$0xff]  ;;  %v1619_v13 = vld [vmem:[%s1592_s25 + $0x30] sm:$0xff]  ;;  %v1634_v14 = vld [vmem:[%s1592_s25 + $0x28] sm:$0xff]  ;;  %vm472_vm3 = vcmask 64512   ;;  %vm723_vm6 = vcmask 7168   ;;  %vm726_vm7 = vcmask 15360  }
  0xc7   : > { %534 = vrot.lane.b32.xlu1 %v1616_v12, %s1483_s18  ;;  %597 = vrot.lane.b32.xlu0 %v1616_v12, %s1484_s19  ;;  %v1643_v15 = vld [vmem:[%s1592_s25 + $0x20] sm:$0xff]  ;;  %v1652_v16 = vld [vmem:[%s1592_s25 + $0x18] sm:$0xff]  ;;  %v498_v21 = vsel %vm472_vm3, %v1616_v12, 0  ;;  %v495_v22 = vsel %vm472_vm3, %v1619_v13, 0  ;;  %v492_v24 = vsel %vm472_vm3, %v1634_v14, 0  ;;  %vm729_vm8 = vcmask 23552  }
  0xc8   : > { %658 = vrot.lane.b32.xlu2 %v1619_v13, %s1485_s20  ;;  %v1661_v17 = vld [vmem:[%s1592_s25 + $0x10] sm:$0xff]  ;;  %v1670_v18 = vld [vmem:[%s1592_s25 + $0x8] sm:$0xff]  ;;  %v1679_v19 = vld [vmem:[%s1592_s25] sm:$0xff]  ;;  %500 = vmatpush.bf16.xpose.msra.mxu0 %v498_v21  ;;  %v489_v26 = vsel %vm472_vm3, %v1643_v15, 0  ;;  %v486_v29 = vsel %vm472_vm3, %v1652_v16, 0  ;;  %s391_s25 = sld [smem:[#allocation7 + %s1577_s3]] }
  0xc9   : > { %v1687_v20 = vld [vmem:[#allocation2] sm:$0xff]  ;;  %v483_v36 = vsel %vm472_vm3, %v1661_v17, 0  ;;  %v480_v43 = vsel %vm472_vm3, %v1670_v18, 0  ;;  %v477_v51 = vsel %vm472_vm3, %v1679_v19, 0  ;;  %vm1062_vm9 = vcmask 31744  }
  0xca   : > { %vm1075_vm11 = vcmask 130048   ;;  %vm1078_vm12 = vcmask 195584   ;;  %vm1081_vm13 = vcmask 261120  }
  0xce   : > { %s1257_s26 = sshll.u32 %s391_s25, 4 }
  0xcf   : > { %660 = vrot.lane.b32.xlu0 %v1616_v12, %s1485_s20  ;;  %595 = vrot.lane.b32.xlu1 %v1619_v13, %s1484_s19 }
  0xd0   : > { %532 = vrot.lane.b32.xlu2 %v1619_v13, %s1483_s18  ;;  %501 = vmatpush.bf16.xpose.msra.mxu0 %v495_v22 }
  0xd7   : > { %593 = vrot.lane.b32.xlu0 %v1634_v14, %s1484_s19  ;;  %656 = vrot.lane.b32.xlu1 %v1634_v14, %s1485_s20 }
  0xd8   : > { %530 = vrot.lane.b32.xlu2 %v1634_v14, %s1483_s18  ;;  %502 = vmatpush.bf16.xpose.msra.mxu0 %v492_v24  ;;  %v393_v24 = vlaneseq }
  0xdf   : > { %591 = vrot.lane.b32.xlu0 %v1643_v15, %s1484_s19  ;;  %654 = vrot.lane.b32.xlu1 %v1643_v15, %s1485_s20 }
  0xe0   : > { %528 = vrot.lane.b32.xlu2 %v1643_v15, %s1483_s18  ;;  %503 = vmatpush.bf16.xpose.msra.mxu0 %v489_v26  ;;  %v396_v26 = vstv %s1257_s26 }
  0xe7   : > { %589 = vrot.lane.b32.xlu0 %v1652_v16, %s1484_s19  ;;  %652 = vrot.lane.b32.xlu1 %v1652_v16, %s1485_s20 }
  0xe8   : > { %526 = vrot.lane.b32.xlu2 %v1652_v16, %s1483_s18  ;;  %504 = vmatpush.bf16.xpose.msra.mxu0 %v486_v29  ;;  %v1373_v29 = vld [vmem:[%s313_s27] ss:$0 sm:$0xff]  ;;  %s1495_s27 = smov 8  }
  0xef   : > { %587 = vrot.lane.b32.xlu0 %v1661_v17, %s1484_s19  ;;  %650 = vrot.lane.b32.xlu1 %v1661_v17, %s1485_s20 }
  0xf0   : > { %524 = vrot.lane.b32.xlu2 %v1661_v17, %s1483_s18  ;;  %505 = vmatpush.bf16.xpose.msra.mxu0 %v483_v36 }
  0xf7   : > { %585 = vrot.lane.b32.xlu0 %v1670_v18, %s1484_s19  ;;  %648 = vrot.lane.b32.xlu1 %v1670_v18, %s1485_s20 }
  0xf8   : > { %522 = vrot.lane.b32.xlu2 %v1670_v18, %s1483_s18  ;;  %506 = vmatpush.bf16.xpose.msra.mxu0 %v480_v43 }
  0xff   : > { %583 = vrot.lane.b32.xlu0 %v1679_v19, %s1484_s19  ;;  %646 = vrot.lane.b32.xlu1 %v1679_v19, %s1485_s20 }
 0x100   : > { %520 = vrot.lane.b32.xlu2 %v1679_v19, %s1483_s18  ;;  %507 = vmatpush.bf16.xpose.msra.mxu0 %v477_v51 }
 0x107   : > { %581 = vrot.lane.b32.xlu0 %v1687_v20, %s1484_s19  ;;  %644 = vrot.lane.b32.xlu1 %v1687_v20, %s1485_s20 }
 0x108   : > { %518 = vrot.lane.b32.xlu2 %v1687_v20, %s1483_s18  ;;  %1294 = vmatmul.msk.bf16.vlgmr.msra.gmra.mxu0 %vm472_vm3, %v1687_v20 }
 0x10f   : > { %781 = vrot.lane.b32.xlu1 %v1670_v18, %s1486_s21  ;;  %864 = vrot.lane.b32.xlu0 %v1619_v13, %s1487_s22 }
 0x110   : > { %779 = vrot.lane.b32.xlu2 %v1679_v19, %s1486_s21 }
 0x117   : > { %947 = vrot.lane.b32.xlu1 %v1616_v12, %s1488_s23  ;;  %862 = vrot.lane.b32.xlu0 %v1634_v14, %s1487_s22 }
 0x118   : > { %783 = vrot.lane.b32.xlu2 %v1661_v17, %s1486_s21 }
 0x11f   : > { %945 = vrot.lane.b32.xlu1 %v1619_v13, %s1488_s23  ;;  %860 = vrot.lane.b32.xlu0 %v1643_v15, %s1487_s22 }
 0x120   : > { %1028 = vrot.lane.b32.xlu2 %v1616_v12, %s1489_s24 }
 0x122   : > { %v659_v23 = vpop.permute.xlu2 %658 }
 0x123   : > { %v684_v44 = vsel %vm472_vm3, %v659_v23, 0 }
 0x127   : > { %1026 = vrot.lane.b32.xlu1 %v1619_v13, %s1489_s24  ;;  %1018 = vrot.lane.b32.xlu0 %v1661_v17, %s1489_s24 }
 0x128   : > { %866 = vrot.lane.b32.xlu2 %v1616_v12, %s1487_s22 }
 0x12a   : > { %v533_v25 = vpop.permute.xlu2 %532 }
 0x12b   : > { %v558_v33 = vsel %vm472_vm3, %v533_v25, 0  ;;  %v394_v25 = vshrl.u32 %v393_v24, 7  ;;  %v1490_v24 = vmov 2  }
 0x12c   : > { %1360 = vset.pattern.permute.xlu2 %v1490_v24  ;;  %1364 = vset.pattern.permute.xlu0 %v1490_v24 }
 0x12f   : > { %1024 = vrot.lane.b32.xlu1 %v1634_v14, %s1489_s24  ;;  %935 = vrot.lane.b32.xlu0 %v1670_v18, %s1488_s23 }
 0x130   : > { %943 = vrot.lane.b32.xlu2 %v1634_v14, %s1488_s23 }
 0x132   : > { %v531_v32 = vpop.permute.xlu2 %530 }
 0x133   : > { %v555_v40 = vsel %vm472_vm3, %v531_v32, 0 }
 0x137   : > { %1022 = vrot.lane.b32.xlu1 %v1643_v15, %s1489_s24  ;;  %933 = vrot.lane.b32.xlu0 %v1679_v19, %s1488_s23 }
 0x138   : > { %941 = vrot.lane.b32.xlu2 %v1643_v15, %s1488_s23 }
 0x139   : > { %v535_v27 = vpop.permute.xlu1 %534  ;;  %v598_v28 = vpop.permute.xlu0 %597 }
 0x13a   : > { %v561_v30 = vsel %vm472_vm3, %v535_v27, 0  ;;  %v624_v31 = vsel %vm472_vm3, %v598_v28, 0  ;;  %v529_v39 = vpop.permute.xlu2 %528  ;;  %v397_v28 = vadd.s32 %v396_v26, %v394_v25 }
 0x13b   : > { %563 = vmatpush.bf16.xpose.msra.mxu1 %v561_v30  ;;  %626 = vmatpush.bf16.xpose.msra.mxu2 %v624_v31  ;;  %v552_v47 = vsel %vm472_vm3, %v529_v39, 0 }
 0x13c   : > { %vm1800_vm4 = vcmp.eq.s32.totalorder %v1373_v29, %v397_v28 }
 0x13f   : > { %1020 = vrot.lane.b32.xlu1 %v1652_v16, %s1489_s24 }
 0x140   : > { %939 = vrot.lane.b32.xlu2 %v1652_v16, %s1488_s23 }
 0x141   : > { %v661_v34 = vpop.permute.xlu0 %660  ;;  %v596_v35 = vpop.permute.xlu1 %595 }
 0x142   : > { %v687_v37 = vsel %vm472_vm3, %v661_v34, 0  ;;  %v621_v38 = vsel %vm472_vm3, %v596_v35, 0  ;;  %v527_v46 = vpop.permute.xlu2 %526  ;;  %v395_v35 = vadd.s32 8, %v394_v25  ;;  %v1491_v25 = vmov 0  }
 0x143   : > { %564 = vmatpush.bf16.xpose.msra.mxu1 %v558_v33  ;;  %689 = vmatpush.bf16.xpose.msra.mxu3 %v687_v37  ;;  %v549_v53 = vsel %vm472_vm3, %v527_v46, 0 }
 0x144   : > { %627 = vmatpush.bf16.xpose.msra.mxu2 %v621_v38  ;;  %v398_v37 = vadd.s32 %v396_v26, %v395_v35  ;;  %1359 = vset.pattern.permute.xlu1 %v1491_v25  ;;  %v421_v35 = vld [vmem:[#allocation3] sm:$0xff] }
 0x146   : > { %vm1809_vm5 = vcmp.eq.s32.totalorder %v1373_v29, %v398_v37 }
 0x147   : > { %937 = vrot.lane.b32.xlu1 %v1661_v17, %s1488_s23  ;;  %vm1907_vm10 = vmpackc.low %vm1809_vm5, %vm1800_vm4 }
 0x148   : > { %858 = vrot.lane.b32.xlu2 %v1652_v16, %s1487_s22 }
 0x149   : > { %v594_v41 = vpop.permute.xlu0 %593  ;;  %v657_v42 = vpop.permute.xlu1 %656 }
 0x14a   : > { %v618_v45 = vsel %vm472_vm3, %v594_v41, 0  ;;  %v681_v48 = vsel %vm472_vm3, %v657_v42, 0  ;;  %v525_v55 = vpop.permute.xlu2 %524 }
 0x14b   : > { %565 = vmatpush.bf16.xpose.msra.mxu1 %v555_v40  ;;  %690 = vmatpush.bf16.xpose.msra.mxu3 %v684_v44  ;;  %v546_v59 = vsel %vm472_vm3, %v525_v55, 0 }
 0x14c   : > { %628 = vmatpush.bf16.xpose.msra.mxu2 %v618_v45 }
 0x14f   : > { %856 = vrot.lane.b32.xlu1 %v1661_v17, %s1487_s22 }
 0x150   : > { %1016 = vrot.lane.b32.xlu2 %v1670_v18, %s1489_s24 }
 0x151   : > { %v592_v49 = vpop.permute.xlu0 %591  ;;  %v655_v50 = vpop.permute.xlu1 %654 }
 0x152   : > { %v615_v52 = vsel %vm472_vm3, %v592_v49, 0  ;;  %v678_v54 = vsel %vm472_vm3, %v655_v50, 0  ;;  %v523_v0 = vpop.permute.xlu2 %522 }
 0x153   : > { %566 = vmatpush.bf16.xpose.msra.mxu1 %v552_v47  ;;  %691 = vmatpush.bf16.xpose.msra.mxu3 %v681_v48  ;;  %v543_v1 = vsel %vm472_vm3, %v523_v0, 0 }
 0x154   : > { %629 = vmatpush.bf16.xpose.msra.mxu2 %v615_v52 }
 0x159   : > { %v590_v56 = vpop.permute.xlu0 %589  ;;  %v653_v57 = vpop.permute.xlu1 %652 }
 0x15a   : > { %v612_v58 = vsel %vm472_vm3, %v590_v56, 0  ;;  %v675_v60 = vsel %vm472_vm3, %v653_v57, 0  ;;  %v521_v6 = vpop.permute.xlu2 %520 }
 0x15b   : > { %567 = vmatpush.bf16.xpose.msra.mxu1 %v549_v53  ;;  %692 = vmatpush.bf16.xpose.msra.mxu3 %v678_v54  ;;  %v540_v7 = vsel %vm472_vm3, %v521_v6, 0 }
 0x15c   : > { %630 = vmatpush.bf16.xpose.msra.mxu2 %v612_v58 }
 0x161   : > { %v588_v61 = vpop.permute.xlu0 %587  ;;  %v651_v62 = vpop.permute.xlu1 %650 }
 0x162   : > { %v609_v63 = vsel %vm472_vm3, %v588_v61, 0  ;;  %v672_v2 = vsel %vm472_vm3, %v651_v62, 0  ;;  %v519_v17 = vpop.permute.xlu2 %518 }
 0x163   : > { %568 = vmatpush.bf16.xpose.msra.mxu1 %v546_v59  ;;  %693 = vmatpush.bf16.xpose.msra.mxu3 %v675_v60 }
 0x164   : > { %631 = vmatpush.bf16.xpose.msra.mxu2 %v609_v63 }
 0x169   : > { %v586_v3 = vpop.permute.xlu0 %585  ;;  %v649_v5 = vpop.permute.xlu1 %648 }
 0x16a   : > { %v606_v4 = vsel %vm472_vm3, %v586_v3, 0  ;;  %v669_v8 = vsel %vm472_vm3, %v649_v5, 0  ;;  %v1789_v23 = vpop.permute.xlu2 %779 }
 0x16b   : > { %569 = vmatpush.bf16.xpose.msra.mxu1 %v543_v1  ;;  %694 = vmatpush.bf16.xpose.msra.mxu3 %v672_v2 }
 0x16c   : > { %632 = vmatpush.bf16.xpose.msra.mxu2 %v606_v4 }
 0x171   : > { %v584_v9 = vpop.permute.xlu0 %583  ;;  %v647_v11 = vpop.permute.xlu1 %646 }
 0x172   : > { %v603_v10 = vsel %vm472_vm3, %v584_v9, 0  ;;  %v666_v20 = vsel %vm472_vm3, %v647_v11, 0  ;;  %v1796_v31 = vpop.permute.xlu2 %783 }
 0x173   : > { %570 = vmatpush.bf16.xpose.msra.mxu1 %v540_v7  ;;  %695 = vmatpush.bf16.xpose.msra.mxu3 %v669_v8 }
 0x174   : > { %633 = vmatpush.bf16.xpose.msra.mxu2 %v603_v10 }
 0x179   : > { %v582_v21 = vpop.permute.xlu0 %581  ;;  %v645_v22 = vpop.permute.xlu1 %644 }
 0x17a   : > { %1295 = vmatmul.msk.bf16.vlgmr.msra.gmra.mxu1 %vm472_vm3, %v519_v17  ;;  %v1029_v39 = vpop.permute.xlu2 %1028 }
 0x17b   : > { %1296 = vmatmul.msk.bf16.vlgmr.msra.gmra.mxu2 %vm472_vm3, %v582_v21  ;;  %696 = vmatpush.bf16.xpose.msra.mxu3 %v666_v20 }
 0x181   : > { %v1798_v32 = vpop.permute.xlu1 %781  ;;  %v865_v47 = vpop.permute.xlu0 %864 }
 0x182   : > { %1297 = vmatmul.msk.bf16.vlgmr.msra.gmra.mxu3 %vm472_vm3, %v645_v22  ;;  %v867_v43 = vpop.permute.xlu2 %866 }
 0x183   : > { %1038 = vmatpush.bf16.msrb.mxu3 %v1029_v39  ;;  %876 = vmatpush.bf16.msrb.mxu1 %v867_v43 }
 0x185   : > { %v509_v27 = vpop.f32.mrf.mxu0 }
 0x186   : > { %v514_v30 = vmul.f32 0.35355338, %v509_v27 }
 0x187   : > { %877 = vmatpush.bf16.msrb.mxu1 %v865_v47 }
 0x188   : > { %v1806_v34 = vsel %vm1800_vm4, %v514_v30, -1e+30 }
 0x189   : > { %707 = vmax.xlane.f32.xlu0 %v1806_v34  ;;  %v948_v40 = vpop.permute.xlu1 %947  ;;  %v863_v53 = vpop.permute.xlu0 %862 }
 0x18a   : > { %957 = vmatpush.bf16.msrb.mxu2 %v948_v40  ;;  %v944_v45 = vpop.permute.xlu2 %943 }
 0x18b   : > { %878 = vmatpush.bf16.msrb.mxu1 %v863_v53 }
 0x18d   : > { %v511_v36 = vpop.f32.mrf.mxu0 }
 0x18e   : > { %v515_v38 = vmul.f32 0.35355338, %v511_v36 }
 0x190   : > { %v1815_v42 = vsel %vm1809_vm5, %v515_v38, -1e+30 }
 0x191   : > { %709 = vmax.xlane.f32.xlu1 %v1815_v42  ;;  %v946_v44 = vpop.permute.xlu1 %945  ;;  %v861_v59 = vpop.permute.xlu0 %860 }
 0x192   : > { %958 = vmatpush.bf16.msrb.mxu2 %v946_v44  ;;  %v942_v50 = vpop.permute.xlu2 %941  ;;  %879 = vmatpush.bf16.msrb.mxu1 %v861_v59 }
 0x196   : > { %959 = vmatpush.bf16.msrb.mxu2 %v944_v45  ;;  %v422_v45 = vld [vmem:[#allocation3 + $0x8] sm:$0xff] }
 0x199   : > { %v1027_v46 = vpop.permute.xlu1 %1026  ;;  %v1019_v5 = vpop.permute.xlu0 %1018 }
 0x19a   : > { %1039 = vmatpush.bf16.msrb.mxu3 %v1027_v46  ;;  %960 = vmatpush.bf16.msrb.mxu2 %v942_v50  ;;  %v940_v57 = vpop.permute.xlu2 %939  ;;  %v1492_v50 = vmov 3  }
 0x19e   : > { %961 = vmatpush.bf16.msrb.mxu2 %v940_v57 }
 0x1a1   : > { %v1025_v51 = vpop.permute.xlu1 %1024  ;;  %v936_v20 = vpop.permute.xlu0 %935 }
 0x1a2   : > { %1040 = vmatpush.bf16.msrb.mxu3 %v1025_v51  ;;  %v859_v3 = vpop.permute.xlu2 %858  ;;  %v1493_v51 = vmov 1  }
 0x1a3   : > { %880 = vmatpush.bf16.msrb.mxu1 %v859_v3 }
 0x1a9   : > { %v1023_v58 = vpop.permute.xlu1 %1022  ;;  %v934_v22 = vpop.permute.xlu0 %933 }
 0x1aa   : > { %1041 = vmatpush.bf16.msrb.mxu3 %v1023_v58  ;;  %v1017_v11 = vpop.permute.xlu2 %1016 }
 0x1b1   : > { %v1021_v4 = vpop.permute.xlu1 %1020 }
 0x1b2   : > { %1042 = vmatpush.bf16.msrb.mxu3 %v1021_v4 }
 0x1b6   : > { %1043 = vmatpush.bf16.msrb.mxu3 %v1019_v5 }
 0x1b9   : > { %v938_v17 = vpop.permute.xlu1 %937 }
 0x1ba   : > { %962 = vmatpush.bf16.msrb.mxu2 %v938_v17  ;;  %1044 = vmatpush.bf16.msrb.mxu3 %v1017_v11 }
 0x1be   : > { %963 = vmatpush.bf16.msrb.mxu2 %v936_v20 }
 0x1c1   : > { %v857_v21 = vpop.permute.xlu1 %856 }
 0x1c2   : > { %881 = vmatpush.bf16.msrb.mxu1 %v857_v21  ;;  %964 = vmatpush.bf16.msrb.mxu2 %v934_v22 }
 0x1f7   : > { %v572_v48 = vpop.f32.mrf.mxu1 }
 0x1f8   : > { %v577_v49 = vmul.f32 0.35355338, %v572_v48 }
 0x1fa   : > { %v1820_v52 = vsel %vm1800_vm4, %v577_v49, -1e+30 }
 0x1fb   : > { %711 = vmax.xlane.f32.xlu2 %v1820_v52 }
 0x1fc   : > { %v708_v26 = vpop.xlane.xlu0 %707 }
 0x1fe   : > { %v635_v54 = vpop.f32.mrf.mxu2 }
 0x1ff   : > { %v640_v55 = vmul.f32 0.35355338, %v635_v54  ;;  %v574_v0 = vpop.f32.mrf.mxu1 }
 0x200   : > { %v578_v6 = vmul.f32 0.35355338, %v574_v0 }
 0x201   : > { %v1825_v56 = vsel %vm1800_vm4, %v640_v55, -1e+30 }
 0x202   : > { %715 = vmax.xlane.f32.xlu0 %v1825_v56  ;;  %v1840_v9 = vsel %vm1809_vm5, %v578_v6, -1e+30 }
 0x204   : > { %v710_v30 = vpop.xlane.xlu1 %709 }
 0x205   : > { %v698_v60 = vpop.f32.mrf.mxu3 }
 0x206   : > { %v703_v61 = vmul.f32 0.35355338, %v698_v60  ;;  %v637_v62 = vpop.f32.mrf.mxu2 }
 0x207   : > { %v641_v63 = vmul.f32 0.35355338, %v637_v62 }
 0x208   : > { %v1830_v1 = vsel %vm1800_vm4, %v703_v61, -1e+30 }
 0x209   : > { %719 = vmax.xlane.f32.xlu2 %v1830_v1  ;;  %v1835_v2 = vsel %vm1809_vm5, %v641_v63, -1e+30 }
 0x20a   : > { %717 = vmax.xlane.f32.xlu1 %v1835_v2 }
 0x20d   : > { %v700_v7 = vpop.f32.mrf.mxu3 }
 0x20e   : > { %v704_v8 = vmul.f32 0.35355338, %v700_v7 }
 0x210   : > { %v1844_v10 = vsel %vm1809_vm5, %v704_v8, -1e+30 }
 0x211   : > { %713 = vmax.xlane.f32.xlu2 %v1840_v9  ;;  %721 = vmax.xlane.f32.xlu0 %v1844_v10 }
 0x26e   : > { %v712_v27 = vpop.xlane.xlu2 %711 }
 0x26f   : > { %v724_v28 = vsel %vm723_vm6, %v708_v26, %v712_v27 }
 0x275   : > { %v716_v29 = vpop.xlane.xlu0 %715 }
 0x276   : > { %v727_v36 = vsel %vm726_vm7, %v724_v28, %v716_v29 }
 0x27c   : > { %v720_v37 = vpop.xlane.xlu2 %719 }
 0x27d   : > { %v730_v38 = vsel %vm729_vm8, %v727_v36, %v720_v37  ;;  %v718_v43 = vpop.xlane.xlu1 %717 }
 0x27e   : > { %v732_v39 = vmax.f32 %v421_v35, %v730_v38 }
 0x280   : > { %1063 = vst.msk [vmem:[#allocation3] sm:$0xff] %vm1062_vm9, %v732_v39  ;;  %901 = vperm.xlu2 %1360, %v732_v39   ;;  %742 = vperm.xlu1 %1359, %v732_v39   ;;  %v734_v53 = vsub.f32 %v421_v35, %v732_v39 }
 0x282   : > { %v736_v54 = vmul.f32 1.442695, %v734_v53 }
 0x284   : > { %v714_v40 = vpop.xlane.xlu2 %713  ;;  %v722_v47 = vpop.xlane.xlu0 %721  ;;  %1374 = vpow2.f32 %v736_v54 }
 0x285   : > { %v725_v44 = vsel %vm723_vm6, %v710_v30, %v714_v40 }
 0x286   : > { %v728_v46 = vsel %vm726_vm7, %v725_v44, %v718_v43 }
 0x287   : > { %v731_v48 = vsel %vm729_vm8, %v728_v46, %v722_v47 }
 0x288   : > { %v733_v49 = vmax.f32 %v422_v45, %v731_v48  ;;  %1361 = vset.pattern.permute.xlu1 %v1492_v50  ;;  %1363 = vset.pattern.permute.xlu2 %v1491_v25 }
 0x289   : > { %982 = vperm.xlu1 %1361, %v732_v39  }
 0x28a   : > { %1064 = vst.msk [vmem:[#allocation3 + $0x8] sm:$0xff] %vm1062_vm9, %v733_v49  ;;  %905 = vperm.xlu0 %1364, %v733_v49   ;;  %747 = vperm.xlu2 %1363, %v733_v49   ;;  %v735_v55 = vsub.f32 %v422_v45, %v733_v49  ;;  %v1865_v58 = vpop.eup %1374 }
 0x28c   : > { %v738_v57 = vmul.f32 1.442695, %v735_v55 }
 0x28e   : > { %1376 = vpow2.f32 %v738_v57 }
 0x291   : > { %1362 = vset.pattern.permute.xlu1 %v1493_v51 }
 0x292   : > { %820 = vperm.xlu1 %1362, %v732_v39   ;;  %852 = vrot.lane.b32.xlu0 %v1679_v19, %s1487_s22 }
 0x293   : > { %1365 = vset.pattern.permute.xlu2 %v1492_v50  ;;  %1367 = vset.pattern.permute.xlu0 %v1491_v25 }
 0x294   : > { %986 = vperm.xlu2 %1365, %v733_v49  }
 0x29a   : > { %854 = vrot.lane.b32.xlu1 %v1670_v18, %s1487_s22  ;;  %789 = vrot.lane.b32.xlu0 %v1634_v14, %s1486_s21  ;;  %v1872_v18 = vpop.eup %1376 }
 0x29b   : > { %1368 = vset.pattern.permute.xlu1 %v1490_v24 }
 0x29c   : > { %1366 = vset.pattern.permute.xlu2 %v1493_v51 }
 0x29d   : > { %824 = vperm.xlu2 %1366, %v733_v49  }
 0x2a2   : > { %793 = vrot.lane.b32.xlu1 %v1616_v12, %s1486_s21  ;;  %768 = vperm.xlu0 %1367, %v1865_v58  }
 0x2a5   : > { %1014 = vrot.lane.b32.xlu2 %v1679_v19, %s1489_s24 }
 0x2aa   : > { %787 = vrot.lane.b32.xlu1 %v1643_v15, %s1486_s21  ;;  %1371 = vset.pattern.permute.xlu0 %v1490_v24 }
 0x2ab   : > { %927 = vperm.xlu0 %1371, %v1872_v18  }
 0x2ad   : > { %791 = vrot.lane.b32.xlu2 %v1619_v13, %s1486_s21 }
 0x2b2   : > { %923 = vperm.xlu1 %1368, %v1865_v58  }
 0x2b3   : > { %1372 = vset.pattern.permute.xlu0 %v1492_v50 }
 0x2b4   : > { %1008 = vperm.xlu0 %1372, %v1872_v18  }
 0x2b5   : > { %785 = vrot.lane.b32.xlu2 %v1652_v16, %s1486_s21 }
 0x2ba   : > { %1369 = vset.pattern.permute.xlu1 %v1492_v50 }
 0x2bb   : > { %1004 = vperm.xlu1 %1369, %v1865_v58  }
 0x2bd   : > { %842 = vperm.xlu2 %1366, %v1865_v58  }
 0x2c3   : > { %1370 = vset.pattern.permute.xlu1 %v1491_v25 }
 0x2c4   : > { %773 = vperm.xlu1 %1370, %v1872_v18  }
 0x2c5   : > { %846 = vperm.xlu2 %1366, %v1872_v18  }
 0x2da   : > { %v902_v12 = vpop.permute.xlu2 %901 }
 0x2db   : > { %v908_v13 = vsub.f32 %v1825_v56, %v902_v12 }
 0x2dd   : > { %v910_v14 = vmul.f32 1.442695, %v908_v13  ;;  %v423_v13 = vld [vmem:[#allocation4] sm:$0xff] }
 0x2df   : > { %1378 = vpow2.f32 %v910_v14 }
 0x2e4   : > { %v748_v15 = vpop.permute.xlu2 %747 }
 0x2e5   : > { %v1379_v19 = vpop.eup %1378  ;;  %v751_v27 = vsub.f32 %v1815_v42, %v748_v15 }
 0x2e6   : > { %v914_v16 = vsel %vm1800_vm4, %v1379_v19, 0.0 }
 0x2e7   : > { %v754_v35 = vmul.f32 1.442695, %v751_v27 }
 0x2ee   : > { %v987_v59 = vpop.permute.xlu2 %986  ;;  %916 = vadd.xlane.f32.xlu2 %v914_v16 }
 0x2ef   : > { %v990_v63 = vsub.f32 %v1844_v10, %v987_v59 }
 0x2f1   : > { %v993_v4 = vmul.f32 1.442695, %v990_v63 }
 0x2f2   : > { %v743_v60 = vpop.permute.xlu1 %742 }
 0x2f3   : > { %v750_v61 = vsub.f32 %v1806_v34, %v743_v60 }
 0x2f5   : > { %v752_v62 = vmul.f32 1.442695, %v750_v61 }
 0x2f7   : > { %1380 = vpow2.f32 %v752_v62  ;;  %v825_v0 = vpop.permute.xlu2 %824 }
 0x2f8   : > { %v828_v3 = vsub.f32 %v1840_v9, %v825_v0 }
 0x2fa   : > { %v831_v56 = vmul.f32 1.442695, %v828_v3 }
 0x2fb   : > { %v983_v5 = vpop.permute.xlu1 %982 }
 0x2fc   : > { %1382 = vpow2.f32 %v831_v56  ;;  %v989_v6 = vsub.f32 %v1830_v1, %v983_v5  ;;  %v906_v7 = vpop.permute.xlu0 %905 }
 0x2fd   : > { %v1381_v8 = vpop.eup %1380  ;;  %v909_v11 = vsub.f32 %v1835_v2, %v906_v7  ;;  %1384 = vpow2.f32 %v993_v4  ;;  %v425_v7 = vld [vmem:[#allocation5] sm:$0xff] }
 0x2fe   : > { %v991_v17 = vmul.f32 1.442695, %v989_v6  ;;  %v756_v34 = vsel %vm1800_vm4, %v1381_v8, 0.0 }
 0x2ff   : > { %v912_v10 = vmul.f32 1.442695, %v909_v11  ;;  %v1015_v20 = vpop.permute.xlu2 %1014  ;;  %760 = vadd.xlane.f32.xlu0 %v756_v34 }
 0x300   : > { %1386 = vpow2.f32 %v991_v17  ;;  %1045 = vmatpush.bf16.msrb.mxu3 %v1015_v20 }
 0x301   : > { %1388 = vpow2.f32 %v912_v10 }
 0x302   : > { %v1383_v9 = vpop.eup %1382 }
 0x303   : > { %v834_v21 = vsel %vm1809_vm5, %v1383_v9, 0.0  ;;  %v1900_v22 = vpop.eup %1384 }
 0x304   : > { %837 = vadd.xlane.f32.xlu1 %v834_v21  ;;  %v821_v1 = vpop.permute.xlu1 %820  ;;  %v853_v42 = vpop.permute.xlu0 %852  ;;  %v996_v4 = vsel %vm1809_vm5, %v1900_v22, 0.0 }
 0x305   : > { %v827_v2 = vsub.f32 %v1820_v52, %v821_v1 }
 0x306   : > { %v1387_v24 = vpop.eup %1386 }
 0x307   : > { %v1389_v26 = vpop.eup %1388  ;;  %v829_v28 = vmul.f32 1.442695, %v827_v2  ;;  %v995_v29 = vsel %vm1800_vm4, %v1387_v24, 0.0  ;;  %v1308_v30 = vpack.c.bf16 %v1900_v22, %v1387_v24  ;;  %v792_v44 = vpop.permute.xlu2 %791 }
 0x308   : > { %997 = vadd.xlane.f32.xlu2 %v995_v29  ;;  %v1305_v52 = vpack.c.bf16 %v1389_v26, %v1379_v19  ;;  %v915_v33 = vsel %vm1809_vm5, %v1389_v26, 0.0 }
 0x309   : > { %1390 = vpow2.f32 %v829_v28  ;;  %1309 = vmatmul.msk.bf16.vlgmr.msrb.gmra.mxu3 %vm1907_vm10, %v1308_v30 }
 0x30a   : > { %1306 = vmatmul.msk.bf16.vlgmr.msrb.gmra.mxu2 %vm1907_vm10, %v1305_v52  ;;  %1392 = vpow2.f32 %v754_v35  ;;  %v426_v35 = vld [vmem:[#allocation5 + $0x8] sm:$0xff] }
 0x30c   : > { %v855_v36 = vpop.permute.xlu1 %854  ;;  %v790_v46 = vpop.permute.xlu0 %789 }
 0x30d   : > { %882 = vmatpush.bf16.msrb.mxu1 %v855_v36 }
 0x30f   : > { %v1391_v37 = vpop.eup %1390  ;;  %v786_v48 = vpop.permute.xlu2 %785 }
 0x310   : > { %v833_v38 = vsel %vm1800_vm4, %v1391_v37, 0.0  ;;  %v1302_v39 = vpack.c.bf16 %v1383_v9, %v1391_v37  ;;  %v1393_v43 = vpop.eup %1392 }
 0x311   : > { %883 = vmatpush.bf16.msrb.mxu1 %v853_v42  ;;  %835 = vadd.xlane.f32.xlu0 %v833_v38  ;;  %v757_v45 = vsel %vm1809_vm5, %v1393_v43, 0.0  ;;  %v1299_v49 = vpack.c.bf16 %v1393_v43, %v1381_v8 }
 0x314   : > { %v794_v40 = vpop.permute.xlu1 %793  ;;  %1303 = vmatmul.msk.bf16.vlgmr.msrb.gmra.mxu1 %vm1907_vm10, %v1302_v39  ;;  %v769_v50 = vpop.permute.xlu0 %768 }
 0x315   : > { %803 = vmatpush.bf16.msrb.mxu0 %v794_v40  ;;  %v776_v11 = vmul.f32 %v769_v50, %v425_v7  ;;  %v424_v50 = vld [vmem:[#allocation4 + $0x8] sm:$0xff] }
 0x317   : > { %v843_v51 = vpop.permute.xlu2 %842 }
 0x318   : > { %v849_v17 = vmul.f32 %v843_v51, %v425_v7  ;;  %v759_v51 = vmul.f32 %v1872_v18, %v424_v50 }
 0x319   : > { %804 = vmatpush.bf16.msrb.mxu0 %v792_v44  ;;  %762 = vadd.xlane.f32.xlu0 %v757_v45 }
 0x31c   : > { %v788_v47 = vpop.permute.xlu1 %787 }
 0x31d   : > { %805 = vmatpush.bf16.msrb.mxu0 %v790_v46  ;;  %v1932_v53 = vpop.permute.xlu0 %927 }
 0x31e   : > { %v931_v42 = vmul.f32 %v1932_v53, %v426_v35 }
 0x31f   : > { %v847_v54 = vpop.permute.xlu2 %846 }
 0x320   : > { %v850_v37 = vmul.f32 %v847_v54, %v426_v35 }
 0x321   : > { %806 = vmatpush.bf16.msrb.mxu0 %v788_v47  ;;  %918 = vadd.xlane.f32.xlu0 %v915_v33 }
 0x324   : > { %v924_v5 = vpop.permute.xlu1 %923 }
 0x325   : > { %807 = vmatpush.bf16.msrb.mxu0 %v786_v48  ;;  %v930_v25 = vmul.f32 %v924_v5, %v425_v7 }
 0x326   : > { %v1934_v55 = vpop.permute.xlu0 %1008 }
 0x327   : > { %v1012_v44 = vmul.f32 %v1934_v55, %v426_v35 }
 0x329   : > { %808 = vmatpush.bf16.msrb.mxu0 %v1796_v31  ;;  %v758_v31 = vmul.f32 %v1865_v58, %v423_v13 }
 0x32d   : > { %809 = vmatpush.bf16.msrb.mxu0 %v1798_v32  ;;  %v1005_v6 = vpop.permute.xlu1 %1004 }
 0x32e   : > { %v1011_v41 = vmul.f32 %v1005_v6, %v425_v7 }
 0x331   : > { %810 = vmatpush.bf16.msrb.mxu0 %v1789_v23 }
 0x334   : > { %1300 = vmatmul.msk.bf16.vlgmr.msrb.gmra.mxu0 %vm1907_vm10, %v1299_v49 }
 0x336   : > { %v774_v21 = vpop.permute.xlu1 %773 }
 0x337   : > { %v777_v39 = vmul.f32 %v774_v21, %v426_v35 }
 0x361   : > { %v917_v57 = vpop.xlane.xlu2 %916 }
 0x362   : > { %v920_v19 = vadd.f32 %v917_v57, %v758_v31 }
 0x372   : > { %v761_v12 = vpop.xlane.xlu0 %760 }
 0x373   : > { %v764_v15 = vadd.f32 %v761_v12, %v758_v31 }
 0x377   : > { %v838_v24 = vpop.xlane.xlu1 %837 }
 0x378   : > { %v840_v57 = vadd.f32 %v838_v24, %v759_v51 }
 0x37b   : > { %v998_v14 = vpop.xlane.xlu2 %997 }
 0x37c   : > { %v1001_v16 = vadd.f32 %v998_v14, %v758_v31 }
 0x384   : > { %v836_v32 = vpop.xlane.xlu0 %835 }
 0x385   : > { %v839_v23 = vadd.f32 %v836_v32, %v758_v31 }
 0x387   : > { %v1065_v59 = vsel %vm723_vm6, %v764_v15, %v839_v23 }
 0x388   : > { %v1067_v60 = vsel %vm726_vm7, %v1065_v59, %v920_v19 }
 0x389   : > { %v1069_v61 = vsel %vm729_vm8, %v1067_v60, %v1001_v16 }
 0x38a   : > { %1071 = vst.msk [vmem:[#allocation4] sm:$0xff] %vm1062_vm9, %v1069_v61 }
 0x38c   : > { %v1047_v58 = vpop.f32.mrf.mxu3  ;;  %v763_v2 = vpop.xlane.xlu0 %762 }
 0x38d   : > { %v966_v62 = vpop.f32.mrf.mxu2  ;;  %v765_v53 = vadd.f32 %v763_v2, %v759_v51 }
 0x38e   : > { %973 = vrot.lane.b32.xlu1 %v966_v62, %s1494_s12 }
 0x38f   : > { %v1066_v55 = vsel %vm723_vm6, %v765_v53, %v840_v57 }
 0x391   : > { %v885_v63 = vpop.f32.mrf.mxu1 }
 0x392   : > { %892 = vrot.lane.b32.xlu2 %v885_v63, %s1495_s27 }
 0x394   : > { %v1049_v56 = vpop.f32.mrf.mxu3  ;;  %v919_v22 = vpop.xlane.xlu0 %918 }
 0x395   : > { %v968_v0 = vpop.f32.mrf.mxu2  ;;  %v921_v54 = vadd.f32 %v919_v22, %v759_v51 }
 0x396   : > { %975 = vrot.lane.b32.xlu0 %v968_v0, %s1494_s12 }
 0x397   : > { %v1068_v31 = vsel %vm726_vm7, %v1066_v55, %v921_v54 }
 0x399   : > { %v887_v3 = vpop.f32.mrf.mxu1 }
 0x39a   : > { %894 = vrot.lane.b32.xlu2 %v887_v3, %s1495_s27 }
 0x39e   : > { %1056 = vrot.lane.b32.xlu0 %v1049_v56, %s1496_s28 }
 0x3a2   : > { %1054 = vrot.lane.b32.xlu2 %v1047_v58, %s1496_s28 }
 0x3b1   : > { %v812_v8 = vpop.f32.mrf.mxu0 }
 0x3b2   : > { %v817_v10 = vadd.f32 %v812_v8, %v776_v11 }
 0x3b8   : > { %999 = vadd.xlane.f32.xlu1 %v996_v4 }
 0x3b9   : > { %v814_v38 = vpop.f32.mrf.mxu0 }
 0x3ba   : > { %v818_v45 = vadd.f32 %v814_v38, %v777_v39 }
 0x3ec   : > { %v893_v34 = vpop.permute.xlu2 %892 }
 0x3ed   : > { %v898_v20 = vadd.f32 %v893_v34, %v849_v17 }
 0x3ef   : > { %v1073_v9 = vsel %vm472_vm3, %v817_v10, %v898_v20 }
 0x3f4   : > { %v895_v1 = vpop.permute.xlu2 %894 }
 0x3f5   : > { %v899_v40 = vadd.f32 %v895_v1, %v850_v37 }
 0x3f7   : > { %v1074_v47 = vsel %vm472_vm3, %v818_v45, %v899_v40 }
 0x3fc   : > { %v1055_v26 = vpop.permute.xlu2 %1054 }
 0x3fd   : > { %v1060_v29 = vadd.f32 %v1055_v26, %v1011_v41 }
 0x400   : > { %v974_v27 = vpop.permute.xlu1 %973 }
 0x401   : > { %v979_v28 = vadd.f32 %v974_v27, %v930_v25 }
 0x403   : > { %v1076_v30 = vsel %vm1075_vm11, %v1073_v9, %v979_v28 }
 0x404   : > { %v1079_v52 = vsel %vm1078_vm12, %v1076_v30, %v1060_v29 }
 0x405   : > { %1082 = vst.msk [vmem:[#allocation5] sm:$0xff] %vm1081_vm13, %v1079_v52 }
 0x408   : > { %v976_v36 = vpop.permute.xlu0 %975 }
 0x409   : > { %v980_v43 = vadd.f32 %v976_v36, %v931_v42 }
 0x40b   : > { %v1077_v48 = vsel %vm1075_vm11, %v1074_v47, %v980_v43 }
 0x410   : > { %v1057_v46 = vpop.permute.xlu0 %1056 }
 0x411   : > { %v1061_v33 = vadd.f32 %v1057_v46, %v1012_v44 }
 0x413   : > { %v1080_v49 = vsel %vm1078_vm12, %v1077_v48, %v1061_v33 }
 0x414   : > { %1083 = vst.msk [vmem:[#allocation5 + $0x8] sm:$0xff] %vm1081_vm13, %v1080_v49 }
 0x42b   : > { %v1000_v12 = vpop.xlane.xlu1 %999 }
 0x42c   : > { %v1002_v13 = vadd.f32 %v1000_v12, %v759_v51 }
 0x42e   : > { %v1070_v14 = vsel %vm729_vm8, %v1068_v31, %v1002_v13 }
 0x42f   : > { %1072 = vst.msk [vmem:[#allocation4 + $0x8] sm:$0xff] %vm1062_vm9, %v1070_v14 }
 0x430 PF: > { %s1084_s29 = sld [smem:[#allocation11 + %s1577_s3]] }
 0x436   : > { %p1310_p9 = scmp.ne.s32.totalorder %s1084_s29, 1 }
 0x438   : > { %1088 = sbr.rel (%p1310_p9) target bundleno = 1232 (0x4d0), region = 52 }
 0x43d   : > { %v1090_v32 = vld [vmem:[#allocation4 + $0x8] sm:$0xff]  ;;  %v1089_v18 = vld [vmem:[#allocation4] sm:$0xff]  ;;  %v1497_v15 = vmov 0   ;;  %v1498_v16 = vmov 2   ;;  %v1499_v61 = vmov 1   ;;  %v1500_v62 = vmov 3  }
 0x43e   : > { %1396 = vset.pattern.permute.xlu1 %v1497_v15  ;;  %1394 = vset.pattern.permute.xlu0 %v1497_v15  ;;  %v1092_v23 = vmax.f32 %v1090_v32, 1e-30  ;;  %v1091_v19 = vmax.f32 %v1089_v18, 1e-30  ;;  %v1096_v5 = vld [vmem:[#allocation5 + $0x8] sm:$0xff]  ;;  %v1095_v6 = vld [vmem:[#allocation5] sm:$0xff] }
 0x43f   : > { %1398 = vset.pattern.permute.xlu2 %v1498_v16  ;;  %vm1139_vm14 = vcmask 64512   ;;  %vm1142_vm15 = vcmask 130048   ;;  %vm1145_vm0 = vcmask 195584   ;;  %vm1148_vm1 = vcmask 261120  }
 0x440   : > { %1402 = vrcp.f32 %v1092_v23 }
 0x441   : > { %1404 = vrcp.f32 %v1091_v19 }
 0x446   : > { %v1403_v59 = vpop.eup %1402 }
 0x447   : > { %v1405_v60 = vpop.eup %1404  ;;  %1104 = vperm.xlu1 %1396, %v1403_v59  }
 0x448   : > { %1099 = vperm.xlu0 %1394, %v1405_v60   ;;  %1120 = vperm.xlu2 %1398, %v1405_v60  }
 0x44f   : > { %1397 = vset.pattern.permute.xlu1 %v1499_v61 }
 0x450   : > { %1395 = vset.pattern.permute.xlu0 %v1499_v61  ;;  %1114 = vperm.xlu1 %1397, %v1403_v59  }
 0x451   : > { %1110 = vperm.xlu0 %1395, %v1405_v60   ;;  %1124 = vperm.xlu2 %1398, %v1403_v59  }
 0x458   : > { %1399 = vset.pattern.permute.xlu1 %v1500_v62 }
 0x459   : > { %1130 = vperm.xlu1 %1399, %v1405_v60   ;;  %1400 = vset.pattern.permute.xlu2 %v1500_v62 }
 0x45a   : > { %1134 = vperm.xlu2 %1400, %v1403_v59   ;;  %1401 = vset.pattern.permute.xlu0 %v1500_v62 }
 0x4a2   : > { %v1121_v63 = vpop.permute.xlu2 %1120 }
 0x4a3   : > { %v1127_v21 = vmul.f32 %v1121_v63, %v1095_v6 }
 0x4ab   : > { %v1125_v3 = vpop.permute.xlu2 %1124 }
 0x4ac   : > { %v1128_v20 = vmul.f32 %v1125_v3, %v1096_v5 }
 0x4b4   : > { %v1135_v34 = vpop.permute.xlu2 %1134 }
 0x4b5   : > { %v1138_v1 = vmul.f32 %v1135_v34, %v1096_v5 }
 0x4b9   : > { %v1105_v58 = vpop.permute.xlu1 %1104 }
 0x4ba   : > { %v1100_v0 = vpop.permute.xlu0 %1099  ;;  %v1108_v11 = vmul.f32 %v1105_v58, %v1096_v5 }
 0x4bb   : > { %v1107_v17 = vmul.f32 %v1100_v0, %v1095_v6 }
 0x4c2   : > { %v1115_v56 = vpop.permute.xlu1 %1114 }
 0x4c3   : > { %v1111_v4 = vpop.permute.xlu0 %1110  ;;  %v1118_v7 = vmul.f32 %v1115_v56, %v1096_v5 }
 0x4c4   : > { %v1117_v8 = vmul.f32 %v1111_v4, %v1095_v6 }
 0x4c5   : > { %v1141_v10 = vsel %vm1139_vm14, %v1108_v11, %v1118_v7 }
 0x4c6   : > { %v1140_v9 = vsel %vm1139_vm14, %v1107_v17, %v1117_v8  ;;  %v1144_v24 = vsel %vm1142_vm15, %v1141_v10, %v1128_v20 }
 0x4c7   : > { %v1143_v26 = vsel %vm1142_vm15, %v1140_v9, %v1127_v21  ;;  %v1147_v22 = vsel %vm1145_vm0, %v1144_v24, %v1138_v1 }
 0x4c8   : > { %1150 = vst.msk [vmem:[%s1603_s30 + $0x8] sm:$0xff] %vm1148_vm1, %v1147_v22 }
 0x4cb   : > { %v1131_v2 = vpop.permute.xlu1 %1130 }
 0x4cc   : > { %v1137_v25 = vmul.f32 %v1131_v2, %v1095_v6 }
 0x4ce   : > { %v1146_v41 = vsel %vm1145_vm0, %v1143_v26, %v1137_v25 }
 0x4cf   : > { %1149 = vst.msk [vmem:[%s1603_s30] sm:$0xff] %vm1148_vm1, %v1146_v41 }
 0x4d0 PF: > { %s48_s2 = sadd.s32 1, %s1474_s2  }
 0x4d1   : > { %p45_p10 = scmp.ge.s32.totalorder %s48_s2, 4  }
 0x4d3   :  { %47 = sbr.rel (!%p45_p10) target bundleno = 14 (0xe), region = 88 }

// kernel: stagen_forward.5
= control target key start
LH: loop header
LB: loop body
LE: loop exit
PB: predicated region body
PF: predicated region fallthrough
CT: control target
= control target key end

     0   :  { %s2593_s22 = smov 0   ;;  %s3306_s0 = inlined_call_operand.vmem [shape: f32[32,32], index: 0, kind: input, shape index: {}]   ;;  %s3307_s1 = inlined_call_operand.vmem [shape: bf16[32,64], index: 1, kind: input, shape index: {}]   ;;  %s3308_s2 = inlined_call_operand.vmem [shape: f32[1,64], index: 2, kind: input, shape index: {}]   ;;  %s3309_s3 = inlined_call_operand.vmem [shape: bf16[64,32], index: 3, kind: input, shape index: {}]   ;;  %s3310_s4 = inlined_call_operand.vmem [shape: f32[1,32], index: 4, kind: input, shape index: {}]   ;;  %s3311_s5 = inlined_call_operand.vmem [shape: bf16[32,16], index: 5, kind: input, shape index: {}]   ;;  %s3312_s6 = inlined_call_operand.vmem [shape: f32[1,16], index: 6, kind: input, shape index: {}]   ;;  %s3313_s7 = inlined_call_operand.vmem [shape: bf16[16,32], index: 7, kind: input, shape index: {}]   ;;  %s3314_s8 = inlined_call_operand.vmem [shape: f32[1,32], index: 8, kind: input, shape index: {}]   ;;  %s3315_s9 = inlined_call_operand.vmem [shape: f32[1,32], index: 9, kind: input, shape index: {}]   ;;  %s3316_s10 = inlined_call_operand.vmem [shape: f32[1,32], index: 10, kind: input, shape index: {}]   ;;  %s3317_s11 = inlined_call_operand.vmem [shape: f32[1,32], index: 11, kind: input, shape index: {}]   ;;  %s3318_s12 = inlined_call_operand.vmem [shape: f32[1,32], index: 12, kind: input, shape index: {}]   ;;  %s3319_s13 = inlined_call_operand.<no memory space> [shape: f32[1,1], index: 13, kind: input, shape index: {}]   ;;  %s3320_s15 = inlined_call_operand.vmem [shape: f32[32,32], index: 15, kind: output, shape index: {}]   ;;  %s3321_s14 = inlined_call_operand.<no memory space> [shape: f32[1,1], index: 14, kind: input, shape index: {}]  }
   0x1   :  { %v20_v0 = vstv %s3319_s13  ;;  %v22_v1 = vstv %s3321_s14 }
   0x2   :  { %21 = vst [vmem:[#allocation2] sm:$0x1] %v20_v0 }
   0x3   :  { %23 = vst [vmem:[#allocation3] sm:$0x1] %v22_v1 }
   0x4 LB: > { %s2190_s23 = sadd.s32 4294967295, %s2492_s22   ;;  %p2194_p0 = scmp.ge.s32.totalorder %s2492_s22, 1  ;;  %s2492_s22 = sphi %s2593_s22, %s29_s22  }
   0x5   : > { %p442_p1 = scmp.lt.s32.totalorder %s2492_s22, 3 }
   0x7   : > { %p443_p2 = pnand %p2194_p0, %p442_p1 }
   0x9   : > { %446 = sbr.rel (%p443_p2) target bundleno = 3597 (0xe0d), region = 80 }
   0xe   : > { %s2195_s13 = sshll.u32 %s2190_s23, 1  ;;  %v2604_v2 = vld [vmem:[%s3307_s1] sm:$0xf]  ;;  %v2609_v3 = vld [vmem:[%s3307_s1] sm:$0xf0]  ;;  %s2747_s24 = smov 0  }
   0xf   : > { %3322 = vst [vmem:[#allocation4_spill] sm:$0xff] %v2604_v2  ;;  %p491_p3 = scmp.lt.s32.totalorder %s2195_s13, 3  ;;  %v2614_v4 = vld [vmem:[%s3307_s1 + $0x8] sm:$0xf]  ;;  %v2619_v5 = vld [vmem:[%s3307_s1 + $0x8] sm:$0xf0] }
  0x10   : > { %3323 = vst [vmem:[#allocation5_spill] sm:$0xff] %v2609_v3  ;;  %v2624_v6 = vld [vmem:[%s3308_s2] sm:$0x1]  ;;  %v2634_v8 = vld [vmem:[%s3309_s3] sm:$0xf0] }
  0x11   : > { %3324 = vst [vmem:[#allocation6_spill] sm:$0xff] %v2614_v4  ;;  %v2629_v7 = vld [vmem:[%s3309_s3] sm:$0xf]  ;;  %s3385_s13 = smov (!%p491_p3, %s2195_s13), 3  ;;  %v2639_v9 = vld [vmem:[%s3309_s3 + $0x8] sm:$0xf] }
  0x12   : > { %3325 = vst [vmem:[#allocation7_spill] sm:$0xff] %v2619_v5  ;;  %v2644_v10 = vld [vmem:[%s3309_s3 + $0x8] sm:$0xf0]  ;;  %v2649_v11 = vld [vmem:[%s3309_s3 + $0x10] sm:$0xf]  ;;  %s2196_s17 = sshll.u32 %s3385_s13, 3 }
  0x13   : > { %3326 = vst [vmem:[#allocation8_spill] sm:$0xff] %v2624_v6  ;;  %v2654_v12 = vld [vmem:[%s3309_s3 + $0x10] sm:$0xf0]  ;;  %v2659_v13 = vld [vmem:[%s3309_s3 + $0x18] sm:$0xf]  ;;  %s2674_s14 = scalar_lea.vmem %s3320_s15, %s2196_s17  ;;  %s494_s18 = scalar_lea.vmem %s3306_s0, %s2196_s17 }
  0x14   : > { %3327 = vst [vmem:[#allocation9_spill] sm:$0xff] %v2629_v7  ;;  %v2664_v14 = vld [vmem:[%s3309_s3 + $0x18] sm:$0xf0]  ;;  %v2669_v15 = vld [vmem:[%s3310_s4] sm:$0x1]  ;;  %v532_v31 = vld [vmem:[%s494_s18 + $0x8] sm:$0xff]  }
  0x15   : > { %3328 = vst [vmem:[#allocation10_spill] sm:$0xff] %v2634_v8  ;;  %v2679_v16 = vld [vmem:[%s3311_s5] sm:$0xf]  ;;  %v2684_v17 = vld [vmem:[%s3311_s5] sm:$0xf0] }
  0x16   : > { %3329 = vst [vmem:[#allocation11_spill] sm:$0xff] %v2639_v9  ;;  %v2689_v18 = vld [vmem:[%s3311_s5 + $0x8] sm:$0xf]  ;;  %v2697_v19 = vld [vmem:[%s3311_s5 + $0x8] sm:$0xf0]  ;;  %v531_v30 = vld [vmem:[%s494_s18] sm:$0xff]  }
  0x17   : > { %3330 = vst [vmem:[#allocation12_spill] sm:$0xff] %v2644_v10  ;;  %v2702_v20 = vld [vmem:[%s3312_s6] sm:$0x1]  ;;  %v2712_v22 = vld [vmem:[%s3313_s7] sm:$0xf0] }
  0x18   : > { %3331 = vst [vmem:[#allocation13_spill] sm:$0xff] %v2649_v11  ;;  %v2707_v21 = vld [vmem:[%s3313_s7] sm:$0xf] }
  0x19   : > { %3332 = vst [vmem:[#allocation14_spill] sm:$0xff] %v2654_v12  ;;  %v2717_v23 = vld [vmem:[%s3314_s8] sm:$0x1]  ;;  %v2741_v29 = vld [vmem:[#allocation3] sm:$0x1] }
  0x1a   : > { %3333 = vst [vmem:[#allocation15_spill] sm:$0xff] %v2659_v13  ;;  %v2722_v24 = vld [vmem:[%s3315_s9] sm:$0x1] }
  0x1b   : > { %3334 = vst [vmem:[#allocation16_spill] sm:$0xff] %v2664_v14  ;;  %v2727_v25 = vld [vmem:[%s3316_s10] sm:$0x1] }
  0x1c   : > { %3335 = vst [vmem:[#allocation17_spill] sm:$0xff] %v2669_v15  ;;  %v2732_v26 = vld [vmem:[%s3317_s11] sm:$0x1] }
  0x1d   : > { %3336 = vst [vmem:[#allocation18_spill] sm:$0xff] %v2679_v16  ;;  %v2737_v27 = vld [vmem:[%s3318_s12] sm:$0x1] }
  0x1e   : > { %3337 = vst [vmem:[#allocation19_spill] sm:$0xff] %v2684_v17  ;;  %v2739_v28 = vld [vmem:[#allocation2] sm:$0x1] }
  0x1f   : > { %3338 = vst [vmem:[#allocation20_spill] sm:$0xff] %v2689_v18 }
  0x20   : > { %3339 = vst [vmem:[#allocation21_spill] sm:$0xff] %v2697_v19 }
  0x21   : > { %3340 = vst [vmem:[#allocation22_spill] sm:$0xff] %v2702_v20 }
  0x22   : > { %3341 = vst [vmem:[#allocation23_spill] sm:$0xff] %v2707_v21 }
  0x23   : > { %3342 = vst [vmem:[#allocation24_spill] sm:$0xff] %v2712_v22 }
  0x24   : > { %3343 = vst [vmem:[#allocation25_spill] sm:$0xff] %v2717_v23 }
  0x25   : > { %3344 = vst [vmem:[#allocation26_spill] sm:$0xff] %v2722_v24 }
  0x26   : > { %3345 = vst [vmem:[#allocation27_spill] sm:$0xff] %v2727_v25 }
  0x27   : > { %3346 = vst [vmem:[#allocation28_spill] sm:$0xff] %v2732_v26 }
  0x28   : > { %3347 = vst [vmem:[#allocation29_spill] sm:$0xff] %v2737_v27 }
  0x29   : > { %3348 = vst [vmem:[#allocation30_spill] sm:$0xff] %v2739_v28 }
  0x2a LB: >> { %v3349_v4 = vld [vmem:[#allocation6_spill] sm:$0xff]  ;;  %v3350_v5 = vld [vmem:[#allocation7_spill] sm:$0xff]  ;;  %v3351_v18 = vld [vmem:[#allocation20_spill] sm:$0xff]  ;;  %v541_v36 = vpack.c.bf16 %v2496_v31, %v2500_v30  ;;  %vm557_vm0 = vcmask 261120   ;;  %vm621_vm1 = vcmask 523264   ;;  %vm696_vm2 = vcmask 130048   ;;  %s2504_s24 = sphi %s2747_s24, %s538_s24   ;;  %v2500_v30 = vphi %v531_v30, %v3383_v30   ;;  %v2496_v31 = vphi %v532_v31, %v3382_v31  }
  0x2b   : >> { %v2760_v32 = vor.u32 %v3350_v5, %v3349_v4  ;;  %v3352_v19 = vld [vmem:[#allocation21_spill] sm:$0xff]  ;;  %v3353_v2 = vld [vmem:[#allocation4_spill] sm:$0xff]  ;;  %v3355_v16 = vld [vmem:[#allocation18_spill] sm:$0xff]  ;;  %s538_s24 = sadd.s32 1, %s2504_s24  }
  0x2c   : >> { %v2764_v33 = vor.u32 %v3352_v19, %v3351_v18  ;;  %v3354_v3 = vld [vmem:[#allocation5_spill] sm:$0xff]  ;;  %v3356_v17 = vld [vmem:[#allocation19_spill] sm:$0xff]  ;;  %v3358_v14 = vld [vmem:[#allocation16_spill] sm:$0xff]  ;;  %p535_p4 = scmp.ge.s32.totalorder %s538_s24, 4  }
  0x2d   : >> { %567 = vmatpush.bf16.msra.mxu0 %v2760_v32  ;;  %v2770_v34 = vor.u32 %v3354_v3, %v3353_v2  ;;  %v2774_v35 = vor.u32 %v3356_v17, %v3355_v16  ;;  %v3357_v13 = vld [vmem:[#allocation15_spill] sm:$0xff]  ;;  %v3359_v11 = vld [vmem:[#allocation13_spill] sm:$0xff]  ;;  %v3360_v12 = vld [vmem:[#allocation14_spill] sm:$0xff] }
  0x2e   : >> { %660 = vmatpush.bf16.msra.mxu2 %v2764_v33  ;;  %v2788_v37 = vor.u32 %v3358_v14, %v3357_v13  ;;  %v2794_v38 = vor.u32 %v3360_v12, %v3359_v11  ;;  %v3361_v9 = vld [vmem:[#allocation11_spill] sm:$0xff]  ;;  %v3362_v10 = vld [vmem:[#allocation12_spill] sm:$0xff]  ;;  %v3364_v7 = vld [vmem:[#allocation9_spill] sm:$0xff] }
  0x2f   : >> { %v2800_v39 = vor.u32 %v3362_v10, %v3361_v9  ;;  %v3363_v6 = vld [vmem:[#allocation8_spill] sm:$0xff]  ;;  %v3365_v8 = vld [vmem:[#allocation10_spill] sm:$0xff]  ;;  %v3367_v21 = vld [vmem:[#allocation23_spill] sm:$0xff] }
  0x30   : >> { %629 = vmatpush.bf16.msra.mxu1 %v2788_v37  ;;  %v2805_v40 = vperm.slane %v3363_v6, 0  ;;  %v2809_v41 = vor.u32 %v3365_v8, %v3364_v7  ;;  %v3366_v20 = vld [vmem:[#allocation22_spill] sm:$0xff]  ;;  %v3368_v22 = vld [vmem:[#allocation24_spill] sm:$0xff]  ;;  %v3369_v15 = vld [vmem:[#allocation17_spill] sm:$0xff] }
  0x31   : >> { %568 = vmatpush.bf16.msra.mxu0 %v2770_v34  ;;  %v2816_v45 = vperm.slane %v3366_v20, 0  ;;  %v2822_v51 = vor.u32 %v3368_v22, %v3367_v21  ;;  %v3370_v23 = vld [vmem:[#allocation25_spill] sm:$0xff]  ;;  %v3371_v26 = vld [vmem:[#allocation28_spill] sm:$0xff]  ;;  %v3373_v24 = vld [vmem:[#allocation26_spill] sm:$0xff] }
  0x32   : >> { %661 = vmatpush.bf16.msra.mxu2 %v2774_v35  ;;  %v3372_v27 = vld [vmem:[#allocation29_spill] sm:$0xff]  ;;  %v3374_v25 = vld [vmem:[#allocation27_spill] sm:$0xff]  ;;  %v3375_v28 = vld [vmem:[#allocation30_spill] sm:$0xff] }
  0x33   : >> { %707 = vmatpush.bf16.msra.mxu3 %v2822_v51 }
  0x34   : >> { %2207 = vmatmul.msk.bf16.vlgmr.msra.gmra.mxu0 %vm557_vm0, %v541_v36  ;;  %630 = vmatpush.bf16.msra.mxu1 %v2794_v38 }
  0x35   : >> { %2233 = vmatmul.msk.bf16.vlgmr.msra.gmra.mxu2 %vm557_vm0, %v541_v36  ;;  %914 = vmatpush.bf16.msrb.mxu0 %v2788_v37 }
  0x36   : >> { %930 = vmatpush.bf16.msrb.mxu2 %v2764_v33 }
  0x37   : >> { %880 = vmatpush.bf16.msrb.mxu3 %v2760_v32 }
  0x38   : >> { %631 = vmatpush.bf16.msra.mxu1 %v2800_v39 }
  0x39   : >> { %915 = vmatpush.bf16.msrb.mxu0 %v2794_v38 }
  0x3a   : >> { %931 = vmatpush.bf16.msrb.mxu2 %v2774_v35 }
  0x3b   : >> { %881 = vmatpush.bf16.msrb.mxu3 %v2770_v34 }
  0x3c   : >> { %632 = vmatpush.bf16.msra.mxu1 %v2809_v41 }
  0x3d   : >> { %916 = vmatpush.bf16.msrb.mxu0 %v2800_v39 }
  0x3e   : >> { %1174 = vmatpush.bf16.msra.mxu2 %v2764_v33 }
  0x40   : >> { %967 = vmatpush.bf16.msrb.mxu1 %v2822_v51 }
  0x41   : >> { %917 = vmatpush.bf16.msrb.mxu0 %v2809_v41 }
  0x42   : >> { %1175 = vmatpush.bf16.msra.mxu2 %v2774_v35 }
  0x45   : >> { %1158 = vmatpush.bf16.msra.mxu0 %v2788_v37 }
  0x49   : >> { %1159 = vmatpush.bf16.msra.mxu0 %v2794_v38 }
  0x4d   : >> { %1160 = vmatpush.bf16.msra.mxu0 %v2800_v39 }
  0x51   : >> { %1161 = vmatpush.bf16.msra.mxu0 %v2809_v41 }
  0xb1   : >> { %v570_v42 = vpop.f32.mrf.mxu0 }
  0xb2   : >> { %v571_v43 = vadd.f32 %v570_v42, %v2805_v40 }
  0xb4   : >> { %v577_v44 = vmul.f32 0.044715, %v571_v43 }
  0xb6   : >> { %v579_v46 = vmul.f32 %v577_v44, %v571_v43 }
  0xb8   : >> { %v663_v47 = vpop.f32.mrf.mxu2  ;;  %v581_v49 = vmul.f32 %v579_v46, %v571_v43 }
  0xb9   : >> { %v664_v48 = vadd.f32 %v663_v47, %v2816_v45  ;;  %v572_v50 = vpop.f32.mrf.mxu0 }
  0xba   : >> { %v573_v53 = vadd.f32 %v572_v50, %v2805_v40  ;;  %v583_v54 = vadd.f32 %v581_v49, %v571_v43  ;;  %v575_v49 = vmul.f32 0.5, %v571_v43 }
  0xbb   : >> { %v670_v52 = vand.u32 2147483647, %v664_v48  ;;  %v668_v43 = vmax.f32 %v664_v48, 0.0  ;;  %v2844_v48 = vperm.slane %v3371_v26, 0 }
  0xbc   : >> { %v578_v56 = vmul.f32 0.044715, %v573_v53  ;;  %v585_v59 = vmul.f32 0.7978846, %v583_v54  ;;  %v576_v54 = vmul.f32 0.5, %v573_v53 }
  0xbd   : >> { %v672_v55 = vsub.f32 0.0, %v670_v52 }
  0xbe   : >> { %v580_v58 = vmul.f32 %v578_v56, %v573_v53 }
  0xbf   : >> { %v674_v57 = vmul.f32 1.442695, %v672_v55 }
  0xc0   : >> { %v665_v60 = vpop.f32.mrf.mxu2  ;;  %v582_v62 = vmul.f32 %v580_v58, %v573_v53 }
  0xc1   : >> { %2306 = vpow2.f32 %v674_v57  ;;  %v666_v61 = vadd.f32 %v665_v60, %v2816_v45 }
  0xc2   : >> { %v584_v0 = vadd.f32 %v582_v62, %v573_v53  ;;  %2308 = vtanh.f32 %v585_v59 }
  0xc3   : >> { %v671_v63 = vand.u32 2147483647, %v666_v61 }
  0xc4   : >> { %v586_v36 = vmul.f32 0.7978846, %v584_v0 }
  0xc5   : >> { %v673_v1 = vsub.f32 0.0, %v671_v63 }
  0xc6   : >> { %2310 = vtanh.f32 %v586_v36 }
  0xc7   : >> { %v2307_v42 = vpop.eup %2306  ;;  %v676_v44 = vmul.f32 1.442695, %v673_v1  ;;  %v669_v1 = vmax.f32 %v666_v61, 0.0 }
  0xc8   : >> { %v2309_v46 = vpop.eup %2308  ;;  %v678_v47 = vadd.f32 1.0, %v2307_v42 }
  0xc9   : >> { %2312 = vpow2.f32 %v676_v44  ;;  %v589_v50 = vadd.f32 1.0, %v2309_v46 }
  0xca   : >> { %2314 = vlog2.f32 %v678_v47  ;;  %v2838_v47 = vperm.slane %v3369_v15, 0 }
  0xcb   : >> { %v591_v58 = vmul.f32 %v589_v50, %v575_v49  ;;  %v2841_v49 = vperm.slane %v3370_v23, 0  ;;  %v2850_v50 = vperm.slane %v3372_v27, 0 }
  0xcc   : >> { %v2311_v52 = vpop.eup %2310 }
  0xcd   : >> { %v590_v55 = vadd.f32 1.0, %v2311_v52  ;;  %v2853_v52 = vperm.slane %v3373_v24, 0 }
  0xcf   : >> { %v2313_v56 = vpop.eup %2312  ;;  %v592_v60 = vmul.f32 %v590_v55, %v576_v54  ;;  %v2856_v54 = vperm.slane %v3374_v25, 0 }
  0xd0   : >> { %v679_v57 = vadd.f32 1.0, %v2313_v56  ;;  %v2315_v62 = vpop.eup %2314 }
  0xd1   : >> { %v593_v59 = vpack.c.bf16 %v592_v60, %v591_v58  ;;  %v681_v63 = vmul.f32 0.6931472, %v2315_v62 }
  0xd2   : >> { %2316 = vlog2.f32 %v679_v57 }
  0xd3   : >> { %2224 = vmatmul.msk.bf16.vlgmr.msra.gmra.mxu1 %vm621_vm1, %v593_v59  ;;  %v684_v42 = vadd.f32 %v681_v63, %v668_v43 }
  0xd4   : >> { %1211 = vmatpush.bf16.msra.mxu1 %v2822_v51 }
  0xd8   : >> { %v2317_v0 = vpop.eup %2316 }
  0xd9   : >> { %v683_v36 = vmul.f32 0.6931472, %v2317_v0 }
  0xdb   : >> { %v685_v53 = vadd.f32 %v683_v36, %v669_v1 }
  0xdd   : >> { %v686_v44 = vpack.c.bf16 %v685_v53, %v684_v42 }
  0xdf   : >> { %2238 = vmatmul.msk.bf16.vlgmr.msra.gmra.mxu3 %vm696_vm2, %v686_v44 }
  0xe0   : >> { %1124 = vmatpush.bf16.msra.mxu3 %v2760_v32 }
  0xe4   : >> { %1125 = vmatpush.bf16.msra.mxu3 %v2770_v34 }
 0x150   : >> { %v634_v46 = vpop.f32.mrf.mxu1 }
 0x151   : >> { %v2847_v61 = vadd.f32 %v634_v46, %v2838_v47 }
 0x153   : >> { %v778_v57 = vmul.f32 %v2844_v48, %v2847_v61  ;;  %v717_v60 = vmul.f32 %v2853_v52, %v2847_v61 }
 0x158   : >> { %v636_v62 = vpop.f32.mrf.mxu1 }
 0x159   : >> { %v2870_v43 = vadd.f32 %v636_v62, %v2838_v47 }
 0x15b   : >> { %v779_v44 = vmul.f32 %v2844_v48, %v2870_v43 }
 0x162   : >> { %v709_v55 = vpop.f32.mrf.mxu3 }
 0x163   : >> { %v2859_v56 = vadd.f32 %v709_v55, %v2841_v49  ;;  %v718_v55 = vmul.f32 %v2853_v52, %v2870_v43 }
 0x165   : >> { %v783_v58 = vmul.f32 %v2850_v50, %v2859_v56  ;;  %v722_v59 = vmul.f32 %v2856_v54, %v2859_v56 }
 0x167   : >> { %v785_v63 = vadd.f32 %v783_v58, %v778_v57  ;;  %v724_v0 = vadd.f32 %v722_v59, %v717_v60 }
 0x169   : >> { %v787_v1 = vsel %vm557_vm0, %v785_v63, 0.0  ;;  %v726_v36 = vsel %vm557_vm0, %v724_v0, 0.0  ;;  %v2506_v63 = vmov 0   ;;  %v2888_v0 = vperm.slane %v2741_v29, 0 }
 0x16a   : >> { %v711_v42 = vpop.f32.mrf.mxu3  ;;  %788 = vadd.xlane.f32.xlu1 %v787_v1  ;;  %727 = vadd.xlane.f32.xlu0 %v726_v36  ;;  %v2891_v1 = vperm.slane %v3375_v28, 0 }
 0x16b   : >> { %v2875_v53 = vadd.f32 %v711_v42, %v2841_v49  ;;  %2304 = vset.pattern.permute.xlu0 %v2506_v63  ;;  %2303 = vset.pattern.permute.xlu2 %v2506_v63 }
 0x16c   : >> { %2305 = vset.pattern.permute.xlu1 %v2506_v63 }
 0x16d   : >> { %v784_v46 = vmul.f32 %v2850_v50, %v2875_v53  ;;  %v723_v57 = vmul.f32 %v2856_v54, %v2875_v53 }
 0x16f   : >> { %v786_v58 = vadd.f32 %v784_v46, %v779_v44  ;;  %v725_v60 = vadd.f32 %v723_v57, %v718_v55 }
 0x171   : >> { %v790_v59 = vsel %vm557_vm0, %v786_v58, 0.0  ;;  %v729_v62 = vsel %vm557_vm0, %v725_v60, 0.0 }
 0x172   : >> { %791 = vadd.xlane.f32.xlu1 %v790_v59  ;;  %730 = vadd.xlane.f32.xlu0 %v729_v62 }
 0x1dd   : >> { %v789_v36 = vpop.xlane.xlu1 %788  ;;  %v728_v42 = vpop.xlane.xlu0 %727 }
 0x1de   : >> { %v796_v44 = vadd.f32 %v2888_v0, %v789_v36  ;;  %v735_v46 = vadd.f32 %v2891_v1, %v728_v42 }
 0x1e0   : >> { %v798_v55 = vsub.f32 0.0, %v796_v44  ;;  %v737_v57 = vsub.f32 0.0, %v735_v46 }
 0x1e2   : >> { %v800_v58 = vmul.f32 1.442695, %v798_v55  ;;  %v739_v60 = vmul.f32 1.442695, %v737_v57 }
 0x1e4   : >> { %2318 = vpow2.f32 %v800_v58 }
 0x1e5   : >> { %2320 = vpow2.f32 %v739_v60  ;;  %v792_v59 = vpop.xlane.xlu1 %791  ;;  %v731_v62 = vpop.xlane.xlu0 %730 }
 0x1e6   : >> { %v797_v2 = vadd.f32 %v2888_v0, %v792_v59  ;;  %v736_v3 = vadd.f32 %v2891_v1, %v731_v62 }
 0x1e8   : >> { %v799_v4 = vsub.f32 0.0, %v797_v2  ;;  %v738_v63 = vsub.f32 0.0, %v736_v3 }
 0x1ea   : >> { %v2319_v5 = vpop.eup %2318  ;;  %v802_v6 = vmul.f32 1.442695, %v799_v4  ;;  %v741_v8 = vmul.f32 1.442695, %v738_v63 }
 0x1eb   : >> { %v2321_v7 = vpop.eup %2320  ;;  %v804_v36 = vadd.f32 1.0, %v2319_v5 }
 0x1ec   : >> { %v743_v42 = vadd.f32 1.0, %v2321_v7  ;;  %2322 = vpow2.f32 %v802_v6 }
 0x1ed   : >> { %2324 = vrcp.f32 %v804_v36  ;;  %v815_v62 = vand.u32 2147483647, %v804_v36  ;;  %v817_v4 = vand.u32 2147483648, %v804_v36  ;;  %vm811_vm5 = vweird.f32 %v804_v36 }
 0x1ee   : >> { %2326 = vrcp.f32 %v743_v42  ;;  %v756_v6 = vand.u32 2147483648, %v743_v42  ;;  %vm750_vm7 = vweird.f32 %v743_v42 }
 0x1ef   : >> { %2328 = vpow2.f32 %v741_v8  ;;  %v754_v8 = vand.u32 2147483647, %v743_v42  ;;  %v818_v10 = vor.u32 1.1754944e-38, %v817_v4  ;;  %vm816_vm8 = vcmp.eq.f32.partialorder %v815_v62, 8.507059e+37 }
 0x1f1   : >> { %vm755_vm10 = vcmp.eq.f32.partialorder %v754_v8, 8.507059e+37 }
 0x1f2   : >> { %v2323_v44 = vpop.eup %2322 }
 0x1f3   : >> { %v2325_v46 = vpop.eup %2324  ;;  %v805_v55 = vadd.f32 1.0, %v2323_v44 }
 0x1f4   : >> { %v2327_v57 = vpop.eup %2326  ;;  %v807_v58 = vmul.f32 %v2325_v46, %v804_v36  ;;  %vm812_vm3 = vweird.f32 %v2325_v46 }
 0x1f5   : >> { %v2329_v60 = vpop.eup %2328  ;;  %2330 = vrcp.f32 %v805_v55  ;;  %v746_v59 = vmul.f32 %v2327_v57, %v743_v42  ;;  %vm751_vm4 = vweird.f32 %v2327_v57  ;;  %vm813_vm6 = vmor %vm811_vm5, %vm812_vm3  ;;  %v830_v4 = vand.u32 2147483647, %v805_v55 }
 0x1f6   : >> { %v744_v2 = vadd.f32 1.0, %v2329_v60  ;;  %v808_v3 = vsub.f32 1.0, %v807_v58  ;;  %vm752_vm9 = vmor %vm750_vm7, %vm751_vm4  ;;  %v757_v58 = vor.u32 1.1754944e-38, %v756_v6  ;;  %vm826_vm12 = vweird.f32 %v805_v55 }
 0x1f7   : >> { %v747_v9 = vsub.f32 1.0, %v746_v59  ;;  %vm831_vm15 = vcmp.eq.f32.partialorder %v830_v4, 8.507059e+37 }
 0x1f8   : >> { %2332 = vrcp.f32 %v744_v2  ;;  %v809_v5 = vmul.f32 %v2325_v46, %v808_v3  ;;  %vm765_vm3 = vweird.f32 %v744_v2 }
 0x1f9   : >> { %v748_v7 = vmul.f32 %v2327_v57, %v747_v9 }
 0x1fa   : >> { %v810_v63 = vadd.f32 %v2325_v46, %v809_v5  ;;  %v832_v5 = vand.u32 2147483648, %v805_v55 }
 0x1fb   : >> { %v2331_v44 = vpop.eup %2330  ;;  %v749_v11 = vadd.f32 %v2327_v57, %v748_v7 }
 0x1fc   : >> { %v814_v12 = vsel %vm813_vm6, %v2325_v46, %v810_v63  ;;  %v822_v60 = vmul.f32 %v2331_v44, %v805_v55  ;;  %vm827_vm11 = vweird.f32 %v2331_v44  ;;  %v771_v46 = vand.u32 2147483648, %v744_v2 }
 0x1fd   : >> { %v819_v59 = vsel %vm816_vm8, %v818_v10, %v814_v12  ;;  %v753_v13 = vsel %vm752_vm9, %v2327_v57, %v749_v11  ;;  %vm828_vm13 = vmor %vm826_vm12, %vm827_vm11  ;;  %v833_v62 = vor.u32 1.1754944e-38, %v832_v5  ;;  %v769_v10 = vand.u32 2147483647, %v744_v2 }
 0x1fe   : >> { %v2333_v3 = vpop.eup %2332  ;;  %850 = vperm.xlu0 %2304, %v819_v59   ;;  %v758_v9 = vsel %vm755_vm10, %v757_v58, %v753_v13  ;;  %v823_v14 = vsub.f32 1.0, %v822_v60  ;;  %v772_v57 = vor.u32 1.1754944e-38, %v771_v46 }
 0x1ff   : >> { %838 = vperm.xlu2 %2303, %v758_v9   ;;  %v761_v36 = vmul.f32 %v2333_v3, %v744_v2  ;;  %vm766_vm14 = vweird.f32 %v2333_v3  ;;  %vm770_vm5 = vcmp.eq.f32.partialorder %v769_v10, 8.507059e+37 }
 0x200   : >> { %v824_v15 = vmul.f32 %v2331_v44, %v823_v14  ;;  %vm767_vm4 = vmor %vm765_vm3, %vm766_vm14 }
 0x201   : >> { %v762_v7 = vsub.f32 1.0, %v761_v36 }
 0x202   : >> { %v825_v42 = vadd.f32 %v2331_v44, %v824_v15 }
 0x203   : >> { %v763_v6 = vmul.f32 %v2333_v3, %v762_v7 }
 0x204   : >> { %v829_v11 = vsel %vm828_vm13, %v2331_v44, %v825_v42 }
 0x205   : >> { %v834_v12 = vsel %vm831_vm15, %v833_v62, %v829_v11  ;;  %v764_v13 = vadd.f32 %v2333_v3, %v763_v6 }
 0x206   : >> { %855 = vperm.xlu1 %2305, %v834_v12  }
 0x207   : >> { %v768_v14 = vsel %vm767_vm4, %v2333_v3, %v764_v13 }
 0x208   : >> { %v773_v8 = vsel %vm770_vm5, %v772_v57, %v768_v14 }
 0x209   : >> { %843 = vperm.xlu2 %2303, %v773_v8  }
 0x259   : >> { %v839_v15 = vpop.permute.xlu2 %838 }
 0x25a   : >> { %v846_v58 = vmul.f32 %v839_v15, %v2847_v61 }
 0x263   : >> { %v844_v60 = vpop.permute.xlu2 %843 }
 0x264   : >> { %v847_v9 = vmul.f32 %v844_v60, %v2870_v43 }
 0x270   : >> { %v851_v55 = vpop.permute.xlu0 %850 }
 0x271   : >> { %v858_v63 = vmul.f32 %v851_v55, %v2859_v56 }
 0x273   : >> { %v2899_v59 = vadd.f32 %v858_v63, %v846_v58 }
 0x275   : >> { %v866_v3 = vmul.f32 0.05, %v2899_v59 }
 0x277   : >> { %v868_v4 = vadd.f32 %v2500_v30, %v866_v3 }
 0x278   : >> { %v856_v44 = vpop.permute.xlu1 %855 }
 0x279   : >> { %v859_v2 = vmul.f32 %v856_v44, %v2875_v53 }
 0x27b   : >> { %v2903_v5 = vadd.f32 %v859_v2, %v847_v9 }
 0x27d   : >> { %v867_v36 = vmul.f32 0.05, %v2903_v5 }
 0x27f   : >> { %v869_v56 = vadd.f32 %v2496_v31, %v867_v36 }
 0x281   : >> { %v870_v7 = vpack.c.bf16 %v869_v56, %v868_v4 }
 0x283   : >> { %2239 = vmatmul.msk.bf16.vlgmr.msrb.gmra.mxu3 %vm557_vm0, %v870_v7  ;;  %2241 = vmatmul.msk.bf16.vlgmr.msrb.gmra.mxu2 %vm557_vm0, %v870_v7 }
 0x284   : >> { %1426 = vmatpush.bf16.msrb.mxu2 %v2764_v33  ;;  %1376 = vmatpush.bf16.msrb.mxu3 %v2760_v32 }
 0x288   : >> { %1427 = vmatpush.bf16.msrb.mxu2 %v2774_v35  ;;  %1377 = vmatpush.bf16.msrb.mxu3 %v2770_v34 }
 0x306   : >> { %v883_v61 = vpop.f32.mrf.mxu3  ;;  %v933_v43 = vpop.f32.mrf.mxu2 }
 0x307   : >> { %v884_v53 = vadd.f32 %v883_v61, %v2805_v40  ;;  %v934_v42 = vadd.f32 %v933_v43, %v2816_v45 }
 0x309   : >> { %v890_v46 = vmul.f32 0.044715, %v884_v53  ;;  %v940_v62 = vand.u32 2147483647, %v934_v42 }
 0x30b   : >> { %v892_v6 = vmul.f32 %v890_v46, %v884_v53  ;;  %v942_v10 = vsub.f32 0.0, %v940_v62 }
 0x30d   : >> { %v894_v11 = vmul.f32 %v892_v6, %v884_v53  ;;  %v944_v12 = vmul.f32 1.442695, %v942_v10  ;;  %v888_v6 = vmul.f32 0.5, %v884_v53 }
 0x30e   : >> { %v885_v13 = vpop.f32.mrf.mxu3  ;;  %v935_v57 = vpop.f32.mrf.mxu2 }
 0x30f   : >> { %v896_v14 = vadd.f32 %v894_v11, %v884_v53  ;;  %v886_v8 = vadd.f32 %v885_v13, %v2805_v40  ;;  %v936_v15 = vadd.f32 %v935_v57, %v2816_v45  ;;  %2334 = vpow2.f32 %v944_v12 }
 0x311   : >> { %v891_v55 = vmul.f32 0.044715, %v886_v8  ;;  %v941_v63 = vand.u32 2147483647, %v936_v15  ;;  %v898_v58 = vmul.f32 0.7978846, %v896_v14 }
 0x312   : >> { %v889_v10 = vmul.f32 0.5, %v886_v8 }
 0x313   : >> { %v893_v60 = vmul.f32 %v891_v55, %v886_v8  ;;  %v943_v44 = vsub.f32 0.0, %v941_v63  ;;  %2336 = vtanh.f32 %v898_v58  ;;  %v938_v58 = vmax.f32 %v934_v42, 0.0 }
 0x315   : >> { %v895_v9 = vmul.f32 %v893_v60, %v886_v8  ;;  %v946_v2 = vmul.f32 1.442695, %v943_v44  ;;  %v2335_v3 = vpop.eup %2334  ;;  %v939_v60 = vmax.f32 %v936_v15, 0.0 }
 0x316   : >> { %v948_v56 = vadd.f32 1.0, %v2335_v3 }
 0x317   : >> { %v897_v36 = vadd.f32 %v895_v9, %v886_v8  ;;  %2338 = vpow2.f32 %v946_v2 }
 0x319   : >> { %v899_v4 = vmul.f32 0.7978846, %v897_v36  ;;  %v2337_v7 = vpop.eup %2336 }
 0x31a   : >> { %v902_v46 = vadd.f32 1.0, %v2337_v7 }
 0x31b   : >> { %2340 = vtanh.f32 %v899_v4 }
 0x31c   : >> { %2342 = vlog2.f32 %v948_v56  ;;  %v904_v13 = vmul.f32 %v902_v46, %v888_v6 }
 0x31d   : >> { %v2339_v61 = vpop.eup %2338 }
 0x31e   : >> { %v949_v43 = vadd.f32 1.0, %v2339_v61 }
 0x320   : >> { %2344 = vlog2.f32 %v949_v43 }
 0x321   : >> { %v2341_v62 = vpop.eup %2340 }
 0x322   : >> { %v903_v11 = vadd.f32 1.0, %v2341_v62  ;;  %v2343_v12 = vpop.eup %2342 }
 0x323   : >> { %v951_v55 = vmul.f32 0.6931472, %v2343_v12 }
 0x324   : >> { %v905_v57 = vmul.f32 %v903_v11, %v889_v10 }
 0x325   : >> { %v954_v9 = vadd.f32 %v951_v55, %v938_v58 }
 0x326   : >> { %v906_v14 = vpack.c.bf16 %v905_v57, %v904_v13  ;;  %v2345_v63 = vpop.eup %2344 }
 0x327   : >> { %v953_v44 = vmul.f32 0.6931472, %v2345_v63 }
 0x328   : >> { %2240 = vmatmul.msk.bf16.vlgmr.msrb.gmra.mxu0 %vm621_vm1, %v906_v14 }
 0x329   : >> { %1410 = vmatpush.bf16.msrb.mxu0 %v2788_v37  ;;  %v955_v2 = vadd.f32 %v953_v44, %v939_v60 }
 0x32b   : >> { %v956_v3 = vpack.c.bf16 %v955_v2, %v954_v9 }
 0x32d   : >> { %1411 = vmatpush.bf16.msrb.mxu0 %v2794_v38  ;;  %2242 = vmatmul.msk.bf16.vlgmr.msrb.gmra.mxu1 %vm696_vm2, %v956_v3 }
 0x32e   : >> { %1463 = vmatpush.bf16.msrb.mxu1 %v2822_v51 }
 0x331   : >> { %1412 = vmatpush.bf16.msrb.mxu0 %v2800_v39 }
 0x335   : >> { %1413 = vmatpush.bf16.msrb.mxu0 %v2809_v41 }
 0x3a5   : >> { %v919_v53 = vpop.f32.mrf.mxu0 }
 0x3a6   : >> { %v2927_v42 = vadd.f32 %v919_v53, %v2838_v47 }
 0x3a8   : >> { %v1026_v36 = vmul.f32 %v2927_v42, %v2844_v48  ;;  %v974_v56 = vmul.f32 %v2927_v42, %v2853_v52 }
 0x3aa   : >> { %v969_v8 = vpop.f32.mrf.mxu1 }
 0x3ab   : >> { %v2930_v15 = vadd.f32 %v969_v8, %v2841_v49 }
 0x3ad   : >> { %v1028_v4 = vmul.f32 %v2930_v15, %v2850_v50  ;;  %v976_v7 = vmul.f32 %v2930_v15, %v2856_v54  ;;  %v921_v61 = vpop.f32.mrf.mxu0 }
 0x3ae   : >> { %v2941_v62 = vadd.f32 %v921_v61, %v2838_v47 }
 0x3af   : >> { %v1030_v43 = vadd.f32 %v1028_v4, %v1026_v36  ;;  %v978_v46 = vadd.f32 %v976_v7, %v974_v56 }
 0x3b0   : >> { %v975_v13 = vmul.f32 %v2941_v62, %v2853_v52  ;;  %v1027_v14 = vmul.f32 %v2941_v62, %v2844_v48 }
 0x3b1   : >> { %v1032_v6 = vsel %vm557_vm0, %v1030_v43, 0.0  ;;  %v980_v10 = vsel %vm557_vm0, %v978_v46, 0.0 }
 0x3b2   : >> { %v971_v11 = vpop.f32.mrf.mxu1  ;;  %1033 = vadd.xlane.f32.xlu0 %v1032_v6  ;;  %981 = vadd.xlane.f32.xlu2 %v980_v10 }
 0x3b3   : >> { %v2946_v12 = vadd.f32 %v971_v11, %v2841_v49 }
 0x3b5   : >> { %v977_v57 = vmul.f32 %v2946_v12, %v2856_v54  ;;  %v1029_v55 = vmul.f32 %v2946_v12, %v2850_v50 }
 0x3b7   : >> { %v979_v63 = vadd.f32 %v977_v57, %v975_v13  ;;  %v1031_v58 = vadd.f32 %v1029_v55, %v1027_v14 }
 0x3b9   : >> { %v983_v60 = vsel %vm557_vm0, %v979_v63, 0.0  ;;  %v1035_v44 = vsel %vm557_vm0, %v1031_v58, 0.0 }
 0x3ba   : >> { %984 = vadd.xlane.f32.xlu1 %v983_v60  ;;  %1036 = vadd.xlane.f32.xlu2 %v1035_v44 }
 0x425   : >> { %v1034_v9 = vpop.xlane.xlu0 %1033  ;;  %v982_v2 = vpop.xlane.xlu2 %981 }
 0x426   : >> { %v1038_v3 = vadd.f32 %v1034_v9, %v2888_v0  ;;  %v986_v53 = vadd.f32 %v982_v2, %v2891_v1 }
 0x428   : >> { %v1040_v8 = vsub.f32 0.0, %v1038_v3  ;;  %v988_v36 = vsub.f32 0.0, %v986_v53 }
 0x42a   : >> { %v1042_v4 = vmul.f32 1.442695, %v1040_v8  ;;  %v990_v56 = vmul.f32 1.442695, %v988_v36 }
 0x42c   : >> { %2346 = vpow2.f32 %v1042_v4 }
 0x42d   : >> { %2348 = vpow2.f32 %v990_v56  ;;  %v985_v7 = vpop.xlane.xlu1 %984  ;;  %v1037_v61 = vpop.xlane.xlu2 %1036 }
 0x42e   : >> { %v987_v43 = vadd.f32 %v985_v7, %v2891_v1  ;;  %v1039_v46 = vadd.f32 %v1037_v61, %v2888_v0 }
 0x430   : >> { %v989_v6 = vsub.f32 0.0, %v987_v43  ;;  %v1041_v10 = vsub.f32 0.0, %v1039_v46 }
 0x432   : >> { %v2347_v11 = vpop.eup %2346  ;;  %v992_v13 = vmul.f32 1.442695, %v989_v6  ;;  %v1044_v55 = vmul.f32 1.442695, %v1041_v10 }
 0x433   : >> { %v2349_v57 = vpop.eup %2348  ;;  %v1046_v14 = vadd.f32 1.0, %v2347_v11 }
 0x434   : >> { %v994_v63 = vadd.f32 1.0, %v2349_v57  ;;  %2350 = vpow2.f32 %v992_v13 }
 0x435   : >> { %2352 = vrcp.f32 %v1046_v14  ;;  %v1059_v17 = vand.u32 2147483648, %v1046_v14  ;;  %vm1053_vm12 = vweird.f32 %v1046_v14 }
 0x436   : >> { %2354 = vrcp.f32 %v994_v63  ;;  %v1007_v56 = vand.u32 2147483648, %v994_v63  ;;  %v1005_v61 = vand.u32 2147483647, %v994_v63  ;;  %vm1001_vm7 = vweird.f32 %v994_v63 }
 0x437   : >> { %2356 = vpow2.f32 %v1044_v55 }
 0x438   : >> { %v1008_v10 = vor.u32 1.1754944e-38, %v1007_v56  ;;  %vm1006_vm9 = vcmp.eq.f32.partialorder %v1005_v61, 8.507059e+37 }
 0x43a   : >> { %v2351_v58 = vpop.eup %2350 }
 0x43b   : >> { %v2353_v60 = vpop.eup %2352  ;;  %v995_v44 = vadd.f32 1.0, %v2351_v58 }
 0x43c   : >> { %v2355_v9 = vpop.eup %2354  ;;  %v1049_v2 = vmul.f32 %v2353_v60, %v1046_v14  ;;  %vm1054_vm10 = vweird.f32 %v2353_v60 }
 0x43d   : >> { %v2357_v3 = vpop.eup %2356  ;;  %2358 = vrcp.f32 %v995_v44  ;;  %v997_v53 = vmul.f32 %v2355_v9, %v994_v63  ;;  %vm1002_vm6 = vweird.f32 %v2355_v9  ;;  %v1020_v16 = vand.u32 2147483647, %v995_v44  ;;  %vm1055_vm14 = vmor %vm1053_vm12, %vm1054_vm10 }
 0x43e   : >> { %v1047_v8 = vadd.f32 1.0, %v2357_v3  ;;  %v1050_v4 = vsub.f32 1.0, %v1049_v2  ;;  %vm1003_vm8 = vmor %vm1001_vm7, %vm1002_vm6  ;;  %v1022_v3 = vand.u32 2147483648, %v995_v44  ;;  %v1057_v63 = vand.u32 2147483647, %v1046_v14 }
 0x43f   : >> { %v998_v36 = vsub.f32 1.0, %v997_v53  ;;  %vm1016_vm13 = vweird.f32 %v995_v44  ;;  %vm1021_vm3 = vcmp.eq.f32.partialorder %v1020_v16, 8.507059e+37 }
 0x440   : >> { %2360 = vrcp.f32 %v1047_v8  ;;  %v1051_v6 = vmul.f32 %v2353_v60, %v1050_v4  ;;  %vm1058_vm4 = vcmp.eq.f32.partialorder %v1057_v63, 8.507059e+37  ;;  %vm1068_vm6 = vweird.f32 %v1047_v8 }
 0x441   : >> { %v999_v7 = vmul.f32 %v2355_v9, %v998_v36  ;;  %v1072_v14 = vand.u32 2147483647, %v1047_v8 }
 0x442   : >> { %v1052_v2 = vadd.f32 %v2353_v60, %v1051_v6 }
 0x443   : >> { %v2359_v43 = vpop.eup %2358  ;;  %v1000_v46 = vadd.f32 %v2355_v9, %v999_v7 }
 0x444   : >> { %v1012_v11 = vmul.f32 %v2359_v43, %v995_v44  ;;  %vm1017_vm11 = vweird.f32 %v2359_v43  ;;  %v1056_v56 = vsel %vm1055_vm14, %v2353_v60, %v1052_v2 }
 0x445   : >> { %v1004_v13 = vsel %vm1003_vm8, %v2355_v9, %v1000_v46  ;;  %vm1018_vm15 = vmor %vm1016_vm13, %vm1017_vm11  ;;  %v1023_v9 = vor.u32 1.1754944e-38, %v1022_v3  ;;  %vm1073_vm8 = vcmp.eq.f32.partialorder %v1072_v14, 8.507059e+37  ;;  %v2990_v14 = vmul.f32 0.9777778, %v2903_v5 }
 0x446   : >> { %v2361_v57 = vpop.eup %2360  ;;  %v1009_v55 = vsel %vm1006_vm9, %v1008_v10, %v1004_v13  ;;  %v1013_v58 = vsub.f32 1.0, %v1012_v11  ;;  %v1060_v10 = vor.u32 1.1754944e-38, %v1059_v17 }
 0x447   : >> { %1080 = vperm.xlu2 %2303, %v1009_v55   ;;  %v1064_v53 = vmul.f32 %v2361_v57, %v1047_v8  ;;  %vm1069_vm5 = vweird.f32 %v2361_v57  ;;  %v1074_v55 = vand.u32 2147483648, %v1047_v8 }
 0x448   : >> { %v1014_v36 = vmul.f32 %v2359_v43, %v1013_v58  ;;  %v1061_v11 = vsel %vm1058_vm4, %v1060_v10, %v1056_v56  ;;  %vm1070_vm7 = vmor %vm1068_vm6, %vm1069_vm5 }
 0x449   : >> { %v1065_v4 = vsub.f32 1.0, %v1064_v53  ;;  %v1075_v58 = vor.u32 1.1754944e-38, %v1074_v55  ;;  %v2965_v53 = vmul.f32 0.9777778, %v2899_v59  ;;  %v1105_v55 = vmul.f32 0.075, %v2903_v5 }
 0x44a   : >> { %v1015_v7 = vadd.f32 %v2359_v43, %v1014_v36  ;;  %v2968_v36 = vmul.f32 2.9525986, %v2899_v59 }
 0x44b   : >> { %v1066_v61 = vmul.f32 %v2361_v57, %v1065_v4  ;;  %v2977_v4 = vmul.f32 2.8462753, %v2899_v59 }
 0x44c   : >> { %v1019_v46 = vsel %vm1018_vm15, %v2359_v43, %v1015_v7 }
 0x44d   : >> { %v1024_v6 = vsel %vm1021_vm3, %v1023_v9, %v1019_v46  ;;  %v1067_v13 = vadd.f32 %v2361_v57, %v1066_v61  ;;  %v1104_v46 = vmul.f32 0.075, %v2899_v59 }
 0x44e   : >> { %1085 = vperm.xlu1 %2305, %v1024_v6  }
 0x44f   : >> { %1092 = vperm.xlu2 %2303, %v1061_v11   ;;  %v1071_v44 = vsel %vm1070_vm7, %v2361_v57, %v1067_v13 }
 0x450   : >> { %v1076_v3 = vsel %vm1073_vm8, %v1075_v58, %v1071_v44  ;;  %v2993_v44 = vmul.f32 2.9525986, %v2903_v5 }
 0x457   : >> { %1097 = vperm.xlu2 %2303, %v1076_v3  }
 0x4a1   : >> { %v1081_v60 = vpop.permute.xlu2 %1080 }
 0x4a2   : >> { %v1088_v16 = vmul.f32 %v1081_v60, %v2927_v42 }
 0x4a9   : >> { %v1093_v43 = vpop.permute.xlu2 %1092 }
 0x4aa   : >> { %v1100_v17 = vmul.f32 %v1093_v43, %v2930_v15 }
 0x4ac   : >> { %v1102_v2 = vadd.f32 %v1100_v17, %v1088_v16 }
 0x4ae   : >> { %v2970_v8 = vmul.f32 3.7333333, %v1102_v2  ;;  %v2972_v57 = vmul.f32 11.595794, %v1102_v2  ;;  %v2974_v63 = vmul.f32 10.757576, %v1102_v2 }
 0x4af   : >> { %v1106_v56 = vmul.f32 0.225, %v1102_v2 }
 0x4b1   : >> { %v1098_v9 = vpop.permute.xlu2 %1097  ;;  %v1108_v11 = vadd.f32 %v1106_v56, %v1104_v46 }
 0x4b2   : >> { %v1101_v10 = vmul.f32 %v1098_v9, %v2946_v12  ;;  %v3002_v12 = vmul.f32 2.8462753, %v2903_v5 }
 0x4c0   : >> { %v1086_v61 = vpop.permute.xlu1 %1085 }
 0x4c1   : >> { %v1089_v6 = vmul.f32 %v1086_v61, %v2941_v62  ;;  %v1110_v62 = vmul.f32 0.25, %v1108_v11 }
 0x4c3   : >> { %v1103_v13 = vadd.f32 %v1101_v10, %v1089_v6  ;;  %v1112_v61 = vadd.f32 %v2500_v30, %v1110_v62 }
 0x4c5   : >> { %v1107_v58 = vmul.f32 0.225, %v1103_v13  ;;  %v2995_v3 = vmul.f32 3.7333333, %v1103_v13  ;;  %v2997_v60 = vmul.f32 11.595794, %v1103_v13 }
 0x4c6   : >> { %v2999_v43 = vmul.f32 10.757576, %v1103_v13 }
 0x4c7   : >> { %v1109_v16 = vadd.f32 %v1107_v58, %v1105_v55 }
 0x4c9   : >> { %v1111_v56 = vmul.f32 0.25, %v1109_v16 }
 0x4cb   : >> { %v1113_v46 = vadd.f32 %v2496_v31, %v1111_v56 }
 0x4cd   : >> { %v1114_v10 = vpack.c.bf16 %v1113_v46, %v1112_v61 }
 0x4cf   : >> { %2243 = vmatmul.msk.bf16.vlgmr.msra.gmra.mxu3 %vm557_vm0, %v1114_v10  ;;  %2245 = vmatmul.msk.bf16.vlgmr.msra.gmra.mxu2 %vm557_vm0, %v1114_v10 }
 0x4d0   : >> { %1682 = vmatpush.bf16.msra.mxu2 %v2764_v33  ;;  %1632 = vmatpush.bf16.msra.mxu3 %v2760_v32 }
 0x4d4   : >> { %1683 = vmatpush.bf16.msra.mxu2 %v2774_v35  ;;  %1633 = vmatpush.bf16.msra.mxu3 %v2770_v34 }
 0x552   : >> { %v1127_v6 = vpop.f32.mrf.mxu3  ;;  %v1177_v11 = vpop.f32.mrf.mxu2 }
 0x553   : >> { %v1128_v13 = vadd.f32 %v1127_v6, %v2805_v40  ;;  %v1178_v55 = vadd.f32 %v1177_v11, %v2816_v45 }
 0x555   : >> { %v1134_v58 = vmul.f32 0.044715, %v1128_v13  ;;  %v1184_v62 = vand.u32 2147483647, %v1178_v55  ;;  %v1132_v22 = vmul.f32 0.5, %v1128_v13 }
 0x557   : >> { %v1136_v16 = vmul.f32 %v1134_v58, %v1128_v13  ;;  %v1186_v56 = vsub.f32 0.0, %v1184_v62 }
 0x559   : >> { %v1138_v61 = vmul.f32 %v1136_v16, %v1128_v13  ;;  %v1188_v46 = vmul.f32 1.442695, %v1186_v56 }
 0x55a   : >> { %v1129_v10 = vpop.f32.mrf.mxu3  ;;  %v1179_v7 = vpop.f32.mrf.mxu2 }
 0x55b   : >> { %v1140_v15 = vadd.f32 %v1138_v61, %v1128_v13  ;;  %v1130_v42 = vadd.f32 %v1129_v10, %v2805_v40  ;;  %v1180_v17 = vadd.f32 %v1179_v7, %v2816_v45  ;;  %2362 = vpow2.f32 %v1188_v46 }
 0x55d   : >> { %v1135_v9 = vmul.f32 0.044715, %v1130_v42  ;;  %v1185_v2 = vand.u32 2147483647, %v1180_v17  ;;  %v1142_v18 = vmul.f32 0.7978846, %v1140_v15 }
 0x55e   : >> { %v1133_v23 = vmul.f32 0.5, %v1130_v42 }
 0x55f   : >> { %v1137_v6 = vmul.f32 %v1135_v9, %v1130_v42  ;;  %v1187_v19 = vsub.f32 0.0, %v1185_v2  ;;  %2364 = vtanh.f32 %v1142_v18 }
 0x561   : >> { %v1139_v11 = vmul.f32 %v1137_v6, %v1130_v42  ;;  %v1190_v20 = vmul.f32 1.442695, %v1187_v19  ;;  %v2363_v21 = vpop.eup %2362 }
 0x562   : >> { %v1192_v16 = vadd.f32 1.0, %v2363_v21  ;;  %v1183_v21 = vmax.f32 %v1180_v17, 0.0 }
 0x563   : >> { %v1141_v58 = vadd.f32 %v1139_v11, %v1130_v42  ;;  %2366 = vpow2.f32 %v1190_v20  ;;  %v1182_v20 = vmax.f32 %v1178_v55, 0.0 }
 0x565   : >> { %v1143_v62 = vmul.f32 0.7978846, %v1141_v58  ;;  %v2365_v56 = vpop.eup %2364 }
 0x566   : >> { %v1146_v10 = vadd.f32 1.0, %v2365_v56 }
 0x567   : >> { %2368 = vtanh.f32 %v1143_v62 }
 0x568   : >> { %2370 = vlog2.f32 %v1192_v16  ;;  %v1148_v9 = vmul.f32 %v1146_v10, %v1132_v22 }
 0x569   : >> { %v2367_v61 = vpop.eup %2366 }
 0x56a   : >> { %v1193_v7 = vadd.f32 1.0, %v2367_v61 }
 0x56c   : >> { %2372 = vlog2.f32 %v1193_v7 }
 0x56d   : >> { %v2369_v46 = vpop.eup %2368 }
 0x56e   : >> { %v1147_v15 = vadd.f32 1.0, %v2369_v46  ;;  %v2371_v2 = vpop.eup %2370 }
 0x56f   : >> { %v1195_v18 = vmul.f32 0.6931472, %v2371_v2 }
 0x570   : >> { %v1149_v19 = vmul.f32 %v1147_v15, %v1133_v23 }
 0x571   : >> { %v1198_v62 = vadd.f32 %v1195_v18, %v1182_v20 }
 0x572   : >> { %v1150_v6 = vpack.c.bf16 %v1149_v19, %v1148_v9  ;;  %v2373_v11 = vpop.eup %2372 }
 0x573   : >> { %v1197_v58 = vmul.f32 0.6931472, %v2373_v11 }
 0x574   : >> { %2244 = vmatmul.msk.bf16.vlgmr.msra.gmra.mxu0 %vm621_vm1, %v1150_v6 }
 0x575   : >> { %1666 = vmatpush.bf16.msra.mxu0 %v2788_v37  ;;  %v1199_v16 = vadd.f32 %v1197_v58, %v1183_v21 }
 0x577   : >> { %v1200_v56 = vpack.c.bf16 %v1199_v16, %v1198_v62 }
 0x579   : >> { %1667 = vmatpush.bf16.msra.mxu0 %v2794_v38  ;;  %2246 = vmatmul.msk.bf16.vlgmr.msra.gmra.mxu1 %vm696_vm2, %v1200_v56 }
 0x57a   : >> { %1719 = vmatpush.bf16.msra.mxu1 %v2822_v51 }
 0x57d   : >> { %1668 = vmatpush.bf16.msra.mxu0 %v2800_v39 }
 0x581   : >> { %1669 = vmatpush.bf16.msra.mxu0 %v2809_v41 }
 0x5f1   : >> { %v1163_v22 = vpop.f32.mrf.mxu0 }
 0x5f2   : >> { %v3030_v23 = vadd.f32 %v1163_v22, %v2838_v47 }
 0x5f4   : >> { %v1218_v13 = vmul.f32 %v3030_v23, %v2853_v52  ;;  %v1270_v19 = vmul.f32 %v3030_v23, %v2844_v48 }
 0x5f6   : >> { %v1213_v42 = vpop.f32.mrf.mxu1 }
 0x5f7   : >> { %v3033_v17 = vadd.f32 %v1213_v42, %v2841_v49 }
 0x5f9   : >> { %v1220_v55 = vmul.f32 %v3033_v17, %v2856_v54  ;;  %v1165_v61 = vpop.f32.mrf.mxu0  ;;  %v1272_v2 = vmul.f32 %v3033_v17, %v2850_v50 }
 0x5fa   : >> { %v3040_v7 = vadd.f32 %v1165_v61, %v2838_v47 }
 0x5fb   : >> { %v1222_v10 = vadd.f32 %v1220_v55, %v1218_v13  ;;  %v1274_v21 = vadd.f32 %v1272_v2, %v1270_v19 }
 0x5fc   : >> { %v1271_v6 = vmul.f32 %v3040_v7, %v2844_v48  ;;  %v1219_v11 = vmul.f32 %v3040_v7, %v2853_v52 }
 0x5fd   : >> { %v1224_v46 = vsel %vm557_vm0, %v1222_v10, 0.0  ;;  %v1276_v22 = vsel %vm557_vm0, %v1274_v21, 0.0 }
 0x5fe   : >> { %v1215_v15 = vpop.f32.mrf.mxu1  ;;  %1225 = vadd.xlane.f32.xlu0 %v1224_v46 }
 0x5ff   : >> { %v3046_v9 = vadd.f32 %v1215_v15, %v2841_v49 }
 0x601   : >> { %v1273_v18 = vmul.f32 %v3046_v9, %v2850_v50  ;;  %v1221_v20 = vmul.f32 %v3046_v9, %v2856_v54 }
 0x603   : >> { %v1275_v58 = vadd.f32 %v1273_v18, %v1271_v6  ;;  %v1223_v62 = vadd.f32 %v1221_v20, %v1219_v11 }
 0x605   : >> { %v1279_v16 = vsel %vm557_vm0, %v1275_v58, 0.0  ;;  %v1227_v56 = vsel %vm557_vm0, %v1223_v62, 0.0 }
 0x606   : >> { %1280 = vadd.xlane.f32.xlu1 %v1279_v16  ;;  %1228 = vadd.xlane.f32.xlu2 %v1227_v56 }
 0x607   : >> { %1277 = vadd.xlane.f32.xlu0 %v1276_v22 }
 0x671   : >> { %v1226_v42 = vpop.xlane.xlu0 %1225 }
 0x672   : >> { %v1230_v13 = vadd.f32 %v1226_v42, %v2891_v1 }
 0x674   : >> { %v1232_v55 = vsub.f32 0.0, %v1230_v13 }
 0x676   : >> { %v1234_v61 = vmul.f32 1.442695, %v1232_v55 }
 0x678   : >> { %2374 = vpow2.f32 %v1234_v61 }
 0x679   : >> { %v1281_v10 = vpop.xlane.xlu1 %1280  ;;  %v1229_v46 = vpop.xlane.xlu2 %1228 }
 0x67a   : >> { %v1283_v15 = vadd.f32 %v1281_v10, %v2888_v0  ;;  %v1231_v2 = vadd.f32 %v1229_v46, %v2891_v1  ;;  %v1278_v19 = vpop.xlane.xlu0 %1277 }
 0x67b   : >> { %v1282_v6 = vadd.f32 %v1278_v19, %v2888_v0 }
 0x67c   : >> { %v1285_v18 = vsub.f32 0.0, %v1283_v15  ;;  %v1233_v11 = vsub.f32 0.0, %v1231_v2 }
 0x67d   : >> { %v1284_v20 = vsub.f32 0.0, %v1282_v6 }
 0x67e   : >> { %v2375_v21 = vpop.eup %2374  ;;  %v1288_v58 = vmul.f32 1.442695, %v1285_v18  ;;  %v1236_v62 = vmul.f32 1.442695, %v1233_v11 }
 0x67f   : >> { %v1238_v16 = vadd.f32 1.0, %v2375_v21  ;;  %v1286_v56 = vmul.f32 1.442695, %v1284_v20 }
 0x680   : >> { %2376 = vpow2.f32 %v1288_v58 }
 0x681   : >> { %2378 = vrcp.f32 %v1238_v16  ;;  %v1251_v19 = vand.u32 2147483648, %v1238_v16  ;;  %v1249_v18 = vand.u32 2147483647, %v1238_v16  ;;  %vm1245_vm10 = vweird.f32 %v1238_v16 }
 0x682   : >> { %2380 = vpow2.f32 %v1236_v62 }
 0x683   : >> { %2382 = vpow2.f32 %v1286_v56  ;;  %v1252_v21 = vor.u32 1.1754944e-38, %v1251_v19  ;;  %vm1250_vm12 = vcmp.eq.f32.partialorder %v1249_v18, 8.507059e+37 }
 0x686   : >> { %v2377_v22 = vpop.eup %2376 }
 0x687   : >> { %v2379_v42 = vpop.eup %2378  ;;  %v1291_v13 = vadd.f32 1.0, %v2377_v22 }
 0x688   : >> { %v2381_v55 = vpop.eup %2380  ;;  %v1241_v61 = vmul.f32 %v2379_v42, %v1238_v16  ;;  %vm1246_vm9 = vweird.f32 %v2379_v42 }
 0x689   : >> { %v2383_v10 = vpop.eup %2382  ;;  %2384 = vrcp.f32 %v1291_v13  ;;  %v1239_v46 = vadd.f32 1.0, %v2381_v55  ;;  %vm1247_vm11 = vmor %vm1245_vm10, %vm1246_vm9  ;;  %v1318_v25 = vand.u32 2147483648, %v1291_v13  ;;  %vm1312_vm14 = vweird.f32 %v1291_v13 }
 0x68a   : >> { %v1290_v15 = vadd.f32 1.0, %v2383_v10  ;;  %v1242_v2 = vsub.f32 1.0, %v1241_v61  ;;  %v1316_v10 = vand.u32 2147483647, %v1291_v13 }
 0x68b   : >> { %2386 = vrcp.f32 %v1239_v46  ;;  %v1266_v16 = vand.u32 2147483648, %v1239_v46  ;;  %v1319_v18 = vor.u32 1.1754944e-38, %v1318_v25  ;;  %vm1260_vm5 = vweird.f32 %v1239_v46 }
 0x68c   : >> { %2388 = vrcp.f32 %v1290_v15  ;;  %v1243_v6 = vmul.f32 %v2379_v42, %v1242_v2  ;;  %vm1317_vm4 = vcmp.eq.f32.partialorder %v1316_v10, 8.507059e+37  ;;  %vm1297_vm9 = vweird.f32 %v1290_v15 }
 0x68e   : >> { %v1244_v11 = vadd.f32 %v2379_v42, %v1243_v6 }
 0x68f   : >> { %v2385_v20 = vpop.eup %2384 }
 0x690   : >> { %v1248_v58 = vsel %vm1247_vm11, %v2379_v42, %v1244_v11  ;;  %v1308_v62 = vmul.f32 %v2385_v20, %v1291_v13  ;;  %vm1313_vm13 = vweird.f32 %v2385_v20  ;;  %v1264_v42 = vand.u32 2147483647, %v1239_v46 }
 0x691   : >> { %v2387_v56 = vpop.eup %2386  ;;  %v1253_v22 = vsel %vm1250_vm12, %v1252_v21, %v1248_v58  ;;  %vm1314_vm3 = vmor %vm1312_vm14, %vm1313_vm13 }
 0x692   : >> { %v2389_v24 = vpop.eup %2388  ;;  %1324 = vperm.xlu0 %2304, %v1253_v22   ;;  %v1309_v55 = vsub.f32 1.0, %v1308_v62  ;;  %v1256_v61 = vmul.f32 %v2387_v56, %v1239_v46  ;;  %vm1261_vm15 = vweird.f32 %v2387_v56  ;;  %v1267_v22 = vor.u32 1.1754944e-38, %v1266_v16 }
 0x693   : >> { %v1293_v26 = vmul.f32 %v2389_v24, %v1290_v15  ;;  %vm1262_vm6 = vmor %vm1260_vm5, %vm1261_vm15  ;;  %vm1265_vm7 = vcmp.eq.f32.partialorder %v1264_v42, 8.507059e+37  ;;  %vm1298_vm8 = vweird.f32 %v2389_v24 }
 0x694   : >> { %v1310_v2 = vmul.f32 %v2385_v20, %v1309_v55  ;;  %v1257_v27 = vsub.f32 1.0, %v1256_v61  ;;  %v1301_v61 = vand.u32 2147483647, %v1290_v15  ;;  %vm1299_vm10 = vmor %vm1297_vm9, %vm1298_vm8 }
 0x695   : >> { %v1294_v6 = vsub.f32 1.0, %v1293_v26 }
 0x696   : >> { %v1311_v28 = vadd.f32 %v2385_v20, %v1310_v2  ;;  %v1258_v19 = vmul.f32 %v2387_v56, %v1257_v27  ;;  %v1303_v27 = vand.u32 2147483648, %v1290_v15  ;;  %vm1302_vm11 = vcmp.eq.f32.partialorder %v1301_v61, 8.507059e+37 }
 0x697   : >> { %v1295_v58 = vmul.f32 %v2389_v24, %v1294_v6  ;;  %v863_v6 = vmul.f32 0.022786459, %v2903_v5 }
 0x698   : >> { %v1315_v11 = vsel %vm1314_vm3, %v2385_v20, %v1311_v28  ;;  %v1259_v21 = vadd.f32 %v2387_v56, %v1258_v19  ;;  %v1304_v25 = vor.u32 1.1754944e-38, %v1303_v27 }
 0x699   : >> { %v1320_v62 = vsel %vm1317_vm4, %v1319_v18, %v1315_v11  ;;  %v1296_v26 = vadd.f32 %v2389_v24, %v1295_v58  ;;  %v865_v15 = vadd.f32 %v2496_v31, %v863_v6 }
 0x69a   : >> { %1341 = vperm.xlu2 %2303, %v1320_v62   ;;  %v1263_v55 = vsel %vm1262_vm6, %v2387_v56, %v1259_v21  ;;  %v3376_v21 = vsub.f32 %v2993_v44, %v2997_v60 }
 0x69b   : >> { %v1268_v13 = vsel %vm1265_vm7, %v1267_v22, %v1263_v55  ;;  %v1300_v10 = vsel %vm1299_vm10, %v2389_v24, %v1296_v26  ;;  %v3378_v26 = vsub.f32 %v2990_v14, %v2995_v3  ;;  %v3381_v14 = vsub.f32 %v2977_v4, %v2974_v63 }
 0x69c   : >> { %1329 = vperm.xlu0 %2304, %v1268_v13   ;;  %v1305_v28 = vsel %vm1302_vm11, %v1304_v25, %v1300_v10  ;;  %v862_v13 = vmul.f32 0.022786459, %v2899_v59 }
 0x69e   : >> { %v864_v25 = vadd.f32 %v2500_v30, %v862_v13 }
 0x6a4   : >> { %1336 = vperm.xlu0 %2304, %v1305_v28  }
 0x6f4   : >> { %v1342_v20 = vpop.permute.xlu2 %1341 }
 0x6f5   : >> { %v1345_v16 = vmul.f32 %v1342_v20, %v3046_v9 }
 0x704   : >> { %v1325_v46 = vpop.permute.xlu0 %1324 }
 0x705   : >> { %v1332_v5 = vmul.f32 %v1325_v46, %v3030_v23 }
 0x70e   : >> { %v1330_v2 = vpop.permute.xlu0 %1329 }
 0x70f   : >> { %v1333_v56 = vmul.f32 %v1330_v2, %v3040_v7  ;;  %v3377_v7 = vsub.f32 %v3002_v12, %v2999_v43  ;;  %v3379_v12 = vsub.f32 %v2965_v53, %v2970_v8 }
 0x711   : >> { %v1347_v19 = vadd.f32 %v1345_v16, %v1333_v56 }
 0x713   : >> { %v1349_v42 = vmul.f32 0.112309076, %v1347_v19  ;;  %v1611_v18 = vmul.f32 9.822893, %v1347_v19  ;;  %v1867_v11 = vmul.f32 8.906423, %v1347_v19 }
 0x714   : >> { %v1359_v24 = vmul.f32 3.5555556, %v1347_v19 }
 0x715   : >> { %v3072_v58 = vadd.f32 %v1611_v18, %v3376_v21  ;;  %v3074_v62 = vadd.f32 %v1349_v42, %v865_v15  ;;  %v3079_v9 = vadd.f32 %v1867_v11, %v3377_v7 }
 0x716   : >> { %v1337_v22 = vpop.permute.xlu0 %1336  ;;  %v1361_v44 = vadd.f32 %v1359_v24, %v3378_v26 }
 0x717   : >> { %v1344_v55 = vmul.f32 %v1337_v22, %v3033_v17  ;;  %v3380_v17 = vsub.f32 %v2968_v36, %v2972_v57 }
 0x718   : >> { %v1363_v43 = vmul.f32 0.25, %v1361_v44 }
 0x719   : >> { %v1346_v60 = vadd.f32 %v1344_v55, %v1332_v5 }
 0x71a   : >> { %v1365_v16 = vadd.f32 %v2496_v31, %v1363_v43 }
 0x71b   : >> { %v1348_v27 = vmul.f32 0.112309076, %v1346_v60  ;;  %v1358_v61 = vmul.f32 3.5555556, %v1346_v60  ;;  %v1610_v10 = vmul.f32 9.822893, %v1346_v60 }
 0x71c   : >> { %v1866_v28 = vmul.f32 8.906423, %v1346_v60 }
 0x71d   : >> { %v1360_v23 = vadd.f32 %v1358_v61, %v3379_v12  ;;  %v3094_v59 = vadd.f32 %v1610_v10, %v3380_v17  ;;  %v3096_v46 = vadd.f32 %v1348_v27, %v864_v25 }
 0x71e   : >> { %v3101_v3 = vadd.f32 %v1866_v28, %v3381_v14 }
 0x71f   : >> { %v1362_v20 = vmul.f32 0.25, %v1360_v23 }
 0x721   : >> { %v1364_v2 = vadd.f32 %v2500_v30, %v1362_v20 }
 0x723   : >> { %v1366_v56 = vpack.c.bf16 %v1365_v16, %v1364_v2 }
 0x725   : >> { %2247 = vmatmul.msk.bf16.vlgmr.msrb.gmra.mxu3 %vm557_vm0, %v1366_v56  ;;  %2249 = vmatmul.msk.bf16.vlgmr.msrb.gmra.mxu2 %vm557_vm0, %v1366_v56 }
 0x726   : >> { %1942 = vmatpush.bf16.msrb.mxu2 %v2764_v33  ;;  %1892 = vmatpush.bf16.msrb.mxu3 %v2760_v32 }
 0x72a   : >> { %1943 = vmatpush.bf16.msrb.mxu2 %v2774_v35  ;;  %1893 = vmatpush.bf16.msrb.mxu3 %v2770_v34 }
 0x7a8   : >> { %v1379_v53 = vpop.f32.mrf.mxu3  ;;  %v1429_v36 = vpop.f32.mrf.mxu2 }
 0x7a9   : >> { %v1380_v8 = vadd.f32 %v1379_v53, %v2805_v40  ;;  %v1430_v57 = vadd.f32 %v1429_v36, %v2816_v45 }
 0x7ab   : >> { %v1386_v63 = vmul.f32 0.044715, %v1380_v8  ;;  %v1436_v4 = vand.u32 2147483647, %v1430_v57  ;;  %v1384_v43 = vmul.f32 0.5, %v1380_v8  ;;  %v1434_v53 = vmax.f32 %v1430_v57, 0.0 }
 0x7ad   : >> { %v1388_v6 = vmul.f32 %v1386_v63, %v1380_v8  ;;  %v1438_v19 = vsub.f32 0.0, %v1436_v4 }
 0x7af   : >> { %v1390_v42 = vmul.f32 %v1388_v6, %v1380_v8  ;;  %v1440_v18 = vmul.f32 1.442695, %v1438_v19 }
 0x7b0   : >> { %v1381_v15 = vpop.f32.mrf.mxu3  ;;  %v1431_v33 = vpop.f32.mrf.mxu2 }
 0x7b1   : >> { %v1392_v11 = vadd.f32 %v1390_v42, %v1380_v8  ;;  %v1382_v32 = vadd.f32 %v1381_v15, %v2805_v40  ;;  %v1432_v35 = vadd.f32 %v1431_v33, %v2816_v45  ;;  %2390 = vpow2.f32 %v1440_v18 }
 0x7b3   : >> { %v1387_v34 = vmul.f32 0.044715, %v1382_v32  ;;  %v1437_v24 = vand.u32 2147483647, %v1432_v35  ;;  %v1394_v21 = vmul.f32 0.7978846, %v1392_v11 }
 0x7b4   : >> { %v1385_v12 = vmul.f32 0.5, %v1382_v32  ;;  %v1435_v36 = vmax.f32 %v1432_v35, 0.0 }
 0x7b5   : >> { %v1389_v22 = vmul.f32 %v1387_v34, %v1382_v32  ;;  %v1439_v7 = vsub.f32 0.0, %v1437_v24  ;;  %2392 = vtanh.f32 %v1394_v21 }
 0x7b7   : >> { %v1391_v5 = vmul.f32 %v1389_v22, %v1382_v32  ;;  %v1442_v55 = vmul.f32 1.442695, %v1439_v7  ;;  %v2391_v13 = vpop.eup %2390 }
 0x7b8   : >> { %v1444_v60 = vadd.f32 1.0, %v2391_v13 }
 0x7b9   : >> { %v1393_v26 = vadd.f32 %v1391_v5, %v1382_v32  ;;  %2394 = vpow2.f32 %v1442_v55 }
 0x7bb   : >> { %v1395_v44 = vmul.f32 0.7978846, %v1393_v26  ;;  %v2393_v27 = vpop.eup %2392 }
 0x7bc   : >> { %v1398_v10 = vadd.f32 1.0, %v2393_v27 }
 0x7bd   : >> { %2396 = vtanh.f32 %v1395_v44 }
 0x7be   : >> { %2398 = vlog2.f32 %v1444_v60  ;;  %v1400_v14 = vmul.f32 %v1398_v10, %v1384_v43 }
 0x7bf   : >> { %v2395_v61 = vpop.eup %2394 }
 0x7c0   : >> { %v1445_v25 = vadd.f32 1.0, %v2395_v61 }
 0x7c2   : >> { %2400 = vlog2.f32 %v1445_v25 }
 0x7c3   : >> { %v2397_v28 = vpop.eup %2396 }
 0x7c4   : >> { %v1399_v23 = vadd.f32 1.0, %v2397_v28  ;;  %v2399_v17 = vpop.eup %2398 }
 0x7c5   : >> { %v1447_v16 = vmul.f32 0.6931472, %v2399_v17 }
 0x7c6   : >> { %v1401_v20 = vmul.f32 %v1399_v23, %v1385_v12 }
 0x7c7   : >> { %v1450_v4 = vadd.f32 %v1447_v16, %v1434_v53 }
 0x7c8   : >> { %v1402_v2 = vpack.c.bf16 %v1401_v20, %v1400_v14  ;;  %v2401_v56 = vpop.eup %2400 }
 0x7c9   : >> { %v1449_v63 = vmul.f32 0.6931472, %v2401_v56 }
 0x7ca   : >> { %2248 = vmatmul.msk.bf16.vlgmr.msrb.gmra.mxu0 %vm621_vm1, %v1402_v2 }
 0x7cb   : >> { %1926 = vmatpush.bf16.msrb.mxu0 %v2788_v37  ;;  %v1451_v6 = vadd.f32 %v1449_v63, %v1435_v36 }
 0x7cd   : >> { %v1452_v19 = vpack.c.bf16 %v1451_v6, %v1450_v4 }
 0x7cf   : >> { %1927 = vmatpush.bf16.msrb.mxu0 %v2794_v38  ;;  %2250 = vmatmul.msk.bf16.vlgmr.msrb.gmra.mxu1 %vm696_vm2, %v1452_v19 }
 0x7d0   : >> { %1979 = vmatpush.bf16.msrb.mxu1 %v2822_v51 }
 0x7d3   : >> { %1928 = vmatpush.bf16.msrb.mxu0 %v2800_v39 }
 0x7d7   : >> { %1929 = vmatpush.bf16.msrb.mxu0 %v2809_v41 }
 0x847   : >> { %v1415_v8 = vpop.f32.mrf.mxu0 }
 0x848   : >> { %v3123_v57 = vadd.f32 %v1415_v8, %v2838_v47 }
 0x84a   : >> { %v1522_v18 = vmul.f32 %v3123_v57, %v2844_v48  ;;  %v1470_v51 = vmul.f32 %v3123_v57, %v2853_v52 }
 0x84c   : >> { %v1465_v42 = vpop.f32.mrf.mxu1 }
 0x84d   : >> { %v3126_v37 = vadd.f32 %v1465_v42, %v2841_v49 }
 0x84f   : >> { %v1524_v38 = vmul.f32 %v3126_v37, %v2850_v50  ;;  %v1472_v39 = vmul.f32 %v3126_v37, %v2856_v54  ;;  %v1417_v41 = vpop.f32.mrf.mxu0 }
 0x850   : >> { %v3137_v11 = vadd.f32 %v1417_v41, %v2838_v47 }
 0x851   : >> { %v1526_v15 = vadd.f32 %v1524_v38, %v1522_v18  ;;  %v1474_v33 = vadd.f32 %v1472_v39, %v1470_v51 }
 0x852   : >> { %v1471_v21 = vmul.f32 %v3137_v11, %v2853_v52  ;;  %v1523_v13 = vmul.f32 %v3137_v11, %v2844_v48 }
 0x853   : >> { %v1528_v32 = vsel %vm557_vm0, %v1526_v15, 0.0  ;;  %v1476_v35 = vsel %vm557_vm0, %v1474_v33, 0.0 }
 0x854   : >> { %v1467_v34 = vpop.f32.mrf.mxu1  ;;  %1529 = vadd.xlane.f32.xlu1 %v1528_v32  ;;  %1477 = vadd.xlane.f32.xlu0 %v1476_v35 }
 0x855   : >> { %v3142_v24 = vadd.f32 %v1467_v34, %v2841_v49 }
 0x857   : >> { %v1473_v22 = vmul.f32 %v3142_v24, %v2856_v54  ;;  %v1525_v55 = vmul.f32 %v3142_v24, %v2850_v50 }
 0x859   : >> { %v1475_v7 = vadd.f32 %v1473_v22, %v1471_v21  ;;  %v1527_v26 = vadd.f32 %v1525_v55, %v1523_v13 }
 0x85b   : >> { %v1479_v5 = vsel %vm557_vm0, %v1475_v7, 0.0  ;;  %v1531_v44 = vsel %vm557_vm0, %v1527_v26, 0.0 }
 0x85c   : >> { %1480 = vadd.xlane.f32.xlu1 %v1479_v5 }
 0x864   : >> { %1532 = vadd.xlane.f32.xlu1 %v1531_v44 }
 0x8c7   : >> { %v1530_v60 = vpop.xlane.xlu1 %1529  ;;  %v1478_v27 = vpop.xlane.xlu0 %1477 }
 0x8c8   : >> { %v1534_v61 = vadd.f32 %v1530_v60, %v2888_v0  ;;  %v1482_v10 = vadd.f32 %v1478_v27, %v2891_v1 }
 0x8ca   : >> { %v1536_v25 = vsub.f32 0.0, %v1534_v61  ;;  %v1484_v28 = vsub.f32 0.0, %v1482_v10 }
 0x8cc   : >> { %v1538_v43 = vmul.f32 1.442695, %v1536_v25  ;;  %v1486_v12 = vmul.f32 1.442695, %v1484_v28 }
 0x8ce   : >> { %2402 = vpow2.f32 %v1538_v43 }
 0x8cf   : >> { %2404 = vpow2.f32 %v1486_v12  ;;  %v1481_v23 = vpop.xlane.xlu1 %1480 }
 0x8d0   : >> { %v1483_v17 = vadd.f32 %v1481_v23, %v2891_v1 }
 0x8d2   : >> { %v1485_v14 = vsub.f32 0.0, %v1483_v17 }
 0x8d4   : >> { %v2403_v20 = vpop.eup %2402  ;;  %v1488_v2 = vmul.f32 1.442695, %v1485_v14 }
 0x8d5   : >> { %v2405_v16 = vpop.eup %2404  ;;  %v1542_v56 = vadd.f32 1.0, %v2403_v20 }
 0x8d6   : >> { %v1490_v53 = vadd.f32 1.0, %v2405_v16  ;;  %2406 = vpow2.f32 %v1488_v2 }
 0x8d7   : >> { %2408 = vrcp.f32 %v1542_v56  ;;  %v1533_v36 = vpop.xlane.xlu1 %1532  ;;  %v1555_v25 = vand.u32 2147483648, %v1542_v56  ;;  %vm1549_vm5 = vweird.f32 %v1542_v56  ;;  %v1553_v28 = vand.u32 2147483647, %v1542_v56 }
 0x8d8   : >> { %2410 = vrcp.f32 %v1490_v53  ;;  %v1535_v63 = vadd.f32 %v1533_v36, %v2888_v0  ;;  %v1503_v15 = vand.u32 2147483648, %v1490_v53  ;;  %v1501_v32 = vand.u32 2147483647, %v1490_v53 }
 0x8d9   : >> { %vm1497_vm13 = vweird.f32 %v1490_v53  ;;  %v1556_v20 = vor.u32 1.1754944e-38, %v1555_v25  ;;  %vm1554_vm10 = vcmp.eq.f32.partialorder %v1553_v28, 8.507059e+37 }
 0x8da   : >> { %v1537_v4 = vsub.f32 0.0, %v1535_v63  ;;  %v1504_v5 = vor.u32 1.1754944e-38, %v1503_v15  ;;  %vm1502_vm15 = vcmp.eq.f32.partialorder %v1501_v32, 8.507059e+37 }
 0x8dc   : >> { %v2407_v6 = vpop.eup %2406  ;;  %v1540_v19 = vmul.f32 1.442695, %v1537_v4 }
 0x8dd   : >> { %v2409_v8 = vpop.eup %2408  ;;  %v1491_v42 = vadd.f32 1.0, %v2407_v6 }
 0x8de   : >> { %v2411_v18 = vpop.eup %2410  ;;  %2412 = vpow2.f32 %v1540_v19  ;;  %v1545_v38 = vmul.f32 %v2409_v8, %v1542_v56  ;;  %vm1550_vm3 = vweird.f32 %v2409_v8 }
 0x8df   : >> { %2414 = vrcp.f32 %v1491_v42  ;;  %v1493_v51 = vmul.f32 %v2411_v18, %v1490_v53  ;;  %vm1498_vm12 = vweird.f32 %v2411_v18  ;;  %v1518_v60 = vand.u32 2147483648, %v1491_v42  ;;  %vm1551_vm7 = vmor %vm1549_vm5, %vm1550_vm3 }
 0x8e0   : >> { %v1546_v41 = vsub.f32 1.0, %v1545_v38  ;;  %vm1499_vm14 = vmor %vm1497_vm13, %vm1498_vm12  ;;  %v1516_v10 = vand.u32 2147483647, %v1491_v42  ;;  %vm1512_vm6 = vweird.f32 %v1491_v42 }
 0x8e1   : >> { %v1494_v39 = vsub.f32 1.0, %v1493_v51  ;;  %v1519_v23 = vor.u32 1.1754944e-38, %v1518_v60 }
 0x8e2   : >> { %v1547_v7 = vmul.f32 %v2409_v8, %v1546_v41  ;;  %vm1517_vm9 = vcmp.eq.f32.partialorder %v1516_v10, 8.507059e+37 }
 0x8e3   : >> { %v1495_v33 = vmul.f32 %v2411_v18, %v1494_v39 }
 0x8e4   : >> { %v2413_v35 = vpop.eup %2412  ;;  %v1548_v27 = vadd.f32 %v2409_v8, %v1547_v7 }
 0x8e5   : >> { %v2415_v34 = vpop.eup %2414  ;;  %v1543_v21 = vadd.f32 1.0, %v2413_v35  ;;  %v1496_v22 = vadd.f32 %v2411_v18, %v1495_v33 }
 0x8e6   : >> { %v1508_v55 = vmul.f32 %v2415_v34, %v1491_v42  ;;  %vm1513_vm4 = vweird.f32 %v2415_v34  ;;  %v1552_v17 = vsel %vm1551_vm7, %v2409_v8, %v1548_v27 }
 0x8e7   : >> { %2416 = vrcp.f32 %v1543_v21  ;;  %v1500_v13 = vsel %vm1499_vm14, %v2411_v18, %v1496_v22  ;;  %vm1514_vm8 = vmor %vm1512_vm6, %vm1513_vm4  ;;  %v1557_v53 = vsel %vm1554_vm10, %v1556_v20, %v1552_v17  ;;  %v1570_v63 = vand.u32 2147483648, %v1543_v21 }
 0x8e8   : >> { %v1505_v26 = vsel %vm1502_vm15, %v1504_v5, %v1500_v13  ;;  %v1509_v44 = vsub.f32 1.0, %v1508_v55  ;;  %v1568_v56 = vand.u32 2147483647, %v1543_v21  ;;  %vm1564_vm12 = vweird.f32 %v1543_v21 }
 0x8e9   : >> { %1576 = vperm.xlu2 %2303, %v1505_v26   ;;  %v1571_v19 = vor.u32 1.1754944e-38, %v1570_v63 }
 0x8ea   : >> { %v1510_v61 = vmul.f32 %v2415_v34, %v1509_v44  ;;  %vm1569_vm14 = vcmp.eq.f32.partialorder %v1568_v56, 8.507059e+37 }
 0x8ec   : >> { %v1511_v43 = vadd.f32 %v2415_v34, %v1510_v61 }
 0x8ed   : >> { %v2417_v12 = vpop.eup %2416 }
 0x8ee   : >> { %v1515_v14 = vsel %vm1514_vm8, %v2415_v34, %v1511_v43  ;;  %v1560_v2 = vmul.f32 %v2417_v12, %v1543_v21  ;;  %vm1565_vm11 = vweird.f32 %v2417_v12 }
 0x8ef   : >> { %v1520_v16 = vsel %vm1517_vm9, %v1519_v23, %v1515_v14  ;;  %vm1566_vm13 = vmor %vm1564_vm12, %vm1565_vm11 }
 0x8f0   : >> { %1581 = vperm.xlu1 %2305, %v1520_v16   ;;  %v1561_v36 = vsub.f32 1.0, %v1560_v2 }
 0x8f1   : >> { %1588 = vperm.xlu2 %2303, %v1557_v53  }
 0x8f2   : >> { %v1562_v4 = vmul.f32 %v2417_v12, %v1561_v36 }
 0x8f4   : >> { %v1563_v6 = vadd.f32 %v2417_v12, %v1562_v4 }
 0x8f6   : >> { %v1567_v42 = vsel %vm1566_vm13, %v2417_v12, %v1563_v6 }
 0x8f7   : >> { %v1572_v8 = vsel %vm1569_vm14, %v1571_v19, %v1567_v42 }
 0x8f9   : >> { %1593 = vperm.xlu2 %2303, %v1572_v8  }
 0x943   : >> { %v1577_v18 = vpop.permute.xlu2 %1576 }
 0x944   : >> { %v1584_v51 = vmul.f32 %v1577_v18, %v3123_v57 }
 0x94b   : >> { %v1589_v38 = vpop.permute.xlu2 %1588 }
 0x94c   : >> { %v1596_v39 = vmul.f32 %v1589_v38, %v3126_v37 }
 0x94e   : >> { %v1598_v41 = vadd.f32 %v1596_v39, %v1584_v51 }
 0x950   : >> { %v1600_v15 = vmul.f32 0.16276042, %v1598_v41  ;;  %v1870_v33 = vmul.f32 0.2784091, %v1598_v41  ;;  %v1614_v21 = vmul.f32 0.29080933, %v1598_v41 }
 0x952   : >> { %v3161_v32 = vadd.f32 %v1870_v33, %v3101_v3  ;;  %v3164_v35 = vadd.f32 %v1600_v15, %v3096_v46  ;;  %v1616_v57 = vsub.f32 %v3094_v59, %v1614_v21 }
 0x953   : >> { %v1594_v34 = vpop.permute.xlu2 %1593 }
 0x954   : >> { %v1597_v7 = vmul.f32 %v1594_v34, %v3142_v24  ;;  %v1618_v44 = vmul.f32 0.25, %v1616_v57 }
 0x956   : >> { %v1620_v24 = vadd.f32 %v2500_v30, %v1618_v44 }
 0x962   : >> { %v1582_v22 = vpop.permute.xlu1 %1581 }
 0x963   : >> { %v1585_v5 = vmul.f32 %v1582_v22, %v3137_v11 }
 0x965   : >> { %v1599_v55 = vadd.f32 %v1597_v7, %v1585_v5 }
 0x967   : >> { %v1601_v37 = vmul.f32 0.16276042, %v1599_v55  ;;  %v1615_v13 = vmul.f32 0.29080933, %v1599_v55  ;;  %v1871_v26 = vmul.f32 0.2784091, %v1599_v55 }
 0x969   : >> { %v1617_v3 = vsub.f32 %v3072_v58, %v1615_v13  ;;  %v3171_v60 = vadd.f32 %v1871_v26, %v3079_v9  ;;  %v3174_v46 = vadd.f32 %v1601_v37, %v3074_v62 }
 0x96b   : >> { %v1619_v27 = vmul.f32 0.25, %v1617_v3 }
 0x96d   : >> { %v1621_v11 = vadd.f32 %v2496_v31, %v1619_v27 }
 0x96f   : >> { %v1622_v61 = vpack.c.bf16 %v1621_v11, %v1620_v24 }
 0x971   : >> { %2251 = vmatmul.msk.bf16.vlgmr.msra.gmra.mxu3 %vm557_vm0, %v1622_v61  ;;  %2253 = vmatmul.msk.bf16.vlgmr.msra.gmra.mxu2 %vm557_vm0, %v1622_v61 }
 0x9f4   : >> { %v1635_v59 = vpop.f32.mrf.mxu3  ;;  %v1685_v10 = vpop.f32.mrf.mxu2 }
 0x9f5   : >> { %v1636_v58 = vadd.f32 %v1635_v59, %v2805_v40  ;;  %v1686_v9 = vadd.f32 %v1685_v10, %v2816_v45 }
 0x9f7   : >> { %v1642_v25 = vmul.f32 0.044715, %v1636_v58  ;;  %v1692_v28 = vand.u32 2147483647, %v1686_v9  ;;  %v1640_v34 = vmul.f32 0.5, %v1636_v58  ;;  %v1690_v26 = vmax.f32 %v1686_v9, 0.0 }
 0x9f9   : >> { %v1644_v62 = vmul.f32 %v1642_v25, %v1636_v58  ;;  %v1694_v43 = vsub.f32 0.0, %v1692_v28 }
 0x9fb   : >> { %v1646_v12 = vmul.f32 %v1644_v62, %v1636_v58  ;;  %v1696_v23 = vmul.f32 1.442695, %v1694_v43 }
 0x9fc   : >> { %v1637_v17 = vpop.f32.mrf.mxu3  ;;  %v1687_v14 = vpop.f32.mrf.mxu2 }
 0x9fd   : >> { %v1648_v20 = vadd.f32 %v1646_v12, %v1636_v58  ;;  %v1638_v2 = vadd.f32 %v1637_v17, %v2805_v40  ;;  %v1688_v16 = vadd.f32 %v1687_v14, %v2816_v45  ;;  %2418 = vpow2.f32 %v1696_v23 }
 0x9ff   : >> { %v1643_v53 = vmul.f32 0.044715, %v1638_v2  ;;  %v1693_v36 = vand.u32 2147483647, %v1688_v16  ;;  %v1650_v63 = vmul.f32 0.7978846, %v1648_v20 }
 0xa00   : >> { %v1641_v21 = vmul.f32 0.5, %v1638_v2  ;;  %v1691_v44 = vmax.f32 %v1688_v16, 0.0 }
 0xa01   : >> { %v1645_v4 = vmul.f32 %v1643_v53, %v1638_v2  ;;  %v1695_v56 = vsub.f32 0.0, %v1693_v36  ;;  %2420 = vtanh.f32 %v1650_v63 }
 0xa03   : >> { %v1647_v6 = vmul.f32 %v1645_v4, %v1638_v2  ;;  %v1698_v19 = vmul.f32 1.442695, %v1695_v56  ;;  %v2419_v42 = vpop.eup %2418 }
 0xa04   : >> { %v1700_v38 = vadd.f32 1.0, %v2419_v42 }
 0xa05   : >> { %v1649_v8 = vadd.f32 %v1647_v6, %v1638_v2  ;;  %2422 = vpow2.f32 %v1698_v19 }
 0xa07   : >> { %v1651_v18 = vmul.f32 0.7978846, %v1649_v8  ;;  %v2421_v51 = vpop.eup %2420 }
 0xa08   : >> { %v1654_v41 = vadd.f32 1.0, %v2421_v51 }
 0xa09   : >> { %2424 = vtanh.f32 %v1651_v18 }
 0xa0a   : >> { %2426 = vlog2.f32 %v1700_v38  ;;  %v1656_v5 = vmul.f32 %v1654_v41, %v1640_v34 }
 0xa0b   : >> { %v2423_v39 = vpop.eup %2422 }
 0xa0c   : >> { %v1701_v15 = vadd.f32 1.0, %v2423_v39 }
 0xa0e   : >> { %2428 = vlog2.f32 %v1701_v15 }
 0xa0f   : >> { %v2425_v33 = vpop.eup %2424 }
 0xa10   : >> { %v1655_v22 = vadd.f32 1.0, %v2425_v33  ;;  %v2427_v7 = vpop.eup %2426 }
 0xa11   : >> { %v1703_v37 = vmul.f32 0.6931472, %v2427_v7 }
 0xa12   : >> { %v1657_v57 = vmul.f32 %v1655_v22, %v1641_v21 }
 0xa13   : >> { %v1706_v27 = vadd.f32 %v1703_v37, %v1690_v26 }
 0xa14   : >> { %v1658_v55 = vpack.c.bf16 %v1657_v57, %v1656_v5  ;;  %v2429_v13 = vpop.eup %2428 }
 0xa15   : >> { %v1705_v3 = vmul.f32 0.6931472, %v2429_v13 }
 0xa16   : >> { %2252 = vmatmul.msk.bf16.vlgmr.msra.gmra.mxu0 %vm621_vm1, %v1658_v55 }
 0xa17   : >> { %v1707_v24 = vadd.f32 %v1705_v3, %v1691_v44 }
 0xa19   : >> { %v1708_v11 = vpack.c.bf16 %v1707_v24, %v1706_v27 }
 0xa1b   : >> { %2254 = vmatmul.msk.bf16.vlgmr.msra.gmra.mxu1 %vm696_vm2, %v1708_v11 }
 0xa93   : >> { %v1671_v61 = vpop.f32.mrf.mxu0 }
 0xa94   : >> { %v3187_v59 = vadd.f32 %v1671_v61, %v2838_v47 }
 0xa96   : >> { %v1778_v25 = vmul.f32 %v3187_v59, %v2844_v48  ;;  %v1726_v28 = vmul.f32 %v3187_v59, %v2853_v52 }
 0xa98   : >> { %v1721_v10 = vpop.f32.mrf.mxu1 }
 0xa99   : >> { %v3190_v58 = vadd.f32 %v1721_v10, %v2841_v49 }
 0xa9b   : >> { %v1780_v9 = vmul.f32 %v3190_v58, %v2850_v50  ;;  %v1728_v62 = vmul.f32 %v3190_v58, %v2856_v54  ;;  %v1673_v43 = vpop.f32.mrf.mxu0 }
 0xa9c   : >> { %v3201_v17 = vadd.f32 %v1673_v43, %v2838_v47 }
 0xa9d   : >> { %v1782_v12 = vadd.f32 %v1780_v9, %v1778_v25  ;;  %v1730_v23 = vadd.f32 %v1728_v62, %v1726_v28 }
 0xa9e   : >> { %v1727_v53 = vmul.f32 %v3201_v17, %v2853_v52  ;;  %v1779_v63 = vmul.f32 %v3201_v17, %v2844_v48 }
 0xa9f   : >> { %v1784_v14 = vsel %vm557_vm0, %v1782_v12, 0.0  ;;  %v1732_v20 = vsel %vm557_vm0, %v1730_v23, 0.0 }
 0xaa0   : >> { %v1723_v2 = vpop.f32.mrf.mxu1  ;;  %1785 = vadd.xlane.f32.xlu1 %v1784_v14  ;;  %1733 = vadd.xlane.f32.xlu0 %v1732_v20 }
 0xaa1   : >> { %v3206_v16 = vadd.f32 %v1723_v2, %v2841_v49 }
 0xaa3   : >> { %v1729_v36 = vmul.f32 %v3206_v16, %v2856_v54  ;;  %v1781_v4 = vmul.f32 %v3206_v16, %v2850_v50 }
 0xaa5   : >> { %v1731_v56 = vadd.f32 %v1729_v36, %v1727_v53  ;;  %v1783_v6 = vadd.f32 %v1781_v4, %v1779_v63 }
 0xaa7   : >> { %v1735_v19 = vsel %vm557_vm0, %v1731_v56, 0.0  ;;  %v1787_v42 = vsel %vm557_vm0, %v1783_v6, 0.0 }
 0xaa8   : >> { %1736 = vadd.xlane.f32.xlu2 %v1735_v19  ;;  %1788 = vadd.xlane.f32.xlu0 %v1787_v42 }
 0xb13   : >> { %v1786_v8 = vpop.xlane.xlu1 %1785  ;;  %v1734_v18 = vpop.xlane.xlu0 %1733 }
 0xb14   : >> { %v1790_v38 = vadd.f32 %v1786_v8, %v2888_v0  ;;  %v1738_v51 = vadd.f32 %v1734_v18, %v2891_v1 }
 0xb16   : >> { %v1792_v39 = vsub.f32 0.0, %v1790_v38  ;;  %v1740_v41 = vsub.f32 0.0, %v1738_v51 }
 0xb18   : >> { %v1794_v15 = vmul.f32 1.442695, %v1792_v39  ;;  %v1742_v33 = vmul.f32 1.442695, %v1740_v41 }
 0xb1a   : >> { %2430 = vpow2.f32 %v1794_v15 }
 0xb1b   : >> { %2432 = vpow2.f32 %v1742_v33  ;;  %v1737_v34 = vpop.xlane.xlu2 %1736  ;;  %v1789_v21 = vpop.xlane.xlu0 %1788 }
 0xb1c   : >> { %v1739_v22 = vadd.f32 %v1737_v34, %v2891_v1  ;;  %v1791_v7 = vadd.f32 %v1789_v21, %v2888_v0 }
 0xb1e   : >> { %v1741_v5 = vsub.f32 0.0, %v1739_v22  ;;  %v1793_v57 = vsub.f32 0.0, %v1791_v7 }
 0xb20   : >> { %v2431_v55 = vpop.eup %2430  ;;  %v1744_v37 = vmul.f32 1.442695, %v1741_v5  ;;  %v1796_v44 = vmul.f32 1.442695, %v1793_v57 }
 0xb21   : >> { %v2433_v13 = vpop.eup %2432  ;;  %v1798_v26 = vadd.f32 1.0, %v2431_v55 }
 0xb22   : >> { %v1746_v3 = vadd.f32 1.0, %v2433_v13  ;;  %2434 = vpow2.f32 %v1744_v37 }
 0xb23   : >> { %2436 = vrcp.f32 %v1798_v26  ;;  %v1809_v43 = vand.u32 2147483647, %v1798_v26  ;;  %v1811_v12 = vand.u32 2147483648, %v1798_v26  ;;  %vm1805_vm4 = vweird.f32 %v1798_v26 }
 0xb24   : >> { %2438 = vrcp.f32 %v1746_v3  ;;  %v1759_v20 = vand.u32 2147483648, %v1746_v3  ;;  %v1757_v53 = vand.u32 2147483647, %v1746_v3  ;;  %vm1753_vm6 = vweird.f32 %v1746_v3 }
 0xb25   : >> { %2440 = vpow2.f32 %v1796_v44  ;;  %v1812_v4 = vor.u32 1.1754944e-38, %v1811_v12  ;;  %vm1810_vm7 = vcmp.eq.f32.partialorder %v1809_v43, 8.507059e+37 }
 0xb26   : >> { %v1760_v19 = vor.u32 1.1754944e-38, %v1759_v20  ;;  %vm1758_vm9 = vcmp.eq.f32.partialorder %v1757_v53, 8.507059e+37 }
 0xb28   : >> { %v2435_v27 = vpop.eup %2434 }
 0xb29   : >> { %v2437_v24 = vpop.eup %2436  ;;  %v1747_v11 = vadd.f32 1.0, %v2435_v27 }
 0xb2a   : >> { %v2439_v61 = vpop.eup %2438  ;;  %v1801_v10 = vmul.f32 %v2437_v24, %v1798_v26  ;;  %vm1806_vm15 = vweird.f32 %v2437_v24 }
 0xb2b   : >> { %v2441_v25 = vpop.eup %2440  ;;  %2442 = vrcp.f32 %v1747_v11  ;;  %v1749_v9 = vmul.f32 %v2439_v61, %v1746_v3  ;;  %vm1754_vm3 = vweird.f32 %v2439_v61  ;;  %vm1807_vm5 = vmor %vm1805_vm4, %vm1806_vm15  ;;  %v1774_v41 = vand.u32 2147483648, %v1747_v11 }
 0xb2c   : >> { %v1799_v28 = vadd.f32 1.0, %v2441_v25  ;;  %v1802_v62 = vsub.f32 1.0, %v1801_v10  ;;  %vm1755_vm8 = vmor %vm1753_vm6, %vm1754_vm3  ;;  %v1772_v34 = vand.u32 2147483647, %v1747_v11  ;;  %vm1768_vm11 = vweird.f32 %v1747_v11 }
 0xb2d   : >> { %v1750_v23 = vsub.f32 1.0, %v1749_v9  ;;  %v1775_v7 = vor.u32 1.1754944e-38, %v1774_v41 }
 0xb2e   : >> { %2444 = vrcp.f32 %v1799_v28  ;;  %v1803_v14 = vmul.f32 %v2437_v24, %v1802_v62  ;;  %vm1773_vm13 = vcmp.eq.f32.partialorder %v1772_v34, 8.507059e+37  ;;  %v1826_v13 = vand.u32 2147483648, %v1799_v28 }
 0xb2f   : >> { %v1751_v2 = vmul.f32 %v2439_v61, %v1750_v23  ;;  %vm1820_vm15 = vweird.f32 %v1799_v28  ;;  %v1824_v26 = vand.u32 2147483647, %v1799_v28 }
 0xb30   : >> { %v1804_v36 = vadd.f32 %v2437_v24, %v1803_v14  ;;  %v1827_v3 = vor.u32 1.1754944e-38, %v1826_v13 }
 0xb31   : >> { %v2443_v63 = vpop.eup %2442  ;;  %v1752_v56 = vadd.f32 %v2439_v61, %v1751_v2  ;;  %vm1825_vm4 = vcmp.eq.f32.partialorder %v1824_v26, 8.507059e+37 }
 0xb32   : >> { %v1808_v6 = vsel %vm1807_vm5, %v2437_v24, %v1804_v36  ;;  %v1764_v42 = vmul.f32 %v2443_v63, %v1747_v11  ;;  %vm1769_vm10 = vweird.f32 %v2443_v63 }
 0xb33   : >> { %v1813_v8 = vsel %vm1810_vm7, %v1812_v4, %v1808_v6  ;;  %v1756_v18 = vsel %vm1755_vm8, %v2439_v61, %v1752_v56  ;;  %vm1770_vm12 = vmor %vm1768_vm11, %vm1769_vm10 }
 0xb34   : >> { %v2445_v38 = vpop.eup %2444  ;;  %1844 = vperm.xlu2 %2303, %v1813_v8   ;;  %v1761_v51 = vsel %vm1758_vm9, %v1760_v19, %v1756_v18  ;;  %v1765_v39 = vsub.f32 1.0, %v1764_v42 }
 0xb35   : >> { %1832 = vperm.xlu0 %2304, %v1761_v51   ;;  %v1816_v15 = vmul.f32 %v2445_v38, %v1799_v28  ;;  %vm1821_vm14 = vweird.f32 %v2445_v38 }
 0xb36   : >> { %v1766_v33 = vmul.f32 %v2443_v63, %v1765_v39  ;;  %vm1822_vm3 = vmor %vm1820_vm15, %vm1821_vm14 }
 0xb37   : >> { %v1817_v21 = vsub.f32 1.0, %v1816_v15 }
 0xb38   : >> { %v1767_v22 = vadd.f32 %v2443_v63, %v1766_v33 }
 0xb39   : >> { %v1818_v5 = vmul.f32 %v2445_v38, %v1817_v21 }
 0xb3a   : >> { %v1771_v57 = vsel %vm1770_vm12, %v2443_v63, %v1767_v22 }
 0xb3b   : >> { %v1776_v55 = vsel %vm1773_vm13, %v1775_v7, %v1771_v57  ;;  %v1819_v37 = vadd.f32 %v2445_v38, %v1818_v5 }
 0xb3d   : >> { %1837 = vperm.xlu0 %2304, %v1776_v55   ;;  %v1823_v44 = vsel %vm1822_vm3, %v2445_v38, %v1819_v37 }
 0xb3e   : >> { %v1828_v27 = vsel %vm1825_vm4, %v1827_v3, %v1823_v44 }
 0xb45   : >> { %1849 = vperm.xlu0 %2304, %v1828_v27  }
 0xb8e   : >> { %v1845_v24 = vpop.permute.xlu2 %1844 }
 0xb8f   : >> { %v1852_v61 = vmul.f32 %v1845_v24, %v3190_v58 }
 0xba7   : >> { %v1833_v11 = vpop.permute.xlu0 %1832 }
 0xba8   : >> { %v1840_v10 = vmul.f32 %v1833_v11, %v3187_v59 }
 0xbaa   : >> { %v1854_v25 = vadd.f32 %v1852_v61, %v1840_v10 }
 0xbac   : >> { %v3224_v9 = vmul.f32 0.08059405, %v1854_v25  ;;  %v1874_v28 = vmul.f32 0.27353132, %v1854_v25 }
 0xbae   : >> { %v1858_v62 = vsub.f32 %v3164_v35, %v3224_v9  ;;  %v1876_v20 = vsub.f32 %v3161_v32, %v1874_v28 }
 0xbaf   : >> { %v1838_v43 = vpop.permute.xlu0 %1837 }
 0xbb0   : >> { %v1841_v23 = vmul.f32 %v1838_v43, %v3201_v17  ;;  %v1878_v59 = vmul.f32 0.25, %v1876_v20 }
 0xbb2   : >> { %v1880_v56 = vadd.f32 %v2500_v30, %v1878_v59 }
 0xbb7   : >> { %v1850_v12 = vpop.permute.xlu0 %1849 }
 0xbb8   : >> { %v1853_v14 = vmul.f32 %v1850_v12, %v3206_v16 }
 0xbba   : >> { %v1855_v2 = vadd.f32 %v1853_v14, %v1841_v23 }
 0xbbc   : >> { %v3231_v53 = vmul.f32 0.08059405, %v1855_v2  ;;  %v1875_v58 = vmul.f32 0.27353132, %v1855_v2 }
 0xbbe   : >> { %v1859_v36 = vsub.f32 %v3174_v46, %v3231_v53  ;;  %v1877_v63 = vsub.f32 %v3171_v60, %v1875_v58 }
 0xbc0   : >> { %v1879_v4 = vmul.f32 0.25, %v1877_v63 }
 0xbc2   : >> { %v1881_v6 = vadd.f32 %v2496_v31, %v1879_v4 }
 0xbc4   : >> { %v1882_v17 = vpack.c.bf16 %v1881_v6, %v1880_v56 }
 0xbc6   : >> { %2255 = vmatmul.msk.bf16.vlgmr.msrb.gmra.mxu3 %vm557_vm0, %v1882_v17  ;;  %2257 = vmatmul.msk.bf16.vlgmr.msrb.gmra.mxu2 %vm557_vm0, %v1882_v17 }
 0xc49   : >> { %v1895_v32 = vpop.f32.mrf.mxu3  ;;  %v1945_v16 = vpop.f32.mrf.mxu2 }
 0xc4a   : >> { %v1896_v19 = vadd.f32 %v1895_v32, %v2805_v40  ;;  %v1946_v42 = vadd.f32 %v1945_v16, %v2816_v45 }
 0xc4c   : >> { %v1902_v8 = vmul.f32 0.044715, %v1896_v19  ;;  %v1952_v18 = vand.u32 2147483647, %v1946_v42  ;;  %v1900_v11 = vmul.f32 0.5, %v1896_v19  ;;  %v1950_v20 = vmax.f32 %v1946_v42, 0.0 }
 0xc4e   : >> { %v1904_v38 = vmul.f32 %v1902_v8, %v1896_v19  ;;  %v1954_v60 = vsub.f32 0.0, %v1952_v18 }
 0xc50   : >> { %v1906_v51 = vmul.f32 %v1904_v38, %v1896_v19  ;;  %v1956_v39 = vmul.f32 1.442695, %v1954_v60 }
 0xc51   : >> { %v1897_v30 = vpop.f32.mrf.mxu3  ;;  %v1947_v41 = vpop.f32.mrf.mxu2 }
 0xc52   : >> { %v1908_v31 = vadd.f32 %v1906_v51, %v1896_v19  ;;  %v1898_v15 = vadd.f32 %v1897_v30, %v2805_v40  ;;  %v1948_v33 = vadd.f32 %v1947_v41, %v2816_v45  ;;  %2446 = vpow2.f32 %v1956_v39 }
 0xc54   : >> { %v1903_v34 = vmul.f32 0.044715, %v1898_v15  ;;  %v1953_v21 = vand.u32 2147483647, %v1948_v33  ;;  %v1910_v22 = vmul.f32 0.7978846, %v1908_v31 }
 0xc55   : >> { %v1901_v61 = vmul.f32 0.5, %v1898_v15  ;;  %v1951_v2 = vmax.f32 %v1948_v33, 0.0 }
 0xc56   : >> { %v1905_v7 = vmul.f32 %v1903_v34, %v1898_v15  ;;  %v1955_v5 = vsub.f32 0.0, %v1953_v21  ;;  %2448 = vtanh.f32 %v1910_v22 }
 0xc58   : >> { %v1907_v57 = vmul.f32 %v1905_v7, %v1898_v15  ;;  %v1958_v55 = vmul.f32 1.442695, %v1955_v5  ;;  %v2447_v37 = vpop.eup %2446 }
 0xc59   : >> { %v1960_v44 = vadd.f32 1.0, %v2447_v37 }
 0xc5a   : >> { %v1909_v13 = vadd.f32 %v1907_v57, %v1898_v15  ;;  %2450 = vpow2.f32 %v1958_v55 }
 0xc5c   : >> { %v1911_v26 = vmul.f32 0.7978846, %v1909_v13  ;;  %v2449_v3 = vpop.eup %2448 }
 0xc5d   : >> { %v1914_v27 = vadd.f32 1.0, %v2449_v3 }
 0xc5e   : >> { %2452 = vtanh.f32 %v1911_v26 }
 0xc5f   : >> { %2454 = vlog2.f32 %v1960_v44  ;;  %v1916_v43 = vmul.f32 %v1914_v27, %v1900_v11 }
 0xc60   : >> { %v2451_v40 = vpop.eup %2450 }
 0xc61   : >> { %v1961_v45 = vadd.f32 1.0, %v2451_v40 }
 0xc63   : >> { %2456 = vlog2.f32 %v1961_v45 }
 0xc64   : >> { %v2453_v24 = vpop.eup %2452 }
 0xc65   : >> { %v1915_v10 = vadd.f32 1.0, %v2453_v24  ;;  %v2455_v25 = vpop.eup %2454 }
 0xc66   : >> { %v1963_v23 = vmul.f32 0.6931472, %v2455_v25 }
 0xc67   : >> { %v1917_v28 = vmul.f32 %v1915_v10, %v1901_v61 }
 0xc68   : >> { %v1966_v59 = vadd.f32 %v1963_v23, %v1950_v20 }
 0xc69   : >> { %v1918_v12 = vpack.c.bf16 %v1917_v28, %v1916_v43  ;;  %v2457_v14 = vpop.eup %2456 }
 0xc6a   : >> { %v1965_v58 = vmul.f32 0.6931472, %v2457_v14 }
 0xc6b   : >> { %2256 = vmatmul.msk.bf16.vlgmr.msrb.gmra.mxu0 %vm621_vm1, %v1918_v12 }
 0xc6c   : >> { %v1967_v63 = vadd.f32 %v1965_v58, %v1951_v2 }
 0xc6e   : >> { %v1968_v4 = vpack.c.bf16 %v1967_v63, %v1966_v59 }
 0xc70   : >> { %2258 = vmatmul.msk.bf16.vlgmr.msrb.gmra.mxu1 %vm696_vm2, %v1968_v4 }
 0xce8   : >> { %v1931_v56 = vpop.f32.mrf.mxu0 }
 0xce9   : >> { %v3247_v6 = vadd.f32 %v1931_v56, %v2838_v47 }
 0xceb   : >> { %v1986_v16 = vmul.f32 %v3247_v6, %v2853_v52  ;;  %v2038_v30 = vmul.f32 %v3247_v6, %v2844_v48 }
 0xced   : >> { %v1981_v17 = vpop.f32.mrf.mxu1 }
 0xcee   : >> { %v3250_v32 = vadd.f32 %v1981_v17, %v2841_v49 }
 0xcf0   : >> { %v1988_v19 = vmul.f32 %v3250_v32, %v2856_v54  ;;  %v1933_v42 = vpop.f32.mrf.mxu0  ;;  %v2040_v60 = vmul.f32 %v3250_v32, %v2850_v50 }
 0xcf1   : >> { %v3257_v18 = vadd.f32 %v1933_v42, %v2838_v47 }
 0xcf2   : >> { %v1990_v8 = vadd.f32 %v1988_v19, %v1986_v16  ;;  %v2042_v31 = vadd.f32 %v2040_v60, %v2038_v30 }
 0xcf3   : >> { %v1987_v41 = vmul.f32 %v3257_v18, %v2853_v52 }
 0xcf4   : >> { %v1992_v38 = vsel %vm557_vm0, %v1990_v8, 0.0  ;;  %v2044_v34 = vsel %vm557_vm0, %v2042_v31, 0.0 }
 0xcf5   : >> { %v1983_v51 = vpop.f32.mrf.mxu1  ;;  %1993 = vadd.xlane.f32.xlu1 %v1992_v38 }
 0xcf6   : >> { %v3263_v39 = vadd.f32 %v1983_v51, %v2841_v49  ;;  %v2039_v49 = vmul.f32 %v3257_v18, %v2844_v48 }
 0xcf8   : >> { %v1989_v47 = vmul.f32 %v3263_v39, %v2856_v54  ;;  %v2041_v21 = vmul.f32 %v3263_v39, %v2850_v50 }
 0xcfa   : >> { %v1991_v15 = vadd.f32 %v1989_v47, %v1987_v41  ;;  %v2043_v22 = vadd.f32 %v2041_v21, %v2039_v49 }
 0xcfc   : >> { %v1995_v33 = vsel %vm557_vm0, %v1991_v15, 0.0  ;;  %v2047_v52 = vsel %vm557_vm0, %v2043_v22, 0.0 }
 0xcfd   : >> { %1996 = vadd.xlane.f32.xlu0 %v1995_v33  ;;  %2045 = vadd.xlane.f32.xlu1 %v2044_v34 }
 0xd05   : >> { %2048 = vadd.xlane.f32.xlu1 %v2047_v52 }
 0xd68   : >> { %v1994_v7 = vpop.xlane.xlu1 %1993 }
 0xd69   : >> { %v1998_v54 = vadd.f32 %v1994_v7, %v2891_v1 }
 0xd6b   : >> { %v2000_v5 = vsub.f32 0.0, %v1998_v54 }
 0xd6d   : >> { %v2002_v57 = vmul.f32 1.442695, %v2000_v5 }
 0xd6f   : >> { %2458 = vpow2.f32 %v2002_v57 }
 0xd70   : >> { %v1997_v55 = vpop.xlane.xlu0 %1996  ;;  %v2046_v37 = vpop.xlane.xlu1 %2045 }
 0xd71   : >> { %v1999_v13 = vadd.f32 %v1997_v55, %v2891_v1  ;;  %v2050_v50 = vadd.f32 %v2046_v37, %v2888_v0 }
 0xd73   : >> { %v2001_v26 = vsub.f32 0.0, %v1999_v13  ;;  %v2052_v44 = vsub.f32 0.0, %v2050_v50 }
 0xd75   : >> { %v2459_v3 = vpop.eup %2458  ;;  %v2004_v48 = vmul.f32 1.442695, %v2001_v26  ;;  %v2054_v40 = vmul.f32 1.442695, %v2052_v44 }
 0xd76   : >> { %v2006_v27 = vadd.f32 1.0, %v2459_v3 }
 0xd77   : >> { %2460 = vpow2.f32 %v2004_v48 }
 0xd78   : >> { %2462 = vrcp.f32 %v2006_v27  ;;  %v2049_v45 = vpop.xlane.xlu1 %2048  ;;  %v2019_v14 = vand.u32 2147483648, %v2006_v27  ;;  %v2017_v2 = vand.u32 2147483647, %v2006_v27  ;;  %vm2013_vm2 = vweird.f32 %v2006_v27 }
 0xd79   : >> { %2464 = vpow2.f32 %v2054_v40  ;;  %v2051_v24 = vadd.f32 %v2049_v45, %v2888_v0 }
 0xd7a   : >> { %v2020_v4 = vor.u32 1.1754944e-38, %v2019_v14  ;;  %vm2018_vm6 = vcmp.eq.f32.partialorder %v2017_v2, 8.507059e+37 }
 0xd7b   : >> { %v2053_v11 = vsub.f32 0.0, %v2051_v24 }
 0xd7d   : >> { %v2461_v61 = vpop.eup %2460  ;;  %v2056_v10 = vmul.f32 1.442695, %v2053_v11 }
 0xd7e   : >> { %v2463_v25 = vpop.eup %2462  ;;  %v2007_v43 = vadd.f32 1.0, %v2461_v61 }
 0xd7f   : >> { %v2465_v1 = vpop.eup %2464  ;;  %2466 = vpow2.f32 %v2056_v10  ;;  %v2009_v28 = vmul.f32 %v2463_v25, %v2006_v27  ;;  %vm2014_vm1 = vweird.f32 %v2463_v25 }
 0xd80   : >> { %2468 = vrcp.f32 %v2007_v43  ;;  %v2058_v12 = vadd.f32 1.0, %v2465_v1  ;;  %vm2015_vm5 = vmor %vm2013_vm2, %vm2014_vm1  ;;  %v2032_v38 = vand.u32 2147483647, %v2007_v43  ;;  %v2034_v60 = vand.u32 2147483648, %v2007_v43 }
 0xd81   : >> { %v2010_v23 = vsub.f32 1.0, %v2009_v28  ;;  %vm2028_vm8 = vweird.f32 %v2007_v43 }
 0xd82   : >> { %2470 = vrcp.f32 %v2058_v12  ;;  %v2071_v41 = vand.u32 2147483648, %v2058_v12  ;;  %v2069_v15 = vand.u32 2147483647, %v2058_v12  ;;  %vm2033_vm11 = vcmp.eq.f32.partialorder %v2032_v38, 8.507059e+37 }
 0xd83   : >> { %v2011_v20 = vmul.f32 %v2463_v25, %v2010_v23  ;;  %v2035_v34 = vor.u32 1.1754944e-38, %v2034_v60  ;;  %vm2065_vm12 = vweird.f32 %v2058_v12 }
 0xd84   : >> { %v2072_v7 = vor.u32 1.1754944e-38, %v2071_v41  ;;  %vm2070_vm14 = vcmp.eq.f32.partialorder %v2069_v15, 8.507059e+37 }
 0xd85   : >> { %v2467_v58 = vpop.eup %2466  ;;  %v2012_v59 = vadd.f32 %v2463_v25, %v2011_v20 }
 0xd86   : >> { %v2469_v0 = vpop.eup %2468  ;;  %v2059_v63 = vadd.f32 1.0, %v2467_v58 }
 0xd87   : >> { %v2016_v56 = vsel %vm2015_vm5, %v2463_v25, %v2012_v59  ;;  %v2024_v17 = vmul.f32 %v2469_v0, %v2007_v43  ;;  %vm2029_vm7 = vweird.f32 %v2469_v0 }
 0xd88   : >> { %v2471_v16 = vpop.eup %2470  ;;  %2472 = vrcp.f32 %v2059_v63  ;;  %v2021_v19 = vsel %vm2018_vm6, %v2020_v4, %v2016_v56  ;;  %vm2030_vm10 = vmor %vm2028_vm8, %vm2029_vm7  ;;  %v2086_v55 = vand.u32 2147483648, %v2059_v63  ;;  %v2084_v13 = vand.u32 2147483647, %v2059_v63 }
 0xd89   : >> { %2092 = vperm.xlu2 %2303, %v2021_v19   ;;  %v2025_v42 = vsub.f32 1.0, %v2024_v17  ;;  %v2061_v8 = vmul.f32 %v2471_v16, %v2058_v12  ;;  %vm2066_vm9 = vweird.f32 %v2471_v16  ;;  %vm2080_vm3 = vweird.f32 %v2059_v63 }
 0xd8a   : >> { %vm2067_vm13 = vmor %vm2065_vm12, %vm2066_vm9  ;;  %v2087_v26 = vor.u32 1.1754944e-38, %v2086_v55  ;;  %vm2085_vm1 = vcmp.eq.f32.partialorder %v2084_v13, 8.507059e+37 }
 0xd8b   : >> { %v2026_v51 = vmul.f32 %v2469_v0, %v2025_v42  ;;  %v2062_v30 = vsub.f32 1.0, %v2061_v8 }
 0xd8d   : >> { %v2027_v47 = vadd.f32 %v2469_v0, %v2026_v51  ;;  %v2063_v31 = vmul.f32 %v2471_v16, %v2062_v30 }
 0xd8e   : >> { %v2473_v33 = vpop.eup %2472 }
 0xd8f   : >> { %v2031_v21 = vsel %vm2030_vm10, %v2469_v0, %v2027_v47  ;;  %v2064_v49 = vadd.f32 %v2471_v16, %v2063_v31  ;;  %v2076_v22 = vmul.f32 %v2473_v33, %v2059_v63  ;;  %vm2081_vm15 = vweird.f32 %v2473_v33 }
 0xd90   : >> { %v2036_v52 = vsel %vm2033_vm11, %v2035_v34, %v2031_v21  ;;  %vm2082_vm4 = vmor %vm2080_vm3, %vm2081_vm15 }
 0xd91   : >> { %2097 = vperm.xlu1 %2305, %v2036_v52   ;;  %v2068_v54 = vsel %vm2067_vm13, %v2471_v16, %v2064_v49  ;;  %v2077_v5 = vsub.f32 1.0, %v2076_v22 }
 0xd92   : >> { %v2073_v57 = vsel %vm2070_vm14, %v2072_v7, %v2068_v54 }
 0xd93   : >> { %2104 = vperm.xlu2 %2303, %v2073_v57   ;;  %v2078_v37 = vmul.f32 %v2473_v33, %v2077_v5 }
 0xd95   : >> { %v2079_v50 = vadd.f32 %v2473_v33, %v2078_v37 }
 0xd97   : >> { %v2083_v44 = vsel %vm2082_vm4, %v2473_v33, %v2079_v50 }
 0xd98   : >> { %v2088_v3 = vsel %vm2085_vm1, %v2087_v26, %v2083_v44 }
 0xd9b   : >> { %2109 = vperm.xlu2 %2303, %v2088_v3  }
 0xde3   : >> { %v2093_v48 = vpop.permute.xlu2 %2092 }
 0xde4   : >> { %v2100_v27 = vmul.f32 %v2093_v48, %v3247_v6 }
 0xded   : >> { %v2105_v40 = vpop.permute.xlu2 %2104 }
 0xdee   : >> { %v2112_v45 = vmul.f32 %v2105_v40, %v3250_v32 }
 0xdf0   : >> { %v2114_v24 = vadd.f32 %v2112_v45, %v2100_v27 }
 0xdf2   : >> { %v2116_v11 = vmul.f32 0.032738097, %v2114_v24 }
 0xdf4   : >> { %v2118_v61 = vadd.f32 %v2116_v11, %v1858_v62  }
 0xdf5   : >> { %v2110_v10 = vpop.permute.xlu2 %2109 }
 0xdf6   : >> { %v2113_v43 = vmul.f32 %v2110_v10, %v3263_v39  ;;  %v3383_v30 = vmov %v2118_v61  ;;  %2121 = vst.msk [vmem:[%s2674_s14] sm:$0xff] (%p535_p4), %vm557_vm0, %v2118_v61 }
 0xe03   : >> { %v2098_v25 = vpop.permute.xlu1 %2097 }
 0xe04   : >> { %v2101_v1 = vmul.f32 %v2098_v25, %v3257_v18 }
 0xe06   : >> { %v2115_v28 = vadd.f32 %v2113_v43, %v2101_v1 }
 0xe08   : >> { %v2117_v12 = vmul.f32 0.032738097, %v2115_v28  ;;  %537 = sbr.rel (!%p535_p4) target bundleno = 42 (0x2a), region = 117 }
 0xe0a   : >> { %v2119_v6 = vadd.f32 %v2117_v12, %v1859_v36  }
 0xe0c   : >> { %v3382_v31 = vmov %v2119_v6  ;;  %2122 = vst.msk [vmem:[%s2674_s14 + $0x8] sm:$0xff] (%p535_p4), %vm557_vm0, %v2119_v6 }
 0xe0d PF: > { %s29_s22 = sadd.s32 1, %s2492_s22  }
 0xe0e   : > { %p26_p5 = scmp.ge.s32.totalorder %s29_s22, 4  }
 0xe10   :  { %28 = sbr.rel (!%p26_p5) target bundleno = 4 (0x4), region = 128 }

</bundles_post_ra>
